<compile_context>
chip_gen: v7x
topology: tpu7x:2x2x1
jax: 0.10.0
libtpu: 0.0.40
codegen_flags: <defaults>
</compile_context>

<pallas_src>
import functools

import numpy as np

import jax
import jax.numpy as jnp
from jax.experimental import pallas as pl
from jax.experimental.pallas import tpu as pltpu


_BN_EPS = 1e-5
# Level (spatial resolution index) of each DoubleConv block, in call order:
# [inc, down1..down4, up1..up4]
_BLOCK_LEVEL = (0, 1, 2, 3, 4, 3, 2, 1, 0)


# ----------------------------------------------------------------------------
# Static per-level geometry and constant spatial operators (numpy, trace time)
# ----------------------------------------------------------------------------
def _level_dims(n, h, w):
    hp, wp = h + 2, w + 2
    s = n * hp * wp
    g = wp + 1
    return dict(n=n, h=h, w=w, hp=hp, wp=wp, s=s, g=g,
                ext=s + 4 * g, mid=s + 2 * g)


def _interior_mask(d):
    """(1, s+2g) mask over the conv1 output range: 1 on interior pixels."""
    m = np.zeros((1, d["mid"]), np.float32)
    for b in range(d["n"]):
        for y in range(1, d["h"] + 1):
            for x in range(1, d["w"] + 1):
                m[0, d["g"] + b * d["hp"] * d["wp"] + y * d["wp"] + x] = 1.0
    return m


def _pool_matrix(d_src, d_dst):
    """(s_src - wp - 1, ext_dst): scatter pooled pixels into next level layout."""
    L = d_src["s"] - d_src["wp"] - 1
    mat = np.zeros((L, d_dst["ext"]), np.float32)
    for b in range(d_src["n"]):
        for i in range(d_dst["h"]):
            for j in range(d_dst["w"]):
                src = (b * d_src["hp"] * d_src["wp"]
                       + (1 + 2 * i) * d_src["wp"] + (1 + 2 * j))
                dst = (2 * d_dst["g"] + b * d_dst["hp"] * d_dst["wp"]
                       + (i + 1) * d_dst["wp"] + (j + 1))
                mat[src, dst] = 1.0
    return mat


def _skip_matrix(d):
    """(s, ext): pass interior pixels through, zero the pad ring and guard."""
    mat = np.zeros((d["s"], d["ext"]), np.float32)
    for b in range(d["n"]):
        for y in range(1, d["h"] + 1):
            for x in range(1, d["w"] + 1):
                src = b * d["hp"] * d["wp"] + y * d["wp"] + x
                mat[src, 2 * d["g"] + src] = 1.0
    return mat


def _upsample_matrix(d_src, d_dst):
    """(s_src, ext_dst): bilinear x2, align_corners=True, into dst layout."""
    mat = np.zeros((d_src["s"], d_dst["ext"]), np.float32)
    hs, ws = d_src["h"], d_src["w"]
    ho, wo = d_dst["h"], d_dst["w"]

    def coords(il, ol):
        if il == 1:
            return np.zeros((ol,), np.float64)
        return np.arange(ol, dtype=np.float64) * (il - 1) / (ol - 1)

    yc, xc = coords(hs, ho), coords(ws, wo)
    y0 = np.floor(yc).astype(np.int64)
    y1 = np.minimum(y0 + 1, hs - 1)
    wy = yc - y0
    x0 = np.floor(xc).astype(np.int64)
    x1 = np.minimum(x0 + 1, ws - 1)
    wx = xc - x0
    for b in range(d_src["n"]):
        for i in range(ho):
            for j in range(wo):
                dst = (2 * d_dst["g"] + b * d_dst["hp"] * d_dst["wp"]
                       + (i + 1) * d_dst["wp"] + (j + 1))
                for yy, wyy in ((y0[i], 1.0 - wy[i]), (y1[i], wy[i])):
                    for xx, wxx in ((x0[j], 1.0 - wx[j]), (x1[j], wx[j])):
                        src = (b * d_src["hp"] * d_src["wp"]
                               + (yy + 1) * d_src["wp"] + (xx + 1))
                        mat[src, dst] += wyy * wxx
    return mat


# ----------------------------------------------------------------------------
# Fused UNet kernel
# ----------------------------------------------------------------------------
def _unet_kernel(*args, dims):
    """Whole UNet forward on VMEM-resident values.

    Input ref layout (all 2-D, full arrays):
      0            : x_ext  (Cin, S0 + 4*g0) bf16  guard-extended padded input
      1 .. 36      : 9 DoubleConv blocks x (w1, b1, w2, b2)
      37 .. 41     : interior masks for levels 0..4          (1, S_l + 2*g_l) bf16
      42 .. 45     : maxpool selection operators, levels 0->1 .. 3->4   bf16
      46 .. 49     : bilinear upsample operators for up1..up4           f32
      50 .. 53     : skip placement operators for x4, x3, x2, x1        bf16
      54, 55       : outc_w (ncls, nf) f32, outc_b (ncls, 1) f32
    Output: o_ref (ncls, S0) f32 (pad ring positions hold garbage, sliced off
    in the wrapper).
    `dims[l] = (wp, s)` per level l.
    """
    refs, o_ref = args[:-1], args[-1]
    x_ext_ref = refs[0]

    def blk(i):
        b = 1 + 4 * i
        return refs[b], refs[b + 1], refs[b + 2], refs[b + 3]

    mask = refs[37:42]
    sel = refs[42:46]
    upm = refs[46:50]
    skp = refs[50:54]
    outw_ref, outb_ref = refs[54], refs[55]

    def conv3x3(src, w_ref, b_ref, wp, out_len):
        # src: (C, out_len + 2g) bf16;  out[:, q] depends on src[:, q + off].
        g = wp + 1
        cols = []
        for dy in range(3):
            for dx in range(3):
                off = g + (dy - 1) * wp + (dx - 1)       # static, in [0, 2g]
                cols.append(src[:, off:off + out_len])
        xcol = jnp.concatenate(cols, axis=0)              # in-VMEM im2col
        acc = jnp.dot(w_ref[...], xcol, preferred_element_type=jnp.float32)
        return jnp.maximum(acc + b_ref[...], 0.0)

    def double_conv(x_ext, iblk):
        lvl = _BLOCK_LEVEL[iblk]
        wp, s = dims[lvl]
        g = wp + 1
        w1, b1, w2, b2 = blk(iblk)
        mid = conv3x3(x_ext, w1, b1, wp, s + 2 * g)        # f32 (Cmid, S+2g)
        mid = mid.astype(jnp.bfloat16) * mask[lvl][...]    # re-zero pad ring
        return conv3x3(mid, w2, b2, wp, s)                 # f32 (Cout, S)

    def pool_ext(y, lvl):
        # 2x2 maxpool via 4 lane-shifted maxima + selection matmul that also
        # produces the next level's guard-extended padded layout.
        wp, s = dims[lvl]
        L = s - wp - 1
        m = jnp.maximum(jnp.maximum(y[:, 0:L], y[:, 1:1 + L]),
                        jnp.maximum(y[:, wp:wp + L], y[:, wp + 1:wp + 1 + L]))
        nxt = jnp.dot(m.astype(jnp.bfloat16), sel[lvl][...],
                      preferred_element_type=jnp.float32)
        return nxt.astype(jnp.bfloat16)

    def up_concat_ext(small, skip, up_ref, skp_ref):
        # bilinear x2 upsample (constant f32 operator) + skip placement
        # (0/1 operator, also zeroes the skip's garbage ring), channel concat.
        up_e = jnp.dot(small, up_ref[...],
                       preferred_element_type=jnp.float32).astype(jnp.bfloat16)
        sk_e = jnp.dot(skip.astype(jnp.bfloat16), skp_ref[...],
                       preferred_element_type=jnp.float32).astype(jnp.bfloat16)
        return jnp.concatenate([sk_e, up_e], axis=0)       # cat([x2, x1], dim=1)

    # Encoder
    x1 = double_conv(x_ext_ref[...], 0)                    # level 0
    x2 = double_conv(pool_ext(x1, 0), 1)                   # level 1
    x3 = double_conv(pool_ext(x2, 1), 2)                   # level 2
    x4 = double_conv(pool_ext(x3, 2), 3)                   # level 3
    x5 = double_conv(pool_ext(x4, 3), 4)                   # level 4
    # Decoder
    y = double_conv(up_concat_ext(x5, x4, upm[0], skp[0]), 5)
    y = double_conv(up_concat_ext(y, x3, upm[1], skp[1]), 6)
    y = double_conv(up_concat_ext(y, x2, upm[2], skp[2]), 7)
    y = double_conv(up_concat_ext(y, x1, upm[3], skp[3]), 8)
    # Fused 1x1 OutConv (f32).
    logits = jnp.dot(outw_ref[...], y,
                     preferred_element_type=jnp.float32) + outb_ref[...]
    o_ref[...] = logits


# ----------------------------------------------------------------------------
# Parameter init (deterministic, PyTorch-shaped) with eval-mode BN folding
# ----------------------------------------------------------------------------
def _fold_conv_bn(w, scale, bias, cin_pad=None):
    """(3,3,Cin,Cout) f32 -> (Cout, 9*Cin) bf16 with BN scale folded."""
    kh, kw, cin, cout = w.shape
    if cin_pad is not None and cin_pad != cin:
        w = jnp.pad(w, ((0, 0), (0, 0), (0, cin_pad - cin), (0, 0)))
        cin = cin_pad
    wf = (w * scale[None, None, None, :]).reshape(kh * kw * cin, cout)
    return wf.T.astype(jnp.bfloat16), bias.reshape(cout, 1).astype(jnp.float32)


def init_double_conv(key, cin, cout, cmid=None, cin_pad=None):
    if cmid is None:
        cmid = cout
    k1, k2 = jax.random.split(key)
    w1 = jax.random.normal(k1, (3, 3, cin, cmid), jnp.float32) * (2.0 / (9 * cin)) ** 0.5
    w2 = jax.random.normal(k2, (3, 3, cmid, cout), jnp.float32) * (2.0 / (9 * cmid)) ** 0.5
    # BatchNorm (eval): gamma=1, beta=0, running_mean=0, running_var=1 folded.
    inv = 1.0 / jnp.sqrt(1.0 + _BN_EPS)
    s1 = jnp.full((cmid,), inv, jnp.float32)
    s2 = jnp.full((cout,), inv, jnp.float32)
    b1 = jnp.zeros((cmid,), jnp.float32)
    b2 = jnp.zeros((cout,), jnp.float32)
    w1f, b1f = _fold_conv_bn(w1, s1, b1, cin_pad=cin_pad)
    w2f, b2f = _fold_conv_bn(w2, s2, b2)
    return dict(w1=w1f, b1=b1f, w2=w2f, b2=b2f)


def init_unet_params(key, n_channels=3, n_classes=2, n_filters=8):
    nf = n_filters
    factor = 2  # bilinear=True
    cin_pad = ((n_channels + 7) // 8) * 8   # pad input channels to a sublane multiple
    keys = jax.random.split(key, 11)
    blocks = [
        init_double_conv(keys[0], n_channels, nf, cin_pad=cin_pad),
        init_double_conv(keys[1], nf, nf * 2),
        init_double_conv(keys[2], nf * 2, nf * 4),
        init_double_conv(keys[3], nf * 4, nf * 8),
        init_double_conv(keys[4], nf * 8, nf * 16 // factor),
        init_double_conv(keys[5], nf * 16, nf * 8 // factor, nf * 16 // 2),
        init_double_conv(keys[6], nf * 8, nf * 4 // factor, nf * 8 // 2),
        init_double_conv(keys[7], nf * 4, nf * 2 // factor, nf * 4 // 2),
        init_double_conv(keys[8], nf * 2, nf, nf * 2 // 2),
    ]
    outc_w = (jax.random.normal(keys[9], (n_classes, nf), jnp.float32)
              / jnp.sqrt(nf)).astype(jnp.float32)
    outc_b = (0.01 * jax.random.normal(keys[10], (n_classes,), jnp.float32)
              ).reshape(n_classes, 1)
    return {"blocks": blocks, "outc_w": outc_w, "outc_b": outc_b}


# ----------------------------------------------------------------------------
# Forward pass (one pallas_call)
# ----------------------------------------------------------------------------
def _prepare_input(x_nchw, cin_pad, d0):
    x = jnp.transpose(x_nchw, (1, 0, 2, 3))                 # NCHW -> (C, N, H, W)
    c = x.shape[0]
    if cin_pad != c:
        x = jnp.pad(x, ((0, cin_pad - c), (0, 0), (0, 0), (0, 0)))
    x = jnp.pad(x.astype(jnp.bfloat16), ((0, 0), (0, 0), (1, 1), (1, 1)))
    x = x.reshape(cin_pad, d0["s"])
    return jnp.pad(x, ((0, 0), (2 * d0["g"], 2 * d0["g"])))  # guard zeros


def unet_forward(params, x_nchw):
    n, c, h, w = x_nchw.shape
    assert h % 16 == 0 and w % 16 == 0, "H and W must be divisible by 16"
    dims = [_level_dims(n, h >> l, w >> l) for l in range(5)]
    cin_pad = params["blocks"][0]["w1"].shape[1] // 9
    ncls = params["outc_w"].shape[0]

    x_ext = _prepare_input(x_nchw, cin_pad, dims[0])

    # Constant spatial operators (built with numpy at trace time -> baked in).
    masks = [jnp.asarray(_interior_mask(d), jnp.bfloat16) for d in dims]
    sels = [jnp.asarray(_pool_matrix(dims[l], dims[l + 1]), jnp.bfloat16)
            for l in range(4)]
    ups = [jnp.asarray(_upsample_matrix(dims[4 - k], dims[3 - k]), jnp.float32)
           for k in range(4)]
    skps = [jnp.asarray(_skip_matrix(dims[3 - k]), jnp.bfloat16)
            for k in range(4)]

    args = [x_ext]
    for bp in params["blocks"]:
        args += [bp["w1"], bp["b1"], bp["w2"], bp["b2"]]
    args += masks + sels + ups + skps + [params["outc_w"], params["outc_b"]]

    kernel = functools.partial(
        _unet_kernel, dims=tuple((d["wp"], d["s"]) for d in dims))

    out = pl.pallas_call(
        kernel,
        out_shape=jax.ShapeDtypeStruct((ncls, dims[0]["s"]), jnp.float32),
        grid=(1,),
        in_specs=[pl.BlockSpec(a.shape, lambda i: (0, 0)) for a in args],
        out_specs=pl.BlockSpec((ncls, dims[0]["s"]), lambda i: (0, 0)),
        compiler_params=pltpu.CompilerParams(
            dimension_semantics=("arbitrary",),
            vmem_limit_bytes=32 * 1024 * 1024),
    )(*args)

    d0 = dims[0]
    out = out.reshape(ncls, n, d0["hp"], d0["wp"])[:, :, 1:h + 1, 1:w + 1]
    return jnp.transpose(out, (1, 0, 2, 3))                 # -> (N, ncls, H, W)


if __name__ == "__main__":
    key = jax.random.PRNGKey(0)
    k_params, k_x = jax.random.split(key)

    n_channels, n_classes, n_filters = 3, 2, 8
    params = init_unet_params(k_params, n_channels, n_classes, n_filters)

    # Small shapes consistent with the module: batch=2, channels=3, spatial=16.
    x = jax.random.normal(k_x, (2, n_channels, 16, 16), jnp.float32)

    fwd = jax.jit(unet_forward)
    logits = jax.block_until_ready(fwd(params, x))

    assert logits.shape == (2, n_classes, 16, 16), logits.shape
    assert bool(jnp.all(jnp.isfinite(logits)))
    print("KERNEL_OK")
</pallas_src>

<mosaic_0001>
module attributes {stable_mosaic.version = 11 : i64} {
  func.func @_unet_kernel(%arg0: i32, %arg1: memref<8x724xbf16, #tpu.memory_space<vmem>>, %arg2: memref<8x72xbf16, #tpu.memory_space<vmem>>, %arg3: memref<8x1xf32, #tpu.memory_space<vmem>>, %arg4: memref<8x72xbf16, #tpu.memory_space<vmem>>, %arg5: memref<8x1xf32, #tpu.memory_space<vmem>>, %arg6: memref<16x72xbf16, #tpu.memory_space<vmem>>, %arg7: memref<16x1xf32, #tpu.memory_space<vmem>>, %arg8: memref<16x144xbf16, #tpu.memory_space<vmem>>, %arg9: memref<16x1xf32, #tpu.memory_space<vmem>>, %arg10: memref<32x144xbf16, #tpu.memory_space<vmem>>, %arg11: memref<32x1xf32, #tpu.memory_space<vmem>>, %arg12: memref<32x288xbf16, #tpu.memory_space<vmem>>, %arg13: memref<32x1xf32, #tpu.memory_space<vmem>>, %arg14: memref<64x288xbf16, #tpu.memory_space<vmem>>, %arg15: memref<64x1xf32, #tpu.memory_space<vmem>>, %arg16: memref<64x576xbf16, #tpu.memory_space<vmem>>, %arg17: memref<64x1xf32, #tpu.memory_space<vmem>>, %arg18: memref<64x576xbf16, #tpu.memory_space<vmem>>, %arg19: memref<64x1xf32, #tpu.memory_space<vmem>>, %arg20: memref<64x576xbf16, #tpu.memory_space<vmem>>, %arg21: memref<64x1xf32, #tpu.memory_space<vmem>>, %arg22: memref<64x1152xbf16, #tpu.memory_space<vmem>>, %arg23: memref<64x1xf32, #tpu.memory_space<vmem>>, %arg24: memref<32x576xbf16, #tpu.memory_space<vmem>>, %arg25: memref<32x1xf32, #tpu.memory_space<vmem>>, %arg26: memref<32x576xbf16, #tpu.memory_space<vmem>>, %arg27: memref<32x1xf32, #tpu.memory_space<vmem>>, %arg28: memref<16x288xbf16, #tpu.memory_space<vmem>>, %arg29: memref<16x1xf32, #tpu.memory_space<vmem>>, %arg30: memref<16x288xbf16, #tpu.memory_space<vmem>>, %arg31: memref<16x1xf32, #tpu.memory_space<vmem>>, %arg32: memref<8x144xbf16, #tpu.memory_space<vmem>>, %arg33: memref<8x1xf32, #tpu.memory_space<vmem>>, %arg34: memref<8x144xbf16, #tpu.memory_space<vmem>>, %arg35: memref<8x1xf32, #tpu.memory_space<vmem>>, %arg36: memref<8x72xbf16, #tpu.memory_space<vmem>>, %arg37: memref<8x1xf32, #tpu.memory_space<vmem>>, %arg38: memref<1x686xbf16, #tpu.memory_space<vmem>>, %arg39: memref<1x222xbf16, #tpu.memory_space<vmem>>, %arg40: memref<1x86xbf16, #tpu.memory_space<vmem>>, %arg41: memref<1x42xbf16, #tpu.memory_space<vmem>>, %arg42: memref<1x26xbf16, #tpu.memory_space<vmem>>, %arg43: memref<629x244xbf16, #tpu.memory_space<vmem>>, %arg44: memref<189x100xbf16, #tpu.memory_space<vmem>>, %arg45: memref<65x52xbf16, #tpu.memory_space<vmem>>, %arg46: memref<27x34xbf16, #tpu.memory_space<vmem>>, %arg47: memref<18x52xf32, #tpu.memory_space<vmem>>, %arg48: memref<32x100xf32, #tpu.memory_space<vmem>>, %arg49: memref<72x244xf32, #tpu.memory_space<vmem>>, %arg50: memref<200x724xf32, #tpu.memory_space<vmem>>, %arg51: memref<32x52xbf16, #tpu.memory_space<vmem>>, %arg52: memref<72x100xbf16, #tpu.memory_space<vmem>>, %arg53: memref<200x244xbf16, #tpu.memory_space<vmem>>, %arg54: memref<648x724xbf16, #tpu.memory_space<vmem>>, %arg55: memref<2x8xf32, #tpu.memory_space<vmem>>, %arg56: memref<2x1xf32, #tpu.memory_space<vmem>>, %arg57: memref<2x648xf32, #tpu.memory_space<vmem>>) attributes {dimension_semantics = [#tpu.dimension_semantics<arbitrary>], iteration_bounds = array<i64: 1>, scalar_prefetch = 0 : i64, scratch_operands = 0 : i64, tpu.core_type = #tpu.core_type<tc>, window_params = [{pipeline_mode = #tpu.pipeline_mode<synchronous>, transform_indices = @transform_0, window_bounds = array<i64: 8, 724>}, {pipeline_mode = #tpu.pipeline_mode<synchronous>, transform_indices = @transform_1, window_bounds = array<i64: 8, 72>}, {pipeline_mode = #tpu.pipeline_mode<synchronous>, transform_indices = @transform_2, window_bounds = array<i64: 8, 1>}, {pipeline_mode = #tpu.pipeline_mode<synchronous>, transform_indices = @transform_3, window_bounds = array<i64: 8, 72>}, {pipeline_mode = #tpu.pipeline_mode<synchronous>, transform_indices = @transform_4, window_bounds = array<i64: 8, 1>}, {pipeline_mode = #tpu.pipeline_mode<synchronous>, transform_indices = @transform_5, window_bounds = array<i64: 16, 72>}, {pipeline_mode = #tpu.pipeline_mode<synchronous>, transform_indices = @transform_6, window_bounds = array<i64: 16, 1>}, {pipeline_mode = #tpu.pipeline_mode<synchronous>, transform_indices = @transform_7, window_bounds = array<i64: 16, 144>}, {pipeline_mode = #tpu.pipeline_mode<synchronous>, transform_indices = @transform_8, window_bounds = array<i64: 16, 1>}, {pipeline_mode = #tpu.pipeline_mode<synchronous>, transform_indices = @transform_9, window_bounds = array<i64: 32, 144>}, {pipeline_mode = #tpu.pipeline_mode<synchronous>, transform_indices = @transform_10, window_bounds = array<i64: 32, 1>}, {pipeline_mode = #tpu.pipeline_mode<synchronous>, transform_indices = @transform_11, window_bounds = array<i64: 32, 288>}, {pipeline_mode = #tpu.pipeline_mode<synchronous>, transform_indices = @transform_12, window_bounds = array<i64: 32, 1>}, {pipeline_mode = #tpu.pipeline_mode<synchronous>, transform_indices = @transform_13, window_bounds = array<i64: 64, 288>}, {pipeline_mode = #tpu.pipeline_mode<synchronous>, transform_indices = @transform_14, window_bounds = array<i64: 64, 1>}, {pipeline_mode = #tpu.pipeline_mode<synchronous>, transform_indices = @transform_15, window_bounds = array<i64: 64, 576>}, {pipeline_mode = #tpu.pipeline_mode<synchronous>, transform_indices = @transform_16, window_bounds = array<i64: 64, 1>}, {pipeline_mode = #tpu.pipeline_mode<synchronous>, transform_indices = @transform_17, window_bounds = array<i64: 64, 576>}, {pipeline_mode = #tpu.pipeline_mode<synchronous>, transform_indices = @transform_18, window_bounds = array<i64: 64, 1>}, {pipeline_mode = #tpu.pipeline_mode<synchronous>, transform_indices = @transform_19, window_bounds = array<i64: 64, 576>}, {pipeline_mode = #tpu.pipeline_mode<synchronous>, transform_indices = @transform_20, window_bounds = array<i64: 64, 1>}, {pipeline_mode = #tpu.pipeline_mode<synchronous>, transform_indices = @transform_21, window_bounds = array<i64: 64, 1152>}, {pipeline_mode = #tpu.pipeline_mode<synchronous>, transform_indices = @transform_22, window_bounds = array<i64: 64, 1>}, {pipeline_mode = #tpu.pipeline_mode<synchronous>, transform_indices = @transform_23, window_bounds = array<i64: 32, 576>}, {pipeline_mode = #tpu.pipeline_mode<synchronous>, transform_indices = @transform_24, window_bounds = array<i64: 32, 1>}, {pipeline_mode = #tpu.pipeline_mode<synchronous>, transform_indices = @transform_25, window_bounds = array<i64: 32, 576>}, {pipeline_mode = #tpu.pipeline_mode<synchronous>, transform_indices = @transform_26, window_bounds = array<i64: 32, 1>}, {pipeline_mode = #tpu.pipeline_mode<synchronous>, transform_indices = @transform_27, window_bounds = array<i64: 16, 288>}, {pipeline_mode = #tpu.pipeline_mode<synchronous>, transform_indices = @transform_28, window_bounds = array<i64: 16, 1>}, {pipeline_mode = #tpu.pipeline_mode<synchronous>, transform_indices = @transform_29, window_bounds = array<i64: 16, 288>}, {pipeline_mode = #tpu.pipeline_mode<synchronous>, transform_indices = @transform_30, window_bounds = array<i64: 16, 1>}, {pipeline_mode = #tpu.pipeline_mode<synchronous>, transform_indices = @transform_31, window_bounds = array<i64: 8, 144>}, {pipeline_mode = #tpu.pipeline_mode<synchronous>, transform_indices = @transform_32, window_bounds = array<i64: 8, 1>}, {pipeline_mode = #tpu.pipeline_mode<synchronous>, transform_indices = @transform_33, window_bounds = array<i64: 8, 144>}, {pipeline_mode = #tpu.pipeline_mode<synchronous>, transform_indices = @transform_34, window_bounds = array<i64: 8, 1>}, {pipeline_mode = #tpu.pipeline_mode<synchronous>, transform_indices = @transform_35, window_bounds = array<i64: 8, 72>}, {pipeline_mode = #tpu.pipeline_mode<synchronous>, transform_indices = @transform_36, window_bounds = array<i64: 8, 1>}, {pipeline_mode = #tpu.pipeline_mode<synchronous>, transform_indices = @transform_37, window_bounds = array<i64: 1, 686>}, {pipeline_mode = #tpu.pipeline_mode<synchronous>, transform_indices = @transform_38, window_bounds = array<i64: 1, 222>}, {pipeline_mode = #tpu.pipeline_mode<synchronous>, transform_indices = @transform_39, window_bounds = array<i64: 1, 86>}, {pipeline_mode = #tpu.pipeline_mode<synchronous>, transform_indices = @transform_40, window_bounds = array<i64: 1, 42>}, {pipeline_mode = #tpu.pipeline_mode<synchronous>, transform_indices = @transform_41, window_bounds = array<i64: 1, 26>}, {pipeline_mode = #tpu.pipeline_mode<synchronous>, transform_indices = @transform_42, window_bounds = array<i64: 629, 244>}, {pipeline_mode = #tpu.pipeline_mode<synchronous>, transform_indices = @transform_43, window_bounds = array<i64: 189, 100>}, {pipeline_mode = #tpu.pipeline_mode<synchronous>, transform_indices = @transform_44, window_bounds = array<i64: 65, 52>}, {pipeline_mode = #tpu.pipeline_mode<synchronous>, transform_indices = @transform_45, window_bounds = array<i64: 27, 34>}, {pipeline_mode = #tpu.pipeline_mode<synchronous>, transform_indices = @transform_46, window_bounds = array<i64: 18, 52>}, {pipeline_mode = #tpu.pipeline_mode<synchronous>, transform_indices = @transform_47, window_bounds = array<i64: 32, 100>}, {pipeline_mode = #tpu.pipeline_mode<synchronous>, transform_indices = @transform_48, window_bounds = array<i64: 72, 244>}, {pipeline_mode = #tpu.pipeline_mode<synchronous>, transform_indices = @transform_49, window_bounds = array<i64: 200, 724>}, {pipeline_mode = #tpu.pipeline_mode<synchronous>, transform_indices = @transform_50, window_bounds = array<i64: 32, 52>}, {pipeline_mode = #tpu.pipeline_mode<synchronous>, transform_indices = @transform_51, window_bounds = array<i64: 72, 100>}, {pipeline_mode = #tpu.pipeline_mode<synchronous>, transform_indices = @transform_52, window_bounds = array<i64: 200, 244>}, {pipeline_mode = #tpu.pipeline_mode<synchronous>, transform_indices = @transform_53, window_bounds = array<i64: 648, 724>}, {pipeline_mode = #tpu.pipeline_mode<synchronous>, transform_indices = @transform_54, window_bounds = array<i64: 2, 8>}, {pipeline_mode = #tpu.pipeline_mode<synchronous>, transform_indices = @transform_55, window_bounds = array<i64: 2, 1>}, {pipeline_mode = #tpu.pipeline_mode<synchronous>, transform_indices = @transform_56, window_bounds = array<i64: 2, 648>}]} {
    %c0 = arith.constant 0 : index
    %c0_0 = arith.constant 0 : index
    %0 = vector.load %arg1[%c0, %c0_0] : memref<8x724xbf16, #tpu.memory_space<vmem>>, vector<8x724xbf16>
    %1 = vector.extract_strided_slice %0 {offsets = [0, 0], sizes = [8, 686], strides = [1, 1]} : vector<8x724xbf16> to vector<8x686xbf16>
    %2 = vector.extract_strided_slice %0 {offsets = [0, 1], sizes = [8, 686], strides = [1, 1]} : vector<8x724xbf16> to vector<8x686xbf16>
    %3 = vector.extract_strided_slice %0 {offsets = [0, 2], sizes = [8, 686], strides = [1, 1]} : vector<8x724xbf16> to vector<8x686xbf16>
    %4 = vector.extract_strided_slice %0 {offsets = [0, 18], sizes = [8, 686], strides = [1, 1]} : vector<8x724xbf16> to vector<8x686xbf16>
    %5 = vector.extract_strided_slice %0 {offsets = [0, 19], sizes = [8, 686], strides = [1, 1]} : vector<8x724xbf16> to vector<8x686xbf16>
    %6 = vector.extract_strided_slice %0 {offsets = [0, 20], sizes = [8, 686], strides = [1, 1]} : vector<8x724xbf16> to vector<8x686xbf16>
    %7 = vector.extract_strided_slice %0 {offsets = [0, 36], sizes = [8, 686], strides = [1, 1]} : vector<8x724xbf16> to vector<8x686xbf16>
    %8 = vector.extract_strided_slice %0 {offsets = [0, 37], sizes = [8, 686], strides = [1, 1]} : vector<8x724xbf16> to vector<8x686xbf16>
    %9 = vector.extract_strided_slice %0 {offsets = [0, 38], sizes = [8, 686], strides = [1, 1]} : vector<8x724xbf16> to vector<8x686xbf16>
    %10 = tpu.concatenate %1, %2, %3, %4, %5, %6, %7, %8, %9 in 0 : vector<8x686xbf16>, vector<8x686xbf16>, vector<8x686xbf16>, vector<8x686xbf16>, vector<8x686xbf16>, vector<8x686xbf16>, vector<8x686xbf16>, vector<8x686xbf16>, vector<8x686xbf16> -> vector<72x686xbf16>
    %c0_1 = arith.constant 0 : index
    %c0_2 = arith.constant 0 : index
    %11 = vector.load %arg2[%c0_1, %c0_2] : memref<8x72xbf16, #tpu.memory_space<vmem>>, vector<8x72xbf16>
    %cst = arith.constant dense<0.000000e+00> : vector<8x686xf32>
    %12 = tpu.matmul %11, %10, %cst {dimension_numbers = #tpu.dot_dimension_numbers<[1], [0], [0], [1], [0, 0, 1, 1], [], []>} : vector<8x72xbf16>, vector<72x686xbf16>, vector<8x686xf32> -> vector<8x686xf32>
    %c0_3 = arith.constant 0 : index
    %c0_4 = arith.constant 0 : index
    %13 = vector.load %arg3[%c0_3, %c0_4] : memref<8x1xf32, #tpu.memory_space<vmem>>, vector<8x1xf32>
    %14 = vector.broadcast %13 : vector<8x1xf32> to vector<8x686xf32>
    %15 = arith.addf %12, %14 : vector<8x686xf32>
    %cst_5 = arith.constant 0.000000e+00 : f32
    %16 = vector.broadcast %cst_5 : f32 to vector<8x686xf32>
    %17 = arith.maximumf %15, %16 : vector<8x686xf32>
    %18 = arith.truncf %17 : vector<8x686xf32> to vector<8x686xbf16>
    %c0_6 = arith.constant 0 : index
    %c0_7 = arith.constant 0 : index
    %19 = vector.load %arg38[%c0_6, %c0_7] : memref<1x686xbf16, #tpu.memory_space<vmem>>, vector<1x686xbf16>
    %20 = vector.broadcast %19 : vector<1x686xbf16> to vector<8x686xbf16>
    %21 = arith.mulf %18, %20 : vector<8x686xbf16>
    %22 = vector.extract_strided_slice %21 {offsets = [0, 0], sizes = [8, 648], strides = [1, 1]} : vector<8x686xbf16> to vector<8x648xbf16>
    %23 = vector.extract_strided_slice %21 {offsets = [0, 1], sizes = [8, 648], strides = [1, 1]} : vector<8x686xbf16> to vector<8x648xbf16>
    %24 = vector.extract_strided_slice %21 {offsets = [0, 2], sizes = [8, 648], strides = [1, 1]} : vector<8x686xbf16> to vector<8x648xbf16>
    %25 = vector.extract_strided_slice %21 {offsets = [0, 18], sizes = [8, 648], strides = [1, 1]} : vector<8x686xbf16> to vector<8x648xbf16>
    %26 = vector.extract_strided_slice %21 {offsets = [0, 19], sizes = [8, 648], strides = [1, 1]} : vector<8x686xbf16> to vector<8x648xbf16>
    %27 = vector.extract_strided_slice %21 {offsets = [0, 20], sizes = [8, 648], strides = [1, 1]} : vector<8x686xbf16> to vector<8x648xbf16>
    %28 = vector.extract_strided_slice %21 {offsets = [0, 36], sizes = [8, 648], strides = [1, 1]} : vector<8x686xbf16> to vector<8x648xbf16>
    %29 = vector.extract_strided_slice %21 {offsets = [0, 37], sizes = [8, 648], strides = [1, 1]} : vector<8x686xbf16> to vector<8x648xbf16>
    %30 = vector.extract_strided_slice %21 {offsets = [0, 38], sizes = [8, 648], strides = [1, 1]} : vector<8x686xbf16> to vector<8x648xbf16>
    %31 = tpu.concatenate %22, %23, %24, %25, %26, %27, %28, %29, %30 in 0 : vector<8x648xbf16>, vector<8x648xbf16>, vector<8x648xbf16>, vector<8x648xbf16>, vector<8x648xbf16>, vector<8x648xbf16>, vector<8x648xbf16>, vector<8x648xbf16>, vector<8x648xbf16> -> vector<72x648xbf16>
    %c0_8 = arith.constant 0 : index
    %c0_9 = arith.constant 0 : index
    %32 = vector.load %arg4[%c0_8, %c0_9] : memref<8x72xbf16, #tpu.memory_space<vmem>>, vector<8x72xbf16>
    %cst_10 = arith.constant dense<0.000000e+00> : vector<8x648xf32>
    %33 = tpu.matmul %32, %31, %cst_10 {dimension_numbers = #tpu.dot_dimension_numbers<[1], [0], [0], [1], [0, 0, 1, 1], [], []>} : vector<8x72xbf16>, vector<72x648xbf16>, vector<8x648xf32> -> vector<8x648xf32>
    %c0_11 = arith.constant 0 : index
    %c0_12 = arith.constant 0 : index
    %34 = vector.load %arg5[%c0_11, %c0_12] : memref<8x1xf32, #tpu.memory_space<vmem>>, vector<8x1xf32>
    %35 = vector.broadcast %34 : vector<8x1xf32> to vector<8x648xf32>
    %36 = arith.addf %33, %35 : vector<8x648xf32>
    %cst_13 = arith.constant 0.000000e+00 : f32
    %37 = vector.broadcast %cst_13 : f32 to vector<8x648xf32>
    %38 = arith.maximumf %36, %37 : vector<8x648xf32>
    %39 = vector.extract_strided_slice %38 {offsets = [0, 0], sizes = [8, 629], strides = [1, 1]} : vector<8x648xf32> to vector<8x629xf32>
    %40 = vector.extract_strided_slice %38 {offsets = [0, 1], sizes = [8, 629], strides = [1, 1]} : vector<8x648xf32> to vector<8x629xf32>
    %41 = arith.maximumf %39, %40 : vector<8x629xf32>
    %42 = vector.extract_strided_slice %38 {offsets = [0, 18], sizes = [8, 629], strides = [1, 1]} : vector<8x648xf32> to vector<8x629xf32>
    %43 = vector.extract_strided_slice %38 {offsets = [0, 19], sizes = [8, 629], strides = [1, 1]} : vector<8x648xf32> to vector<8x629xf32>
    %44 = arith.maximumf %42, %43 : vector<8x629xf32>
    %45 = arith.maximumf %41, %44 : vector<8x629xf32>
    %46 = arith.truncf %45 : vector<8x629xf32> to vector<8x629xbf16>
    %c0_14 = arith.constant 0 : index
    %c0_15 = arith.constant 0 : index
    %47 = vector.load %arg43[%c0_14, %c0_15] : memref<629x244xbf16, #tpu.memory_space<vmem>>, vector<629x244xbf16>
    %cst_16 = arith.constant dense<0.000000e+00> : vector<8x244xf32>
    %48 = tpu.matmul %46, %47, %cst_16 {dimension_numbers = #tpu.dot_dimension_numbers<[1], [0], [0], [1], [0, 0, 1, 1], [], []>} : vector<8x629xbf16>, vector<629x244xbf16>, vector<8x244xf32> -> vector<8x244xf32>
    %49 = arith.truncf %48 : vector<8x244xf32> to vector<8x244xbf16>
    %50 = vector.extract_strided_slice %49 {offsets = [0, 0], sizes = [8, 222], strides = [1, 1]} : vector<8x244xbf16> to vector<8x222xbf16>
    %51 = vector.extract_strided_slice %49 {offsets = [0, 1], sizes = [8, 222], strides = [1, 1]} : vector<8x244xbf16> to vector<8x222xbf16>
    %52 = vector.extract_strided_slice %49 {offsets = [0, 2], sizes = [8, 222], strides = [1, 1]} : vector<8x244xbf16> to vector<8x222xbf16>
    %53 = vector.extract_strided_slice %49 {offsets = [0, 10], sizes = [8, 222], strides = [1, 1]} : vector<8x244xbf16> to vector<8x222xbf16>
    %54 = vector.extract_strided_slice %49 {offsets = [0, 11], sizes = [8, 222], strides = [1, 1]} : vector<8x244xbf16> to vector<8x222xbf16>
    %55 = vector.extract_strided_slice %49 {offsets = [0, 12], sizes = [8, 222], strides = [1, 1]} : vector<8x244xbf16> to vector<8x222xbf16>
    %56 = vector.extract_strided_slice %49 {offsets = [0, 20], sizes = [8, 222], strides = [1, 1]} : vector<8x244xbf16> to vector<8x222xbf16>
    %57 = vector.extract_strided_slice %49 {offsets = [0, 21], sizes = [8, 222], strides = [1, 1]} : vector<8x244xbf16> to vector<8x222xbf16>
    %58 = vector.extract_strided_slice %49 {offsets = [0, 22], sizes = [8, 222], strides = [1, 1]} : vector<8x244xbf16> to vector<8x222xbf16>
    %59 = tpu.concatenate %50, %51, %52, %53, %54, %55, %56, %57, %58 in 0 : vector<8x222xbf16>, vector<8x222xbf16>, vector<8x222xbf16>, vector<8x222xbf16>, vector<8x222xbf16>, vector<8x222xbf16>, vector<8x222xbf16>, vector<8x222xbf16>, vector<8x222xbf16> -> vector<72x222xbf16>
    %c0_17 = arith.constant 0 : index
    %c0_18 = arith.constant 0 : index
    %60 = vector.load %arg6[%c0_17, %c0_18] : memref<16x72xbf16, #tpu.memory_space<vmem>>, vector<16x72xbf16>
    %cst_19 = arith.constant dense<0.000000e+00> : vector<16x222xf32>
    %61 = tpu.matmul %60, %59, %cst_19 {dimension_numbers = #tpu.dot_dimension_numbers<[1], [0], [0], [1], [0, 0, 1, 1], [], []>} : vector<16x72xbf16>, vector<72x222xbf16>, vector<16x222xf32> -> vector<16x222xf32>
    %c0_20 = arith.constant 0 : index
    %c0_21 = arith.constant 0 : index
    %62 = vector.load %arg7[%c0_20, %c0_21] : memref<16x1xf32, #tpu.memory_space<vmem>>, vector<16x1xf32>
    %63 = vector.broadcast %62 : vector<16x1xf32> to vector<16x222xf32>
    %64 = arith.addf %61, %63 : vector<16x222xf32>
    %cst_22 = arith.constant 0.000000e+00 : f32
    %65 = vector.broadcast %cst_22 : f32 to vector<16x222xf32>
    %66 = arith.maximumf %64, %65 : vector<16x222xf32>
    %67 = arith.truncf %66 : vector<16x222xf32> to vector<16x222xbf16>
    %c0_23 = arith.constant 0 : index
    %c0_24 = arith.constant 0 : index
    %68 = vector.load %arg39[%c0_23, %c0_24] : memref<1x222xbf16, #tpu.memory_space<vmem>>, vector<1x222xbf16>
    %69 = vector.broadcast %68 : vector<1x222xbf16> to vector<16x222xbf16>
    %70 = arith.mulf %67, %69 : vector<16x222xbf16>
    %71 = vector.extract_strided_slice %70 {offsets = [0, 0], sizes = [16, 200], strides = [1, 1]} : vector<16x222xbf16> to vector<16x200xbf16>
    %72 = vector.extract_strided_slice %70 {offsets = [0, 1], sizes = [16, 200], strides = [1, 1]} : vector<16x222xbf16> to vector<16x200xbf16>
    %73 = vector.extract_strided_slice %70 {offsets = [0, 2], sizes = [16, 200], strides = [1, 1]} : vector<16x222xbf16> to vector<16x200xbf16>
    %74 = vector.extract_strided_slice %70 {offsets = [0, 10], sizes = [16, 200], strides = [1, 1]} : vector<16x222xbf16> to vector<16x200xbf16>
    %75 = vector.extract_strided_slice %70 {offsets = [0, 11], sizes = [16, 200], strides = [1, 1]} : vector<16x222xbf16> to vector<16x200xbf16>
    %76 = vector.extract_strided_slice %70 {offsets = [0, 12], sizes = [16, 200], strides = [1, 1]} : vector<16x222xbf16> to vector<16x200xbf16>
    %77 = vector.extract_strided_slice %70 {offsets = [0, 20], sizes = [16, 200], strides = [1, 1]} : vector<16x222xbf16> to vector<16x200xbf16>
    %78 = vector.extract_strided_slice %70 {offsets = [0, 21], sizes = [16, 200], strides = [1, 1]} : vector<16x222xbf16> to vector<16x200xbf16>
    %79 = vector.extract_strided_slice %70 {offsets = [0, 22], sizes = [16, 200], strides = [1, 1]} : vector<16x222xbf16> to vector<16x200xbf16>
    %80 = tpu.concatenate %71, %72, %73, %74, %75, %76, %77, %78, %79 in 0 : vector<16x200xbf16>, vector<16x200xbf16>, vector<16x200xbf16>, vector<16x200xbf16>, vector<16x200xbf16>, vector<16x200xbf16>, vector<16x200xbf16>, vector<16x200xbf16>, vector<16x200xbf16> -> vector<144x200xbf16>
    %c0_25 = arith.constant 0 : index
    %c0_26 = arith.constant 0 : index
    %81 = vector.load %arg8[%c0_25, %c0_26] : memref<16x144xbf16, #tpu.memory_space<vmem>>, vector<16x144xbf16>
    %cst_27 = arith.constant dense<0.000000e+00> : vector<16x200xf32>
    %82 = tpu.matmul %81, %80, %cst_27 {dimension_numbers = #tpu.dot_dimension_numbers<[1], [0], [0], [1], [0, 0, 1, 1], [], []>} : vector<16x144xbf16>, vector<144x200xbf16>, vector<16x200xf32> -> vector<16x200xf32>
    %c0_28 = arith.constant 0 : index
    %c0_29 = arith.constant 0 : index
    %83 = vector.load %arg9[%c0_28, %c0_29] : memref<16x1xf32, #tpu.memory_space<vmem>>, vector<16x1xf32>
    %84 = vector.broadcast %83 : vector<16x1xf32> to vector<16x200xf32>
    %85 = arith.addf %82, %84 : vector<16x200xf32>
    %cst_30 = arith.constant 0.000000e+00 : f32
    %86 = vector.broadcast %cst_30 : f32 to vector<16x200xf32>
    %87 = arith.maximumf %85, %86 : vector<16x200xf32>
    %88 = vector.extract_strided_slice %87 {offsets = [0, 0], sizes = [16, 189], strides = [1, 1]} : vector<16x200xf32> to vector<16x189xf32>
    %89 = vector.extract_strided_slice %87 {offsets = [0, 1], sizes = [16, 189], strides = [1, 1]} : vector<16x200xf32> to vector<16x189xf32>
    %90 = arith.maximumf %88, %89 : vector<16x189xf32>
    %91 = vector.extract_strided_slice %87 {offsets = [0, 10], sizes = [16, 189], strides = [1, 1]} : vector<16x200xf32> to vector<16x189xf32>
    %92 = vector.extract_strided_slice %87 {offsets = [0, 11], sizes = [16, 189], strides = [1, 1]} : vector<16x200xf32> to vector<16x189xf32>
    %93 = arith.maximumf %91, %92 : vector<16x189xf32>
    %94 = arith.maximumf %90, %93 : vector<16x189xf32>
    %95 = arith.truncf %94 : vector<16x189xf32> to vector<16x189xbf16>
    %c0_31 = arith.constant 0 : index
    %c0_32 = arith.constant 0 : index
    %96 = vector.load %arg44[%c0_31, %c0_32] : memref<189x100xbf16, #tpu.memory_space<vmem>>, vector<189x100xbf16>
    %cst_33 = arith.constant dense<0.000000e+00> : vector<16x100xf32>
    %97 = tpu.matmul %95, %96, %cst_33 {dimension_numbers = #tpu.dot_dimension_numbers<[1], [0], [0], [1], [0, 0, 1, 1], [], []>} : vector<16x189xbf16>, vector<189x100xbf16>, vector<16x100xf32> -> vector<16x100xf32>
    %98 = arith.truncf %97 : vector<16x100xf32> to vector<16x100xbf16>
    %99 = vector.extract_strided_slice %98 {offsets = [0, 0], sizes = [16, 86], strides = [1, 1]} : vector<16x100xbf16> to vector<16x86xbf16>
    %100 = vector.extract_strided_slice %98 {offsets = [0, 1], sizes = [16, 86], strides = [1, 1]} : vector<16x100xbf16> to vector<16x86xbf16>
    %101 = vector.extract_strided_slice %98 {offsets = [0, 2], sizes = [16, 86], strides = [1, 1]} : vector<16x100xbf16> to vector<16x86xbf16>
    %102 = vector.extract_strided_slice %98 {offsets = [0, 6], sizes = [16, 86], strides = [1, 1]} : vector<16x100xbf16> to vector<16x86xbf16>
    %103 = vector.extract_strided_slice %98 {offsets = [0, 7], sizes = [16, 86], strides = [1, 1]} : vector<16x100xbf16> to vector<16x86xbf16>
    %104 = vector.extract_strided_slice %98 {offsets = [0, 8], sizes = [16, 86], strides = [1, 1]} : vector<16x100xbf16> to vector<16x86xbf16>
    %105 = vector.extract_strided_slice %98 {offsets = [0, 12], sizes = [16, 86], strides = [1, 1]} : vector<16x100xbf16> to vector<16x86xbf16>
    %106 = vector.extract_strided_slice %98 {offsets = [0, 13], sizes = [16, 86], strides = [1, 1]} : vector<16x100xbf16> to vector<16x86xbf16>
    %107 = vector.extract_strided_slice %98 {offsets = [0, 14], sizes = [16, 86], strides = [1, 1]} : vector<16x100xbf16> to vector<16x86xbf16>
    %108 = tpu.concatenate %99, %100, %101, %102, %103, %104, %105, %106, %107 in 0 : vector<16x86xbf16>, vector<16x86xbf16>, vector<16x86xbf16>, vector<16x86xbf16>, vector<16x86xbf16>, vector<16x86xbf16>, vector<16x86xbf16>, vector<16x86xbf16>, vector<16x86xbf16> -> vector<144x86xbf16>
    %c0_34 = arith.constant 0 : index
    %c0_35 = arith.constant 0 : index
    %109 = vector.load %arg10[%c0_34, %c0_35] : memref<32x144xbf16, #tpu.memory_space<vmem>>, vector<32x144xbf16>
    %cst_36 = arith.constant dense<0.000000e+00> : vector<32x86xf32>
    %110 = tpu.matmul %109, %108, %cst_36 {dimension_numbers = #tpu.dot_dimension_numbers<[1], [0], [0], [1], [0, 0, 1, 1], [], []>} : vector<32x144xbf16>, vector<144x86xbf16>, vector<32x86xf32> -> vector<32x86xf32>
    %c0_37 = arith.constant 0 : index
    %c0_38 = arith.constant 0 : index
    %111 = vector.load %arg11[%c0_37, %c0_38] : memref<32x1xf32, #tpu.memory_space<vmem>>, vector<32x1xf32>
    %112 = vector.broadcast %111 : vector<32x1xf32> to vector<32x86xf32>
    %113 = arith.addf %110, %112 : vector<32x86xf32>
    %cst_39 = arith.constant 0.000000e+00 : f32
    %114 = vector.broadcast %cst_39 : f32 to vector<32x86xf32>
    %115 = arith.maximumf %113, %114 : vector<32x86xf32>
    %116 = arith.truncf %115 : vector<32x86xf32> to vector<32x86xbf16>
    %c0_40 = arith.constant 0 : index
    %c0_41 = arith.constant 0 : index
    %117 = vector.load %arg40[%c0_40, %c0_41] : memref<1x86xbf16, #tpu.memory_space<vmem>>, vector<1x86xbf16>
    %118 = vector.broadcast %117 : vector<1x86xbf16> to vector<32x86xbf16>
    %119 = arith.mulf %116, %118 : vector<32x86xbf16>
    %120 = vector.extract_strided_slice %119 {offsets = [0, 0], sizes = [32, 72], strides = [1, 1]} : vector<32x86xbf16> to vector<32x72xbf16>
    %121 = vector.extract_strided_slice %119 {offsets = [0, 1], sizes = [32, 72], strides = [1, 1]} : vector<32x86xbf16> to vector<32x72xbf16>
    %122 = vector.extract_strided_slice %119 {offsets = [0, 2], sizes = [32, 72], strides = [1, 1]} : vector<32x86xbf16> to vector<32x72xbf16>
    %123 = vector.extract_strided_slice %119 {offsets = [0, 6], sizes = [32, 72], strides = [1, 1]} : vector<32x86xbf16> to vector<32x72xbf16>
    %124 = vector.extract_strided_slice %119 {offsets = [0, 7], sizes = [32, 72], strides = [1, 1]} : vector<32x86xbf16> to vector<32x72xbf16>
    %125 = vector.extract_strided_slice %119 {offsets = [0, 8], sizes = [32, 72], strides = [1, 1]} : vector<32x86xbf16> to vector<32x72xbf16>
    %126 = vector.extract_strided_slice %119 {offsets = [0, 12], sizes = [32, 72], strides = [1, 1]} : vector<32x86xbf16> to vector<32x72xbf16>
    %127 = vector.extract_strided_slice %119 {offsets = [0, 13], sizes = [32, 72], strides = [1, 1]} : vector<32x86xbf16> to vector<32x72xbf16>
    %128 = vector.extract_strided_slice %119 {offsets = [0, 14], sizes = [32, 72], strides = [1, 1]} : vector<32x86xbf16> to vector<32x72xbf16>
    %129 = tpu.concatenate %120, %121, %122, %123, %124, %125, %126, %127, %128 in 0 : vector<32x72xbf16>, vector<32x72xbf16>, vector<32x72xbf16>, vector<32x72xbf16>, vector<32x72xbf16>, vector<32x72xbf16>, vector<32x72xbf16>, vector<32x72xbf16>, vector<32x72xbf16> -> vector<288x72xbf16>
    %c0_42 = arith.constant 0 : index
    %c0_43 = arith.constant 0 : index
    %130 = vector.load %arg12[%c0_42, %c0_43] : memref<32x288xbf16, #tpu.memory_space<vmem>>, vector<32x288xbf16>
    %cst_44 = arith.constant dense<0.000000e+00> : vector<32x72xf32>
    %131 = tpu.matmul %130, %129, %cst_44 {dimension_numbers = #tpu.dot_dimension_numbers<[1], [0], [0], [1], [0, 0, 1, 1], [], []>} : vector<32x288xbf16>, vector<288x72xbf16>, vector<32x72xf32> -> vector<32x72xf32>
    %c0_45 = arith.constant 0 : index
    %c0_46 = arith.constant 0 : index
    %132 = vector.load %arg13[%c0_45, %c0_46] : memref<32x1xf32, #tpu.memory_space<vmem>>, vector<32x1xf32>
    %133 = vector.broadcast %132 : vector<32x1xf32> to vector<32x72xf32>
    %134 = arith.addf %131, %133 : vector<32x72xf32>
    %cst_47 = arith.constant 0.000000e+00 : f32
    %135 = vector.broadcast %cst_47 : f32 to vector<32x72xf32>
    %136 = arith.maximumf %134, %135 : vector<32x72xf32>
    %137 = vector.extract_strided_slice %136 {offsets = [0, 0], sizes = [32, 65], strides = [1, 1]} : vector<32x72xf32> to vector<32x65xf32>
    %138 = vector.extract_strided_slice %136 {offsets = [0, 1], sizes = [32, 65], strides = [1, 1]} : vector<32x72xf32> to vector<32x65xf32>
    %139 = arith.maximumf %137, %138 : vector<32x65xf32>
    %140 = vector.extract_strided_slice %136 {offsets = [0, 6], sizes = [32, 65], strides = [1, 1]} : vector<32x72xf32> to vector<32x65xf32>
    %141 = vector.extract_strided_slice %136 {offsets = [0, 7], sizes = [32, 65], strides = [1, 1]} : vector<32x72xf32> to vector<32x65xf32>
    %142 = arith.maximumf %140, %141 : vector<32x65xf32>
    %143 = arith.maximumf %139, %142 : vector<32x65xf32>
    %144 = arith.truncf %143 : vector<32x65xf32> to vector<32x65xbf16>
    %c0_48 = arith.constant 0 : index
    %c0_49 = arith.constant 0 : index
    %145 = vector.load %arg45[%c0_48, %c0_49] : memref<65x52xbf16, #tpu.memory_space<vmem>>, vector<65x52xbf16>
    %cst_50 = arith.constant dense<0.000000e+00> : vector<32x52xf32>
    %146 = tpu.matmul %144, %145, %cst_50 {dimension_numbers = #tpu.dot_dimension_numbers<[1], [0], [0], [1], [0, 0, 1, 1], [], []>} : vector<32x65xbf16>, vector<65x52xbf16>, vector<32x52xf32> -> vector<32x52xf32>
    %147 = arith.truncf %146 : vector<32x52xf32> to vector<32x52xbf16>
    %148 = vector.extract_strided_slice %147 {offsets = [0, 0], sizes = [32, 42], strides = [1, 1]} : vector<32x52xbf16> to vector<32x42xbf16>
    %149 = vector.extract_strided_slice %147 {offsets = [0, 1], sizes = [32, 42], strides = [1, 1]} : vector<32x52xbf16> to vector<32x42xbf16>
    %150 = vector.extract_strided_slice %147 {offsets = [0, 2], sizes = [32, 42], strides = [1, 1]} : vector<32x52xbf16> to vector<32x42xbf16>
    %151 = vector.extract_strided_slice %147 {offsets = [0, 4], sizes = [32, 42], strides = [1, 1]} : vector<32x52xbf16> to vector<32x42xbf16>
    %152 = vector.extract_strided_slice %147 {offsets = [0, 5], sizes = [32, 42], strides = [1, 1]} : vector<32x52xbf16> to vector<32x42xbf16>
    %153 = vector.extract_strided_slice %147 {offsets = [0, 6], sizes = [32, 42], strides = [1, 1]} : vector<32x52xbf16> to vector<32x42xbf16>
    %154 = vector.extract_strided_slice %147 {offsets = [0, 8], sizes = [32, 42], strides = [1, 1]} : vector<32x52xbf16> to vector<32x42xbf16>
    %155 = vector.extract_strided_slice %147 {offsets = [0, 9], sizes = [32, 42], strides = [1, 1]} : vector<32x52xbf16> to vector<32x42xbf16>
    %156 = vector.extract_strided_slice %147 {offsets = [0, 10], sizes = [32, 42], strides = [1, 1]} : vector<32x52xbf16> to vector<32x42xbf16>
    %157 = tpu.concatenate %148, %149, %150, %151, %152, %153, %154, %155, %156 in 0 : vector<32x42xbf16>, vector<32x42xbf16>, vector<32x42xbf16>, vector<32x42xbf16>, vector<32x42xbf16>, vector<32x42xbf16>, vector<32x42xbf16>, vector<32x42xbf16>, vector<32x42xbf16> -> vector<288x42xbf16>
    %c0_51 = arith.constant 0 : index
    %c0_52 = arith.constant 0 : index
    %158 = vector.load %arg14[%c0_51, %c0_52] : memref<64x288xbf16, #tpu.memory_space<vmem>>, vector<64x288xbf16>
    %cst_53 = arith.constant dense<0.000000e+00> : vector<64x42xf32>
    %159 = tpu.matmul %158, %157, %cst_53 {dimension_numbers = #tpu.dot_dimension_numbers<[1], [0], [0], [1], [0, 0, 1, 1], [], []>} : vector<64x288xbf16>, vector<288x42xbf16>, vector<64x42xf32> -> vector<64x42xf32>
    %c0_54 = arith.constant 0 : index
    %c0_55 = arith.constant 0 : index
    %160 = vector.load %arg15[%c0_54, %c0_55] : memref<64x1xf32, #tpu.memory_space<vmem>>, vector<64x1xf32>
    %161 = vector.broadcast %160 : vector<64x1xf32> to vector<64x42xf32>
    %162 = arith.addf %159, %161 : vector<64x42xf32>
    %cst_56 = arith.constant 0.000000e+00 : f32
    %163 = vector.broadcast %cst_56 : f32 to vector<64x42xf32>
    %164 = arith.maximumf %162, %163 : vector<64x42xf32>
    %165 = arith.truncf %164 : vector<64x42xf32> to vector<64x42xbf16>
    %c0_57 = arith.constant 0 : index
    %c0_58 = arith.constant 0 : index
    %166 = vector.load %arg41[%c0_57, %c0_58] : memref<1x42xbf16, #tpu.memory_space<vmem>>, vector<1x42xbf16>
    %167 = vector.broadcast %166 : vector<1x42xbf16> to vector<64x42xbf16>
    %168 = arith.mulf %165, %167 : vector<64x42xbf16>
    %169 = vector.extract_strided_slice %168 {offsets = [0, 0], sizes = [64, 32], strides = [1, 1]} : vector<64x42xbf16> to vector<64x32xbf16>
    %170 = vector.extract_strided_slice %168 {offsets = [0, 1], sizes = [64, 32], strides = [1, 1]} : vector<64x42xbf16> to vector<64x32xbf16>
    %171 = vector.extract_strided_slice %168 {offsets = [0, 2], sizes = [64, 32], strides = [1, 1]} : vector<64x42xbf16> to vector<64x32xbf16>
    %172 = vector.extract_strided_slice %168 {offsets = [0, 4], sizes = [64, 32], strides = [1, 1]} : vector<64x42xbf16> to vector<64x32xbf16>
    %173 = vector.extract_strided_slice %168 {offsets = [0, 5], sizes = [64, 32], strides = [1, 1]} : vector<64x42xbf16> to vector<64x32xbf16>
    %174 = vector.extract_strided_slice %168 {offsets = [0, 6], sizes = [64, 32], strides = [1, 1]} : vector<64x42xbf16> to vector<64x32xbf16>
    %175 = vector.extract_strided_slice %168 {offsets = [0, 8], sizes = [64, 32], strides = [1, 1]} : vector<64x42xbf16> to vector<64x32xbf16>
    %176 = vector.extract_strided_slice %168 {offsets = [0, 9], sizes = [64, 32], strides = [1, 1]} : vector<64x42xbf16> to vector<64x32xbf16>
    %177 = vector.extract_strided_slice %168 {offsets = [0, 10], sizes = [64, 32], strides = [1, 1]} : vector<64x42xbf16> to vector<64x32xbf16>
    %178 = tpu.concatenate %169, %170, %171, %172, %173, %174, %175, %176, %177 in 0 : vector<64x32xbf16>, vector<64x32xbf16>, vector<64x32xbf16>, vector<64x32xbf16>, vector<64x32xbf16>, vector<64x32xbf16>, vector<64x32xbf16>, vector<64x32xbf16>, vector<64x32xbf16> -> vector<576x32xbf16>
    %c0_59 = arith.constant 0 : index
    %c0_60 = arith.constant 0 : index
    %179 = vector.load %arg16[%c0_59, %c0_60] : memref<64x576xbf16, #tpu.memory_space<vmem>>, vector<64x576xbf16>
    %cst_61 = arith.constant dense<0.000000e+00> : vector<64x32xf32>
    %180 = tpu.matmul %179, %178, %cst_61 {dimension_numbers = #tpu.dot_dimension_numbers<[1], [0], [0], [1], [0, 0, 1, 1], [], []>} : vector<64x576xbf16>, vector<576x32xbf16>, vector<64x32xf32> -> vector<64x32xf32>
    %c0_62 = arith.constant 0 : index
    %c0_63 = arith.constant 0 : index
    %181 = vector.load %arg17[%c0_62, %c0_63] : memref<64x1xf32, #tpu.memory_space<vmem>>, vector<64x1xf32>
    %182 = vector.broadcast %181 : vector<64x1xf32> to vector<64x32xf32>
    %183 = arith.addf %180, %182 : vector<64x32xf32>
    %cst_64 = arith.constant 0.000000e+00 : f32
    %184 = vector.broadcast %cst_64 : f32 to vector<64x32xf32>
    %185 = arith.maximumf %183, %184 : vector<64x32xf32>
    %186 = vector.extract_strided_slice %185 {offsets = [0, 0], sizes = [64, 27], strides = [1, 1]} : vector<64x32xf32> to vector<64x27xf32>
    %187 = vector.extract_strided_slice %185 {offsets = [0, 1], sizes = [64, 27], strides = [1, 1]} : vector<64x32xf32> to vector<64x27xf32>
    %188 = arith.maximumf %186, %187 : vector<64x27xf32>
    %189 = vector.extract_strided_slice %185 {offsets = [0, 4], sizes = [64, 27], strides = [1, 1]} : vector<64x32xf32> to vector<64x27xf32>
    %190 = vector.extract_strided_slice %185 {offsets = [0, 5], sizes = [64, 27], strides = [1, 1]} : vector<64x32xf32> to vector<64x27xf32>
    %191 = arith.maximumf %189, %190 : vector<64x27xf32>
    %192 = arith.maximumf %188, %191 : vector<64x27xf32>
    %193 = arith.truncf %192 : vector<64x27xf32> to vector<64x27xbf16>
    %c0_65 = arith.constant 0 : index
    %c0_66 = arith.constant 0 : index
    %194 = vector.load %arg46[%c0_65, %c0_66] : memref<27x34xbf16, #tpu.memory_space<vmem>>, vector<27x34xbf16>
    %cst_67 = arith.constant dense<0.000000e+00> : vector<64x34xf32>
    %195 = tpu.matmul %193, %194, %cst_67 {dimension_numbers = #tpu.dot_dimension_numbers<[1], [0], [0], [1], [0, 0, 1, 1], [], []>} : vector<64x27xbf16>, vector<27x34xbf16>, vector<64x34xf32> -> vector<64x34xf32>
    %196 = arith.truncf %195 : vector<64x34xf32> to vector<64x34xbf16>
    %197 = vector.extract_strided_slice %196 {offsets = [0, 0], sizes = [64, 26], strides = [1, 1]} : vector<64x34xbf16> to vector<64x26xbf16>
    %198 = vector.extract_strided_slice %196 {offsets = [0, 1], sizes = [64, 26], strides = [1, 1]} : vector<64x34xbf16> to vector<64x26xbf16>
    %199 = vector.extract_strided_slice %196 {offsets = [0, 2], sizes = [64, 26], strides = [1, 1]} : vector<64x34xbf16> to vector<64x26xbf16>
    %200 = vector.extract_strided_slice %196 {offsets = [0, 3], sizes = [64, 26], strides = [1, 1]} : vector<64x34xbf16> to vector<64x26xbf16>
    %201 = vector.extract_strided_slice %196 {offsets = [0, 4], sizes = [64, 26], strides = [1, 1]} : vector<64x34xbf16> to vector<64x26xbf16>
    %202 = vector.extract_strided_slice %196 {offsets = [0, 5], sizes = [64, 26], strides = [1, 1]} : vector<64x34xbf16> to vector<64x26xbf16>
    %203 = vector.extract_strided_slice %196 {offsets = [0, 6], sizes = [64, 26], strides = [1, 1]} : vector<64x34xbf16> to vector<64x26xbf16>
    %204 = vector.extract_strided_slice %196 {offsets = [0, 7], sizes = [64, 26], strides = [1, 1]} : vector<64x34xbf16> to vector<64x26xbf16>
    %205 = vector.extract_strided_slice %196 {offsets = [0, 8], sizes = [64, 26], strides = [1, 1]} : vector<64x34xbf16> to vector<64x26xbf16>
    %206 = tpu.concatenate %197, %198, %199, %200, %201, %202, %203, %204, %205 in 0 : vector<64x26xbf16>, vector<64x26xbf16>, vector<64x26xbf16>, vector<64x26xbf16>, vector<64x26xbf16>, vector<64x26xbf16>, vector<64x26xbf16>, vector<64x26xbf16>, vector<64x26xbf16> -> vector<576x26xbf16>
    %c0_68 = arith.constant 0 : index
    %c0_69 = arith.constant 0 : index
    %207 = vector.load %arg18[%c0_68, %c0_69] : memref<64x576xbf16, #tpu.memory_space<vmem>>, vector<64x576xbf16>
    %cst_70 = arith.constant dense<0.000000e+00> : vector<64x26xf32>
    %208 = tpu.matmul %207, %206, %cst_70 {dimension_numbers = #tpu.dot_dimension_numbers<[1], [0], [0], [1], [0, 0, 1, 1], [], []>} : vector<64x576xbf16>, vector<576x26xbf16>, vector<64x26xf32> -> vector<64x26xf32>
    %c0_71 = arith.constant 0 : index
    %c0_72 = arith.constant 0 : index
    %209 = vector.load %arg19[%c0_71, %c0_72] : memref<64x1xf32, #tpu.memory_space<vmem>>, vector<64x1xf32>
    %210 = vector.broadcast %209 : vector<64x1xf32> to vector<64x26xf32>
    %211 = arith.addf %208, %210 : vector<64x26xf32>
    %cst_73 = arith.constant 0.000000e+00 : f32
    %212 = vector.broadcast %cst_73 : f32 to vector<64x26xf32>
    %213 = arith.maximumf %211, %212 : vector<64x26xf32>
    %214 = arith.truncf %213 : vector<64x26xf32> to vector<64x26xbf16>
    %c0_74 = arith.constant 0 : index
    %c0_75 = arith.constant 0 : index
    %215 = vector.load %arg42[%c0_74, %c0_75] : memref<1x26xbf16, #tpu.memory_space<vmem>>, vector<1x26xbf16>
    %216 = vector.broadcast %215 : vector<1x26xbf16> to vector<64x26xbf16>
    %217 = arith.mulf %214, %216 : vector<64x26xbf16>
    %218 = vector.extract_strided_slice %217 {offsets = [0, 0], sizes = [64, 18], strides = [1, 1]} : vector<64x26xbf16> to vector<64x18xbf16>
    %219 = vector.extract_strided_slice %217 {offsets = [0, 1], sizes = [64, 18], strides = [1, 1]} : vector<64x26xbf16> to vector<64x18xbf16>
    %220 = vector.extract_strided_slice %217 {offsets = [0, 2], sizes = [64, 18], strides = [1, 1]} : vector<64x26xbf16> to vector<64x18xbf16>
    %221 = vector.extract_strided_slice %217 {offsets = [0, 3], sizes = [64, 18], strides = [1, 1]} : vector<64x26xbf16> to vector<64x18xbf16>
    %222 = vector.extract_strided_slice %217 {offsets = [0, 4], sizes = [64, 18], strides = [1, 1]} : vector<64x26xbf16> to vector<64x18xbf16>
    %223 = vector.extract_strided_slice %217 {offsets = [0, 5], sizes = [64, 18], strides = [1, 1]} : vector<64x26xbf16> to vector<64x18xbf16>
    %224 = vector.extract_strided_slice %217 {offsets = [0, 6], sizes = [64, 18], strides = [1, 1]} : vector<64x26xbf16> to vector<64x18xbf16>
    %225 = vector.extract_strided_slice %217 {offsets = [0, 7], sizes = [64, 18], strides = [1, 1]} : vector<64x26xbf16> to vector<64x18xbf16>
    %226 = vector.extract_strided_slice %217 {offsets = [0, 8], sizes = [64, 18], strides = [1, 1]} : vector<64x26xbf16> to vector<64x18xbf16>
    %227 = tpu.concatenate %218, %219, %220, %221, %222, %223, %224, %225, %226 in 0 : vector<64x18xbf16>, vector<64x18xbf16>, vector<64x18xbf16>, vector<64x18xbf16>, vector<64x18xbf16>, vector<64x18xbf16>, vector<64x18xbf16>, vector<64x18xbf16>, vector<64x18xbf16> -> vector<576x18xbf16>
    %c0_76 = arith.constant 0 : index
    %c0_77 = arith.constant 0 : index
    %228 = vector.load %arg20[%c0_76, %c0_77] : memref<64x576xbf16, #tpu.memory_space<vmem>>, vector<64x576xbf16>
    %cst_78 = arith.constant dense<0.000000e+00> : vector<64x18xf32>
    %229 = tpu.matmul %228, %227, %cst_78 {dimension_numbers = #tpu.dot_dimension_numbers<[1], [0], [0], [1], [0, 0, 1, 1], [], []>} : vector<64x576xbf16>, vector<576x18xbf16>, vector<64x18xf32> -> vector<64x18xf32>
    %c0_79 = arith.constant 0 : index
    %c0_80 = arith.constant 0 : index
    %230 = vector.load %arg21[%c0_79, %c0_80] : memref<64x1xf32, #tpu.memory_space<vmem>>, vector<64x1xf32>
    %231 = vector.broadcast %230 : vector<64x1xf32> to vector<64x18xf32>
    %232 = arith.addf %229, %231 : vector<64x18xf32>
    %cst_81 = arith.constant 0.000000e+00 : f32
    %233 = vector.broadcast %cst_81 : f32 to vector<64x18xf32>
    %234 = arith.maximumf %232, %233 : vector<64x18xf32>
    %c0_82 = arith.constant 0 : index
    %c0_83 = arith.constant 0 : index
    %235 = vector.load %arg47[%c0_82, %c0_83] : memref<18x52xf32, #tpu.memory_space<vmem>>, vector<18x52xf32>
    %cst_84 = arith.constant dense<0.000000e+00> : vector<64x52xf32>
    %236 = tpu.matmul %234, %235, %cst_84 {dimension_numbers = #tpu.dot_dimension_numbers<[1], [0], [0], [1], [0, 0, 1, 1], [], []>} : vector<64x18xf32>, vector<18x52xf32>, vector<64x52xf32> -> vector<64x52xf32>
    %237 = arith.truncf %236 : vector<64x52xf32> to vector<64x52xbf16>
    %238 = arith.truncf %185 : vector<64x32xf32> to vector<64x32xbf16>
    %c0_85 = arith.constant 0 : index
    %c0_86 = arith.constant 0 : index
    %239 = vector.load %arg51[%c0_85, %c0_86] : memref<32x52xbf16, #tpu.memory_space<vmem>>, vector<32x52xbf16>
    %cst_87 = arith.constant dense<0.000000e+00> : vector<64x52xf32>
    %240 = tpu.matmul %238, %239, %cst_87 {dimension_numbers = #tpu.dot_dimension_numbers<[1], [0], [0], [1], [0, 0, 1, 1], [], []>} : vector<64x32xbf16>, vector<32x52xbf16>, vector<64x52xf32> -> vector<64x52xf32>
    %241 = arith.truncf %240 : vector<64x52xf32> to vector<64x52xbf16>
    %242 = tpu.concatenate %241, %237 in 0 : vector<64x52xbf16>, vector<64x52xbf16> -> vector<128x52xbf16>
    %243 = vector.extract_strided_slice %242 {offsets = [0, 0], sizes = [128, 42], strides = [1, 1]} : vector<128x52xbf16> to vector<128x42xbf16>
    %244 = vector.extract_strided_slice %242 {offsets = [0, 1], sizes = [128, 42], strides = [1, 1]} : vector<128x52xbf16> to vector<128x42xbf16>
    %245 = vector.extract_strided_slice %242 {offsets = [0, 2], sizes = [128, 42], strides = [1, 1]} : vector<128x52xbf16> to vector<128x42xbf16>
    %246 = vector.extract_strided_slice %242 {offsets = [0, 4], sizes = [128, 42], strides = [1, 1]} : vector<128x52xbf16> to vector<128x42xbf16>
    %247 = vector.extract_strided_slice %242 {offsets = [0, 5], sizes = [128, 42], strides = [1, 1]} : vector<128x52xbf16> to vector<128x42xbf16>
    %248 = vector.extract_strided_slice %242 {offsets = [0, 6], sizes = [128, 42], strides = [1, 1]} : vector<128x52xbf16> to vector<128x42xbf16>
    %249 = vector.extract_strided_slice %242 {offsets = [0, 8], sizes = [128, 42], strides = [1, 1]} : vector<128x52xbf16> to vector<128x42xbf16>
    %250 = vector.extract_strided_slice %242 {offsets = [0, 9], sizes = [128, 42], strides = [1, 1]} : vector<128x52xbf16> to vector<128x42xbf16>
    %251 = vector.extract_strided_slice %242 {offsets = [0, 10], sizes = [128, 42], strides = [1, 1]} : vector<128x52xbf16> to vector<128x42xbf16>
    %252 = tpu.concatenate %243, %244, %245, %246, %247, %248, %249, %250, %251 in 0 : vector<128x42xbf16>, vector<128x42xbf16>, vector<128x42xbf16>, vector<128x42xbf16>, vector<128x42xbf16>, vector<128x42xbf16>, vector<128x42xbf16>, vector<128x42xbf16>, vector<128x42xbf16> -> vector<1152x42xbf16>
    %c0_88 = arith.constant 0 : index
    %c0_89 = arith.constant 0 : index
    %253 = vector.load %arg22[%c0_88, %c0_89] : memref<64x1152xbf16, #tpu.memory_space<vmem>>, vector<64x1152xbf16>
    %cst_90 = arith.constant dense<0.000000e+00> : vector<64x42xf32>
    %254 = tpu.matmul %253, %252, %cst_90 {dimension_numbers = #tpu.dot_dimension_numbers<[1], [0], [0], [1], [0, 0, 1, 1], [], []>} : vector<64x1152xbf16>, vector<1152x42xbf16>, vector<64x42xf32> -> vector<64x42xf32>
    %c0_91 = arith.constant 0 : index
    %c0_92 = arith.constant 0 : index
    %255 = vector.load %arg23[%c0_91, %c0_92] : memref<64x1xf32, #tpu.memory_space<vmem>>, vector<64x1xf32>
    %256 = vector.broadcast %255 : vector<64x1xf32> to vector<64x42xf32>
    %257 = arith.addf %254, %256 : vector<64x42xf32>
    %cst_93 = arith.constant 0.000000e+00 : f32
    %258 = vector.broadcast %cst_93 : f32 to vector<64x42xf32>
    %259 = arith.maximumf %257, %258 : vector<64x42xf32>
    %260 = arith.truncf %259 : vector<64x42xf32> to vector<64x42xbf16>
    %c0_94 = arith.constant 0 : index
    %c0_95 = arith.constant 0 : index
    %261 = vector.load %arg41[%c0_94, %c0_95] : memref<1x42xbf16, #tpu.memory_space<vmem>>, vector<1x42xbf16>
    %262 = vector.broadcast %261 : vector<1x42xbf16> to vector<64x42xbf16>
    %263 = arith.mulf %260, %262 : vector<64x42xbf16>
    %264 = vector.extract_strided_slice %263 {offsets = [0, 0], sizes = [64, 32], strides = [1, 1]} : vector<64x42xbf16> to vector<64x32xbf16>
    %265 = vector.extract_strided_slice %263 {offsets = [0, 1], sizes = [64, 32], strides = [1, 1]} : vector<64x42xbf16> to vector<64x32xbf16>
    %266 = vector.extract_strided_slice %263 {offsets = [0, 2], sizes = [64, 32], strides = [1, 1]} : vector<64x42xbf16> to vector<64x32xbf16>
    %267 = vector.extract_strided_slice %263 {offsets = [0, 4], sizes = [64, 32], strides = [1, 1]} : vector<64x42xbf16> to vector<64x32xbf16>
    %268 = vector.extract_strided_slice %263 {offsets = [0, 5], sizes = [64, 32], strides = [1, 1]} : vector<64x42xbf16> to vector<64x32xbf16>
    %269 = vector.extract_strided_slice %263 {offsets = [0, 6], sizes = [64, 32], strides = [1, 1]} : vector<64x42xbf16> to vector<64x32xbf16>
    %270 = vector.extract_strided_slice %263 {offsets = [0, 8], sizes = [64, 32], strides = [1, 1]} : vector<64x42xbf16> to vector<64x32xbf16>
    %271 = vector.extract_strided_slice %263 {offsets = [0, 9], sizes = [64, 32], strides = [1, 1]} : vector<64x42xbf16> to vector<64x32xbf16>
    %272 = vector.extract_strided_slice %263 {offsets = [0, 10], sizes = [64, 32], strides = [1, 1]} : vector<64x42xbf16> to vector<64x32xbf16>
    %273 = tpu.concatenate %264, %265, %266, %267, %268, %269, %270, %271, %272 in 0 : vector<64x32xbf16>, vector<64x32xbf16>, vector<64x32xbf16>, vector<64x32xbf16>, vector<64x32xbf16>, vector<64x32xbf16>, vector<64x32xbf16>, vector<64x32xbf16>, vector<64x32xbf16> -> vector<576x32xbf16>
    %c0_96 = arith.constant 0 : index
    %c0_97 = arith.constant 0 : index
    %274 = vector.load %arg24[%c0_96, %c0_97] : memref<32x576xbf16, #tpu.memory_space<vmem>>, vector<32x576xbf16>
    %cst_98 = arith.constant dense<0.000000e+00> : vector<32x32xf32>
    %275 = tpu.matmul %274, %273, %cst_98 {dimension_numbers = #tpu.dot_dimension_numbers<[1], [0], [0], [1], [0, 0, 1, 1], [], []>} : vector<32x576xbf16>, vector<576x32xbf16>, vector<32x32xf32> -> vector<32x32xf32>
    %c0_99 = arith.constant 0 : index
    %c0_100 = arith.constant 0 : index
    %276 = vector.load %arg25[%c0_99, %c0_100] : memref<32x1xf32, #tpu.memory_space<vmem>>, vector<32x1xf32>
    %277 = vector.broadcast %276 : vector<32x1xf32> to vector<32x32xf32>
    %278 = arith.addf %275, %277 : vector<32x32xf32>
    %cst_101 = arith.constant 0.000000e+00 : f32
    %279 = vector.broadcast %cst_101 : f32 to vector<32x32xf32>
    %280 = arith.maximumf %278, %279 : vector<32x32xf32>
    %c0_102 = arith.constant 0 : index
    %c0_103 = arith.constant 0 : index
    %281 = vector.load %arg48[%c0_102, %c0_103] : memref<32x100xf32, #tpu.memory_space<vmem>>, vector<32x100xf32>
    %cst_104 = arith.constant dense<0.000000e+00> : vector<32x100xf32>
    %282 = tpu.matmul %280, %281, %cst_104 {dimension_numbers = #tpu.dot_dimension_numbers<[1], [0], [0], [1], [0, 0, 1, 1], [], []>} : vector<32x32xf32>, vector<32x100xf32>, vector<32x100xf32> -> vector<32x100xf32>
    %283 = arith.truncf %282 : vector<32x100xf32> to vector<32x100xbf16>
    %284 = arith.truncf %136 : vector<32x72xf32> to vector<32x72xbf16>
    %c0_105 = arith.constant 0 : index
    %c0_106 = arith.constant 0 : index
    %285 = vector.load %arg52[%c0_105, %c0_106] : memref<72x100xbf16, #tpu.memory_space<vmem>>, vector<72x100xbf16>
    %cst_107 = arith.constant dense<0.000000e+00> : vector<32x100xf32>
    %286 = tpu.matmul %284, %285, %cst_107 {dimension_numbers = #tpu.dot_dimension_numbers<[1], [0], [0], [1], [0, 0, 1, 1], [], []>} : vector<32x72xbf16>, vector<72x100xbf16>, vector<32x100xf32> -> vector<32x100xf32>
    %287 = arith.truncf %286 : vector<32x100xf32> to vector<32x100xbf16>
    %288 = tpu.concatenate %287, %283 in 0 : vector<32x100xbf16>, vector<32x100xbf16> -> vector<64x100xbf16>
    %289 = vector.extract_strided_slice %288 {offsets = [0, 0], sizes = [64, 86], strides = [1, 1]} : vector<64x100xbf16> to vector<64x86xbf16>
    %290 = vector.extract_strided_slice %288 {offsets = [0, 1], sizes = [64, 86], strides = [1, 1]} : vector<64x100xbf16> to vector<64x86xbf16>
    %291 = vector.extract_strided_slice %288 {offsets = [0, 2], sizes = [64, 86], strides = [1, 1]} : vector<64x100xbf16> to vector<64x86xbf16>
    %292 = vector.extract_strided_slice %288 {offsets = [0, 6], sizes = [64, 86], strides = [1, 1]} : vector<64x100xbf16> to vector<64x86xbf16>
    %293 = vector.extract_strided_slice %288 {offsets = [0, 7], sizes = [64, 86], strides = [1, 1]} : vector<64x100xbf16> to vector<64x86xbf16>
    %294 = vector.extract_strided_slice %288 {offsets = [0, 8], sizes = [64, 86], strides = [1, 1]} : vector<64x100xbf16> to vector<64x86xbf16>
    %295 = vector.extract_strided_slice %288 {offsets = [0, 12], sizes = [64, 86], strides = [1, 1]} : vector<64x100xbf16> to vector<64x86xbf16>
    %296 = vector.extract_strided_slice %288 {offsets = [0, 13], sizes = [64, 86], strides = [1, 1]} : vector<64x100xbf16> to vector<64x86xbf16>
    %297 = vector.extract_strided_slice %288 {offsets = [0, 14], sizes = [64, 86], strides = [1, 1]} : vector<64x100xbf16> to vector<64x86xbf16>
    %298 = tpu.concatenate %289, %290, %291, %292, %293, %294, %295, %296, %297 in 0 : vector<64x86xbf16>, vector<64x86xbf16>, vector<64x86xbf16>, vector<64x86xbf16>, vector<64x86xbf16>, vector<64x86xbf16>, vector<64x86xbf16>, vector<64x86xbf16>, vector<64x86xbf16> -> vector<576x86xbf16>
    %c0_108 = arith.constant 0 : index
    %c0_109 = arith.constant 0 : index
    %299 = vector.load %arg26[%c0_108, %c0_109] : memref<32x576xbf16, #tpu.memory_space<vmem>>, vector<32x576xbf16>
    %cst_110 = arith.constant dense<0.000000e+00> : vector<32x86xf32>
    %300 = tpu.matmul %299, %298, %cst_110 {dimension_numbers = #tpu.dot_dimension_numbers<[1], [0], [0], [1], [0, 0, 1, 1], [], []>} : vector<32x576xbf16>, vector<576x86xbf16>, vector<32x86xf32> -> vector<32x86xf32>
    %c0_111 = arith.constant 0 : index
    %c0_112 = arith.constant 0 : index
    %301 = vector.load %arg27[%c0_111, %c0_112] : memref<32x1xf32, #tpu.memory_space<vmem>>, vector<32x1xf32>
    %302 = vector.broadcast %301 : vector<32x1xf32> to vector<32x86xf32>
    %303 = arith.addf %300, %302 : vector<32x86xf32>
    %cst_113 = arith.constant 0.000000e+00 : f32
    %304 = vector.broadcast %cst_113 : f32 to vector<32x86xf32>
    %305 = arith.maximumf %303, %304 : vector<32x86xf32>
    %306 = arith.truncf %305 : vector<32x86xf32> to vector<32x86xbf16>
    %c0_114 = arith.constant 0 : index
    %c0_115 = arith.constant 0 : index
    %307 = vector.load %arg40[%c0_114, %c0_115] : memref<1x86xbf16, #tpu.memory_space<vmem>>, vector<1x86xbf16>
    %308 = vector.broadcast %307 : vector<1x86xbf16> to vector<32x86xbf16>
    %309 = arith.mulf %306, %308 : vector<32x86xbf16>
    %310 = vector.extract_strided_slice %309 {offsets = [0, 0], sizes = [32, 72], strides = [1, 1]} : vector<32x86xbf16> to vector<32x72xbf16>
    %311 = vector.extract_strided_slice %309 {offsets = [0, 1], sizes = [32, 72], strides = [1, 1]} : vector<32x86xbf16> to vector<32x72xbf16>
    %312 = vector.extract_strided_slice %309 {offsets = [0, 2], sizes = [32, 72], strides = [1, 1]} : vector<32x86xbf16> to vector<32x72xbf16>
    %313 = vector.extract_strided_slice %309 {offsets = [0, 6], sizes = [32, 72], strides = [1, 1]} : vector<32x86xbf16> to vector<32x72xbf16>
    %314 = vector.extract_strided_slice %309 {offsets = [0, 7], sizes = [32, 72], strides = [1, 1]} : vector<32x86xbf16> to vector<32x72xbf16>
    %315 = vector.extract_strided_slice %309 {offsets = [0, 8], sizes = [32, 72], strides = [1, 1]} : vector<32x86xbf16> to vector<32x72xbf16>
    %316 = vector.extract_strided_slice %309 {offsets = [0, 12], sizes = [32, 72], strides = [1, 1]} : vector<32x86xbf16> to vector<32x72xbf16>
    %317 = vector.extract_strided_slice %309 {offsets = [0, 13], sizes = [32, 72], strides = [1, 1]} : vector<32x86xbf16> to vector<32x72xbf16>
    %318 = vector.extract_strided_slice %309 {offsets = [0, 14], sizes = [32, 72], strides = [1, 1]} : vector<32x86xbf16> to vector<32x72xbf16>
    %319 = tpu.concatenate %310, %311, %312, %313, %314, %315, %316, %317, %318 in 0 : vector<32x72xbf16>, vector<32x72xbf16>, vector<32x72xbf16>, vector<32x72xbf16>, vector<32x72xbf16>, vector<32x72xbf16>, vector<32x72xbf16>, vector<32x72xbf16>, vector<32x72xbf16> -> vector<288x72xbf16>
    %c0_116 = arith.constant 0 : index
    %c0_117 = arith.constant 0 : index
    %320 = vector.load %arg28[%c0_116, %c0_117] : memref<16x288xbf16, #tpu.memory_space<vmem>>, vector<16x288xbf16>
    %cst_118 = arith.constant dense<0.000000e+00> : vector<16x72xf32>
    %321 = tpu.matmul %320, %319, %cst_118 {dimension_numbers = #tpu.dot_dimension_numbers<[1], [0], [0], [1], [0, 0, 1, 1], [], []>} : vector<16x288xbf16>, vector<288x72xbf16>, vector<16x72xf32> -> vector<16x72xf32>
    %c0_119 = arith.constant 0 : index
    %c0_120 = arith.constant 0 : index
    %322 = vector.load %arg29[%c0_119, %c0_120] : memref<16x1xf32, #tpu.memory_space<vmem>>, vector<16x1xf32>
    %323 = vector.broadcast %322 : vector<16x1xf32> to vector<16x72xf32>
    %324 = arith.addf %321, %323 : vector<16x72xf32>
    %cst_121 = arith.constant 0.000000e+00 : f32
    %325 = vector.broadcast %cst_121 : f32 to vector<16x72xf32>
    %326 = arith.maximumf %324, %325 : vector<16x72xf32>
    %c0_122 = arith.constant 0 : index
    %c0_123 = arith.constant 0 : index
    %327 = vector.load %arg49[%c0_122, %c0_123] : memref<72x244xf32, #tpu.memory_space<vmem>>, vector<72x244xf32>
    %cst_124 = arith.constant dense<0.000000e+00> : vector<16x244xf32>
    %328 = tpu.matmul %326, %327, %cst_124 {dimension_numbers = #tpu.dot_dimension_numbers<[1], [0], [0], [1], [0, 0, 1, 1], [], []>} : vector<16x72xf32>, vector<72x244xf32>, vector<16x244xf32> -> vector<16x244xf32>
    %329 = arith.truncf %328 : vector<16x244xf32> to vector<16x244xbf16>
    %330 = arith.truncf %87 : vector<16x200xf32> to vector<16x200xbf16>
    %c0_125 = arith.constant 0 : index
    %c0_126 = arith.constant 0 : index
    %331 = vector.load %arg53[%c0_125, %c0_126] : memref<200x244xbf16, #tpu.memory_space<vmem>>, vector<200x244xbf16>
    %cst_127 = arith.constant dense<0.000000e+00> : vector<16x244xf32>
    %332 = tpu.matmul %330, %331, %cst_127 {dimension_numbers = #tpu.dot_dimension_numbers<[1], [0], [0], [1], [0, 0, 1, 1], [], []>} : vector<16x200xbf16>, vector<200x244xbf16>, vector<16x244xf32> -> vector<16x244xf32>
    %333 = arith.truncf %332 : vector<16x244xf32> to vector<16x244xbf16>
    %334 = tpu.concatenate %333, %329 in 0 : vector<16x244xbf16>, vector<16x244xbf16> -> vector<32x244xbf16>
    %335 = vector.extract_strided_slice %334 {offsets = [0, 0], sizes = [32, 222], strides = [1, 1]} : vector<32x244xbf16> to vector<32x222xbf16>
    %336 = vector.extract_strided_slice %334 {offsets = [0, 1], sizes = [32, 222], strides = [1, 1]} : vector<32x244xbf16> to vector<32x222xbf16>
    %337 = vector.extract_strided_slice %334 {offsets = [0, 2], sizes = [32, 222], strides = [1, 1]} : vector<32x244xbf16> to vector<32x222xbf16>
    %338 = vector.extract_strided_slice %334 {offsets = [0, 10], sizes = [32, 222], strides = [1, 1]} : vector<32x244xbf16> to vector<32x222xbf16>
    %339 = vector.extract_strided_slice %334 {offsets = [0, 11], sizes = [32, 222], strides = [1, 1]} : vector<32x244xbf16> to vector<32x222xbf16>
    %340 = vector.extract_strided_slice %334 {offsets = [0, 12], sizes = [32, 222], strides = [1, 1]} : vector<32x244xbf16> to vector<32x222xbf16>
    %341 = vector.extract_strided_slice %334 {offsets = [0, 20], sizes = [32, 222], strides = [1, 1]} : vector<32x244xbf16> to vector<32x222xbf16>
    %342 = vector.extract_strided_slice %334 {offsets = [0, 21], sizes = [32, 222], strides = [1, 1]} : vector<32x244xbf16> to vector<32x222xbf16>
    %343 = vector.extract_strided_slice %334 {offsets = [0, 22], sizes = [32, 222], strides = [1, 1]} : vector<32x244xbf16> to vector<32x222xbf16>
    %344 = tpu.concatenate %335, %336, %337, %338, %339, %340, %341, %342, %343 in 0 : vector<32x222xbf16>, vector<32x222xbf16>, vector<32x222xbf16>, vector<32x222xbf16>, vector<32x222xbf16>, vector<32x222xbf16>, vector<32x222xbf16>, vector<32x222xbf16>, vector<32x222xbf16> -> vector<288x222xbf16>
    %c0_128 = arith.constant 0 : index
    %c0_129 = arith.constant 0 : index
    %345 = vector.load %arg30[%c0_128, %c0_129] : memref<16x288xbf16, #tpu.memory_space<vmem>>, vector<16x288xbf16>
    %cst_130 = arith.constant dense<0.000000e+00> : vector<16x222xf32>
    %346 = tpu.matmul %345, %344, %cst_130 {dimension_numbers = #tpu.dot_dimension_numbers<[1], [0], [0], [1], [0, 0, 1, 1], [], []>} : vector<16x288xbf16>, vector<288x222xbf16>, vector<16x222xf32> -> vector<16x222xf32>
    %c0_131 = arith.constant 0 : index
    %c0_132 = arith.constant 0 : index
    %347 = vector.load %arg31[%c0_131, %c0_132] : memref<16x1xf32, #tpu.memory_space<vmem>>, vector<16x1xf32>
    %348 = vector.broadcast %347 : vector<16x1xf32> to vector<16x222xf32>
    %349 = arith.addf %346, %348 : vector<16x222xf32>
    %cst_133 = arith.constant 0.000000e+00 : f32
    %350 = vector.broadcast %cst_133 : f32 to vector<16x222xf32>
    %351 = arith.maximumf %349, %350 : vector<16x222xf32>
    %352 = arith.truncf %351 : vector<16x222xf32> to vector<16x222xbf16>
    %c0_134 = arith.constant 0 : index
    %c0_135 = arith.constant 0 : index
    %353 = vector.load %arg39[%c0_134, %c0_135] : memref<1x222xbf16, #tpu.memory_space<vmem>>, vector<1x222xbf16>
    %354 = vector.broadcast %353 : vector<1x222xbf16> to vector<16x222xbf16>
    %355 = arith.mulf %352, %354 : vector<16x222xbf16>
    %356 = vector.extract_strided_slice %355 {offsets = [0, 0], sizes = [16, 200], strides = [1, 1]} : vector<16x222xbf16> to vector<16x200xbf16>
    %357 = vector.extract_strided_slice %355 {offsets = [0, 1], sizes = [16, 200], strides = [1, 1]} : vector<16x222xbf16> to vector<16x200xbf16>
    %358 = vector.extract_strided_slice %355 {offsets = [0, 2], sizes = [16, 200], strides = [1, 1]} : vector<16x222xbf16> to vector<16x200xbf16>
    %359 = vector.extract_strided_slice %355 {offsets = [0, 10], sizes = [16, 200], strides = [1, 1]} : vector<16x222xbf16> to vector<16x200xbf16>
    %360 = vector.extract_strided_slice %355 {offsets = [0, 11], sizes = [16, 200], strides = [1, 1]} : vector<16x222xbf16> to vector<16x200xbf16>
    %361 = vector.extract_strided_slice %355 {offsets = [0, 12], sizes = [16, 200], strides = [1, 1]} : vector<16x222xbf16> to vector<16x200xbf16>
    %362 = vector.extract_strided_slice %355 {offsets = [0, 20], sizes = [16, 200], strides = [1, 1]} : vector<16x222xbf16> to vector<16x200xbf16>
    %363 = vector.extract_strided_slice %355 {offsets = [0, 21], sizes = [16, 200], strides = [1, 1]} : vector<16x222xbf16> to vector<16x200xbf16>
    %364 = vector.extract_strided_slice %355 {offsets = [0, 22], sizes = [16, 200], strides = [1, 1]} : vector<16x222xbf16> to vector<16x200xbf16>
    %365 = tpu.concatenate %356, %357, %358, %359, %360, %361, %362, %363, %364 in 0 : vector<16x200xbf16>, vector<16x200xbf16>, vector<16x200xbf16>, vector<16x200xbf16>, vector<16x200xbf16>, vector<16x200xbf16>, vector<16x200xbf16>, vector<16x200xbf16>, vector<16x200xbf16> -> vector<144x200xbf16>
    %c0_136 = arith.constant 0 : index
    %c0_137 = arith.constant 0 : index
    %366 = vector.load %arg32[%c0_136, %c0_137] : memref<8x144xbf16, #tpu.memory_space<vmem>>, vector<8x144xbf16>
    %cst_138 = arith.constant dense<0.000000e+00> : vector<8x200xf32>
    %367 = tpu.matmul %366, %365, %cst_138 {dimension_numbers = #tpu.dot_dimension_numbers<[1], [0], [0], [1], [0, 0, 1, 1], [], []>} : vector<8x144xbf16>, vector<144x200xbf16>, vector<8x200xf32> -> vector<8x200xf32>
    %c0_139 = arith.constant 0 : index
    %c0_140 = arith.constant 0 : index
    %368 = vector.load %arg33[%c0_139, %c0_140] : memref<8x1xf32, #tpu.memory_space<vmem>>, vector<8x1xf32>
    %369 = vector.broadcast %368 : vector<8x1xf32> to vector<8x200xf32>
    %370 = arith.addf %367, %369 : vector<8x200xf32>
    %cst_141 = arith.constant 0.000000e+00 : f32
    %371 = vector.broadcast %cst_141 : f32 to vector<8x200xf32>
    %372 = arith.maximumf %370, %371 : vector<8x200xf32>
    %c0_142 = arith.constant 0 : index
    %c0_143 = arith.constant 0 : index
    %373 = vector.load %arg50[%c0_142, %c0_143] : memref<200x724xf32, #tpu.memory_space<vmem>>, vector<200x724xf32>
    %cst_144 = arith.constant dense<0.000000e+00> : vector<8x724xf32>
    %374 = tpu.matmul %372, %373, %cst_144 {dimension_numbers = #tpu.dot_dimension_numbers<[1], [0], [0], [1], [0, 0, 1, 1], [], []>} : vector<8x200xf32>, vector<200x724xf32>, vector<8x724xf32> -> vector<8x724xf32>
    %375 = arith.truncf %374 : vector<8x724xf32> to vector<8x724xbf16>
    %376 = arith.truncf %38 : vector<8x648xf32> to vector<8x648xbf16>
    %c0_145 = arith.constant 0 : index
    %c0_146 = arith.constant 0 : index
    %377 = vector.load %arg54[%c0_145, %c0_146] : memref<648x724xbf16, #tpu.memory_space<vmem>>, vector<648x724xbf16>
    %cst_147 = arith.constant dense<0.000000e+00> : vector<8x724xf32>
    %378 = tpu.matmul %376, %377, %cst_147 {dimension_numbers = #tpu.dot_dimension_numbers<[1], [0], [0], [1], [0, 0, 1, 1], [], []>} : vector<8x648xbf16>, vector<648x724xbf16>, vector<8x724xf32> -> vector<8x724xf32>
    %379 = arith.truncf %378 : vector<8x724xf32> to vector<8x724xbf16>
    %380 = tpu.concatenate %379, %375 in 0 : vector<8x724xbf16>, vector<8x724xbf16> -> vector<16x724xbf16>
    %381 = vector.extract_strided_slice %380 {offsets = [0, 0], sizes = [16, 686], strides = [1, 1]} : vector<16x724xbf16> to vector<16x686xbf16>
    %382 = vector.extract_strided_slice %380 {offsets = [0, 1], sizes = [16, 686], strides = [1, 1]} : vector<16x724xbf16> to vector<16x686xbf16>
    %383 = vector.extract_strided_slice %380 {offsets = [0, 2], sizes = [16, 686], strides = [1, 1]} : vector<16x724xbf16> to vector<16x686xbf16>
    %384 = vector.extract_strided_slice %380 {offsets = [0, 18], sizes = [16, 686], strides = [1, 1]} : vector<16x724xbf16> to vector<16x686xbf16>
    %385 = vector.extract_strided_slice %380 {offsets = [0, 19], sizes = [16, 686], strides = [1, 1]} : vector<16x724xbf16> to vector<16x686xbf16>
    %386 = vector.extract_strided_slice %380 {offsets = [0, 20], sizes = [16, 686], strides = [1, 1]} : vector<16x724xbf16> to vector<16x686xbf16>
    %387 = vector.extract_strided_slice %380 {offsets = [0, 36], sizes = [16, 686], strides = [1, 1]} : vector<16x724xbf16> to vector<16x686xbf16>
    %388 = vector.extract_strided_slice %380 {offsets = [0, 37], sizes = [16, 686], strides = [1, 1]} : vector<16x724xbf16> to vector<16x686xbf16>
    %389 = vector.extract_strided_slice %380 {offsets = [0, 38], sizes = [16, 686], strides = [1, 1]} : vector<16x724xbf16> to vector<16x686xbf16>
    %390 = tpu.concatenate %381, %382, %383, %384, %385, %386, %387, %388, %389 in 0 : vector<16x686xbf16>, vector<16x686xbf16>, vector<16x686xbf16>, vector<16x686xbf16>, vector<16x686xbf16>, vector<16x686xbf16>, vector<16x686xbf16>, vector<16x686xbf16>, vector<16x686xbf16> -> vector<144x686xbf16>
    %c0_148 = arith.constant 0 : index
    %c0_149 = arith.constant 0 : index
    %391 = vector.load %arg34[%c0_148, %c0_149] : memref<8x144xbf16, #tpu.memory_space<vmem>>, vector<8x144xbf16>
    %cst_150 = arith.constant dense<0.000000e+00> : vector<8x686xf32>
    %392 = tpu.matmul %391, %390, %cst_150 {dimension_numbers = #tpu.dot_dimension_numbers<[1], [0], [0], [1], [0, 0, 1, 1], [], []>} : vector<8x144xbf16>, vector<144x686xbf16>, vector<8x686xf32> -> vector<8x686xf32>
    %c0_151 = arith.constant 0 : index
    %c0_152 = arith.constant 0 : index
    %393 = vector.load %arg35[%c0_151, %c0_152] : memref<8x1xf32, #tpu.memory_space<vmem>>, vector<8x1xf32>
    %394 = vector.broadcast %393 : vector<8x1xf32> to vector<8x686xf32>
    %395 = arith.addf %392, %394 : vector<8x686xf32>
    %cst_153 = arith.constant 0.000000e+00 : f32
    %396 = vector.broadcast %cst_153 : f32 to vector<8x686xf32>
    %397 = arith.maximumf %395, %396 : vector<8x686xf32>
    %398 = arith.truncf %397 : vector<8x686xf32> to vector<8x686xbf16>
    %c0_154 = arith.constant 0 : index
    %c0_155 = arith.constant 0 : index
    %399 = vector.load %arg38[%c0_154, %c0_155] : memref<1x686xbf16, #tpu.memory_space<vmem>>, vector<1x686xbf16>
    %400 = vector.broadcast %399 : vector<1x686xbf16> to vector<8x686xbf16>
    %401 = arith.mulf %398, %400 : vector<8x686xbf16>
    %402 = vector.extract_strided_slice %401 {offsets = [0, 0], sizes = [8, 648], strides = [1, 1]} : vector<8x686xbf16> to vector<8x648xbf16>
    %403 = vector.extract_strided_slice %401 {offsets = [0, 1], sizes = [8, 648], strides = [1, 1]} : vector<8x686xbf16> to vector<8x648xbf16>
    %404 = vector.extract_strided_slice %401 {offsets = [0, 2], sizes = [8, 648], strides = [1, 1]} : vector<8x686xbf16> to vector<8x648xbf16>
    %405 = vector.extract_strided_slice %401 {offsets = [0, 18], sizes = [8, 648], strides = [1, 1]} : vector<8x686xbf16> to vector<8x648xbf16>
    %406 = vector.extract_strided_slice %401 {offsets = [0, 19], sizes = [8, 648], strides = [1, 1]} : vector<8x686xbf16> to vector<8x648xbf16>
    %407 = vector.extract_strided_slice %401 {offsets = [0, 20], sizes = [8, 648], strides = [1, 1]} : vector<8x686xbf16> to vector<8x648xbf16>
    %408 = vector.extract_strided_slice %401 {offsets = [0, 36], sizes = [8, 648], strides = [1, 1]} : vector<8x686xbf16> to vector<8x648xbf16>
    %409 = vector.extract_strided_slice %401 {offsets = [0, 37], sizes = [8, 648], strides = [1, 1]} : vector<8x686xbf16> to vector<8x648xbf16>
    %410 = vector.extract_strided_slice %401 {offsets = [0, 38], sizes = [8, 648], strides = [1, 1]} : vector<8x686xbf16> to vector<8x648xbf16>
    %411 = tpu.concatenate %402, %403, %404, %405, %406, %407, %408, %409, %410 in 0 : vector<8x648xbf16>, vector<8x648xbf16>, vector<8x648xbf16>, vector<8x648xbf16>, vector<8x648xbf16>, vector<8x648xbf16>, vector<8x648xbf16>, vector<8x648xbf16>, vector<8x648xbf16> -> vector<72x648xbf16>
    %c0_156 = arith.constant 0 : index
    %c0_157 = arith.constant 0 : index
    %412 = vector.load %arg36[%c0_156, %c0_157] : memref<8x72xbf16, #tpu.memory_space<vmem>>, vector<8x72xbf16>
    %cst_158 = arith.constant dense<0.000000e+00> : vector<8x648xf32>
    %413 = tpu.matmul %412, %411, %cst_158 {dimension_numbers = #tpu.dot_dimension_numbers<[1], [0], [0], [1], [0, 0, 1, 1], [], []>} : vector<8x72xbf16>, vector<72x648xbf16>, vector<8x648xf32> -> vector<8x648xf32>
    %c0_159 = arith.constant 0 : index
    %c0_160 = arith.constant 0 : index
    %414 = vector.load %arg37[%c0_159, %c0_160] : memref<8x1xf32, #tpu.memory_space<vmem>>, vector<8x1xf32>
    %415 = vector.broadcast %414 : vector<8x1xf32> to vector<8x648xf32>
    %416 = arith.addf %413, %415 : vector<8x648xf32>
    %cst_161 = arith.constant 0.000000e+00 : f32
    %417 = vector.broadcast %cst_161 : f32 to vector<8x648xf32>
    %418 = arith.maximumf %416, %417 : vector<8x648xf32>
    %c0_162 = arith.constant 0 : index
    %c0_163 = arith.constant 0 : index
    %419 = vector.load %arg55[%c0_162, %c0_163] : memref<2x8xf32, #tpu.memory_space<vmem>>, vector<2x8xf32>
    %cst_164 = arith.constant dense<0.000000e+00> : vector<2x648xf32>
    %420 = tpu.matmul %419, %418, %cst_164 {dimension_numbers = #tpu.dot_dimension_numbers<[1], [0], [0], [1], [0, 0, 1, 1], [], []>} : vector<2x8xf32>, vector<8x648xf32>, vector<2x648xf32> -> vector<2x648xf32>
    %c0_165 = arith.constant 0 : index
    %c0_166 = arith.constant 0 : index
    %421 = vector.load %arg56[%c0_165, %c0_166] : memref<2x1xf32, #tpu.memory_space<vmem>>, vector<2x1xf32>
    %422 = vector.broadcast %421 : vector<2x1xf32> to vector<2x648xf32>
    %423 = arith.addf %420, %422 : vector<2x648xf32>
    %c0_167 = arith.constant 0 : index
    %c0_168 = arith.constant 0 : index
    %424 = vector.load %arg57[%c0_167, %c0_168] : memref<2x648xf32, #tpu.memory_space<vmem>>, vector<2x648xf32>
    tpu.vector_store %arg57[%c0_167, %c0_168], %423 {strides = array<i32>} : memref<2x648xf32, #tpu.memory_space<vmem>>, vector<2x648xf32>,
    return
  }
  func.func @transform_0(%arg0: i32) -> (i32, i32) {
    %c0_i32 = arith.constant 0 : i32
    %c0_i32_0 = arith.constant 0 : i32
    %c0_i32_1 = arith.constant 0 : i32
    return %c0_i32, %c0_i32_0 : i32, i32
  }
  func.func @transform_1(%arg0: i32) -> (i32, i32) {
    %c0_i32 = arith.constant 0 : i32
    %c0_i32_0 = arith.constant 0 : i32
    %c0_i32_1 = arith.constant 0 : i32
    return %c0_i32, %c0_i32_0 : i32, i32
  }
  func.func @transform_2(%arg0: i32) -> (i32, i32) {
    %c0_i32 = arith.constant 0 : i32
    %c0_i32_0 = arith.constant 0 : i32
    %c0_i32_1 = arith.constant 0 : i32
    return %c0_i32, %c0_i32_0 : i32, i32
  }
  func.func @transform_3(%arg0: i32) -> (i32, i32) {
    %c0_i32 = arith.constant 0 : i32
    %c0_i32_0 = arith.constant 0 : i32
    %c0_i32_1 = arith.constant 0 : i32
    return %c0_i32, %c0_i32_0 : i32, i32
  }
  func.func @transform_4(%arg0: i32) -> (i32, i32) {
    %c0_i32 = arith.constant 0 : i32
    %c0_i32_0 = arith.constant 0 : i32
    %c0_i32_1 = arith.constant 0 : i32
    return %c0_i32, %c0_i32_0 : i32, i32
  }
  func.func @transform_5(%arg0: i32) -> (i32, i32) {
    %c0_i32 = arith.constant 0 : i32
    %c0_i32_0 = arith.constant 0 : i32
    %c0_i32_1 = arith.constant 0 : i32
    return %c0_i32, %c0_i32_0 : i32, i32
  }
  func.func @transform_6(%arg0: i32) -> (i32, i32) {
    %c0_i32 = arith.constant 0 : i32
    %c0_i32_0 = arith.constant 0 : i32
    %c0_i32_1 = arith.constant 0 : i32
    return %c0_i32, %c0_i32_0 : i32, i32
  }
  func.func @transform_7(%arg0: i32) -> (i32, i32) {
    %c0_i32 = arith.constant 0 : i32
    %c0_i32_0 = arith.constant 0 : i32
    %c0_i32_1 = arith.constant 0 : i32
    return %c0_i32, %c0_i32_0 : i32, i32
  }
  func.func @transform_8(%arg0: i32) -> (i32, i32) {
    %c0_i32 = arith.constant 0 : i32
    %c0_i32_0 = arith.constant 0 : i32
    %c0_i32_1 = arith.constant 0 : i32
    return %c0_i32, %c0_i32_0 : i32, i32
  }
  func.func @transform_9(%arg0: i32) -> (i32, i32) {
    %c0_i32 = arith.constant 0 : i32
    %c0_i32_0 = arith.constant 0 : i32
    %c0_i32_1 = arith.constant 0 : i32
    return %c0_i32, %c0_i32_0 : i32, i32
  }
  func.func @transform_10(%arg0: i32) -> (i32, i32) {
    %c0_i32 = arith.constant 0 : i32
    %c0_i32_0 = arith.constant 0 : i32
    %c0_i32_1 = arith.constant 0 : i32
    return %c0_i32, %c0_i32_0 : i32, i32
  }
  func.func @transform_11(%arg0: i32) -> (i32, i32) {
    %c0_i32 = arith.constant 0 : i32
    %c0_i32_0 = arith.constant 0 : i32
    %c0_i32_1 = arith.constant 0 : i32
    return %c0_i32, %c0_i32_0 : i32, i32
  }
  func.func @transform_12(%arg0: i32) -> (i32, i32) {
    %c0_i32 = arith.constant 0 : i32
    %c0_i32_0 = arith.constant 0 : i32
    %c0_i32_1 = arith.constant 0 : i32
    return %c0_i32, %c0_i32_0 : i32, i32
  }
  func.func @transform_13(%arg0: i32) -> (i32, i32) {
    %c0_i32 = arith.constant 0 : i32
    %c0_i32_0 = arith.constant 0 : i32
    %c0_i32_1 = arith.constant 0 : i32
    return %c0_i32, %c0_i32_0 : i32, i32
  }
  func.func @transform_14(%arg0: i32) -> (i32, i32) {
    %c0_i32 = arith.constant 0 : i32
    %c0_i32_0 = arith.constant 0 : i32
    %c0_i32_1 = arith.constant 0 : i32
    return %c0_i32, %c0_i32_0 : i32, i32
  }
  func.func @transform_15(%arg0: i32) -> (i32, i32) {
    %c0_i32 = arith.constant 0 : i32
    %c0_i32_0 = arith.constant 0 : i32
    %c0_i32_1 = arith.constant 0 : i32
    return %c0_i32, %c0_i32_0 : i32, i32
  }
  func.func @transform_16(%arg0: i32) -> (i32, i32) {
    %c0_i32 = arith.constant 0 : i32
    %c0_i32_0 = arith.constant 0 : i32
    %c0_i32_1 = arith.constant 0 : i32
    return %c0_i32, %c0_i32_0 : i32, i32
  }
  func.func @transform_17(%arg0: i32) -> (i32, i32) {
    %c0_i32 = arith.constant 0 : i32
    %c0_i32_0 = arith.constant 0 : i32
    %c0_i32_1 = arith.constant 0 : i32
    return %c0_i32, %c0_i32_0 : i32, i32
  }
  func.func @transform_18(%arg0: i32) -> (i32, i32) {
    %c0_i32 = arith.constant 0 : i32
    %c0_i32_0 = arith.constant 0 : i32
    %c0_i32_1 = arith.constant 0 : i32
    return %c0_i32, %c0_i32_0 : i32, i32
  }
  func.func @transform_19(%arg0: i32) -> (i32, i32) {
    %c0_i32 = arith.constant 0 : i32
    %c0_i32_0 = arith.constant 0 : i32
    %c0_i32_1 = arith.constant 0 : i32
    return %c0_i32, %c0_i32_0 : i32, i32
  }
  func.func @transform_20(%arg0: i32) -> (i32, i32) {
    %c0_i32 = arith.constant 0 : i32
    %c0_i32_0 = arith.constant 0 : i32
    %c0_i32_1 = arith.constant 0 : i32
    return %c0_i32, %c0_i32_0 : i32, i32
  }
  func.func @transform_21(%arg0: i32) -> (i32, i32) {
    %c0_i32 = arith.constant 0 : i32
    %c0_i32_0 = arith.constant 0 : i32
    %c0_i32_1 = arith.constant 0 : i32
    return %c0_i32, %c0_i32_0 : i32, i32
  }
  func.func @transform_22(%arg0: i32) -> (i32, i32) {
    %c0_i32 = arith.constant 0 : i32
    %c0_i32_0 = arith.constant 0 : i32
    %c0_i32_1 = arith.constant 0 : i32
    return %c0_i32, %c0_i32_0 : i32, i32
  }
  func.func @transform_23(%arg0: i32) -> (i32, i32) {
    %c0_i32 = arith.constant 0 : i32
    %c0_i32_0 = arith.constant 0 : i32
    %c0_i32_1 = arith.constant 0 : i32
    return %c0_i32, %c0_i32_0 : i32, i32
  }
  func.func @transform_24(%arg0: i32) -> (i32, i32) {
    %c0_i32 = arith.constant 0 : i32
    %c0_i32_0 = arith.constant 0 : i32
    %c0_i32_1 = arith.constant 0 : i32
    return %c0_i32, %c0_i32_0 : i32, i32
  }
  func.func @transform_25(%arg0: i32) -> (i32, i32) {
    %c0_i32 = arith.constant 0 : i32
    %c0_i32_0 = arith.constant 0 : i32
    %c0_i32_1 = arith.constant 0 : i32
    return %c0_i32, %c0_i32_0 : i32, i32
  }
  func.func @transform_26(%arg0: i32) -> (i32, i32) {
    %c0_i32 = arith.constant 0 : i32
    %c0_i32_0 = arith.constant 0 : i32
    %c0_i32_1 = arith.constant 0 : i32
    return %c0_i32, %c0_i32_0 : i32, i32
  }
  func.func @transform_27(%arg0: i32) -> (i32, i32) {
    %c0_i32 = arith.constant 0 : i32
    %c0_i32_0 = arith.constant 0 : i32
    %c0_i32_1 = arith.constant 0 : i32
    return %c0_i32, %c0_i32_0 : i32, i32
  }
  func.func @transform_28(%arg0: i32) -> (i32, i32) {
    %c0_i32 = arith.constant 0 : i32
    %c0_i32_0 = arith.constant 0 : i32
    %c0_i32_1 = arith.constant 0 : i32
    return %c0_i32, %c0_i32_0 : i32, i32
  }
  func.func @transform_29(%arg0: i32) -> (i32, i32) {
    %c0_i32 = arith.constant 0 : i32
    %c0_i32_0 = arith.constant 0 : i32
    %c0_i32_1 = arith.constant 0 : i32
    return %c0_i32, %c0_i32_0 : i32, i32
  }
  func.func @transform_30(%arg0: i32) -> (i32, i32) {
    %c0_i32 = arith.constant 0 : i32
    %c0_i32_0 = arith.constant 0 : i32
    %c0_i32_1 = arith.constant 0 : i32
    return %c0_i32, %c0_i32_0 : i32, i32
  }
  func.func @transform_31(%arg0: i32) -> (i32, i32) {
    %c0_i32 = arith.constant 0 : i32
    %c0_i32_0 = arith.constant 0 : i32
    %c0_i32_1 = arith.constant 0 : i32
    return %c0_i32, %c0_i32_0 : i32, i32
  }
  func.func @transform_32(%arg0: i32) -> (i32, i32) {
    %c0_i32 = arith.constant 0 : i32
    %c0_i32_0 = arith.constant 0 : i32
    %c0_i32_1 = arith.constant 0 : i32
    return %c0_i32, %c0_i32_0 : i32, i32
  }
  func.func @transform_33(%arg0: i32) -> (i32, i32) {
    %c0_i32 = arith.constant 0 : i32
    %c0_i32_0 = arith.constant 0 : i32
    %c0_i32_1 = arith.constant 0 : i32
    return %c0_i32, %c0_i32_0 : i32, i32
  }
  func.func @transform_34(%arg0: i32) -> (i32, i32) {
    %c0_i32 = arith.constant 0 : i32
    %c0_i32_0 = arith.constant 0 : i32
    %c0_i32_1 = arith.constant 0 : i32
    return %c0_i32, %c0_i32_0 : i32, i32
  }
  func.func @transform_35(%arg0: i32) -> (i32, i32) {
    %c0_i32 = arith.constant 0 : i32
    %c0_i32_0 = arith.constant 0 : i32
    %c0_i32_1 = arith.constant 0 : i32
    return %c0_i32, %c0_i32_0 : i32, i32
  }
  func.func @transform_36(%arg0: i32) -> (i32, i32) {
    %c0_i32 = arith.constant 0 : i32
    %c0_i32_0 = arith.constant 0 : i32
    %c0_i32_1 = arith.constant 0 : i32
    return %c0_i32, %c0_i32_0 : i32, i32
  }
  func.func @transform_37(%arg0: i32) -> (i32, i32) {
    %c0_i32 = arith.constant 0 : i32
    %c0_i32_0 = arith.constant 0 : i32
    %c0_i32_1 = arith.constant 0 : i32
    return %c0_i32, %c0_i32_0 : i32, i32
  }
  func.func @transform_38(%arg0: i32) -> (i32, i32) {
    %c0_i32 = arith.constant 0 : i32
    %c0_i32_0 = arith.constant 0 : i32
    %c0_i32_1 = arith.constant 0 : i32
    return %c0_i32, %c0_i32_0 : i32, i32
  }
  func.func @transform_39(%arg0: i32) -> (i32, i32) {
    %c0_i32 = arith.constant 0 : i32
    %c0_i32_0 = arith.constant 0 : i32
    %c0_i32_1 = arith.constant 0 : i32
    return %c0_i32, %c0_i32_0 : i32, i32
  }
  func.func @transform_40(%arg0: i32) -> (i32, i32) {
    %c0_i32 = arith.constant 0 : i32
    %c0_i32_0 = arith.constant 0 : i32
    %c0_i32_1 = arith.constant 0 : i32
    return %c0_i32, %c0_i32_0 : i32, i32
  }
  func.func @transform_41(%arg0: i32) -> (i32, i32) {
    %c0_i32 = arith.constant 0 : i32
    %c0_i32_0 = arith.constant 0 : i32
    %c0_i32_1 = arith.constant 0 : i32
    return %c0_i32, %c0_i32_0 : i32, i32
  }
  func.func @transform_42(%arg0: i32) -> (i32, i32) {
    %c0_i32 = arith.constant 0 : i32
    %c0_i32_0 = arith.constant 0 : i32
    %c0_i32_1 = arith.constant 0 : i32
    return %c0_i32, %c0_i32_0 : i32, i32
  }
  func.func @transform_43(%arg0: i32) -> (i32, i32) {
    %c0_i32 = arith.constant 0 : i32
    %c0_i32_0 = arith.constant 0 : i32
    %c0_i32_1 = arith.constant 0 : i32
    return %c0_i32, %c0_i32_0 : i32, i32
  }
  func.func @transform_44(%arg0: i32) -> (i32, i32) {
    %c0_i32 = arith.constant 0 : i32
    %c0_i32_0 = arith.constant 0 : i32
    %c0_i32_1 = arith.constant 0 : i32
    return %c0_i32, %c0_i32_0 : i32, i32
  }
  func.func @transform_45(%arg0: i32) -> (i32, i32) {
    %c0_i32 = arith.constant 0 : i32
    %c0_i32_0 = arith.constant 0 : i32
    %c0_i32_1 = arith.constant 0 : i32
    return %c0_i32, %c0_i32_0 : i32, i32
  }
  func.func @transform_46(%arg0: i32) -> (i32, i32) {
    %c0_i32 = arith.constant 0 : i32
    %c0_i32_0 = arith.constant 0 : i32
    %c0_i32_1 = arith.constant 0 : i32
    return %c0_i32, %c0_i32_0 : i32, i32
  }
  func.func @transform_47(%arg0: i32) -> (i32, i32) {
    %c0_i32 = arith.constant 0 : i32
    %c0_i32_0 = arith.constant 0 : i32
    %c0_i32_1 = arith.constant 0 : i32
    return %c0_i32, %c0_i32_0 : i32, i32
  }
  func.func @transform_48(%arg0: i32) -> (i32, i32) {
    %c0_i32 = arith.constant 0 : i32
    %c0_i32_0 = arith.constant 0 : i32
    %c0_i32_1 = arith.constant 0 : i32
    return %c0_i32, %c0_i32_0 : i32, i32
  }
  func.func @transform_49(%arg0: i32) -> (i32, i32) {
    %c0_i32 = arith.constant 0 : i32
    %c0_i32_0 = arith.constant 0 : i32
    %c0_i32_1 = arith.constant 0 : i32
    return %c0_i32, %c0_i32_0 : i32, i32
  }
  func.func @transform_50(%arg0: i32) -> (i32, i32) {
    %c0_i32 = arith.constant 0 : i32
    %c0_i32_0 = arith.constant 0 : i32
    %c0_i32_1 = arith.constant 0 : i32
    return %c0_i32, %c0_i32_0 : i32, i32
  }
  func.func @transform_51(%arg0: i32) -> (i32, i32) {
    %c0_i32 = arith.constant 0 : i32
    %c0_i32_0 = arith.constant 0 : i32
    %c0_i32_1 = arith.constant 0 : i32
    return %c0_i32, %c0_i32_0 : i32, i32
  }
  func.func @transform_52(%arg0: i32) -> (i32, i32) {
    %c0_i32 = arith.constant 0 : i32
    %c0_i32_0 = arith.constant 0 : i32
    %c0_i32_1 = arith.constant 0 : i32
    return %c0_i32, %c0_i32_0 : i32, i32
  }
  func.func @transform_53(%arg0: i32) -> (i32, i32) {
    %c0_i32 = arith.constant 0 : i32
    %c0_i32_0 = arith.constant 0 : i32
    %c0_i32_1 = arith.constant 0 : i32
    return %c0_i32, %c0_i32_0 : i32, i32
  }
  func.func @transform_54(%arg0: i32) -> (i32, i32) {
    %c0_i32 = arith.constant 0 : i32
    %c0_i32_0 = arith.constant 0 : i32
    %c0_i32_1 = arith.constant 0 : i32
    return %c0_i32, %c0_i32_0 : i32, i32
  }
  func.func @transform_55(%arg0: i32) -> (i32, i32) {
    %c0_i32 = arith.constant 0 : i32
    %c0_i32_0 = arith.constant 0 : i32
    %c0_i32_1 = arith.constant 0 : i32
    return %c0_i32, %c0_i32_0 : i32, i32
  }
  func.func @transform_56(%arg0: i32) -> (i32, i32) {
    %c0_i32 = arith.constant 0 : i32
    %c0_i32_0 = arith.constant 0 : i32
    %c0_i32_1 = arith.constant 0 : i32
    return %c0_i32, %c0_i32_0 : i32, i32
  }
}

</mosaic_0001>

<bundles_post_ra>
// kernel: unet_forward.1
= control target key start
LH: loop header
LB: loop body
LE: loop exit
PB: predicated region body
PF: predicated region fallthrough
CT: control target
= control target key end

     0   :  { %s14925_s6 = smov 1   ;;  %s14926_s10 = smov 2   ;;  %s17796_s0 = inlined_call_operand.smem [shape: u32[57], index: -1, kind: input, shape index: {}] }
   0x1   :  { %s15063_s5 = sld [smem:[%s17796_s0]]   ;;  %s14927_s14 = smov 3  }
   0x2   :  { %s15068_s9 = sld [smem:[%s17796_s0 + %s14925_s6]]   ;;  %s14928_s18 = smov 4  }
   0x3   :  { %s15073_s13 = sld [smem:[%s17796_s0 + %s14926_s10]]   ;;  %s14929_s22 = smov 5  }
   0x4   :  { %s15078_s17 = sld [smem:[%s17796_s0 + %s14927_s14]]   ;;  %s14930_s26 = smov 6  }
   0x5   :  { %s15083_s21 = sld [smem:[%s17796_s0 + %s14928_s18]]   ;;  %s14931_s30 = smov 7  }
   0x6   :  { %s15088_s25 = sld [smem:[%s17796_s0 + %s14929_s22]]   ;;  %s14932_s4 = smov 8  }
   0x7   :  { %17841 = sst [smem:[#allocation68_spill]] %s15063_s5  ;;  %s14933_s10 = smov 9  }
   0x8   :  { %17842 = sst [smem:[#allocation69_spill]] %s15068_s9  ;;  %s14934_s15 = smov 10  }
   0x9   :  { %17843 = sst [smem:[#allocation70_spill]] %s15073_s13  ;;  %s14935_s20 = smov 11  }
   0xa   :  { %s15093_s29 = sld [smem:[%s17796_s0 + %s14930_s26]]   ;;  %s14936_s26 = smov 12  }
   0xb   :  { %17844 = sst [smem:[#allocation71_spill]] %s15083_s21  ;;  %s14937_s1 = smov 13  }
   0xc   :  { %17845 = sst [smem:[#allocation72_spill]] %s15088_s25  ;;  %s14938_s7 = smov 14  }
   0xd   :  { %s15098_s3 = sld [smem:[%s17796_s0 + %s14931_s30]]   ;;  %s14940_s22 = smov 16  }
   0xe   :  { %s15103_s8 = sld [smem:[%s17796_s0 + %s14932_s4]]   ;;  %s14941_s28 = smov 17  }
   0xf   :  { %s15108_s14 = sld [smem:[%s17796_s0 + %s14933_s10]]  }
  0x10   :  { %17846 = sst [smem:[#allocation73_spill]] %s15093_s29 }
  0x11   :  { %s15113_s19 = sld [smem:[%s17796_s0 + %s14934_s15]]   ;;  %s14939_s15 = smov 15  }
  0x12   :  { %s15118_s24 = sld [smem:[%s17796_s0 + %s14935_s20]]  }
  0x13   :  { %s15123_s30 = sld [smem:[%s17796_s0 + %s14936_s26]]  }
  0x14   :  { %17847 = sst [smem:[#allocation74_spill]] %s15103_s8 }
  0x15   :  { %17848 = sst [smem:[#allocation75_spill]] %s15108_s14 }
  0x16   :  { %s15128_s6 = sld [smem:[%s17796_s0 + %s14937_s1]]  }
  0x17   :  { %17849 = sst [smem:[#allocation76_spill]] %s15113_s19 }
  0x18   :  { %s15133_s12 = sld [smem:[%s17796_s0 + %s14938_s7]]   ;;  %s14942_s7 = smov 18  }
  0x19   :  { %17850 = sst [smem:[#allocation77_spill]] %s15123_s30 }
  0x1a   :  { %s15138_s20 = sld [smem:[%s17796_s0 + %s14939_s15]]   ;;  %s14943_s15 = smov 19  }
  0x1b   :  { %s15143_s27 = sld [smem:[%s17796_s0 + %s14940_s22]]   ;;  %s14944_s22 = smov 20  }
  0x1c   :  { %17851 = sst [smem:[#allocation78_spill]] %s15128_s6 }
  0x1d   :  { %s15148_s4 = sld [smem:[%s17796_s0 + %s14941_s28]]   ;;  %s14945_s28 = smov 21  }
  0x1e   :  { %17852 = sst [smem:[#allocation79_spill]] %s15133_s12 }
  0x1f   :  { %s15153_s12 = sld [smem:[%s17796_s0 + %s14942_s7]]   ;;  %s14946_s7 = smov 22  }
  0x20   :  { %s15158_s30 = sld [smem:[%s17796_s0 + %s14943_s15]]   ;;  %s14947_s15 = smov 23  }
  0x21   :  { %17853 = sst [smem:[#allocation80_spill]] %s15143_s27 }
  0x22   :  { %s15163_s27 = sld [smem:[%s17796_s0 + %s14944_s22]]   ;;  %s14948_s22 = smov 24  }
  0x23   :  { %17854 = sst [smem:[#allocation81_spill]] %s15148_s4 }
  0x24   :  { %s15168_s19 = sld [smem:[%s17796_s0 + %s14945_s28]]   ;;  %s14949_s28 = smov 25  }
  0x25   :  { %17855 = sst [smem:[#allocation82_spill]] %s15153_s12 }
  0x26   :  { %s15173_s12 = sld [smem:[%s17796_s0 + %s14946_s7]]   ;;  %s14950_s7 = smov 26  }
  0x27   :  { %s15178_s8 = sld [smem:[%s17796_s0 + %s14947_s15]]   ;;  %s14951_s15 = smov 27  }
  0x28   :  { %17856 = sst [smem:[#allocation83_spill]] %s15163_s27 }
  0x29   :  { %s15183_s27 = sld [smem:[%s17796_s0 + %s14948_s22]]   ;;  %s14952_s22 = smov 28  }
  0x2a   :  { %17857 = sst [smem:[#allocation84_spill]] %s15168_s19 }
  0x2b   :  { %s15188_s29 = sld [smem:[%s17796_s0 + %s14949_s28]]   ;;  %s14953_s28 = smov 29  }
  0x2c   :  { %17858 = sst [smem:[#allocation85_spill]] %s15173_s12 }
  0x2d   :  { %s15193_s12 = sld [smem:[%s17796_s0 + %s14950_s7]]   ;;  %s14954_s7 = smov 30  }
  0x2e   :  { %s15198_s21 = sld [smem:[%s17796_s0 + %s14951_s15]]   ;;  %s14955_s15 = smov 31  }
  0x2f   :  { %17859 = sst [smem:[#allocation86_spill]] %s15183_s27 }
  0x30   :  { %s15203_s27 = sld [smem:[%s17796_s0 + %s14952_s22]]   ;;  %s14956_s22 = smov 32  }
  0x31   :  { %17860 = sst [smem:[#allocation87_spill]] %s15188_s29 }
  0x32   :  { %s15208_s13 = sld [smem:[%s17796_s0 + %s14953_s28]]   ;;  %s14957_s28 = smov 33  }
  0x33   :  { %17861 = sst [smem:[#allocation88_spill]] %s15193_s12 }
  0x34   :  { %s15213_s12 = sld [smem:[%s17796_s0 + %s14954_s7]]   ;;  %s14958_s7 = smov 34  }
  0x35   :  { %s15218_s5 = sld [smem:[%s17796_s0 + %s14955_s15]]   ;;  %s14959_s15 = smov 35  }
  0x36   :  { %17862 = sst [smem:[#allocation89_spill]] %s15203_s27 }
  0x37   :  { %s15223_s27 = sld [smem:[%s17796_s0 + %s14956_s22]]   ;;  %s14960_s22 = smov 36  }
  0x38   :  { %17863 = sst [smem:[#allocation90_spill]] %s15208_s13 }
  0x39   :  { %s15228_s13 = sld [smem:[%s17796_s0 + %s14957_s28]]   ;;  %s14961_s28 = smov 37  }
  0x3a   :  { %17864 = sst [smem:[#allocation91_spill]] %s15213_s12 }
  0x3b   :  { %s15233_s12 = sld [smem:[%s17796_s0 + %s14958_s7]]   ;;  %s14962_s7 = smov 38  }
  0x3c   :  { %s15238_s29 = sld [smem:[%s17796_s0 + %s14959_s15]]   ;;  %s14963_s15 = smov 39  }
  0x3d   :  { %17865 = sst [smem:[#allocation92_spill]] %s15223_s27 }
  0x3e   :  { %s15243_s27 = sld [smem:[%s17796_s0 + %s14960_s22]]   ;;  %s14964_s22 = smov 40  }
  0x3f   :  { %17866 = sst [smem:[#allocation93_spill]] %s15228_s13 }
  0x40   :  { %s15248_s13 = sld [smem:[%s17796_s0 + %s14961_s28]]   ;;  %s14965_s28 = smov 41  }
  0x41   :  { %17867 = sst [smem:[#allocation94_spill]] %s15233_s12 }
  0x42   :  { %s15253_s12 = sld [smem:[%s17796_s0 + %s14962_s7]]   ;;  %s14966_s7 = smov 42  }
  0x43   :  { %s15258_s19 = sld [smem:[%s17796_s0 + %s14963_s15]]   ;;  %s14967_s15 = smov 43  }
  0x44   :  { %17868 = sst [smem:[#allocation95_spill]] %s15243_s27 }
  0x45   :  { %s15263_s27 = sld [smem:[%s17796_s0 + %s14964_s22]]   ;;  %s14968_s22 = smov 44  }
  0x46   :  { %17869 = sst [smem:[#allocation96_spill]] %s15248_s13 }
  0x47   :  { %s15268_s13 = sld [smem:[%s17796_s0 + %s14965_s28]]   ;;  %s14969_s28 = smov 45  }
  0x48   :  { %s15273_s4 = sld [smem:[%s17796_s0 + %s14966_s7]]   ;;  %s14970_s7 = smov 46  }
  0x49   :  { %17870 = sst [smem:[#allocation97_spill]] %s15258_s19 }
  0x4a   :  { %s15278_s19 = sld [smem:[%s17796_s0 + %s14967_s15]]   ;;  %s14971_s15 = smov 47  }
  0x4b   :  { %s15283_s6 = sld [smem:[%s17796_s0 + %s14968_s22]]   ;;  %s14972_s22 = smov 48  }
  0x4c   :  { %s15293_s14 = sld [smem:[%s17796_s0 + %s14970_s7]]   ;;  %s14974_s7 = smov 50  }
  0x4d   :  { %17871 = sst [smem:[#allocation98_spill]] %s15268_s13 }
  0x4e   :  { %s15288_s13 = sld [smem:[%s17796_s0 + %s14969_s28]]   ;;  %s14973_s28 = smov 49  }
  0x4f   :  { %s15308_s25 = sld [smem:[%s17796_s0 + %s14973_s28]]   ;;  %s14977_s28 = smov 53  }
  0x50   :  { %17872 = sst [smem:[#allocation99_spill]] %s15278_s19 }
  0x51   :  { %17873 = sst [smem:[#allocation100_spill]] %s15283_s6 }
  0x52   :  { %17874 = sst [smem:[#allocation101_spill]] %s15293_s14 }
  0x53   :  { %s15298_s19 = sld [smem:[%s17796_s0 + %s14971_s15]]   ;;  %s14975_s15 = smov 51  }
  0x54   :  { %s15303_s6 = sld [smem:[%s17796_s0 + %s14972_s22]]   ;;  %s14976_s22 = smov 52  }
  0x55   :  { %17876 = sst [smem:[#allocation103_spill]] %s15308_s25 }
  0x56   :  { %s15313_s14 = sld [smem:[%s17796_s0 + %s14974_s7]]   ;;  %s14978_s7 = smov 54  }
  0x57   :  { %s15318_s9 = sld [smem:[%s17796_s0 + %s14975_s15]]   ;;  %s14979_s15 = smov 55  }
  0x58   :  { %s15328_s25 = sld [smem:[%s17796_s0 + %s14977_s28]]  }
  0x5a   :  { %17875 = sst [smem:[#allocation102_spill]] %s15303_s6 }
  0x5b   :  { %s15323_s6 = sld [smem:[%s17796_s0 + %s14976_s22]]   ;;  %s14980_s22 = smov 56  }
  0x5c   :  { %17877 = sst [smem:[#allocation104_spill]] %s15313_s14 }
  0x5d   :  { %17878 = sst [smem:[#allocation105_spill]] %s15318_s9 }
  0x5e   :  { %s15333_s14 = sld [smem:[%s17796_s0 + %s14978_s7]]  }
  0x5f   :  { %s15338_s9 = sld [smem:[%s17796_s0 + %s14979_s15]]  }
  0x61   :  { %17879 = sst [smem:[#allocation106_spill]] %s15323_s6 }
  0x62   :  { %s15343_s6 = sld [smem:[%s17796_s0 + %s14980_s22]]  }
  0x63   :  { %118 = vsyncpa [#allocation3], 0 }
  0x64   :  { %119 = vsyncpa [#allocation5], 0 }
  0x65   :  { %120 = vsyncpa [#allocation8], 0 }
  0x66   :  { %121 = vsyncpa [#allocation11], 0 }
  0x67   :  { %122 = vsyncpa [#allocation14], 0 }
  0x68   :  { %123 = vsyncpa [#allocation17], 0 }
  0x69   :  { %124 = vsyncpa [#allocation20], 0 }
  0x6a   :  { %125 = vsyncpa [#allocation23], 0 }
  0x6b   :  { %126 = vsyncpa [#allocation26], 0 }
  0x6c   :  { %127 = vsyncpa [#allocation29], 0 }
  0x6d   :  { %128 = vsyncpa [#allocation32], 0 }
  0x6e   :  { %129 = vsyncpa [#allocation35], 0 }
  0x6f   :  { %130 = vsyncpa [#allocation38], 0 }
  0x70   :  { %131 = vsyncpa [#allocation41], 0 }
  0x71   :  { %132 = vsyncpa [#allocation44], 0 }
  0x72   :  { %133 = vsyncpa [#allocation47], 0 }
  0x73   :  { %134 = vsyncpa [#allocation50], 0  ;;  %s14981_s0 = smov [#allocation4]   ;;  %s14982_s1 = smov [#allocation7]  }
  0x74   :  { %s155_s28 = sshll.u32 %s14981_s0, 4  ;;  %s180_s2 = sshll.u32 %s14982_s1, 4  ;;  %s156_s28 = int_to_ptr.vmem [resolvable:$true] %s155_s28  ;;  %s15345_s2 = int_to_ptr.vmem [resolvable:$true] %s180_s2 }
  0x75   :  { %s14187_s7 = scalar_lea.hbm %s15078_s17, 64 }
  0x76   :  { %p14188_p0 = scmp.ne.s32.totalorder %s15078_s17, %s14187_s7  ;;  %p14191_p1 = scmp.lt.u32.totalorder %s14187_s7, %s15078_s17 }
  0x78   :  { %p14193_p2 = pnand %p14191_p1, %p14188_p0 }
  0x7a   :  { %14196 = shalt.err (!%p14193_p2)
}
  0x7b   :  { %s14197_s10 = scalar_lea.vmem %s156_s28, 64  ;;  %p14202_p4 = scmp.lt.s32.totalorder %s156_s28, %s156_s28 }
  0x7c   :  { %p14198_p3 = scmp.ne.s32.totalorder %s156_s28, %s14197_s10  ;;  %p14203_p5 = scmp.lt.s32.totalorder %s14197_s10, %s14197_s10 }
  0x7e   :  { %p14204_p6 = por %p14203_p5, %p14202_p4 }
  0x80   :  { %p14205_p7 = pnand %p14204_p6, %p14198_p3 }
  0x82   :  { %14208 = shalt.err (!%p14205_p7)
}
  0x83   :  { %158 = dma.hbm_to_vmem [thread:$0]  %s15078_s17, 64, %s156_s28, [#allocation5]  }
  0x84   :  { %s14209_s11 = scalar_lea.hbm %s15098_s3, 256 }
  0x85   :  { %p14210_p8 = scmp.ne.s32.totalorder %s15098_s3, %s14209_s11  ;;  %p14213_p9 = scmp.lt.u32.totalorder %s14209_s11, %s15098_s3 }
  0x87   :  { %p14215_p10 = pnand %p14213_p9, %p14210_p8 }
  0x89   :  { %14218 = shalt.err (!%p14215_p10)
}
  0x8a   :  { %s14219_s15 = scalar_lea.vmem %s15345_s2, 256  ;;  %p14224_p12 = scmp.lt.s32.totalorder %s15345_s2, %s15345_s2 }
  0x8b   :  { %p14220_p11 = scmp.ne.s32.totalorder %s15345_s2, %s14219_s15  ;;  %p14225_p13 = scmp.lt.s32.totalorder %s14219_s15, %s14219_s15 }
  0x8d   :  { %p14226_p0 = por %p14225_p13, %p14224_p12 }
  0x8f   :  { %p14227_p1 = pnand %p14226_p0, %p14220_p11 }
  0x91   :  { %14230 = shalt.err (!%p14227_p1)
}
  0x92   :  { %s14983_s16 = smov 128   ;;  %s14984_s17 = smov 8  }
  0x93   :  { %186 = dma.hbm_to_vmem [thread:$0]  %s15098_s3, 256, %s15345_s2, [#allocation8], %s14983_s16, %s14983_s16, %s14984_s17  }
  0x94   :  { %s14985_s18 = smov [#allocation10]   ;;  %s14231_s23 = scalar_lea.hbm %s15118_s24, 768 }
  0x95   :  { %s208_s22 = sshll.u32 %s14985_s18, 4  ;;  %p14232_p2 = scmp.ne.s32.totalorder %s15118_s24, %s14231_s23  ;;  %s209_s22 = int_to_ptr.vmem [resolvable:$true] %s208_s22 }
  0x96   :  { %p14235_p3 = scmp.lt.u32.totalorder %s14231_s23, %s15118_s24 }
  0x98   :  { %p14237_p4 = pnand %p14235_p3, %p14232_p2 }
  0x9a   :  { %14240 = shalt.err (!%p14237_p4)
}
  0x9b   :  { %s14241_s26 = scalar_lea.vmem %s209_s22, 768  ;;  %p14246_p6 = scmp.lt.s32.totalorder %s209_s22, %s209_s22 }
  0x9c   :  { %p14242_p5 = scmp.ne.s32.totalorder %s209_s22, %s14241_s26  ;;  %p14247_p7 = scmp.lt.s32.totalorder %s14241_s26, %s14241_s26 }
  0x9e   :  { %p14248_p8 = por %p14247_p7, %p14246_p6 }
  0xa0   :  { %p14249_p9 = pnand %p14248_p8, %p14242_p5 }
  0xa2   :  { %14252 = shalt.err (!%p14249_p9)
}
  0xa3   :  { %s14986_s0 = smov 192   ;;  %s14987_s3 = smov 12  }
  0xa4   :  { %214 = dma.hbm_to_vmem [thread:$0]  %s15118_s24, 768, %s209_s22, [#allocation11], %s14986_s0, %s14986_s0, %s14987_s3  }
  0xa5   :  { %s14988_s28 = smov [#allocation13]   ;;  %s14253_s2 = scalar_lea.hbm %s15138_s20, 2560 }
  0xa6   :  { %s236_s1 = sshll.u32 %s14988_s28, 4  ;;  %p14254_p10 = scmp.ne.s32.totalorder %s15138_s20, %s14253_s2  ;;  %s237_s1 = int_to_ptr.vmem [resolvable:$true] %s236_s1 }
  0xa7   :  { %p14257_p11 = scmp.lt.u32.totalorder %s14253_s2, %s15138_s20 }
  0xa9   :  { %p14259_p12 = pnand %p14257_p11, %p14254_p10 }
  0xab   :  { %14262 = shalt.err (!%p14259_p12)
}
  0xac   :  { %s14263_s7 = scalar_lea.vmem %s237_s1, 2560  ;;  %p14268_p0 = scmp.lt.s32.totalorder %s237_s1, %s237_s1 }
  0xad   :  { %p14264_p13 = scmp.ne.s32.totalorder %s237_s1, %s14263_s7  ;;  %p14269_p1 = scmp.lt.s32.totalorder %s14263_s7, %s14263_s7 }
  0xaf   :  { %p14270_p2 = por %p14269_p1, %p14268_p0 }
  0xb1   :  { %p14271_p3 = pnand %p14270_p2, %p14264_p13 }
  0xb3   :  { %14274 = shalt.err (!%p14271_p3)
}
  0xb4   :  { %s14989_s10 = smov 320   ;;  %s14990_s24 = smov 20  }
  0xb5   :  { %242 = dma.hbm_to_vmem [thread:$0]  %s15138_s20, 2560, %s237_s1, [#allocation14], %s14989_s10, %s14989_s10, %s14990_s24  }
  0xb6   :  { %s14991_s11 = smov [#allocation16]   ;;  %s14992_s18 = smov [#allocation19]  }
  0xb7   :  { %s264_s15 = sshll.u32 %s14991_s11, 4  ;;  %s292_s22 = sshll.u32 %s14992_s18, 4  ;;  %s265_s15 = int_to_ptr.vmem [resolvable:$true] %s264_s15  ;;  %s15377_s22 = int_to_ptr.vmem [resolvable:$true] %s292_s22 }
  0xb8   :  { %s14275_s23 = scalar_lea.hbm %s15158_s30, 2560 }
  0xb9   :  { %p14276_p4 = scmp.ne.s32.totalorder %s15158_s30, %s14275_s23  ;;  %p14279_p5 = scmp.lt.u32.totalorder %s14275_s23, %s15158_s30 }
  0xbb   :  { %p14281_p6 = pnand %p14279_p5, %p14276_p4 }
  0xbd   :  { %14284 = shalt.err (!%p14281_p6)
}
  0xbe   :  { %s14285_s26 = scalar_lea.vmem %s265_s15, 2560  ;;  %p14290_p8 = scmp.lt.s32.totalorder %s265_s15, %s265_s15 }
  0xbf   :  { %p14286_p7 = scmp.ne.s32.totalorder %s265_s15, %s14285_s26  ;;  %p14291_p9 = scmp.lt.s32.totalorder %s14285_s26, %s14285_s26 }
  0xc1   :  { %p14292_p10 = por %p14291_p9, %p14290_p8 }
  0xc3   :  { %p14293_p11 = pnand %p14292_p10, %p14286_p7 }
  0xc5   :  { %14296 = shalt.err (!%p14293_p11)
}
  0xc6   :  { %270 = dma.hbm_to_vmem [thread:$0]  %s15158_s30, 2560, %s265_s15, [#allocation17], %s14989_s10, %s14989_s10, %s14990_s24  }
  0xc7   :  { %s14297_s20 = scalar_lea.hbm %s15178_s8, 1280 }
  0xc8   :  { %p14298_p12 = scmp.ne.s32.totalorder %s15178_s8, %s14297_s20  ;;  %p14301_p13 = scmp.lt.u32.totalorder %s14297_s20, %s15178_s8 }
  0xca   :  { %p14303_p0 = pnand %p14301_p13, %p14298_p12 }
  0xcc   :  { %14306 = shalt.err (!%p14303_p0)
}
  0xcd   :  { %s14307_s28 = scalar_lea.vmem %s15377_s22, 1280  ;;  %p14312_p2 = scmp.lt.s32.totalorder %s15377_s22, %s15377_s22 }
  0xce   :  { %p14308_p1 = scmp.ne.s32.totalorder %s15377_s22, %s14307_s28  ;;  %p14313_p3 = scmp.lt.s32.totalorder %s14307_s28, %s14307_s28 }
  0xd0   :  { %p14314_p4 = por %p14313_p3, %p14312_p2 }
  0xd2   :  { %p14315_p5 = pnand %p14314_p4, %p14308_p1 }
  0xd4   :  { %14318 = shalt.err (!%p14315_p5)
}
  0xd5   :  { %298 = dma.hbm_to_vmem [thread:$0]  %s15178_s8, 1280, %s15377_s22, [#allocation20], %s14989_s10, %s14989_s10, %s14990_s24  }
  0xd6   :  { %s14993_s30 = smov [#allocation22]   ;;  %s14994_s2 = smov [#allocation25]  }
  0xd7   :  { %s320_s1 = sshll.u32 %s14993_s30, 4  ;;  %s349_s7 = sshll.u32 %s14994_s2, 4  ;;  %s321_s1 = int_to_ptr.vmem [resolvable:$true] %s320_s1  ;;  %s350_s7 = int_to_ptr.vmem [resolvable:$true] %s349_s7 }
  0xd8   :  { %s14319_s11 = scalar_lea.hbm %s15198_s21, 384 }
  0xd9   :  { %p14320_p6 = scmp.ne.s32.totalorder %s15198_s21, %s14319_s11  ;;  %p14323_p7 = scmp.lt.u32.totalorder %s14319_s11, %s15198_s21 }
  0xdb   :  { %p14325_p8 = pnand %p14323_p7, %p14320_p6 }
  0xdd   :  { %14328 = shalt.err (!%p14325_p8)
}
  0xde   :  { %s14329_s15 = scalar_lea.vmem %s321_s1, 384  ;;  %p14334_p10 = scmp.lt.s32.totalorder %s321_s1, %s321_s1 }
  0xdf   :  { %p14330_p9 = scmp.ne.s32.totalorder %s321_s1, %s14329_s15  ;;  %p14335_p11 = scmp.lt.s32.totalorder %s14329_s15, %s14329_s15 }
  0xe1   :  { %p14336_p12 = por %p14335_p11, %p14334_p10 }
  0xe3   :  { %p14337_p13 = pnand %p14336_p12, %p14330_p9 }
  0xe5   :  { %14340 = shalt.err (!%p14337_p13)
}
  0xe6   :  { %326 = dma.hbm_to_vmem [thread:$0]  %s15198_s21, 384, %s321_s1, [#allocation23], %s14986_s0, %s14986_s0, %s14987_s3  }
  0xe7   :  { %s14341_s8 = scalar_lea.hbm %s15218_s5, 128 }
  0xe8   :  { %p14342_p0 = scmp.ne.s32.totalorder %s15218_s5, %s14341_s8  ;;  %p14345_p1 = scmp.lt.u32.totalorder %s14341_s8, %s15218_s5 }
  0xea   :  { %p14347_p2 = pnand %p14345_p1, %p14342_p0 }
  0xec   :  { %14350 = shalt.err (!%p14347_p2)
}
  0xed   :  { %s14351_s18 = scalar_lea.vmem %s350_s7, 128  ;;  %p14356_p4 = scmp.lt.s32.totalorder %s350_s7, %s350_s7 }
  0xee   :  { %p14352_p3 = scmp.ne.s32.totalorder %s350_s7, %s14351_s18  ;;  %p14357_p5 = scmp.lt.s32.totalorder %s14351_s18, %s14351_s18 }
  0xf0   :  { %p14358_p6 = por %p14357_p5, %p14356_p4 }
  0xf2   :  { %p14359_p7 = pnand %p14358_p6, %p14352_p3 }
  0xf4   :  { %14362 = shalt.err (!%p14359_p7)
}
  0xf5   :  { %352 = dma.hbm_to_vmem [thread:$0]  %s15218_s5, 128, %s350_s7, [#allocation26]  }
  0xf6   :  { %s14995_s22 = smov [#allocation28]   ;;  %s14996_s21 = smov [#allocation31]  }
  0xf7   :  { %s373_s23 = sshll.u32 %s14995_s22, 4  ;;  %s395_s26 = sshll.u32 %s14996_s21, 4  ;;  %s374_s23 = int_to_ptr.vmem [resolvable:$true] %s373_s23  ;;  %s396_s26 = int_to_ptr.vmem [resolvable:$true] %s395_s26 }
  0xf8   :  { %s14363_s20 = scalar_lea.hbm %s15238_s29, 64 }
  0xf9   :  { %p14364_p8 = scmp.ne.s32.totalorder %s15238_s29, %s14363_s20  ;;  %p14367_p9 = scmp.lt.u32.totalorder %s14363_s20, %s15238_s29 }
  0xfb   :  { %p14369_p10 = pnand %p14367_p9, %p14364_p8 }
  0xfd   :  { %14372 = shalt.err (!%p14369_p10)
}
  0xfe   :  { %s14373_s28 = scalar_lea.vmem %s374_s23, 64  ;;  %p14378_p12 = scmp.lt.s32.totalorder %s374_s23, %s374_s23 }
  0xff   :  { %p14374_p11 = scmp.ne.s32.totalorder %s374_s23, %s14373_s28  ;;  %p14379_p13 = scmp.lt.s32.totalorder %s14373_s28, %s14373_s28 }
 0x101   :  { %p14380_p0 = por %p14379_p13, %p14378_p12 }
 0x103   :  { %p14381_p1 = pnand %p14380_p0, %p14374_p11 }
 0x105   :  { %14384 = shalt.err (!%p14381_p1)
}
 0x106   :  { %376 = dma.hbm_to_vmem [thread:$0]  %s15238_s29, 64, %s374_s23, [#allocation29]  }
 0x107   :  { %s14385_s5 = scalar_lea.hbm %s15253_s12, 32 }
 0x108   :  { %p14386_p2 = scmp.ne.s32.totalorder %s15253_s12, %s14385_s5  ;;  %p14389_p3 = scmp.lt.u32.totalorder %s14385_s5, %s15253_s12 }
 0x10a   :  { %p14391_p4 = pnand %p14389_p3, %p14386_p2 }
 0x10c   :  { %14394 = shalt.err (!%p14391_p4)
}
 0x10d   :  { %s14395_s30 = scalar_lea.vmem %s396_s26, 32  ;;  %p14400_p6 = scmp.lt.s32.totalorder %s396_s26, %s396_s26 }
 0x10e   :  { %p14396_p5 = scmp.ne.s32.totalorder %s396_s26, %s14395_s30  ;;  %p14401_p7 = scmp.lt.s32.totalorder %s14395_s30, %s14395_s30 }
 0x110   :  { %p14402_p8 = por %p14401_p7, %p14400_p6 }
 0x112   :  { %p14403_p9 = pnand %p14402_p8, %p14396_p5 }
 0x114   :  { %14406 = shalt.err (!%p14403_p9)
}
 0x115   :  { %398 = dma.hbm_to_vmem [thread:$0]  %s15253_s12, 32, %s396_s26, [#allocation32]  }
 0x116   :  { %s14997_s1 = smov [#allocation34]   ;;  %s14998_s29 = smov [#allocation37]  }
 0x117   :  { %s415_s2 = sshll.u32 %s14997_s1, 4  ;;  %s434_s7 = sshll.u32 %s14998_s29, 4  ;;  %s416_s2 = int_to_ptr.vmem [resolvable:$true] %s415_s2  ;;  %s15417_s7 = int_to_ptr.vmem [resolvable:$true] %s434_s7 }
 0x118   :  { %s14407_s11 = scalar_lea.hbm %s15263_s27, 16 }
 0x119   :  { %p14408_p10 = scmp.ne.s32.totalorder %s15263_s27, %s14407_s11  ;;  %p14411_p11 = scmp.lt.u32.totalorder %s14407_s11, %s15263_s27 }
 0x11b   :  { %p14413_p12 = pnand %p14411_p11, %p14408_p10 }
 0x11d   :  { %14416 = shalt.err (!%p14413_p12)
}
 0x11e   :  { %s14417_s15 = scalar_lea.vmem %s416_s2, 16  ;;  %s14421_s8 = scalar_lea.vmem %s416_s2, 32 }
 0x11f   :  { %p14418_p13 = scmp.ne.s32.totalorder %s416_s2, %s14417_s15  ;;  %p14422_p0 = scmp.lt.s32.totalorder %s416_s2, %s416_s2 }
 0x120   :  { %p14423_p1 = scmp.lt.s32.totalorder %s14421_s8, %s14417_s15 }
 0x122   :  { %p14424_p2 = por %p14423_p1, %p14422_p0 }
 0x124   :  { %p14425_p3 = pnand %p14424_p2, %p14418_p13 }
 0x126   :  { %14428 = shalt.err (!%p14425_p3)
}
 0x127   :  { %418 = dma.hbm_to_vmem [thread:$0]  %s15263_s27, 16, %s416_s2, [#allocation35]  }
 0x128   :  { %s14429_s12 = scalar_lea.hbm %s15273_s4, 10112 }
 0x129   :  { %p14430_p4 = scmp.ne.s32.totalorder %s15273_s4, %s14429_s12  ;;  %p14433_p5 = scmp.lt.u32.totalorder %s14429_s12, %s15273_s4 }
 0x12b   :  { %p14435_p6 = pnand %p14433_p5, %p14430_p4 }
 0x12d   :  { %14438 = shalt.err (!%p14435_p6)
}
 0x12e   :  { %s14439_s18 = scalar_lea.vmem %s15417_s7, 10112  ;;  %p14444_p8 = scmp.lt.s32.totalorder %s15417_s7, %s15417_s7 }
 0x12f   :  { %p14440_p7 = scmp.ne.s32.totalorder %s15417_s7, %s14439_s18  ;;  %p14445_p9 = scmp.lt.s32.totalorder %s14439_s18, %s14439_s18 }
 0x131   :  { %p14446_p10 = por %p14445_p9, %p14444_p8 }
 0x133   :  { %p14447_p11 = pnand %p14446_p10, %p14440_p7 }
 0x135   :  { %14450 = shalt.err (!%p14447_p11)
}
 0x136   :  { %440 = dma.hbm_to_vmem [thread:$0]  %s15273_s4, 10112, %s15417_s7, [#allocation38], %s14983_s16, %s14983_s16, %s14984_s17  }
 0x137   :  { %s14999_s27 = smov [#allocation40]   ;;  %s15000_s23 = smov [#allocation43]  }
 0x138   :  { %s460_s22 = sshll.u32 %s14999_s27, 4  ;;  %s484_s21 = sshll.u32 %s15000_s23, 4  ;;  %s461_s22 = int_to_ptr.vmem [resolvable:$true] %s460_s22  ;;  %s15435_s21 = int_to_ptr.vmem [resolvable:$true] %s484_s21 }
 0x139   :  { %s14451_s26 = scalar_lea.hbm %s15288_s13, 256 }
 0x13a   :  { %p14452_p12 = scmp.ne.s32.totalorder %s15288_s13, %s14451_s26  ;;  %p14455_p13 = scmp.lt.u32.totalorder %s14451_s26, %s15288_s13 }
 0x13c   :  { %p14457_p0 = pnand %p14455_p13, %p14452_p12 }
 0x13e   :  { %14460 = shalt.err (!%p14457_p0)
}
 0x13f   :  { %s14461_s20 = scalar_lea.vmem %s461_s22, 256  ;;  %p14466_p2 = scmp.lt.s32.totalorder %s461_s22, %s461_s22 }
 0x140   :  { %p14462_p1 = scmp.ne.s32.totalorder %s461_s22, %s14461_s20  ;;  %p14467_p3 = scmp.lt.s32.totalorder %s14461_s20, %s14461_s20 }
 0x142   :  { %p14468_p4 = por %p14467_p3, %p14466_p2 }
 0x144   :  { %p14469_p5 = pnand %p14468_p4, %p14462_p1 }
 0x146   :  { %14472 = shalt.err (!%p14469_p5)
}
 0x147   :  { %s15001_s4 = smov 64   ;;  %s15002_s28 = smov 4  }
 0x148   :  { %466 = dma.hbm_to_vmem [thread:$0]  %s15288_s13, 256, %s461_s22, [#allocation41], %s15001_s4, %s15001_s4, %s15002_s28  }
 0x149   :  { %s14473_s5 = scalar_lea.hbm %s15298_s19, 512 }
 0x14a   :  { %p14474_p6 = scmp.ne.s32.totalorder %s15298_s19, %s14473_s5  ;;  %p14477_p7 = scmp.lt.u32.totalorder %s14473_s5, %s15298_s19 }
 0x14c   :  { %p14479_p8 = pnand %p14477_p7, %p14474_p6 }
 0x14e   :  { %14482 = shalt.err (!%p14479_p8)
}
 0x14f   :  { %s14483_s30 = scalar_lea.vmem %s15435_s21, 512  ;;  %p14488_p10 = scmp.lt.s32.totalorder %s15435_s21, %s15435_s21 }
 0x150   :  { %p14484_p9 = scmp.ne.s32.totalorder %s15435_s21, %s14483_s30  ;;  %p14489_p11 = scmp.lt.s32.totalorder %s14483_s30, %s14483_s30 }
 0x152   :  { %p14490_p12 = por %p14489_p11, %p14488_p10 }
 0x154   :  { %p14491_p13 = pnand %p14490_p12, %p14484_p9 }
 0x156   :  { %14494 = shalt.err (!%p14491_p13)
}
 0x157   :  { %s17880_s13 = sld [smem:[#allocation105_spill]]  ;;  %s15003_s1 = smov [#allocation46]  }
 0x158   :  { %490 = dma.hbm_to_vmem [thread:$0]  %s15298_s19, 512, %s15435_s21, [#allocation44], %s14983_s16, %s14983_s16, %s14984_s17  }
 0x159   :  { %s512_s2 = sshll.u32 %s15003_s1, 4  ;;  %s15004_s29 = smov [#allocation2]   ;;  %s513_s2 = int_to_ptr.vmem [resolvable:$true] %s512_s2 }
 0x15a   :  { %s143_s7 = sshll.u32 %s15004_s29, 4  ;;  %s144_s7 = int_to_ptr.vmem [resolvable:$true] %s143_s7 }
 0x15d   :  { %s14495_s11 = scalar_lea.hbm %s17880_s13, 576 }
 0x15e   :  { %p14496_p0 = scmp.ne.s32.totalorder %s17880_s13, %s14495_s11  ;;  %p14499_p1 = scmp.lt.u32.totalorder %s14495_s11, %s17880_s13 }
 0x160   :  { %p14501_p2 = pnand %p14499_p1, %p14496_p0 }
 0x162   :  { %14504 = shalt.err (!%p14501_p2)
}
 0x163   :  { %s14505_s15 = scalar_lea.vmem %s513_s2, 576  ;;  %p14510_p4 = scmp.lt.s32.totalorder %s513_s2, %s513_s2 }
 0x164   :  { %p14506_p3 = scmp.ne.s32.totalorder %s513_s2, %s14505_s15  ;;  %p14511_p5 = scmp.lt.s32.totalorder %s14505_s15, %s14505_s15 }
 0x166   :  { %p14512_p6 = por %p14511_p5, %p14510_p4 }
 0x168   :  { %p14513_p7 = pnand %p14512_p6, %p14506_p3 }
 0x16a   :  { %14516 = shalt.err (!%p14513_p7)
}
 0x16b   :  { %s17881_s19 = sld [smem:[#allocation69_spill]] }
 0x16c   :  { %518 = dma.hbm_to_vmem [thread:$0]  %s17880_s13, 576, %s513_s2, [#allocation47], %s15001_s4, %s15001_s4, %s15002_s28  }
 0x171   :  { %s14517_s8 = scalar_lea.hbm %s17881_s19, 64 }
 0x172   :  { %p14518_p8 = scmp.ne.s32.totalorder %s17881_s19, %s14517_s8  ;;  %p14521_p9 = scmp.lt.u32.totalorder %s14517_s8, %s17881_s19 }
 0x174   :  { %p14523_p10 = pnand %p14521_p9, %p14518_p8 }
 0x176   :  { %14526 = shalt.err (!%p14523_p10)
}
 0x177   :  { %s14527_s12 = scalar_lea.vmem %s144_s7, 64  ;;  %p14532_p12 = scmp.lt.s32.totalorder %s144_s7, %s144_s7 }
 0x178   :  { %p14528_p11 = scmp.ne.s32.totalorder %s144_s7, %s14527_s12  ;;  %p14533_p13 = scmp.lt.s32.totalorder %s14527_s12, %s14527_s12 }
 0x17a   :  { %p14534_p0 = por %p14533_p13, %p14532_p12 }
 0x17c   :  { %p14535_p1 = pnand %p14534_p0, %p14528_p11 }
 0x17e   :  { %14538 = shalt.err (!%p14535_p1)
}
 0x17f   :  { %s17882_s18 = sld [smem:[#allocation72_spill]]  ;;  %s15005_s27 = smov [#allocation6]  }
 0x180   :  { %146 = dma.hbm_to_vmem [thread:$0]  %s17881_s19, 64, %s144_s7, [#allocation3]  }
 0x181   :  { %s166_s22 = sshll.u32 %s15005_s27, 4  ;;  %s15006_s23 = smov [#allocation9]   ;;  %s167_s22 = int_to_ptr.vmem [resolvable:$true] %s166_s22 }
 0x182   :  { %s194_s21 = sshll.u32 %s15006_s23, 4  ;;  %s15467_s21 = int_to_ptr.vmem [resolvable:$true] %s194_s21 }
 0x185   :  { %s14539_s26 = scalar_lea.hbm %s17882_s18, 128 }
 0x186   :  { %p14540_p2 = scmp.ne.s32.totalorder %s17882_s18, %s14539_s26  ;;  %p14543_p3 = scmp.lt.u32.totalorder %s14539_s26, %s17882_s18 }
 0x188   :  { %p14545_p4 = pnand %p14543_p3, %p14540_p2 }
 0x18a   :  { %14548 = shalt.err (!%p14545_p4)
}
 0x18b   :  { %s14549_s20 = scalar_lea.vmem %s167_s22, 128  ;;  %p14554_p6 = scmp.lt.s32.totalorder %s167_s22, %s167_s22 }
 0x18c   :  { %p14550_p5 = scmp.ne.s32.totalorder %s167_s22, %s14549_s20  ;;  %p14555_p7 = scmp.lt.s32.totalorder %s14549_s20, %s14549_s20 }
 0x18e   :  { %p14556_p8 = por %p14555_p7, %p14554_p6 }
 0x190   :  { %p14557_p9 = pnand %p14556_p8, %p14550_p5 }
 0x192   :  { %14560 = shalt.err (!%p14557_p9)
}
 0x193   :  { %s17883_s5 = sld [smem:[#allocation75_spill]] }
 0x194   :  { %172 = dma.hbm_to_vmem [thread:$0]  %s17882_s18, 128, %s167_s22, [#allocation5], %s15001_s4, %s15001_s4, %s15002_s28  }
 0x199   :  { %s14561_s30 = scalar_lea.hbm %s17883_s5, 512 }
 0x19a   :  { %p14562_p10 = scmp.ne.s32.totalorder %s17883_s5, %s14561_s30  ;;  %p14565_p11 = scmp.lt.u32.totalorder %s14561_s30, %s17883_s5 }
 0x19c   :  { %p14567_p12 = pnand %p14565_p11, %p14562_p10 }
 0x19e   :  { %14570 = shalt.err (!%p14567_p12)
}
 0x19f   :  { %s14571_s13 = scalar_lea.vmem %s15467_s21, 512  ;;  %p14576_p0 = scmp.lt.s32.totalorder %s15467_s21, %s15467_s21 }
 0x1a0   :  { %p14572_p13 = scmp.ne.s32.totalorder %s15467_s21, %s14571_s13  ;;  %p14577_p1 = scmp.lt.s32.totalorder %s14571_s13, %s14571_s13 }
 0x1a2   :  { %p14578_p2 = por %p14577_p1, %p14576_p0 }
 0x1a4   :  { %p14579_p3 = pnand %p14578_p2, %p14572_p13 }
 0x1a6   :  { %14582 = shalt.err (!%p14579_p3)
}
 0x1a7   :  { %s17884_s1 = sld [smem:[#allocation78_spill]]  ;;  %s15007_s2 = smov [#allocation12]  }
 0x1a8   :  { %200 = dma.hbm_to_vmem [thread:$0]  %s17883_s5, 512, %s15467_s21, [#allocation8], %s14983_s16, %s14983_s16, %s14984_s17  }
 0x1a9   :  { %s222_s29 = sshll.u32 %s15007_s2, 4  ;;  %s15008_s7 = smov [#allocation15]   ;;  %s223_s29 = int_to_ptr.vmem [resolvable:$true] %s222_s29 }
 0x1aa   :  { %s250_s11 = sshll.u32 %s15008_s7, 4  ;;  %s15488_s11 = int_to_ptr.vmem [resolvable:$true] %s250_s11 }
 0x1ad   :  { %s14583_s15 = scalar_lea.hbm %s17884_s1, 1536 }
 0x1ae   :  { %p14584_p4 = scmp.ne.s32.totalorder %s17884_s1, %s14583_s15  ;;  %p14587_p5 = scmp.lt.u32.totalorder %s14583_s15, %s17884_s1 }
 0x1b0   :  { %p14589_p6 = pnand %p14587_p5, %p14584_p4 }
 0x1b2   :  { %14592 = shalt.err (!%p14589_p6)
}
 0x1b3   :  { %s14593_s19 = scalar_lea.vmem %s223_s29, 1536  ;;  %p14598_p8 = scmp.lt.s32.totalorder %s223_s29, %s223_s29 }
 0x1b4   :  { %p14594_p7 = scmp.ne.s32.totalorder %s223_s29, %s14593_s19  ;;  %p14599_p9 = scmp.lt.s32.totalorder %s14593_s19, %s14593_s19 }
 0x1b6   :  { %p14600_p10 = por %p14599_p9, %p14598_p8 }
 0x1b8   :  { %p14601_p11 = pnand %p14600_p10, %p14594_p7 }
 0x1ba   :  { %14604 = shalt.err (!%p14601_p11)
}
 0x1bb   :  { %s17885_s8 = sld [smem:[#allocation81_spill]] }
 0x1bc   :  { %228 = dma.hbm_to_vmem [thread:$0]  %s17884_s1, 1536, %s223_s29, [#allocation11], %s14986_s0, %s14986_s0, %s14987_s3  }
 0x1c1   :  { %s14605_s12 = scalar_lea.hbm %s17885_s8, 2560 }
 0x1c2   :  { %p14606_p12 = scmp.ne.s32.totalorder %s17885_s8, %s14605_s12  ;;  %p14609_p13 = scmp.lt.u32.totalorder %s14605_s12, %s17885_s8 }
 0x1c4   :  { %p14611_p0 = pnand %p14609_p13, %p14606_p12 }
 0x1c6   :  { %14614 = shalt.err (!%p14611_p0)
}
 0x1c7   :  { %s14615_s18 = scalar_lea.vmem %s15488_s11, 2560  ;;  %p14620_p2 = scmp.lt.s32.totalorder %s15488_s11, %s15488_s11 }
 0x1c8   :  { %p14616_p1 = scmp.ne.s32.totalorder %s15488_s11, %s14615_s18  ;;  %p14621_p3 = scmp.lt.s32.totalorder %s14615_s18, %s14615_s18 }
 0x1ca   :  { %p14622_p4 = por %p14621_p3, %p14620_p2 }
 0x1cc   :  { %p14623_p5 = pnand %p14622_p4, %p14616_p1 }
 0x1ce   :  { %14626 = shalt.err (!%p14623_p5)
}
 0x1cf   :  { %s17886_s27 = sld [smem:[#allocation84_spill]]  ;;  %s15009_s22 = smov [#allocation18]  }
 0x1d0   :  { %256 = dma.hbm_to_vmem [thread:$0]  %s17885_s8, 2560, %s15488_s11, [#allocation14], %s14989_s10, %s14989_s10, %s14990_s24  }
 0x1d1   :  { %s278_s23 = sshll.u32 %s15009_s22, 4  ;;  %s279_s23 = int_to_ptr.vmem [resolvable:$true] %s278_s23 }
 0x1d5   :  { %s14627_s21 = scalar_lea.hbm %s17886_s27, 4608 }
 0x1d6   :  { %p14628_p6 = scmp.ne.s32.totalorder %s17886_s27, %s14627_s21  ;;  %p14631_p7 = scmp.lt.u32.totalorder %s14627_s21, %s17886_s27 }
 0x1d8   :  { %p14633_p8 = pnand %p14631_p7, %p14628_p6 }
 0x1da   :  { %14636 = shalt.err (!%p14633_p8)
}
 0x1db   :  { %s14637_s26 = scalar_lea.vmem %s279_s23, 4608  ;;  %p14642_p10 = scmp.lt.s32.totalorder %s279_s23, %s279_s23 }
 0x1dc   :  { %p14638_p9 = scmp.ne.s32.totalorder %s279_s23, %s14637_s26  ;;  %p14643_p11 = scmp.lt.s32.totalorder %s14637_s26, %s14637_s26 }
 0x1de   :  { %p14644_p12 = por %p14643_p11, %p14642_p10 }
 0x1e0   :  { %p14645_p13 = pnand %p14644_p12, %p14638_p9 }
 0x1e2   :  { %14648 = shalt.err (!%p14645_p13)
}
 0x1e3   :  { %s15010_s20 = smov 576   ;;  %s17887_s5 = sld [smem:[#allocation87_spill]] }
 0x1e4   :  { %s15011_s30 = smov 36   ;;  %s15012_s13 = smov [#allocation21]  }
 0x1e5   :  { %284 = dma.hbm_to_vmem [thread:$0]  %s17886_s27, 4608, %s279_s23, [#allocation17], %s15010_s20, %s15010_s20, %s15011_s30  }
 0x1e6   :  { %s306_s1 = sshll.u32 %s15012_s13, 4  ;;  %s15013_s2 = smov [#allocation24]   ;;  %s307_s1 = int_to_ptr.vmem [resolvable:$true] %s306_s1 }
 0x1e7   :  { %s334_s29 = sshll.u32 %s15013_s2, 4  ;;  %s335_s29 = int_to_ptr.vmem [resolvable:$true] %s334_s29 }
 0x1e9   :  { %s14649_s7 = scalar_lea.hbm %s17887_s5, 1280 }
 0x1ea   :  { %p14650_p0 = scmp.ne.s32.totalorder %s17887_s5, %s14649_s7  ;;  %p14653_p1 = scmp.lt.u32.totalorder %s14649_s7, %s17887_s5 }
 0x1ec   :  { %p14655_p2 = pnand %p14653_p1, %p14650_p0 }
 0x1ee   :  { %14658 = shalt.err (!%p14655_p2)
}
 0x1ef   :  { %s14659_s11 = scalar_lea.vmem %s307_s1, 1280  ;;  %p14664_p4 = scmp.lt.s32.totalorder %s307_s1, %s307_s1 }
 0x1f0   :  { %p14660_p3 = scmp.ne.s32.totalorder %s307_s1, %s14659_s11  ;;  %p14665_p5 = scmp.lt.s32.totalorder %s14659_s11, %s14659_s11 }
 0x1f2   :  { %p14666_p6 = por %p14665_p5, %p14664_p4 }
 0x1f4   :  { %p14667_p7 = pnand %p14666_p6, %p14660_p3 }
 0x1f6   :  { %14670 = shalt.err (!%p14667_p7)
}
 0x1f7   :  { %s17888_s15 = sld [smem:[#allocation90_spill]] }
 0x1f8   :  { %312 = dma.hbm_to_vmem [thread:$0]  %s17887_s5, 1280, %s307_s1, [#allocation20], %s14989_s10, %s14989_s10, %s14990_s24  }
 0x1fd   :  { %s14671_s19 = scalar_lea.hbm %s17888_s15, 384 }
 0x1fe   :  { %p14672_p8 = scmp.ne.s32.totalorder %s17888_s15, %s14671_s19  ;;  %p14675_p9 = scmp.lt.u32.totalorder %s14671_s19, %s17888_s15 }
 0x200   :  { %p14677_p10 = pnand %p14675_p9, %p14672_p8 }
 0x202   :  { %14680 = shalt.err (!%p14677_p10)
}
 0x203   :  { %s14681_s8 = scalar_lea.vmem %s335_s29, 384  ;;  %p14686_p12 = scmp.lt.s32.totalorder %s335_s29, %s335_s29 }
 0x204   :  { %p14682_p11 = scmp.ne.s32.totalorder %s335_s29, %s14681_s8  ;;  %p14687_p13 = scmp.lt.s32.totalorder %s14681_s8, %s14681_s8 }
 0x206   :  { %p14688_p0 = por %p14687_p13, %p14686_p12 }
 0x208   :  { %p14689_p1 = pnand %p14688_p0, %p14682_p11 }
 0x20a   :  { %14692 = shalt.err (!%p14689_p1)
}
 0x20b   :  { %s17889_s12 = sld [smem:[#allocation93_spill]]  ;;  %s15014_s10 = smov [#allocation27]  }
 0x20c   :  { %340 = dma.hbm_to_vmem [thread:$0]  %s17888_s15, 384, %s335_s29, [#allocation23], %s14986_s0, %s14986_s0, %s14987_s3  }
 0x20d   :  { %s361_s24 = sshll.u32 %s15014_s10, 4  ;;  %s15015_s18 = smov [#allocation30]   ;;  %s362_s24 = int_to_ptr.vmem [resolvable:$true] %s361_s24 }
 0x20e   :  { %s385_s27 = sshll.u32 %s15015_s18, 4  ;;  %s386_s27 = int_to_ptr.vmem [resolvable:$true] %s385_s27 }
 0x211   :  { %s14693_s22 = scalar_lea.hbm %s17889_s12, 128 }
 0x212   :  { %p14694_p2 = scmp.ne.s32.totalorder %s17889_s12, %s14693_s22  ;;  %p14697_p3 = scmp.lt.u32.totalorder %s14693_s22, %s17889_s12 }
 0x214   :  { %p14699_p4 = pnand %p14697_p3, %p14694_p2 }
 0x216   :  { %14702 = shalt.err (!%p14699_p4)
}
 0x217   :  { %s14703_s23 = scalar_lea.vmem %s362_s24, 128  ;;  %p14708_p6 = scmp.lt.s32.totalorder %s362_s24, %s362_s24 }
 0x218   :  { %p14704_p5 = scmp.ne.s32.totalorder %s362_s24, %s14703_s23  ;;  %p14709_p7 = scmp.lt.s32.totalorder %s14703_s23, %s14703_s23 }
 0x21a   :  { %p14710_p8 = por %p14709_p7, %p14708_p6 }
 0x21c   :  { %p14711_p9 = pnand %p14710_p8, %p14704_p5 }
 0x21e   :  { %14714 = shalt.err (!%p14711_p9)
}
 0x21f   :  { %s17890_s21 = sld [smem:[#allocation96_spill]] }
 0x220   :  { %364 = dma.hbm_to_vmem [thread:$0]  %s17889_s12, 128, %s362_s24, [#allocation26]  }
 0x225   :  { %s14715_s0 = scalar_lea.hbm %s17890_s21, 96 }
 0x226   :  { %p14716_p10 = scmp.ne.s32.totalorder %s17890_s21, %s14715_s0  ;;  %p14719_p11 = scmp.lt.u32.totalorder %s14715_s0, %s17890_s21 }
 0x228   :  { %p14721_p12 = pnand %p14719_p11, %p14716_p10 }
 0x22a   :  { %14724 = shalt.err (!%p14721_p12)
}
 0x22b   :  { %s14725_s3 = scalar_lea.vmem %s386_s27, 96  ;;  %p14730_p0 = scmp.lt.s32.totalorder %s386_s27, %s386_s27 }
 0x22c   :  { %p14726_p13 = scmp.ne.s32.totalorder %s386_s27, %s14725_s3  ;;  %p14731_p1 = scmp.lt.s32.totalorder %s14725_s3, %s14725_s3 }
 0x22e   :  { %p14732_p2 = por %p14731_p1, %p14730_p0 }
 0x230   :  { %p14733_p3 = pnand %p14732_p2, %p14726_p13 }
 0x232   :  { %14736 = shalt.err (!%p14733_p3)
}
 0x233   :  { %s17891_s26 = sld [smem:[#allocation97_spill]]  ;;  %s15016_s20 = smov [#allocation33]  }
 0x234   :  { %388 = dma.hbm_to_vmem [thread:$0]  %s17890_s21, 96, %s386_s27, [#allocation29]  }
 0x235   :  { %s405_s5 = sshll.u32 %s15016_s20, 4  ;;  %s15017_s30 = smov [#allocation36]   ;;  %s406_s5 = int_to_ptr.vmem [resolvable:$true] %s405_s5 }
 0x236   :  { %s425_s13 = sshll.u32 %s15017_s30, 4  ;;  %s426_s13 = int_to_ptr.vmem [resolvable:$true] %s425_s13 }
 0x239   :  { %s14737_s1 = scalar_lea.hbm %s17891_s26, 16 }
 0x23a   :  { %p14738_p4 = scmp.ne.s32.totalorder %s17891_s26, %s14737_s1  ;;  %p14741_p5 = scmp.lt.u32.totalorder %s14737_s1, %s17891_s26 }
 0x23c   :  { %p14743_p6 = pnand %p14741_p5, %p14738_p4 }
 0x23e   :  { %14746 = shalt.err (!%p14743_p6)
}
 0x23f   :  { %s14747_s2 = scalar_lea.vmem %s406_s5, 16  ;;  %s14751_s29 = scalar_lea.vmem %s406_s5, 32 }
 0x240   :  { %p14748_p7 = scmp.ne.s32.totalorder %s406_s5, %s14747_s2  ;;  %p14752_p8 = scmp.lt.s32.totalorder %s406_s5, %s406_s5 }
 0x241   :  { %p14753_p9 = scmp.lt.s32.totalorder %s14751_s29, %s14747_s2 }
 0x243   :  { %p14754_p10 = por %p14753_p9, %p14752_p8 }
 0x245   :  { %p14755_p11 = pnand %p14754_p10, %p14748_p7 }
 0x247   :  { %14758 = shalt.err (!%p14755_p11)
}
 0x248   :  { %s17892_s7 = sld [smem:[#allocation98_spill]] }
 0x249   :  { %408 = dma.hbm_to_vmem [thread:$0]  %s17891_s26, 16, %s406_s5, [#allocation32]  }
 0x24e   :  { %s14759_s11 = scalar_lea.hbm %s17892_s7, 16 }
 0x24f   :  { %p14760_p12 = scmp.ne.s32.totalorder %s17892_s7, %s14759_s11  ;;  %p14763_p13 = scmp.lt.u32.totalorder %s14759_s11, %s17892_s7 }
 0x251   :  { %p14765_p0 = pnand %p14763_p13, %p14760_p12 }
 0x253   :  { %14768 = shalt.err (!%p14765_p0)
}
 0x254   :  { %s14769_s15 = scalar_lea.vmem %s426_s13, 16  ;;  %s14773_s19 = scalar_lea.vmem %s426_s13, 32 }
 0x255   :  { %p14770_p1 = scmp.ne.s32.totalorder %s426_s13, %s14769_s15  ;;  %p14774_p2 = scmp.lt.s32.totalorder %s426_s13, %s426_s13 }
 0x256   :  { %p14775_p3 = scmp.lt.s32.totalorder %s14773_s19, %s14769_s15 }
 0x258   :  { %p14776_p4 = por %p14775_p3, %p14774_p2 }
 0x25a   :  { %p14777_p5 = pnand %p14776_p4, %p14770_p1 }
 0x25c   :  { %14780 = shalt.err (!%p14777_p5)
}
 0x25d   :  { %s17893_s8 = sld [smem:[#allocation100_spill]]  ;;  %s15018_s12 = smov [#allocation39]  }
 0x25e   :  { %428 = dma.hbm_to_vmem [thread:$0]  %s17892_s7, 16, %s426_s13, [#allocation35]  }
 0x25f   :  { %s448_s10 = sshll.u32 %s15018_s12, 4  ;;  %s15019_s24 = smov [#allocation42]   ;;  %s449_s10 = int_to_ptr.vmem [resolvable:$true] %s448_s10 }
 0x260   :  { %s472_s18 = sshll.u32 %s15019_s24, 4  ;;  %s473_s18 = int_to_ptr.vmem [resolvable:$true] %s472_s18 }
 0x263   :  { %s14781_s27 = scalar_lea.hbm %s17893_s8, 576 }
 0x264   :  { %p14782_p6 = scmp.ne.s32.totalorder %s17893_s8, %s14781_s27  ;;  %p14785_p7 = scmp.lt.u32.totalorder %s14781_s27, %s17893_s8 }
 0x266   :  { %p14787_p8 = pnand %p14785_p7, %p14782_p6 }
 0x268   :  { %14790 = shalt.err (!%p14787_p8)
}
 0x269   :  { %s14791_s22 = scalar_lea.vmem %s449_s10, 576  ;;  %p14796_p10 = scmp.lt.s32.totalorder %s449_s10, %s449_s10 }
 0x26a   :  { %p14792_p9 = scmp.ne.s32.totalorder %s449_s10, %s14791_s22  ;;  %p14797_p11 = scmp.lt.s32.totalorder %s14791_s22, %s14791_s22 }
 0x26c   :  { %p14798_p12 = por %p14797_p11, %p14796_p10 }
 0x26e   :  { %p14799_p13 = pnand %p14798_p12, %p14792_p9 }
 0x270   :  { %14802 = shalt.err (!%p14799_p13)
}
 0x271   :  { %s17894_s23 = sld [smem:[#allocation101_spill]] }
 0x272   :  { %454 = dma.hbm_to_vmem [thread:$0]  %s17893_s8, 576, %s449_s10, [#allocation38], %s15001_s4, %s15001_s4, %s15002_s28  }
 0x277   :  { %s14803_s21 = scalar_lea.hbm %s17894_s23, 384 }
 0x278   :  { %p14804_p0 = scmp.ne.s32.totalorder %s17894_s23, %s14803_s21  ;;  %p14807_p1 = scmp.lt.u32.totalorder %s14803_s21, %s17894_s23 }
 0x27a   :  { %p14809_p2 = pnand %p14807_p1, %p14804_p0 }
 0x27c   :  { %14812 = shalt.err (!%p14809_p2)
}
 0x27d   :  { %s14813_s0 = scalar_lea.vmem %s473_s18, 384  ;;  %p14818_p4 = scmp.lt.s32.totalorder %s473_s18, %s473_s18 }
 0x27e   :  { %p14814_p3 = scmp.ne.s32.totalorder %s473_s18, %s14813_s0  ;;  %p14819_p5 = scmp.lt.s32.totalorder %s14813_s0, %s14813_s0 }
 0x280   :  { %p14820_p6 = por %p14819_p5, %p14818_p4 }
 0x282   :  { %p14821_p7 = pnand %p14820_p6, %p14814_p3 }
 0x284   :  { %14824 = shalt.err (!%p14821_p7)
}
 0x285   :  { %s17895_s3 = sld [smem:[#allocation102_spill]]  ;;  %s15020_s4 = smov [#allocation45]  }
 0x286   :  { %478 = dma.hbm_to_vmem [thread:$0]  %s17894_s23, 384, %s473_s18, [#allocation41], %s14983_s16, %s14983_s16, %s14984_s17  }
 0x287   :  { %s496_s28 = sshll.u32 %s15020_s4, 4  ;;  %s497_s28 = int_to_ptr.vmem [resolvable:$true] %s496_s28 }
 0x28b   :  { %s14825_s26 = scalar_lea.hbm %s17895_s3, 2304 }
 0x28c   :  { %p14826_p8 = scmp.ne.s32.totalorder %s17895_s3, %s14825_s26  ;;  %p14829_p9 = scmp.lt.u32.totalorder %s14825_s26, %s17895_s3 }
 0x28e   :  { %p14831_p10 = pnand %p14829_p9, %p14826_p8 }
 0x290   :  { %14834 = shalt.err (!%p14831_p10)
}
 0x291   :  { %s14835_s20 = scalar_lea.vmem %s497_s28, 2304  ;;  %p14840_p12 = scmp.lt.s32.totalorder %s497_s28, %s497_s28 }
 0x292   :  { %p14836_p11 = scmp.ne.s32.totalorder %s497_s28, %s14835_s20  ;;  %p14841_p13 = scmp.lt.s32.totalorder %s14835_s20, %s14835_s20 }
 0x294   :  { %p14842_p0 = por %p14841_p13, %p14840_p12 }
 0x296   :  { %p14843_p1 = pnand %p14842_p0, %p14836_p11 }
 0x298   :  { %14846 = shalt.err (!%p14843_p1)
}
 0x299   :  { %s15021_s5 = smov 256   ;;  %s15022_s16 = smov 16  }
 0x29a   :  { %502 = dma.hbm_to_vmem [thread:$0]  %s17895_s3, 2304, %s497_s28, [#allocation44], %s15021_s5, %s15021_s5, %s15022_s16  }
 0x29b   :  { %s15023_s17 = smov [#allocation48]   ;;  %s14847_s13 = scalar_lea.hbm %s15328_s25, 31104 }
 0x29c   :  { %s526_s30 = sshll.u32 %s15023_s17, 4  ;;  %p14848_p2 = scmp.ne.s32.totalorder %s15328_s25, %s14847_s13  ;;  %s527_s30 = int_to_ptr.vmem [resolvable:$true] %s526_s30 }
 0x29d   :  { %p14851_p3 = scmp.lt.u32.totalorder %s14847_s13, %s15328_s25 }
 0x29f   :  { %p14853_p4 = pnand %p14851_p3, %p14848_p2 }
 0x2a1   :  { %14856 = shalt.err (!%p14853_p4)
}
 0x2a2   :  { %s14857_s1 = scalar_lea.vmem %s527_s30, 31104  ;;  %p14862_p6 = scmp.lt.s32.totalorder %s527_s30, %s527_s30 }
 0x2a3   :  { %p14858_p5 = scmp.ne.s32.totalorder %s527_s30, %s14857_s1  ;;  %p14863_p7 = scmp.lt.s32.totalorder %s14857_s1, %s14857_s1 }
 0x2a5   :  { %p14864_p8 = por %p14863_p7, %p14862_p6 }
 0x2a7   :  { %p14865_p9 = pnand %p14864_p8, %p14858_p5 }
 0x2a9   :  { %14868 = shalt.err (!%p14865_p9)
}
 0x2aa   :  { %s15024_s2 = smov 384   ;;  %s15025_s29 = smov 24  }
 0x2ab   :  { %532 = dma.hbm_to_vmem [thread:$0]  %s15328_s25, 31104, %s527_s30, [#allocation47], %s15024_s2, %s15024_s2, %s15025_s29  }
 0x2ac   :  { %s15026_s7 = smov [#allocation49]   ;;  %s14869_s15 = scalar_lea.hbm %s15333_s14, 32 }
 0x2ad   :  { %s539_s11 = sshll.u32 %s15026_s7, 4  ;;  %p14870_p10 = scmp.ne.s32.totalorder %s15333_s14, %s14869_s15  ;;  %s540_s11 = int_to_ptr.vmem [resolvable:$true] %s539_s11 }
 0x2ae   :  { %p14873_p11 = scmp.lt.u32.totalorder %s14869_s15, %s15333_s14 }
 0x2b0   :  { %p14875_p12 = pnand %p14873_p11, %p14870_p10 }
 0x2b2   :  { %14878 = shalt.err (!%p14875_p12)
}
 0x2b3   :  { %s14879_s19 = scalar_lea.vmem %s540_s11, 32  ;;  %p14884_p0 = scmp.lt.s32.totalorder %s540_s11, %s540_s11 }
 0x2b4   :  { %p14880_p13 = scmp.ne.s32.totalorder %s540_s11, %s14879_s19  ;;  %p14885_p1 = scmp.lt.s32.totalorder %s14879_s19, %s14879_s19 }
 0x2b6   :  { %p14886_p2 = por %p14885_p1, %p14884_p0 }
 0x2b8   :  { %p14887_p3 = pnand %p14886_p2, %p14880_p13 }
 0x2ba   :  { %14890 = shalt.err (!%p14887_p3)
}
 0x2bb   :  { %542 = dma.hbm_to_vmem [thread:$0]  %s15333_s14, 32, %s540_s11, [#allocation50]  }
 0x2bc   :  { %14891 = dma.done.wait [#allocation3], 64  }
 0x2bd   :  { %14892 = vsyncadd [#allocation3], 4294967232 }
 0x2be   :  { %14893 = dma.done.wait [#allocation5], 192  }
 0x2bf   :  { %14894 = vsyncadd [#allocation5], 4294967104 }
 0x2c0   :  { %14895 = dma.done.wait [#allocation8], 768  }
 0x2c1   :  { %14896 = vsyncadd [#allocation8], 4294966528 }
 0x2c2   :  { %14897 = dma.done.wait [#allocation11], 2304  }
 0x2c3   :  { %14898 = vsyncadd [#allocation11], 4294964992 }
 0x2c4   :  { %14899 = dma.done.wait [#allocation14], 5120  }
 0x2c5   :  { %14900 = vsyncadd [#allocation14], 4294962176 }
 0x2c6   :  { %14901 = dma.done.wait [#allocation17], 7168  }
 0x2c7   :  { %14902 = vsyncadd [#allocation17], 4294960128 }
 0x2c8   :  { %14903 = dma.done.wait [#allocation20], 2560  }
 0x2c9   :  { %14904 = vsyncadd [#allocation20], 4294964736 }
 0x2ca   :  { %14905 = dma.done.wait [#allocation23], 768  }
 0x2cb   :  { %14906 = vsyncadd [#allocation23], 4294966528 }
 0x2cc   :  { %14907 = dma.done.wait [#allocation26], 256  }
 0x2cd   :  { %14908 = vsyncadd [#allocation26], 4294967040 }
 0x2ce   :  { %14909 = dma.done.wait [#allocation29], 160  }
 0x2cf   :  { %14910 = vsyncadd [#allocation29], 4294967136 }
 0x2d0   :  { %14911 = dma.done.wait [#allocation32], 48  }
 0x2d1   :  { %14912 = vsyncadd [#allocation32], 4294967248 }
 0x2d2   :  { %14913 = dma.done.wait [#allocation35], 32  }
 0x2d3   :  { %14914 = vsyncadd [#allocation35], 4294967264 }
 0x2d4   :  { %14915 = dma.done.wait [#allocation38], 10688  }
 0x2d5   :  { %14916 = vsyncadd [#allocation38], 4294956608 }
 0x2d6   :  { %14917 = dma.done.wait [#allocation41], 640  }
 0x2d7   :  { %14918 = vsyncadd [#allocation41], 4294966656 }
 0x2d8   :  { %14919 = dma.done.wait [#allocation44], 2816  }
 0x2d9   :  { %14920 = vsyncadd [#allocation44], 4294964480 }
 0x2da   :  { %14921 = dma.done.wait [#allocation47], 31680  }
 0x2db   :  { %14922 = vsyncadd [#allocation47], 4294935616 }
 0x2dc   :  { %14923 = dma.done.wait [#allocation50], 32  }
 0x2dd   :  { %14924 = vsyncadd [#allocation50], 4294967264  ;;  %s17896_s25 = sld [smem:[#allocation68_spill]]  ;;  %s15027_s14 = smov 127   ;;  %v17836_v6 = vmov 0   ;;  %vm672_vm0 = vcmask 1039360  }
 0x2de   :  { %s15028_s8 = smov 126   ;;  %s15029_s12 = smov 110   ;;  %962 = vmatprep.mubr.bf16.mxu0 %v17836_v6  ;;  %1003 = vmatprep.mubr.bf16.mxu1 %v17836_v6  ;;  %vm804_vm1 = vcmask 1043456   ;;  %vm690_vm2 = vcmask 1031168   ;;  %vm17835_vm3 = vcmask 900096   ;;  %vm17834_vm4 = vcmask 891904  }
 0x2df   :  { %s15030_s10 = smov 109   ;;  %s15031_s24 = smov 108   ;;  %13314 = vset.pattern.permute.xlu0 %v17836_v6  ;;  %13340 = vset.pattern.permute.xlu1 %v17836_v6  ;;  %vm744_vm5 = vcmask 883712   ;;  %vm17833_vm6 = vcmask 752640   ;;  %vm17832_vm7 = vcmask 744448   ;;  %vm17831_vm8 = vcmask 736256  }
 0x2e0   :  { %s15032_s18 = smov 92   ;;  %s15033_s27 = smov 91   ;;  %v15735_v59 = vld [vmem:[#allocation2] sm:$0xf]  ;;  %vm908_vm9 = vcmask 588800   ;;  %vm2118_vm10 = vcmask 1041408  }
 0x2e1   :  { %s15034_s22 = smov 90   ;;  %s17897_s23 = sld [smem:[#allocation70_spill]]  ;;  %vm2119_vm11 = vcmask 1042432   ;;  %vm2114_vm12 = vcmask 957440   ;;  %vm2271_vm13 = vcmask 965632   ;;  %vm2283_vm14 = vcmask 949248  }
 0x2e2   :  { %s17900_s21 = sld [smem:[#allocation71_spill]]  ;;  %s15038_s0 = smov 117   ;;  %vm2294_vm15 = vcmask 875520  }
 0x2e3   :  { %v642_v0 = vld [vmem:[%s17896_s25] sm:$0xff]  ;;  %v643_v1 = vld [vmem:[%s17896_s25 + $0x8] sm:$0xff]  ;;  %v644_v5 = vld [vmem:[%s17896_s25 + $0x10] sm:$0xff]  ;;  %s17902_s3 = sld [smem:[#allocation73_spill]]  ;;  %s15039_s4 = smov 118  }
 0x2e4   :  { %v15571_v2 = vcombine.high %v642_v0, %v642_v0  ;;  %v15573_v3 = vcombine.low %v642_v0, %v642_v0  ;;  %v15579_v4 = vcombine.low %v643_v1, %v643_v1  ;;  %v15630_v7 = vcombine.high %v643_v1, %v643_v1  ;;  %s15040_s28 = smov 116   ;;  %s15041_s26 = smov 107  }
 0x2e5   :  { %v15632_v8 = vcombine.low %v644_v5, %v644_v5  ;;  %v15638_v9 = vcombine.high %v644_v5, %v644_v5  ;;  %s15042_s20 = smov 106   ;;  %s17903_s5 = sld [smem:[#allocation74_spill]] }
 0x2e6   :  { %662 = vrot.lane.b32.xlu0 %v15571_v2, %s15027_s14  ;;  %660 = vrot.lane.b32.xlu1 %v15573_v3, %s15027_s14  ;;  %s17904_s16 = sld [smem:[#allocation99_spill]]  ;;  %s17905_s17 = sld [smem:[#allocation76_spill]] }
 0x2e7   :  { %v902_v10 = vld [vmem:[%s17897_s23] sm:$0xff]  ;;  %s15043_s30 = smov 121   ;;  %s15044_s13 = smov 122  }
 0x2e8   :  { %s15045_s1 = smov 120   ;;  %s15046_s2 = smov 114  }
 0x2e9   :  { %s15047_s29 = smov 115   ;;  %s17906_s7 = sld [smem:[#allocation77_spill]] }
 0x2ea   :  { %664 = vrot.lane.b32.xlu0 %v15579_v4, %s15027_s14  ;;  %680 = vrot.lane.b32.xlu1 %v15571_v2, %s15028_s8  ;;  %s15048_s11 = smov 123   ;;  %s17907_s15 = sld [smem:[#allocation79_spill]] }
 0x2eb   :  { %s15049_s19 = smov 124   ;;  %s15050_s25 = smov 119  }
 0x2ec   :  { %s17908_s23 = sld [smem:[#allocation80_spill]] }
 0x2ee   :  { %682 = vrot.lane.b32.xlu0 %v15579_v4, %s15028_s8  ;;  %698 = vrot.lane.b32.xlu1 %v15571_v2, %s15029_s12 }
 0x2f2   :  { %700 = vrot.lane.b32.xlu0 %v15579_v4, %s15029_s12  ;;  %678 = vrot.lane.b32.xlu1 %v15573_v3, %s15028_s8 }
 0x2f6   :  { %696 = vrot.lane.b32.xlu0 %v15573_v3, %s15029_s12  ;;  %716 = vrot.lane.b32.xlu1 %v15571_v2, %s15030_s10 }
 0x2fa   :  { %718 = vrot.lane.b32.xlu0 %v15579_v4, %s15030_s10  ;;  %734 = vrot.lane.b32.xlu1 %v15571_v2, %s15031_s24 }
 0x2fe   :  { %736 = vrot.lane.b32.xlu0 %v15579_v4, %s15031_s24  ;;  %714 = vrot.lane.b32.xlu1 %v15573_v3, %s15030_s10 }
 0x302   :  { %732 = vrot.lane.b32.xlu0 %v15573_v3, %s15031_s24  ;;  %752 = vrot.lane.b32.xlu1 %v15571_v2, %s15032_s18 }
 0x306   :  { %754 = vrot.lane.b32.xlu0 %v15579_v4, %s15032_s18  ;;  %770 = vrot.lane.b32.xlu1 %v15571_v2, %s15033_s27 }
 0x30a   :  { %772 = vrot.lane.b32.xlu0 %v15579_v4, %s15033_s27  ;;  %750 = vrot.lane.b32.xlu1 %v15573_v3, %s15032_s18 }
 0x30e   :  { %768 = vrot.lane.b32.xlu0 %v15573_v3, %s15033_s27  ;;  %786 = vrot.lane.b32.xlu1 %v15573_v3, %s15034_s22 }
 0x312   :  { %788 = vrot.lane.b32.xlu0 %v15571_v2, %s15034_s22  ;;  %790 = vrot.lane.b32.xlu1 %v15579_v4, %s15034_s22 }
 0x316   :  { %666 = vrot.lane.b32.xlu0 %v15630_v7, %s15027_s14  ;;  %668 = vrot.lane.b32.xlu1 %v15632_v8, %s15027_s14 }
 0x31a   :  { %670 = vrot.lane.b32.xlu0 %v15638_v9, %s15027_s14  ;;  %684 = vrot.lane.b32.xlu1 %v15630_v7, %s15028_s8 }
 0x31e   :  { %686 = vrot.lane.b32.xlu0 %v15632_v8, %s15028_s8  ;;  %702 = vrot.lane.b32.xlu1 %v15630_v7, %s15029_s12 }
 0x322   :  { %704 = vrot.lane.b32.xlu0 %v15632_v8, %s15029_s12  ;;  %688 = vrot.lane.b32.xlu1 %v15638_v9, %s15028_s8 }
 0x326   :  { %706 = vrot.lane.b32.xlu0 %v15638_v9, %s15029_s12  ;;  %720 = vrot.lane.b32.xlu1 %v15630_v7, %s15030_s10 }
 0x32a   :  { %722 = vrot.lane.b32.xlu0 %v15632_v8, %s15030_s10  ;;  %738 = vrot.lane.b32.xlu1 %v15630_v7, %s15031_s24 }
 0x32e   :  { %740 = vrot.lane.b32.xlu0 %v15632_v8, %s15031_s24  ;;  %724 = vrot.lane.b32.xlu1 %v15638_v9, %s15030_s10 }
 0x332   :  { %742 = vrot.lane.b32.xlu0 %v15638_v9, %s15031_s24  ;;  %756 = vrot.lane.b32.xlu1 %v15630_v7, %s15032_s18 }
 0x336   :  { %758 = vrot.lane.b32.xlu0 %v15632_v8, %s15032_s18  ;;  %774 = vrot.lane.b32.xlu1 %v15630_v7, %s15033_s27 }
 0x33a   :  { %776 = vrot.lane.b32.xlu0 %v15632_v8, %s15033_s27  ;;  %760 = vrot.lane.b32.xlu1 %v15638_v9, %s15032_s18 }
 0x33e   :  { %778 = vrot.lane.b32.xlu0 %v15638_v9, %s15033_s27  ;;  %792 = vrot.lane.b32.xlu1 %v15630_v7, %s15034_s22 }
 0x342   :  { %794 = vrot.lane.b32.xlu0 %v15632_v8, %s15034_s22  ;;  %796 = vrot.lane.b32.xlu1 %v15638_v9, %s15034_s22 }
 0x346   :  { %905 = vperm.xlu0 %13314, %v902_v10  }
 0x358   :  { %v663_v11 = vpop.permute.xlu0 %662  ;;  %v661_v12 = vpop.permute.xlu1 %660 }
 0x359   :  { %v673_v13 = vsel %vm672_vm0, %v661_v12, %v663_v11 }
 0x35a   :  { %v807_v18 = vsel %vm804_vm1, %v15573_v3, %v673_v13 }
 0x35c   :  { %v15686_v14 = vpop.permute.xlu0 %664  ;;  %v681_v15 = vpop.permute.xlu1 %680 }
 0x35d   :  { %v674_v16 = vsel %vm672_vm0, %v663_v11, %v15686_v14 }
 0x35e   :  { %v811_v17 = vsel %vm804_vm1, %v15571_v2, %v674_v16 }
 0x35f   :  { %930 = vmatprep.subr.bf16.mxu0 %v811_v17 }
 0x360   :  { %v15694_v19 = vpop.permute.xlu0 %682  ;;  %931 = vmatpush1.bf16.msra.mxu0 %v807_v18  ;;  %v699_v20 = vpop.permute.xlu1 %698 }
 0x361   :  { %v692_v23 = vsel %vm690_vm2, %v681_v15, %v15694_v19 }
 0x364   :  { %v15696_v21 = vpop.permute.xlu0 %700  ;;  %v679_v22 = vpop.permute.xlu1 %678 }
 0x365   :  { %v710_v24 = vsel %vm17835_vm3, %v699_v20, %v15696_v21  ;;  %v691_v28 = vsel %vm690_vm2, %v679_v22, %v681_v15 }
 0x366   :  { %v835_v25 = vsel %vm804_vm1, %v692_v23, %v710_v24 }
 0x367   :  { %932 = vmatprep.subr.bf16.mxu0 %v835_v25 }
 0x368   :  { %v697_v26 = vpop.permute.xlu0 %696  ;;  %v717_v27 = vpop.permute.xlu1 %716 }
 0x369   :  { %v709_v29 = vsel %vm17835_vm3, %v697_v26, %v699_v20 }
 0x36a   :  { %v831_v30 = vsel %vm804_vm1, %v691_v28, %v709_v29 }
 0x36b   :  { %933 = vmatpush1.bf16.msra.mxu0 %v831_v30 }
 0x36c   :  { %v15706_v31 = vpop.permute.xlu0 %718  ;;  %v735_v32 = vpop.permute.xlu1 %734 }
 0x36d   :  { %v728_v35 = vsel %vm17834_vm4, %v717_v27, %v15706_v31 }
 0x370   :  { %v15708_v33 = vpop.permute.xlu0 %736  ;;  %v715_v34 = vpop.permute.xlu1 %714 }
 0x371   :  { %v746_v36 = vsel %vm744_vm5, %v735_v32, %v15708_v33  ;;  %v727_v40 = vsel %vm17834_vm4, %v715_v34, %v717_v27 }
 0x372   :  { %v859_v37 = vsel %vm804_vm1, %v728_v35, %v746_v36 }
 0x373   :  { %934 = vmatprep.subr.bf16.mxu0 %v859_v37 }
 0x374   :  { %v733_v38 = vpop.permute.xlu0 %732  ;;  %v753_v39 = vpop.permute.xlu1 %752 }
 0x375   :  { %v745_v41 = vsel %vm744_vm5, %v733_v38, %v735_v32 }
 0x376   :  { %v855_v42 = vsel %vm804_vm1, %v727_v40, %v745_v41 }
 0x377   :  { %935 = vmatpush1.bf16.msra.mxu0 %v855_v42 }
 0x378   :  { %v15718_v43 = vpop.permute.xlu0 %754  ;;  %v771_v44 = vpop.permute.xlu1 %770 }
 0x379   :  { %v764_v47 = vsel %vm17833_vm6, %v753_v39, %v15718_v43 }
 0x37c   :  { %v15720_v45 = vpop.permute.xlu0 %772  ;;  %v751_v46 = vpop.permute.xlu1 %750 }
 0x37d   :  { %v782_v48 = vsel %vm17832_vm7, %v771_v44, %v15720_v45  ;;  %v763_v52 = vsel %vm17833_vm6, %v751_v46, %v753_v39 }
 0x37e   :  { %v883_v49 = vsel %vm804_vm1, %v764_v47, %v782_v48 }
 0x37f   :  { %936 = vmatprep.subr.bf16.mxu0 %v883_v49 }
 0x380   :  { %v769_v50 = vpop.permute.xlu0 %768  ;;  %v787_v51 = vpop.permute.xlu1 %786 }
 0x381   :  { %v781_v53 = vsel %vm17832_vm7, %v769_v50, %v771_v44 }
 0x382   :  { %v879_v54 = vsel %vm804_vm1, %v763_v52, %v781_v53 }
 0x383   :  { %937 = vmatpush1.bf16.msra.mxu0 %v879_v54 }
 0x384   :  { %v789_v55 = vpop.permute.xlu0 %788  ;;  %v15730_v56 = vpop.permute.xlu1 %790 }
 0x385   :  { %v800_v57 = vsel %vm17831_vm8, %v789_v55, %v15730_v56  ;;  %v799_v58 = vsel %vm17831_vm8, %v787_v51, %v789_v55 }
 0x386   :  { %11431 = vmatprep.subr.msk.bf16.mxu0 %vm804_vm1, %v800_v57  ;;  %v913_v60 = vsel %vm804_vm1, %v799_v58, 0 }
 0x387   :  { %939 = vmatpush1.bf16.msra.mxu0 %v913_v60 }
 0x388   :  { %v667_v61 = vpop.permute.xlu0 %666  ;;  %v669_v62 = vpop.permute.xlu1 %668 }
 0x389   :  { %v676_v63 = vsel %vm672_vm0, %v667_v61, %v669_v62  ;;  %v675_v0 = vsel %vm672_vm0, %v15686_v14, %v667_v61 }
 0x38a   :  { %v819_v1 = vsel %vm804_vm1, %v15630_v7, %v676_v63  ;;  %v815_v2 = vsel %vm804_vm1, %v15579_v4, %v675_v0  ;;  %11432 = vmatmul.mubr.msk.bf16.vlgmr.msra.gmra.mrb[0].mxu0 %vm908_vm9, %v15735_v59 }
 0x38b   :  { %971 = vmatprep.subr.bf16.mxu1 %v819_v1  ;;  %1044 = vmatprep.mubr.bf16.mxu0 %v17836_v6 }
 0x38c   :  { %v671_v3 = vpop.permute.xlu0 %670  ;;  %972 = vmatpush1.bf16.msra.mxu1 %v815_v2  ;;  %v685_v5 = vpop.permute.xlu1 %684 }
 0x38d   :  { %v677_v10 = vsel %vm672_vm0, %v669_v62, %v671_v3  ;;  %v827_v11 = vsel %vm804_vm1, %v15638_v9, %v671_v3  ;;  %v693_v18 = vsel %vm690_vm2, %v15694_v19, %v685_v5  ;;  %v1071_v3 = vlaneseq }
 0x38e   :  { %1012 = vmatprep.subr.bf16.mxu0 %v827_v11  ;;  %v823_v7 = vsel %vm804_vm1, %v15632_v8, %v677_v10 }
 0x38f   :  { %1013 = vmatpush1.bf16.msra.mxu0 %v823_v7  ;;  %v15804_v10 = vshrl.u32 %v1071_v3, 7  ;;  %v15809_v7 = vld [vmem:[#allocation30] sm:$0x3f] }
 0x390   :  { %v687_v4 = vpop.permute.xlu0 %686  ;;  %v703_v12 = vpop.permute.xlu1 %702 }
 0x391   :  { %v711_v13 = vsel %vm17835_vm3, %v15696_v21, %v703_v12  ;;  %v694_v16 = vsel %vm690_vm2, %v685_v5, %v687_v4  ;;  %17898 = vst [vmem:[#allocation107_spill] sm:$0xff] %v15804_v10 }
 0x392   :  { %v839_v8 = vsel %vm804_vm1, %v693_v18, %v711_v13 }
 0x394   :  { %v705_v14 = vpop.permute.xlu0 %704  ;;  %v689_v15 = vpop.permute.xlu1 %688 }
 0x395   :  { %v712_v17 = vsel %vm17835_vm3, %v703_v12, %v705_v14  ;;  %v695_v23 = vsel %vm690_vm2, %v687_v4, %v689_v15 }
 0x396   :  { %v843_v9 = vsel %vm804_vm1, %v694_v16, %v712_v17 }
 0x397   :  { %973 = vmatprep.subr.bf16.mxu1 %v843_v9 }
 0x398   :  { %v707_v20 = vpop.permute.xlu0 %706  ;;  %974 = vmatpush1.bf16.msra.mxu1 %v839_v8  ;;  %v721_v22 = vpop.permute.xlu1 %720 }
 0x399   :  { %v713_v21 = vsel %vm17835_vm3, %v705_v14, %v707_v20  ;;  %v851_v24 = vsel %vm804_vm1, %v689_v15, %v707_v20  ;;  %v729_v34 = vsel %vm17834_vm4, %v15706_v31, %v721_v22  ;;  %v15817_v15 = vsub.s32 0, %v15804_v10 }
 0x39a   :  { %1014 = vmatprep.subr.bf16.mxu0 %v851_v24  ;;  %v847_v25 = vsel %vm804_vm1, %v695_v23, %v713_v21 }
 0x39b   :  { %1015 = vmatpush1.bf16.msra.mxu0 %v847_v25 }
 0x39c   :  { %v723_v26 = vpop.permute.xlu0 %722  ;;  %v739_v19 = vpop.permute.xlu1 %738 }
 0x39d   :  { %v747_v27 = vsel %vm744_vm5, %v15708_v33, %v739_v19  ;;  %v730_v30 = vsel %vm17834_vm4, %v721_v22, %v723_v26 }
 0x39e   :  { %v863_v36 = vsel %vm804_vm1, %v729_v34, %v747_v27 }
 0x3a0   :  { %v741_v28 = vpop.permute.xlu0 %740  ;;  %v725_v29 = vpop.permute.xlu1 %724 }
 0x3a1   :  { %v748_v32 = vsel %vm744_vm5, %v739_v19, %v741_v28  ;;  %v731_v39 = vsel %vm17834_vm4, %v723_v26, %v725_v29 }
 0x3a2   :  { %v867_v35 = vsel %vm804_vm1, %v730_v30, %v748_v32 }
 0x3a3   :  { %975 = vmatprep.subr.bf16.mxu1 %v867_v35 }
 0x3a4   :  { %v743_v37 = vpop.permute.xlu0 %742  ;;  %976 = vmatpush1.bf16.msra.mxu1 %v863_v36  ;;  %v757_v38 = vpop.permute.xlu1 %756 }
 0x3a5   :  { %v749_v33 = vsel %vm744_vm5, %v741_v28, %v743_v37  ;;  %v875_v40 = vsel %vm804_vm1, %v725_v29, %v743_v37  ;;  %v765_v50 = vsel %vm17833_vm6, %v15718_v43, %v757_v38 }
 0x3a6   :  { %1016 = vmatprep.subr.bf16.mxu0 %v875_v40  ;;  %v871_v41 = vsel %vm804_vm1, %v731_v39, %v749_v33 }
 0x3a7   :  { %1017 = vmatpush1.bf16.msra.mxu0 %v871_v41 }
 0x3a8   :  { %v759_v42 = vpop.permute.xlu0 %758  ;;  %v775_v31 = vpop.permute.xlu1 %774 }
 0x3a9   :  { %v783_v44 = vsel %vm17832_vm7, %v15720_v45, %v775_v31  ;;  %v766_v48 = vsel %vm17833_vm6, %v757_v38, %v759_v42 }
 0x3aa   :  { %v887_v52 = vsel %vm804_vm1, %v765_v50, %v783_v44 }
 0x3ac   :  { %v777_v46 = vpop.permute.xlu0 %776  ;;  %v761_v47 = vpop.permute.xlu1 %760 }
 0x3ad   :  { %v784_v49 = vsel %vm17832_vm7, %v775_v31, %v777_v46  ;;  %v767_v55 = vsel %vm17833_vm6, %v759_v42, %v761_v47 }
 0x3ae   :  { %v891_v51 = vsel %vm804_vm1, %v766_v48, %v784_v49 }
 0x3af   :  { %977 = vmatprep.subr.bf16.mxu1 %v891_v51 }
 0x3b0   :  { %v779_v53 = vpop.permute.xlu0 %778  ;;  %978 = vmatpush1.bf16.msra.mxu1 %v887_v52  ;;  %v793_v54 = vpop.permute.xlu1 %792 }
 0x3b1   :  { %v785_v45 = vsel %vm17832_vm7, %v777_v46, %v779_v53  ;;  %v899_v57 = vsel %vm804_vm1, %v761_v47, %v779_v53  ;;  %v801_v43 = vsel %vm17831_vm8, %v15730_v56, %v793_v54  ;;  %v15036_v56 = vmov 1966171168  }
 0x3b2   :  { %1018 = vmatprep.subr.bf16.mxu0 %v899_v57  ;;  %v895_v58 = vsel %vm804_vm1, %v767_v55, %v785_v45  ;;  %v919_v0 = vsel %vm804_vm1, %v801_v43, 0  ;;  %v1069_v2 = vunpack.c.l.s4 %v15036_v56  ;;  %v1067_v45 = vcombine.high %v15809_v7, %v15809_v7 }
 0x3b3   :  { %1019 = vmatpush1.bf16.msra.mxu0 %v895_v58 }
 0x3b4   :  { %v795_v60 = vpop.permute.xlu0 %794  ;;  %v797_v61 = vpop.permute.xlu1 %796  ;;  %v1070_v5 = vunpack.c.0.s8 %v1069_v2 }
 0x3b5   :  { %v803_v62 = vsel %vm17831_vm8, %v795_v60, %v797_v61  ;;  %v802_v63 = vsel %vm17831_vm8, %v793_v54, %v795_v60  ;;  %11435 = vmatprep.subr.msk.bf16.mxu0 %vm804_vm1, %v797_v61 }
 0x3b6   :  { %11433 = vmatprep.subr.msk.bf16.mxu1 %vm804_vm1, %v802_v63  ;;  %v925_v1 = vsel %vm804_vm1, %v803_v62, 0  ;;  %v15807_v11 = vsub.s32 %v1070_v5, %v15804_v10 }
 0x3b7   :  { %980 = vmatpush1.bf16.msra.mxu1 %v919_v0  ;;  %1021 = vmatpush1.bf16.msra.mxu0 %v925_v1 }
 0x3b8   :  { %v1074_v4 = vrot.slane %v15809_v7, %v15807_v11  ;;  %v1081_v57 = vrot.slane %v1067_v45, %v15807_v11 }
 0x3ba   :  { %11434 = vmatmul.mubr.msk.bf16.vlgmr.msra.gmra.mrb[0].mxu1 %vm908_vm9, %v15735_v59  ;;  %11436 = vmatmul.mubr.msk.bf16.vlgmr.msra.gmra.mrb[4].mxu0 %vm908_vm9, %v15735_v59  ;;  %v1090_v59 = vrot.slane %v1074_v4, %v15807_v11  ;;  %v1082_v12 = vcombine.high %v1074_v4, %v1074_v4  ;;  %v1097_v60 = vrot.slane %v1081_v57, %v15807_v11 }
 0x3bb   :  { %1466 = vmatprep.mubr.bf16.mxu1 %v17836_v6  ;;  %1507 = vmatprep.mubr.bf16.mxu0 %v17836_v6  ;;  %v1083_v3 = vcombine.high %v1081_v57, %v1081_v57 }
 0x3bc   :  { %v1115_v14 = vpack.i.b16 %v1090_v59, %v1090_v59  ;;  %v1104_v9 = vrot.slane %v1082_v12, %v15807_v11  ;;  %v1112_v30 = vcombine.high %v1090_v59, %v1090_v59  ;;  %v1143_v62 = vpack.i.b16 %v1097_v60, %v1097_v60 }
 0x3bd   :  { %v1111_v7 = vrot.slane %v1083_v3, %v15807_v11 }
 0x3be   :  { %v15823_v23 = vrot.slane %v1115_v14, %v15817_v15  ;;  %v1122_v26 = vpack.i.b16 %v1104_v9, %v1104_v9  ;;  %v1113_v32 = vcombine.high %v1104_v9, %v1104_v9  ;;  %v1129_v34 = vpack.i.b16 %v1112_v30, %v1112_v30 }
 0x3bf   :  { %v15890_v1 = vrot.slane %v1143_v62, %v15817_v15  ;;  %v1150_v59 = vpack.i.b16 %v1111_v7, %v1111_v7 }
 0x3c0   :  { %v15829_v28 = vrot.slane %v1122_v26, %v15817_v15  ;;  %v1136_v37 = vpack.i.b16 %v1113_v32, %v1113_v32  ;;  %v15843_v44 = vrot.slane %v1129_v34, %v15817_v15 }
 0x3c1   :  { %17899 = vst [vmem:[#allocation108_spill] sm:$0xff] %v15890_v1  ;;  %v15921_v14 = vrot.slane %v1150_v59, %v15817_v15 }
 0x3c2   :  { %v15846_v49 = vrot.slane %v1136_v37, %v15817_v15 }
 0x3c3   :  { %17901 = vst [vmem:[#allocation109_spill] sm:$0xff] %v15921_v14 }
 0x3c5   :  { %v15814_v13 = vpop.permute.xlu0 %905 }
 0x45d   :  { %v964_v16 = vpop.f32.mrb[0].mxu0 }
 0x45e   :  { %v965_v17 = vadd.f32 %v964_v16, %v15814_v13  ;;  %v966_v18 = vpop.f32.mrb[1].mxu0 }
 0x45f   :  { %v967_v8 = vadd.f32 %v966_v18, %v15814_v13  ;;  %v968_v20 = vpop.f32.mrb[2].mxu0 }
 0x460   :  { %v1053_v22 = vmax.f32 %v965_v17, 0.0  ;;  %v969_v21 = vpop.f32.mrb[3].mxu0  ;;  %v1407_v17 = vld [vmem:[%s17900_s21] sm:$0xff]  ;;  %s15051_s21 = smov 125  }
 0x461   :  { %v1054_v25 = vmax.f32 %v967_v8, 0.0 }
 0x462   :  { %v1059_v24 = vpack.c.bf16 %v1053_v22, %v1053_v22 }
 0x463   :  { %v1060_v27 = vpack.c.bf16 %v1054_v25, %v1054_v25 }
 0x464   :  { %v15826_v19 = vmul.bf16 %v15823_v23, %v1059_v24 }
 0x465   :  { %v15834_v29 = vmul.bf16 %v15829_v28, %v1060_v27 }
 0x466   :  { %1191 = vrot.lane.b32.xlu1 %v15826_v19, %s15028_s8  ;;  %v1168_v54 = vrot.slane %v15826_v19, 4 }
 0x467   :  { %v1169_v58 = vrot.slane %v15834_v29, 4 }
 0x46a   :  { %1225 = vrot.lane.b32.xlu1 %v15826_v19, %s15030_s10 }
 0x46e   :  { %1193 = vrot.lane.b32.xlu1 %v15834_v29, %s15028_s8 }
 0x48d   :  { %v1005_v35 = vpop.f32.mrb[0].mxu1  ;;  %v1046_v36 = vpop.f32.mrb[4].mxu0 }
 0x48e   :  { %v1006_v38 = vadd.f32 %v1005_v35, %v15814_v13  ;;  %v1007_v39 = vpop.f32.mrb[1].mxu1  ;;  %v1048_v33 = vpop.f32.mrb[5].mxu0  ;;  %v1047_v43 = vadd.f32 %v1046_v36, %v15814_v13 }
 0x48f   :  { %v1008_v40 = vadd.f32 %v1007_v39, %v15814_v13  ;;  %v1009_v41 = vpop.f32.mrb[2].mxu1  ;;  %v1050_v42 = vpop.f32.mrb[6].mxu0  ;;  %v1049_v5 = vadd.f32 %v1048_v33, %v15814_v13 }
 0x490   :  { %v1055_v31 = vmax.f32 %v1006_v38, 0.0  ;;  %v1010_v46 = vpop.f32.mrb[3].mxu1  ;;  %v1051_v47 = vpop.f32.mrb[7].mxu0  ;;  %v1057_v61 = vmax.f32 %v1047_v43, 0.0 }
 0x491   :  { %v1056_v48 = vmax.f32 %v1008_v40, 0.0  ;;  %v1058_v4 = vmax.f32 %v1049_v5, 0.0 }
 0x492   :  { %v1061_v50 = vpack.c.bf16 %v1055_v31, %v1055_v31  ;;  %v1063_v0 = vpack.c.bf16 %v1057_v61, %v1057_v61 }
 0x493   :  { %v1062_v51 = vpack.c.bf16 %v1056_v48, %v1056_v48  ;;  %v1064_v12 = vpack.c.bf16 %v1058_v4, %v1058_v4 }
 0x494   :  { %v15849_v52 = vmul.bf16 %v15843_v44, %v1061_v50  ;;  %v15895_v56 = vmul.bf16 %v15890_v1, %v1063_v0 }
 0x495   :  { %v15852_v53 = vmul.bf16 %v15846_v49, %v1062_v51  ;;  %v15928_v13 = vmul.bf16 %v15921_v14, %v1064_v12 }
 0x496   :  { %1195 = vrot.lane.b32.xlu0 %v15849_v52, %s15028_s8  ;;  %v1170_v55 = vrot.slane %v15849_v52, 4  ;;  %v1172_v2 = vrot.slane %v15895_v56, 4 }
 0x497   :  { %1197 = vrot.lane.b32.xlu1 %v15852_v53, %s15028_s8  ;;  %v1171_v63 = vrot.slane %v15852_v53, 4  ;;  %v1173_v16 = vrot.slane %v15928_v13, 4 }
 0x49a   :  { %1229 = vrot.lane.b32.xlu0 %v15849_v52, %s15030_s10 }
 0x49b   :  { %1227 = vrot.lane.b32.xlu1 %v15834_v29, %s15030_s10 }
 0x49e   :  { %1263 = vrot.lane.b32.xlu0 %v15849_v52, %s15032_s18 }
 0x49f   :  { %1231 = vrot.lane.b32.xlu1 %v15852_v53, %s15030_s10 }
 0x4a2   :  { %1174 = vrot.lane.b32.xlu0 %v1168_v54, %s15027_s14 }
 0x4a3   :  { %1261 = vrot.lane.b32.xlu1 %v15834_v29, %s15032_s18 }
 0x4a6   :  { %1212 = vrot.lane.b32.xlu0 %v1170_v55, %s15029_s12 }
 0x4a7   :  { %1265 = vrot.lane.b32.xlu1 %v15852_v53, %s15032_s18 }
 0x4aa   :  { %1208 = vrot.lane.b32.xlu0 %v1168_v54, %s15029_s12 }
 0x4ab   :  { %1178 = vrot.lane.b32.xlu1 %v1170_v55, %s15027_s14 }
 0x4ae   :  { %1246 = vrot.lane.b32.xlu0 %v1170_v55, %s15031_s24 }
 0x4af   :  { %1176 = vrot.lane.b32.xlu1 %v1169_v58, %s15027_s14 }
 0x4b2   :  { %1242 = vrot.lane.b32.xlu0 %v1168_v54, %s15031_s24 }
 0x4b3   :  { %1210 = vrot.lane.b32.xlu1 %v1169_v58, %s15029_s12 }
 0x4b6   :  { %1280 = vrot.lane.b32.xlu0 %v1170_v55, %s15033_s27 }
 0x4b7   :  { %1214 = vrot.lane.b32.xlu1 %v1171_v63, %s15029_s12 }
 0x4ba   :  { %1180 = vrot.lane.b32.xlu0 %v1171_v63, %s15027_s14 }
 0x4bb   :  { %1244 = vrot.lane.b32.xlu1 %v1169_v58, %s15031_s24 }
 0x4be   :  { %1199 = vrot.lane.b32.xlu0 %v15895_v56, %s15028_s8 }
 0x4bf   :  { %1248 = vrot.lane.b32.xlu1 %v1171_v63, %s15031_s24 }
 0x4c2   :  { %1233 = vrot.lane.b32.xlu0 %v15895_v56, %s15030_s10 }
 0x4c3   :  { %1278 = vrot.lane.b32.xlu1 %v1169_v58, %s15033_s27 }
 0x4c6   :  { %1267 = vrot.lane.b32.xlu0 %v15895_v56, %s15032_s18 }
 0x4c7   :  { %1182 = vrot.lane.b32.xlu1 %v1172_v2, %s15027_s14 }
 0x4ca   :  { %1276 = vrot.lane.b32.xlu0 %v1168_v54, %s15033_s27 }
 0x4cb   :  { %1282 = vrot.lane.b32.xlu1 %v1171_v63, %s15033_s27 }
 0x4ce   :  { %1216 = vrot.lane.b32.xlu0 %v1172_v2, %s15029_s12 }
 0x4cf   :  { %1259 = vrot.lane.b32.xlu1 %v15826_v19, %s15032_s18 }
 0x4d2   :  { %1250 = vrot.lane.b32.xlu0 %v1172_v2, %s15031_s24 }
 0x4d3   :  { %1293 = vrot.lane.b32.xlu1 %v15826_v19, %s15034_s22 }
 0x4d6   :  { %1284 = vrot.lane.b32.xlu0 %v1172_v2, %s15033_s27 }
 0x4d7   :  { %1297 = vrot.lane.b32.xlu1 %v15849_v52, %s15034_s22 }
 0x4d8   :  { %v1192_v18 = vpop.permute.xlu1 %1191 }
 0x4da   :  { %1295 = vrot.lane.b32.xlu0 %v15834_v29, %s15034_s22 }
 0x4db   :  { %1301 = vrot.lane.b32.xlu1 %v15895_v56, %s15034_s22 }
 0x4dc   :  { %v1226_v9 = vpop.permute.xlu1 %1225 }
 0x4de   :  { %1299 = vrot.lane.b32.xlu0 %v15852_v53, %s15034_s22 }
 0x4df   :  { %1201 = vrot.lane.b32.xlu1 %v15928_v13, %s15028_s8 }
 0x4e0   :  { %v1194_v8 = vpop.permute.xlu1 %1193 }
 0x4e1   :  { %v1203_v46 = vsel %vm690_vm2, %v1192_v18, %v1194_v8 }
 0x4e2   :  { %1184 = vrot.lane.b32.xlu0 %v1173_v16, %s15027_s14 }
 0x4e3   :  { %1235 = vrot.lane.b32.xlu1 %v15928_v13, %s15030_s10 }
 0x4e6   :  { %1218 = vrot.lane.b32.xlu0 %v1173_v16, %s15029_s12 }
 0x4e7   :  { %1269 = vrot.lane.b32.xlu1 %v15928_v13, %s15032_s18 }
 0x4ea   :  { %1252 = vrot.lane.b32.xlu0 %v1173_v16, %s15031_s24 }
 0x4eb   :  { %1303 = vrot.lane.b32.xlu1 %v15928_v13, %s15034_s22 }
 0x4ee   :  { %1286 = vrot.lane.b32.xlu0 %v1173_v16, %s15033_s27 }
 0x4f2   :  { %1410 = vperm.xlu0 %13314, %v1407_v17  }
 0x508   :  { %v15946_v20 = vpop.permute.xlu0 %1195 }
 0x509   :  { %v15948_v22 = vpop.permute.xlu1 %1197  ;;  %v1204_v47 = vsel %vm690_vm2, %v1194_v8, %v15946_v20 }
 0x50c   :  { %v15950_v21 = vpop.permute.xlu0 %1229 }
 0x50d   :  { %v1228_v24 = vpop.permute.xlu1 %1227 }
 0x50e   :  { %v1237_v57 = vsel %vm17834_vm4, %v1226_v9, %v1228_v24  ;;  %v1238_v58 = vsel %vm17834_vm4, %v1228_v24, %v15950_v21 }
 0x510   :  { %v15952_v25 = vpop.permute.xlu0 %1263 }
 0x511   :  { %v15954_v26 = vpop.permute.xlu1 %1231 }
 0x514   :  { %v1175_v27 = vpop.permute.xlu0 %1174 }
 0x515   :  { %v1262_v30 = vpop.permute.xlu1 %1261 }
 0x516   :  { %v1272_v5 = vsel %vm17833_vm6, %v1262_v30, %v15952_v25 }
 0x518   :  { %v1213_v32 = vpop.permute.xlu0 %1212 }
 0x519   :  { %v15956_v34 = vpop.permute.xlu1 %1265 }
 0x51c   :  { %v1209_v35 = vpop.permute.xlu0 %1208 }
 0x51d   :  { %v1179_v36 = vpop.permute.xlu1 %1178 }
 0x520   :  { %v1247_v37 = vpop.permute.xlu0 %1246 }
 0x521   :  { %v1177_v38 = vpop.permute.xlu1 %1176 }
 0x522   :  { %v1186_v39 = vsel %vm672_vm0, %v1175_v27, %v1177_v38  ;;  %v1187_v33 = vsel %vm672_vm0, %v1177_v38, %v1179_v36 }
 0x523   :  { %v1316_v40 = vsel %vm804_vm1, %v15834_v29, %v1187_v33  ;;  %v1312_v41 = vsel %vm804_vm1, %v15826_v19, %v1186_v39 }
 0x524   :  { %v1243_v42 = vpop.permute.xlu0 %1242  ;;  %1434 = vmatprep.subr.bf16.mxu1 %v1316_v40 }
 0x525   :  { %1435 = vmatpush1.bf16.msra.mxu1 %v1312_v41  ;;  %v1211_v31 = vpop.permute.xlu1 %1210 }
 0x526   :  { %v1220_v48 = vsel %vm17835_vm3, %v1209_v35, %v1211_v31  ;;  %v1221_v50 = vsel %vm17835_vm3, %v1211_v31, %v1213_v32 }
 0x527   :  { %v1340_v51 = vsel %vm804_vm1, %v1204_v47, %v1221_v50  ;;  %v1336_v29 = vsel %vm804_vm1, %v1203_v46, %v1220_v48 }
 0x528   :  { %v1281_v54 = vpop.permute.xlu0 %1280  ;;  %1436 = vmatprep.subr.bf16.mxu1 %v1340_v51 }
 0x529   :  { %1437 = vmatpush1.bf16.msra.mxu1 %v1336_v29  ;;  %v1215_v19 = vpop.permute.xlu1 %1214 }
 0x52a   :  { %v1222_v27 = vsel %vm17835_vm3, %v1213_v32, %v1215_v19 }
 0x52c   :  { %v1181_v55 = vpop.permute.xlu0 %1180 }
 0x52d   :  { %v1245_v45 = vpop.permute.xlu1 %1244  ;;  %v1188_v12 = vsel %vm672_vm0, %v1179_v36, %v1181_v55 }
 0x52e   :  { %v1254_v43 = vsel %vm744_vm5, %v1243_v42, %v1245_v45  ;;  %v1255_v60 = vsel %vm744_vm5, %v1245_v45, %v1247_v37  ;;  %v1320_v8 = vsel %vm804_vm1, %v15849_v52, %v1188_v12 }
 0x52f   :  { %v1364_v61 = vsel %vm804_vm1, %v1238_v58, %v1255_v60  ;;  %v1360_v62 = vsel %vm804_vm1, %v1237_v57, %v1254_v43  ;;  %v1406_v60 = vld [vmem:[#allocation4] sm:$0xf] }
 0x530   :  { %v15978_v63 = vpop.permute.xlu0 %1199  ;;  %1438 = vmatprep.subr.bf16.mxu1 %v1364_v61 }
 0x531   :  { %1439 = vmatpush1.bf16.msra.mxu1 %v1360_v62  ;;  %v1249_v0 = vpop.permute.xlu1 %1248  ;;  %v1206_v36 = vsel %vm690_vm2, %v15948_v22, %v15978_v63 }
 0x532   :  { %v1256_v42 = vsel %vm744_vm5, %v1247_v37, %v1249_v0 }
 0x534   :  { %v15980_v2 = vpop.permute.xlu0 %1233 }
 0x535   :  { %v1279_v3 = vpop.permute.xlu1 %1278 }
 0x536   :  { %v1289_v7 = vsel %vm17832_vm7, %v1279_v3, %v1281_v54 }
 0x537   :  { %v1388_v4 = vsel %vm804_vm1, %v1272_v5, %v1289_v7 }
 0x538   :  { %v15986_v59 = vpop.permute.xlu0 %1267  ;;  %1440 = vmatprep.subr.bf16.mxu1 %v1388_v4 }
 0x539   :  { %v1183_v16 = vpop.permute.xlu1 %1182  ;;  %v1274_v51 = vsel %vm17833_vm6, %v15956_v34, %v15986_v59 }
 0x53a   :  { %v1189_v17 = vsel %vm672_vm0, %v1181_v55, %v1183_v16 }
 0x53b   :  { %v1324_v18 = vsel %vm804_vm1, %v15852_v53, %v1189_v17  ;;  %v1205_v53 = vsel %vm690_vm2, %v15946_v20, %v15948_v22  ;;  %v1240_v20 = vsel %vm17834_vm4, %v15954_v26, %v15980_v2 }
 0x53c   :  { %v1277_v9 = vpop.permute.xlu0 %1276  ;;  %1475 = vmatprep.subr.bf16.mxu0 %v1324_v18  ;;  %v1344_v41 = vsel %vm804_vm1, %v1205_v53, %v1222_v27 }
 0x53d   :  { %1476 = vmatpush1.bf16.msra.mxu0 %v1320_v8  ;;  %v1283_v24 = vpop.permute.xlu1 %1282  ;;  %v1288_v33 = vsel %vm17832_vm7, %v1277_v9, %v1279_v3 }
 0x53e   :  { %v1290_v37 = vsel %vm17832_vm7, %v1281_v54, %v1283_v24 }
 0x540   :  { %v1217_v35 = vpop.permute.xlu0 %1216 }
 0x541   :  { %v1223_v38 = vsel %vm17835_vm3, %v1215_v19, %v1217_v35  ;;  %v1260_v39 = vpop.permute.xlu1 %1259 }
 0x542   :  { %v1271_v52 = vsel %vm17833_vm6, %v1260_v39, %v1262_v30  ;;  %v1348_v40 = vsel %vm804_vm1, %v1206_v36, %v1223_v38  ;;  %v1239_v30 = vsel %vm17834_vm4, %v15950_v21, %v15954_v26  ;;  %v1273_v21 = vsel %vm17833_vm6, %v15952_v25, %v15956_v34 }
 0x543   :  { %1477 = vmatprep.subr.bf16.mxu0 %v1348_v40  ;;  %v1384_v32 = vsel %vm804_vm1, %v1271_v52, %v1288_v33  ;;  %v1368_v48 = vsel %vm804_vm1, %v1239_v30, %v1256_v42  ;;  %v1392_v55 = vsel %vm804_vm1, %v1273_v21, %v1290_v37 }
 0x544   :  { %v1251_v31 = vpop.permute.xlu0 %1250  ;;  %1441 = vmatpush1.bf16.msra.mxu1 %v1384_v32  ;;  %1478 = vmatpush1.bf16.msra.mxu0 %v1344_v41 }
 0x545   :  { %v1257_v22 = vsel %vm744_vm5, %v1249_v0, %v1251_v31  ;;  %v1294_v46 = vpop.permute.xlu1 %1293 }
 0x546   :  { %v1372_v47 = vsel %vm804_vm1, %v1240_v20, %v1257_v22 }
 0x547   :  { %1479 = vmatprep.subr.bf16.mxu0 %v1372_v47 }
 0x548   :  { %v1285_v50 = vpop.permute.xlu0 %1284  ;;  %1480 = vmatpush1.bf16.msra.mxu0 %v1368_v48 }
 0x549   :  { %v1291_v29 = vsel %vm17832_vm7, %v1283_v24, %v1285_v50  ;;  %v1298_v19 = vpop.permute.xlu1 %1297 }
 0x54a   :  { %v1396_v26 = vsel %vm804_vm1, %v1274_v51, %v1291_v29 }
 0x54b   :  { %1481 = vmatprep.subr.bf16.mxu0 %v1396_v26 }
 0x54c   :  { %v1296_v45 = vpop.permute.xlu0 %1295  ;;  %1482 = vmatpush1.bf16.msra.mxu0 %v1392_v55 }
 0x54d   :  { %v1305_v54 = vsel %vm17831_vm8, %v1294_v46, %v1296_v45  ;;  %v1302_v57 = vpop.permute.xlu1 %1301  ;;  %v1306_v58 = vsel %vm17831_vm8, %v1296_v45, %v1298_v19  ;;  %v13428_v45 = vld [vmem:[#allocation37] ss:$8 sps:$4 sm:$0xff]  }
 0x54e   :  { %11437 = vmatprep.subr.msk.bf16.mxu1 %vm804_vm1, %v1306_v58  ;;  %v1417_v43 = vsel %vm804_vm1, %v1305_v54, 0  ;;  %v13430_v54 = vld [vmem:[#allocation37 + $0x4] ss:$8 sps:$4 sm:$0xff]   ;;  %v13431_v58 = vld [vmem:[#allocation37 + $0x10] ss:$8 sps:$4 sm:$0xff]  }
 0x54f   :  { %1443 = vmatpush1.bf16.msra.mxu1 %v1417_v43  ;;  %v13436_v43 = vld [vmem:[#allocation37 + $0x24] ss:$8 sps:$4 sm:$0xff]  }
 0x550   :  { %v1300_v61 = vpop.permute.xlu0 %1299 }
 0x551   :  { %v1307_v25 = vsel %vm17831_vm8, %v1298_v19, %v1300_v61  ;;  %v1202_v34 = vpop.permute.xlu1 %1201  ;;  %v1308_v62 = vsel %vm17831_vm8, %v1300_v61, %v1302_v57  ;;  %v13439_v61 = vld [vmem:[#allocation37 + $0x34] ss:$8 sps:$4 sm:$0xff]  }
 0x552   :  { %11438 = vmatmul.mubr.msk.bf16.vlgmr.msra.gmra.mrb[4].mxu1 %vm908_vm9, %v1406_v60  ;;  %11439 = vmatprep.subr.msk.bf16.mxu0 %vm804_vm1, %v1308_v62  ;;  %v1423_v0 = vsel %vm804_vm1, %v1307_v25, 0  ;;  %v1207_v18 = vsel %vm690_vm2, %v15978_v63, %v1202_v34  ;;  %v13437_v25 = vld [vmem:[#allocation37 + $0x30] ss:$8 sps:$4 sm:$0xff]  }
 0x553   :  { %1484 = vmatpush1.bf16.msra.mxu0 %v1423_v0  ;;  %1548 = vmatprep.mubr.bf16.mxu1 %v17836_v6 }
 0x554   :  { %v1185_v3 = vpop.permute.xlu0 %1184  ;;  %2128 = vmatprep.subr.bf16.mxu0 %v13430_v54 }
 0x555   :  { %v1190_v5 = vsel %vm672_vm0, %v1183_v16, %v1185_v3  ;;  %v1236_v7 = vpop.permute.xlu1 %1235  ;;  %v1332_v4 = vsel %vm804_vm1, %v15928_v13, %v1185_v3  ;;  %v13440_v3 = vld [vmem:[#allocation37 + $0x40] ss:$8 sps:$4 sm:$0xff]  }
 0x556   :  { %11440 = vmatmul.mubr.msk.bf16.vlgmr.msra.gmra.mrb[8].mxu0 %vm908_vm9, %v1406_v60  ;;  %1516 = vmatprep.subr.bf16.mxu1 %v1332_v4  ;;  %v1328_v12 = vsel %vm804_vm1, %v15895_v56, %v1190_v5  ;;  %v1241_v27 = vsel %vm17834_vm4, %v15980_v2, %v1236_v7  ;;  %vm3226_vm4 = vcmask 1040384  }
 0x557   :  { %1517 = vmatpush1.bf16.msra.mxu1 %v1328_v12  ;;  %2129 = vmatpush1.bf16.msra.mxu0 %v13428_v45  ;;  %v13443_v12 = vld [vmem:[#allocation37 + $0x50] ss:$8 sps:$4 sm:$0xff]  }
 0x558   :  { %v1219_v17 = vpop.permute.xlu0 %1218 }
 0x559   :  { %v1224_v9 = vsel %vm17835_vm3, %v1217_v35, %v1219_v17  ;;  %v1356_v8 = vsel %vm804_vm1, %v1202_v34, %v1219_v17  ;;  %v1270_v16 = vpop.permute.xlu1 %1269  ;;  %v13442_v34 = vld [vmem:[#allocation37 + $0x44] ss:$8 sps:$4 sm:$0xff]  }
 0x55a   :  { %1518 = vmatprep.subr.bf16.mxu1 %v1356_v8  ;;  %v1352_v24 = vsel %vm804_vm1, %v1207_v18, %v1224_v9  ;;  %v1275_v39 = vsel %vm17833_vm6, %v15986_v59, %v1270_v16  ;;  %v13448_v17 = vld [vmem:[#allocation37 + $0x64] ss:$8 sps:$4 sm:$0xff]   ;;  %v13446_v18 = vld [vmem:[#allocation37 + $0x60] ss:$8 sps:$4 sm:$0xff]   ;;  %v13451_v9 = vld [vmem:[#allocation37 + $0x74] ss:$8 sps:$4 sm:$0xff]  }
 0x55b   :  { %1519 = vmatpush1.bf16.msra.mxu1 %v1352_v24  ;;  %v13449_v8 = vld [vmem:[#allocation37 + $0x70] ss:$8 sps:$4 sm:$0xff]   ;;  %v13452_v24 = vld [vmem:[#allocation37 + $0x80] ss:$8 sps:$4 sm:$0xff]   ;;  %vm2730_vm6 = vcmask 1046528  }
 0x55c   :  { %v1253_v13 = vpop.permute.xlu0 %1252 }
 0x55d   :  { %v1258_v56 = vsel %vm744_vm5, %v1251_v31, %v1253_v13  ;;  %v1380_v36 = vsel %vm804_vm1, %v1236_v7, %v1253_v13  ;;  %v1304_v35 = vpop.permute.xlu1 %1303  ;;  %v13445_v7 = vld [vmem:[#allocation37 + $0x54] ss:$8 sps:$4 sm:$0xff]  }
 0x55e   :  { %1520 = vmatprep.subr.bf16.mxu1 %v1380_v36  ;;  %v1376_v63 = vsel %vm804_vm1, %v1241_v27, %v1258_v56  ;;  %v1309_v52 = vsel %vm17831_vm8, %v1302_v57, %v1304_v35  ;;  %v13433_v57 = vld [vmem:[#allocation37 + $0x14] ss:$8 sps:$4 sm:$0xff]   ;;  %v13455_v27 = vld [vmem:[#allocation37 + $0x90] ss:$8 sps:$4 sm:$0xff]   ;;  %v13460_v56 = vld [vmem:[#allocation37 + $0xa4] ss:$8 sps:$4 sm:$0xff]  }
 0x55f   :  { %1521 = vmatpush1.bf16.msra.mxu1 %v1376_v63  ;;  %v1429_v40 = vsel %vm804_vm1, %v1309_v52, 0  ;;  %2130 = vmatprep.subr.bf16.mxu0 %v13433_v57  ;;  %v13457_v13 = vld [vmem:[#allocation37 + $0x94] ss:$8 sps:$4 sm:$0xff]   ;;  %v13458_v36 = vld [vmem:[#allocation37 + $0xa0] ss:$8 sps:$4 sm:$0xff]   ;;  %vm2532_vm8 = vcmask 130048  }
 0x560   :  { %v1287_v38 = vpop.permute.xlu0 %1286  ;;  %2131 = vmatpush1.bf16.msra.mxu0 %v13431_v58  ;;  %v13463_v63 = vld [vmem:[#allocation37 + $0xb4] ss:$8 sps:$4 sm:$0xff]   ;;  %v13470_v52 = vld [vmem:[#allocation37 + $0xe0] ss:$8 sps:$4 sm:$0xff]   ;;  %v13478_v58 = vld [vmem:[#allocation37 + $0x104] ss:$8 sps:$4 sm:$0xff]  }
 0x561   :  { %v1292_v53 = vsel %vm17832_vm7, %v1285_v50, %v1287_v38  ;;  %v1404_v33 = vsel %vm804_vm1, %v1270_v16, %v1287_v38  ;;  %2132 = vmatprep.subr.bf16.mxu0 %v13436_v43  ;;  %v13454_v16 = vld [vmem:[#allocation37 + $0x84] ss:$8 sps:$4 sm:$0xff]   ;;  %vm2729_vm7 = vcmask 1045504  }
 0x562   :  { %1522 = vmatprep.subr.bf16.mxu1 %v1404_v33  ;;  %v1400_v2 = vsel %vm804_vm1, %v1275_v39, %v1292_v53  ;;  %v13466_v38 = vld [vmem:[#allocation37 + $0xc4] ss:$8 sps:$4 sm:$0xff]   ;;  %v13464_v39 = vld [vmem:[#allocation37 + $0xc0] ss:$8 sps:$4 sm:$0xff]   ;;  %v13469_v53 = vld [vmem:[#allocation37 + $0xd4] ss:$8 sps:$4 sm:$0xff]  }
 0x563   :  { %1523 = vmatpush1.bf16.msra.mxu1 %v1400_v2  ;;  %v13467_v33 = vld [vmem:[#allocation37 + $0xd0] ss:$8 sps:$4 sm:$0xff]   ;;  %v13472_v2 = vld [vmem:[#allocation37 + $0xe4] ss:$8 sps:$4 sm:$0xff]  }
 0x564   :  { %11441 = vmatprep.subr.msk.bf16.mxu1 %vm804_vm1, %v1304_v35  ;;  %v13461_v35 = vld [vmem:[#allocation37 + $0xb0] ss:$8 sps:$4 sm:$0xff]  }
 0x567   :  { %1525 = vmatpush1.bf16.msra.mxu1 %v1429_v40  ;;  %v13475_v40 = vld [vmem:[#allocation37 + $0xf4] ss:$8 sps:$4 sm:$0xff]  }
 0x56a   :  { %11442 = vmatmul.mubr.msk.bf16.vlgmr.msra.gmra.mrb[8].mxu1 %vm908_vm9, %v1406_v60  ;;  %v13434_v60 = vld [vmem:[#allocation37 + $0x20] ss:$8 sps:$4 sm:$0xff]  }
 0x56b   :  { %2394 = vmatprep.mubr.bf16.mxu1 %v17836_v6  ;;  %2133 = vmatpush1.bf16.msra.mxu0 %v13434_v60 }
 0x56c   :  { %2134 = vmatprep.subr.bf16.mxu0 %v13439_v61 }
 0x56f   :  { %2135 = vmatpush1.bf16.msra.mxu0 %v13437_v25 }
 0x570   :  { %2136 = vmatprep.subr.bf16.mxu0 %v13442_v34 }
 0x571   :  { %v16063_v41 = vpop.permute.xlu0 %1410 }
 0x573   :  { %2137 = vmatpush1.bf16.msra.mxu0 %v13440_v3 }
 0x574   :  { %2138 = vmatprep.subr.bf16.mxu0 %v13445_v7 }
 0x577   :  { %2139 = vmatpush1.bf16.msra.mxu0 %v13443_v12 }
 0x578   :  { %2140 = vmatprep.subr.bf16.mxu0 %v13448_v17 }
 0x57b   :  { %2141 = vmatpush1.bf16.msra.mxu0 %v13446_v18 }
 0x57c   :  { %2142 = vmatprep.subr.bf16.mxu0 %v13451_v9  ;;  %v13476_v9 = vld [vmem:[#allocation37 + $0x100] ss:$8 sps:$4 sm:$0xff]  }
 0x57f   :  { %2143 = vmatpush1.bf16.msra.mxu0 %v13449_v8 }
 0x580   :  { %2144 = vmatprep.subr.bf16.mxu0 %v13454_v16 }
 0x583   :  { %2145 = vmatpush1.bf16.msra.mxu0 %v13452_v24 }
 0x584   :  { %2146 = vmatprep.subr.bf16.mxu0 %v13457_v13  ;;  %v13481_v13 = vld [vmem:[#allocation37 + $0x114] ss:$8 sps:$4 sm:$0xff]  }
 0x587   :  { %2147 = vmatpush1.bf16.msra.mxu0 %v13455_v27 }
 0x588   :  { %2148 = vmatprep.subr.bf16.mxu0 %v13460_v56 }
 0x58b   :  { %2149 = vmatpush1.bf16.msra.mxu0 %v13458_v36 }
 0x58c   :  { %2150 = vmatprep.subr.bf16.mxu0 %v13463_v63  ;;  %v13479_v63 = vld [vmem:[#allocation37 + $0x110] ss:$8 sps:$4 sm:$0xff]  }
 0x58f   :  { %2151 = vmatpush1.bf16.msra.mxu0 %v13461_v35  ;;  %v13484_v35 = vld [vmem:[#allocation37 + $0x124] ss:$8 sps:$4 sm:$0xff]  }
 0x590   :  { %2152 = vmatprep.subr.bf16.mxu0 %v13466_v38  ;;  %v13482_v38 = vld [vmem:[#allocation37 + $0x120] ss:$8 sps:$4 sm:$0xff]  }
 0x593   :  { %2153 = vmatpush1.bf16.msra.mxu0 %v13464_v39  ;;  %v13487_v39 = vld [vmem:[#allocation37 + $0x134] ss:$8 sps:$4 sm:$0xff]  }
 0x594   :  { %2154 = vmatprep.subr.bf16.mxu0 %v13469_v53  ;;  %v13485_v53 = vld [vmem:[#allocation37 + $0x130] ss:$8 sps:$4 sm:$0xff]  }
 0x597   :  { %2155 = vmatpush1.bf16.msra.mxu0 %v13467_v33  ;;  %v13490_v33 = vld [vmem:[#allocation37 + $0x144] ss:$8 sps:$4 sm:$0xff]  }
 0x598   :  { %2156 = vmatprep.subr.bf16.mxu0 %v13472_v2  ;;  %v13488_v2 = vld [vmem:[#allocation37 + $0x140] ss:$8 sps:$4 sm:$0xff]  }
 0x59b   :  { %2157 = vmatpush1.bf16.msra.mxu0 %v13470_v52  ;;  %v13493_v52 = vld [vmem:[#allocation37 + $0x154] ss:$8 sps:$4 sm:$0xff]  }
 0x59c   :  { %2158 = vmatprep.subr.bf16.mxu0 %v13475_v40  ;;  %v13491_v40 = vld [vmem:[#allocation37 + $0x150] ss:$8 sps:$4 sm:$0xff]  }
 0x625   :  { %v1468_v59 = vpop.f32.mrb[4].mxu1 }
 0x626   :  { %v1470_v32 = vpop.f32.mrb[5].mxu1  ;;  %v1469_v22 = vadd.f32 %v1468_v59, %v16063_v41  ;;  %v13473_v59 = vld [vmem:[#allocation37 + $0xf0] ss:$8 sps:$4 sm:$0xff]  }
 0x627   :  { %v1472_v42 = vpop.f32.mrb[6].mxu1  ;;  %v1471_v31 = vadd.f32 %v1470_v32, %v16063_v41  ;;  %2159 = vmatpush1.bf16.msra.mxu0 %v13473_v59  ;;  %v13496_v59 = vld [vmem:[#allocation37 + $0x164] ss:$8 sps:$4 sm:$0xff]  }
 0x628   :  { %v1473_v20 = vpop.f32.mrb[7].mxu1  ;;  %v16073_v19 = vmax.f32 %v1469_v22, 0.0  ;;  %2169 = vmatprep.subr.bf16.mxu0 %v13478_v58  ;;  %v13515_v58 = vld [vmem:[#allocation37 + $0x1d0] ss:$8 sps:$4 sm:$0xff]  }
 0x629   :  { %v1509_v46 = vpop.f32.mrb[8].mxu0  ;;  %v16069_v50 = vmax.f32 %v1471_v31, 0.0 }
 0x62a   :  { %v1510_v30 = vadd.f32 %v1509_v46, %v16063_v41  ;;  %v1511_v47 = vpop.f32.mrb[9].mxu0 }
 0x62b   :  { %v1512_v48 = vadd.f32 %v1511_v47, %v16063_v41  ;;  %v1513_v37 = vpop.f32.mrb[10].mxu0 }
 0x62c   :  { %v16071_v51 = vmax.f32 %v1510_v30, 0.0  ;;  %v1514_v29 = vpop.f32.mrb[11].mxu0 }
 0x62d   :  { %v16075_v21 = vmax.f32 %v1512_v48, 0.0 }
 0x62e   :  { %v13315_v26 = vpack.i.bf16 %v16071_v51, %v16069_v50 }
 0x62f   :  { %v13320_v55 = vpack.i.bf16 %v16073_v19, %v16075_v21 }
 0x630   :  { %13316 = vrot.lane.b32.xlu1 %v13315_v26, %s15027_s14 }
 0x631   :  { %13321 = vrot.lane.b32.xlu0 %v13320_v55, %s15027_s14 }
 0x63d   :  { %v1550_v62 = vpop.f32.mrb[8].mxu1 }
 0x63e   :  { %v1552_v0 = vpop.f32.mrb[9].mxu1  ;;  %v1551_v30 = vadd.f32 %v1550_v62, %v16063_v41 }
 0x63f   :  { %v1554_v5 = vpop.f32.mrb[10].mxu1  ;;  %v1553_v47 = vadd.f32 %v1552_v0, %v16063_v41 }
 0x640   :  { %v1555_v4 = vpop.f32.mrb[11].mxu1  ;;  %v16093_v54 = vmax.f32 %v1551_v30, 0.0  ;;  %v13503_v30 = vld [vmem:[#allocation37 + $0x190] ss:$8 sps:$4 sm:$0xff]  }
 0x641   :  { %v16095_v57 = vmax.f32 %v1553_v47, 0.0  ;;  %v13508_v47 = vld [vmem:[#allocation37 + $0x1a4] ss:$8 sps:$4 sm:$0xff]  }
 0x643   :  { %v13330_v43 = vpack.i.bf16 %v16095_v57, %v16093_v54 }
 0x6a2   :  { %v13317_v32 = vpop.permute.xlu1 %13316 }
 0x6a3   :  { %v13319_v42 = vunpack.i.h.bf16 %v13317_v32  ;;  %v13318_v31 = vunpack.i.l.bf16 %v13317_v32  ;;  %v13322_v20 = vpop.permute.xlu0 %13321  ;;  %v13494_v32 = vld [vmem:[#allocation37 + $0x160] ss:$8 sps:$4 sm:$0xff]  }
 0x6a4   :  { %v13324_v22 = vunpack.i.h.bf16 %v13322_v20  ;;  %v13323_v46 = vunpack.i.l.bf16 %v13322_v20  ;;  %v13502_v20 = vld [vmem:[#allocation37 + $0x184] ss:$8 sps:$4 sm:$0xff]  }
 0x6a5   :  { %v1580_v48 = vsel %vm672_vm0, %v13318_v31, %v13319_v42 }
 0x6a6   :  { %v1589_v37 = vmax.f32 %v16069_v50, %v1580_v48  ;;  %v1579_v29 = vsel %vm672_vm0, %v13324_v22, %v13318_v31  ;;  %v1581_v26 = vsel %vm672_vm0, %v13319_v42, %v13323_v46  ;;  %v13499_v42 = vld [vmem:[#allocation37 + $0x174] ss:$8 sps:$4 sm:$0xff]   ;;  %v13497_v31 = vld [vmem:[#allocation37 + $0x170] ss:$8 sps:$4 sm:$0xff]   ;;  %v13500_v22 = vld [vmem:[#allocation37 + $0x180] ss:$8 sps:$4 sm:$0xff]  }
 0x6a7   :  { %v16090_v55 = vmax.f32 %v16071_v51, %v1581_v26  ;;  %v1588_v45 = vmax.f32 %v16073_v19, %v1579_v29  ;;  %v13506_v48 = vld [vmem:[#allocation37 + $0x1a0] ss:$8 sps:$4 sm:$0xff]   ;;  %v13509_v29 = vld [vmem:[#allocation37 + $0x1b0] ss:$8 sps:$4 sm:$0xff]   ;;  %v13514_v26 = vld [vmem:[#allocation37 + $0x1c4] ss:$8 sps:$4 sm:$0xff]  }
 0x6a9   :  { %1607 = vrot.lane.b32.xlu0 %v1588_v45, %s15029_s12  ;;  %v13325_v41 = vpack.i.bf16 %v16090_v55, %v1589_v37 }
 0x6ab   :  { %13326 = vrot.lane.b32.xlu1 %v13325_v41, %s15029_s12  ;;  %v13517_v41 = vld [vmem:[#allocation37 + $0x1d4] ss:$8 sps:$4 sm:$0xff]  }
 0x6af   :  { %13331 = vrot.lane.b32.xlu1 %v13330_v43, %s15027_s14  ;;  %v13520_v43 = vld [vmem:[#allocation37 + $0x1e4] ss:$8 sps:$4 sm:$0xff]  }
 0x71b   :  { %v1608_v34 = vpop.permute.xlu0 %1607 }
 0x71d   :  { %v16103_v60 = vpop.permute.xlu1 %13326 }
 0x71e   :  { %v13329_v61 = vunpack.i.h.bf16 %v16103_v60  ;;  %v13328_v25 = vunpack.i.l.bf16 %v16103_v60  ;;  %v13532_v60 = vld [vmem:[#allocation37 + $0x224] ss:$8 sps:$4 sm:$0xff]  }
 0x720   :  { %v1620_v62 = vsel %vm17835_vm3, %v1608_v34, %v13328_v25  ;;  %v1621_v0 = vsel %vm17835_vm3, %v13328_v25, %v13329_v61  ;;  %v13518_v25 = vld [vmem:[#allocation37 + $0x1e0] ss:$8 sps:$4 sm:$0xff]   ;;  %v13523_v34 = vld [vmem:[#allocation37 + $0x1f4] ss:$8 sps:$4 sm:$0xff]  }
 0x721   :  { %v13332_v3 = vpop.permute.xlu1 %13331  ;;  %v1631_v5 = vmax.f32 %v1589_v37, %v1621_v0  ;;  %v1630_v7 = vmax.f32 %v1588_v45, %v1620_v62  ;;  %v13511_v37 = vld [vmem:[#allocation37 + $0x1b4] ss:$8 sps:$4 sm:$0xff]   ;;  %v13512_v45 = vld [vmem:[#allocation37 + $0x1c0] ss:$8 sps:$4 sm:$0xff]   ;;  %v13521_v62 = vld [vmem:[#allocation37 + $0x1f0] ss:$8 sps:$4 sm:$0xff]  }
 0x722   :  { %v13334_v4 = vunpack.i.h.bf16 %v13332_v3  ;;  %v16111_v12 = vunpack.i.l.bf16 %v13332_v3  ;;  %v13526_v0 = vld [vmem:[#allocation37 + $0x204] ss:$8 sps:$4 sm:$0xff]  }
 0x723   :  { %v1636_v17 = vpack.c.bf16 %v1631_v5, %v1631_v5  ;;  %v1635_v18 = vpack.c.bf16 %v1630_v7, %v1630_v7 }
 0x724   :  { %v1600_v8 = vmax.f32 %v16095_v57, %v13334_v4  ;;  %v1582_v16 = vsel %vm672_vm0, %v13323_v46, %v16111_v12  ;;  %v1596_v24 = vsel %vm672_vm0, %v16111_v12, %v13334_v4  ;;  %v13505_v46 = vld [vmem:[#allocation37 + $0x194] ss:$8 sps:$4 sm:$0xff]  }
 0x725   :  { %v16119_v27 = vmax.f32 %v16075_v21, %v1582_v16  ;;  %v1599_v56 = vmax.f32 %v16093_v54, %v1596_v24  ;;  %2160 = vmatprep.mubr.bf16.mxu0 %v1636_v17  ;;  %v13524_v16 = vld [vmem:[#allocation37 + $0x200] ss:$8 sps:$4 sm:$0xff]  }
 0x726   :  { %1617 = vrot.lane.b32.xlu1 %v1600_v8, %s15029_s12  ;;  %2161 = vmatmul.mubr.bf16.vlgmr.msra.gmra.mrb[12].mxu0 %v1635_v18 }
 0x727   :  { %v13335_v36 = vpack.i.bf16 %v1599_v56, %v16119_v27  ;;  %2170 = vmatpush1.bf16.msra.mxu0 %v13476_v9  ;;  %v13527_v56 = vld [vmem:[#allocation37 + $0x210] ss:$8 sps:$4 sm:$0xff]  }
 0x728   :  { %2171 = vmatprep.subr.bf16.mxu0 %v13481_v13  ;;  %v13529_v13 = vld [vmem:[#allocation37 + $0x214] ss:$8 sps:$4 sm:$0xff]  }
 0x729   :  { %13336 = vrot.lane.b32.xlu0 %v13335_v36, %s15029_s12  ;;  %v13535_v36 = vld [vmem:[#allocation37 + $0x234] ss:$8 sps:$4 sm:$0xff]  }
 0x72b   :  { %2172 = vmatpush1.bf16.msra.mxu0 %v13479_v63  ;;  %v13536_v63 = vld [vmem:[#allocation37 + $0x240] ss:$8 sps:$4 sm:$0xff]  }
 0x72c   :  { %2173 = vmatprep.subr.bf16.mxu0 %v13484_v35  ;;  %v13541_v35 = vld [vmem:[#allocation37 + $0x254] ss:$8 sps:$4 sm:$0xff]  }
 0x72f   :  { %2174 = vmatpush1.bf16.msra.mxu0 %v13482_v38  ;;  %v1718_v38 = vld [vmem:[#allocation37 + $0x270] sm:$0x77] }
 0x730   :  { %2175 = vmatprep.subr.bf16.mxu0 %v13487_v39  ;;  %v15037_v39 = vmov 65535  }
 0x733   :  { %2176 = vmatpush1.bf16.msra.mxu0 %v13485_v53  ;;  %v2120_v53 = vsel %vm2118_vm10, 4294967295, %v15037_v39 }
 0x734   :  { %2177 = vmatprep.subr.bf16.mxu0 %v13490_v33  ;;  %v13539_v33 = vld [vmem:[#allocation37 + $0x250] ss:$8 sps:$4 sm:$0xff]  }
 0x737   :  { %2178 = vmatpush1.bf16.msra.mxu0 %v13488_v2  ;;  %v13544_v2 = vld [vmem:[#allocation37 + $0x264] ss:$8 sps:$4 sm:$0xff]  }
 0x738   :  { %2179 = vmatprep.subr.bf16.mxu0 %v13493_v52  ;;  %v11522_v52 = vcombine.high %v1718_v38, %v1718_v38 }
 0x73b   :  { %2180 = vmatpush1.bf16.msra.mxu0 %v13491_v40  ;;  %v2121_v40 = vsel %vm2119_vm11, %v2120_v53, 0  ;;  %vm2300_vm11 = vcmask 867328  }
 0x73c   :  { %2181 = vmatprep.subr.bf16.mxu0 %v13496_v59  ;;  %v13542_v59 = vld [vmem:[#allocation37 + $0x260] ss:$8 sps:$4 sm:$0xff]  }
 0x73f   :  { %2182 = vmatpush1.bf16.msra.mxu0 %v13494_v32  ;;  %v11521_v32 = vcombine.low %v1718_v38, %v1718_v38 }
 0x740   :  { %2183 = vmatprep.subr.bf16.mxu0 %v13499_v42 }
 0x743   :  { %2184 = vmatpush1.bf16.msra.mxu0 %v13497_v31  ;;  %v2126_v31 = vand.u32 %v11522_v52, %v2121_v40 }
 0x744   :  { %2185 = vmatprep.subr.bf16.mxu0 %v13502_v20 }
 0x747   :  { %2186 = vmatpush1.bf16.msra.mxu0 %v13500_v22  ;;  %v1592_v22 = vmax.f32 %v16093_v54, %v16111_v12 }
 0x748   :  { %2187 = vmatprep.subr.bf16.mxu0 %v13505_v46  ;;  %v2123_v46 = vand.u32 %v11521_v32, %v2121_v40 }
 0x74b   :  { %2188 = vmatpush1.bf16.msra.mxu0 %v13503_v30 }
 0x74c   :  { %2189 = vmatprep.subr.bf16.mxu0 %v13508_v47 }
 0x74f   :  { %2190 = vmatpush1.bf16.msra.mxu0 %v13506_v48 }
 0x750   :  { %2191 = vmatprep.subr.bf16.mxu0 %v13511_v37 }
 0x753   :  { %2192 = vmatpush1.bf16.msra.mxu0 %v13509_v29 }
 0x754   :  { %2193 = vmatprep.subr.bf16.mxu0 %v13514_v26 }
 0x757   :  { %2194 = vmatpush1.bf16.msra.mxu0 %v13512_v45 }
 0x758   :  { %2195 = vmatprep.subr.bf16.mxu0 %v13517_v41 }
 0x75b   :  { %2196 = vmatpush1.bf16.msra.mxu0 %v13515_v58 }
 0x75c   :  { %2197 = vmatprep.subr.bf16.mxu0 %v13520_v43  ;;  %v2336_v43 = vld [vmem:[%s17902_s3] sm:$0xff] }
 0x75f   :  { %2198 = vmatpush1.bf16.msra.mxu0 %v13518_v25  ;;  %v2337_v25 = vld [vmem:[%s17902_s3 + $0x8] sm:$0xff]  ;;  %s17909_s3 = sld [smem:[#allocation82_spill]] }
 0x760   :  { %2199 = vmatprep.subr.bf16.mxu0 %v13523_v34 }
 0x763   :  { %2200 = vmatpush1.bf16.msra.mxu0 %v13521_v62 }
 0x764   :  { %2210 = vmatprep.subr.bf16.mxu0 %v13526_v0 }
 0x798   :  { %v1618_v42 = vpop.permute.xlu1 %1617 }
 0x79b   :  { %v13337_v3 = vpop.permute.xlu0 %13336 }
 0x79c   :  { %v13339_v5 = vunpack.i.h.bf16 %v13337_v3  ;;  %v13338_v7 = vunpack.i.l.bf16 %v13337_v3 }
 0x79e   :  { %v1622_v4 = vsel %vm17835_vm3, %v13329_v61, %v13338_v7  ;;  %v1623_v17 = vsel %vm17835_vm3, %v13338_v7, %v13339_v5  ;;  %v13530_v61 = vld [vmem:[#allocation37 + $0x220] ss:$8 sps:$4 sm:$0xff]   ;;  %v1624_v20 = vsel %vm17835_vm3, %v13339_v5, %v1618_v42  ;;  %vm4223_vm3 = vcmask 1044480  }
 0x79f   :  { %v1633_v18 = vmax.f32 %v16119_v27, %v1623_v17  ;;  %v1632_v9 = vmax.f32 %v16090_v55, %v1622_v4  ;;  %v13533_v27 = vld [vmem:[#allocation37 + $0x230] ss:$8 sps:$4 sm:$0xff]   ;;  %v13538_v55 = vld [vmem:[#allocation37 + $0x244] ss:$8 sps:$4 sm:$0xff]   ;;  %v1634_v30 = vmax.f32 %v1592_v22, %v1624_v20 }
 0x7a0   :  { %v13547_v22 = vld [vmem:[#allocation6] sm:$0xff]  }
 0x7a1   :  { %v1638_v8 = vpack.c.bf16 %v1633_v18, %v1633_v18  ;;  %v1637_v24 = vpack.c.bf16 %v1632_v9, %v1632_v9  ;;  %v1639_v47 = vpack.c.bf16 %v1634_v30, %v1634_v30 }
 0x7a3   :  { %2201 = vmatprep.mubr.bf16.mxu0 %v1638_v8 }
 0x7a4   :  { %2202 = vmatmul.mubr.bf16.vlgmr.msra.gmra.mrb[12].mxu0 %v1637_v24 }
 0x7a5   :  { %2211 = vmatpush1.bf16.msra.mxu0 %v13524_v16  ;;  %2242 = vmatprep.mubr.bf16.mxu0 %v17836_v6 }
 0x7a6   :  { %2212 = vmatprep.subr.bf16.mxu0 %v13529_v13 }
 0x7a9   :  { %2213 = vmatpush1.bf16.msra.mxu0 %v13527_v56 }
 0x7aa   :  { %2214 = vmatprep.subr.bf16.mxu0 %v13532_v60 }
 0x7ad   :  { %2215 = vmatpush1.bf16.msra.mxu0 %v13530_v61 }
 0x7ae   :  { %2216 = vmatprep.subr.bf16.mxu0 %v13535_v36 }
 0x7b1   :  { %2217 = vmatpush1.bf16.msra.mxu0 %v13533_v27 }
 0x7b2   :  { %2218 = vmatprep.subr.bf16.mxu0 %v13538_v55 }
 0x7b5   :  { %2219 = vmatpush1.bf16.msra.mxu0 %v13536_v63 }
 0x7b6   :  { %2220 = vmatprep.subr.bf16.mxu0 %v13541_v35 }
 0x7b9   :  { %2221 = vmatpush1.bf16.msra.mxu0 %v13539_v33 }
 0x7ba   :  { %2222 = vmatprep.subr.bf16.mxu0 %v13544_v2 }
 0x7bd   :  { %2223 = vmatpush1.bf16.msra.mxu0 %v13542_v59 }
 0x7be   :  { %2224 = vmatprep.subr.bf16.mxu0 %v2126_v31 }
 0x7c1   :  { %2225 = vmatpush1.bf16.msra.mxu0 %v2123_v46  ;;  %v11527_v46 = vld.sshfl [vmem:[#allocation31] sm:$0x11 pattern:$0x75316420] }
 0x7c2   :  { %v2420_v30 = vcombine.high %v11527_v46, %v11527_v46 }
 0x7c4   :  { %11523 = vmatmul.mubr.msk.bf16.vlgmr.msra.gmra.mrb[12].mxu0 %vm2114_vm12, %v1639_v47  ;;  %v2427_v47 = vrot.slane %v11527_v46, %v15807_v11 }
 0x897   :  { %v2244_v48 = vpop.f32.mrb[12].mxu0 }
 0x898   :  { %v2251_v37 = vpack.c.bf16 %v2244_v48, %v2244_v48  ;;  %v2246_v29 = vpop.f32.mrb[13].mxu0  ;;  %v2434_v48 = vrot.slane %v2420_v30, %v15807_v11 }
 0x899   :  { %v2252_v26 = vpack.c.bf16 %v2246_v29, %v2246_v29  ;;  %v2248_v45 = vpop.f32.mrb[14].mxu0 }
 0x89a   :  { %2262 = vrot.lane.b32.xlu0 %v2251_v37, %s15028_s8  ;;  %v2249_v41 = vpop.f32.mrb[15].mxu0  ;;  %v2255_v12 = vrot.slane %v2251_v37, 4 }
 0x89b   :  { %2264 = vrot.lane.b32.xlu1 %v2252_v26, %s15028_s8  ;;  %v2256_v58 = vrot.slane %v2252_v26, 4 }
 0x89e   :  { %2273 = vrot.lane.b32.xlu0 %v2251_v37, %s15038_s0 }
 0x89f   :  { %2275 = vrot.lane.b32.xlu1 %v2252_v26, %s15038_s0 }
 0x8a2   :  { %2285 = vrot.lane.b32.xlu0 %v2251_v37, %s15031_s24 }
 0x8a3   :  { %2287 = vrot.lane.b32.xlu1 %v2252_v26, %s15031_s24 }
 0x8a6   :  { %2257 = vrot.lane.b32.xlu0 %v2255_v12, %s15027_s14 }
 0x8a7   :  { %2259 = vrot.lane.b32.xlu1 %v2256_v58, %s15027_s14 }
 0x8aa   :  { %2267 = vrot.lane.b32.xlu0 %v2255_v12, %s15039_s4 }
 0x8ab   :  { %2269 = vrot.lane.b32.xlu1 %v2256_v58, %s15039_s4 }
 0x8ae   :  { %2279 = vrot.lane.b32.xlu0 %v2255_v12, %s15040_s28 }
 0x8af   :  { %2281 = vrot.lane.b32.xlu1 %v2256_v58, %s15040_s28 }
 0x8b2   :  { %2290 = vrot.lane.b32.xlu0 %v2255_v12, %s15041_s26  ;;  %v2436_v12 = vpack.i.b16 %v2427_v47, %v2427_v47 }
 0x8b3   :  { %2292 = vrot.lane.b32.xlu1 %v2256_v58, %s15041_s26 }
 0x8b6   :  { %2296 = vrot.lane.b32.xlu0 %v2251_v37, %s15042_s20 }
 0x8b7   :  { %2298 = vrot.lane.b32.xlu1 %v2252_v26, %s15042_s20 }
 0x8ba   :  { %2340 = vperm.xlu0 %13314, %v2336_v43  }
 0x8bb   :  { %2345 = vperm.xlu1 %13340, %v2337_v25   ;;  %v2443_v25 = vpack.i.b16 %v2434_v48, %v2434_v48 }
 0x8bd   :  { %v16181_v11 = vrot.slane %v2443_v25, %v15817_v15 }
 0x90c   :  { %v2263_v34 = vpop.permute.xlu0 %2262 }
 0x90d   :  { %v2265_v62 = vpop.permute.xlu1 %2264 }
 0x90e   :  { %v2266_v13 = vsel %vm690_vm2, %v2263_v34, %v2265_v62 }
 0x910   :  { %v2274_v0 = vpop.permute.xlu0 %2273 }
 0x911   :  { %v2276_v3 = vpop.permute.xlu1 %2275 }
 0x912   :  { %v2278_v55 = vsel %vm2114_vm12, %v2274_v0, %v2276_v3 }
 0x914   :  { %v2286_v5 = vpop.permute.xlu0 %2285 }
 0x915   :  { %v2288_v7 = vpop.permute.xlu1 %2287 }
 0x916   :  { %v2289_v2 = vsel %vm744_vm5, %v2286_v5, %v2288_v7  ;;  %v16178_v5 = vrot.slane %v2436_v12, %v15817_v15 }
 0x918   :  { %v2258_v4 = vpop.permute.xlu0 %2257 }
 0x919   :  { %v2260_v17 = vpop.permute.xlu1 %2259 }
 0x91a   :  { %v2261_v18 = vsel %vm672_vm0, %v2258_v4, %v2260_v17  ;;  %v2308_v9 = vsel %vm804_vm1, %v2252_v26, %v2260_v17 }
 0x91b   :  { %2362 = vmatprep.subr.bf16.mxu1 %v2308_v9  ;;  %v2304_v8 = vsel %vm804_vm1, %v2251_v37, %v2261_v18 }
 0x91c   :  { %v2268_v16 = vpop.permute.xlu0 %2267  ;;  %2363 = vmatpush1.bf16.msra.mxu1 %v2304_v8 }
 0x91d   :  { %v2270_v24 = vpop.permute.xlu1 %2269 }
 0x91e   :  { %v2272_v56 = vsel %vm2271_vm13, %v2268_v16, %v2270_v24  ;;  %v2316_v60 = vsel %vm804_vm1, %v2265_v62, %v2270_v24  ;;  %v13548_v24 = vld [vmem:[#allocation7 + $0x4] ss:$8 sps:$4 sm:$0xff]  }
 0x91f   :  { %2364 = vmatprep.subr.bf16.mxu1 %v2316_v60  ;;  %v2312_v61 = vsel %vm804_vm1, %v2266_v13, %v2272_v56  ;;  %v2511_v13 = vld [vmem:[%s17903_s5] sm:$0xff]  ;;  %v2512_v56 = vld [vmem:[%s17903_s5 + $0x8] sm:$0xff]  ;;  %s17910_s5 = sld [smem:[#allocation83_spill]] }
 0x920   :  { %v2280_v36 = vpop.permute.xlu0 %2279  ;;  %2365 = vmatpush1.bf16.msra.mxu1 %v2312_v61 }
 0x921   :  { %v2282_v27 = vpop.permute.xlu1 %2281 }
 0x922   :  { %v2284_v63 = vsel %vm2283_vm14, %v2280_v36, %v2282_v27  ;;  %v2324_v35 = vsel %vm804_vm1, %v2276_v3, %v2282_v27 }
 0x923   :  { %2366 = vmatprep.subr.bf16.mxu1 %v2324_v35  ;;  %v2320_v38 = vsel %vm804_vm1, %v2278_v55, %v2284_v63 }
 0x924   :  { %v2291_v53 = vpop.permute.xlu0 %2290  ;;  %2367 = vmatpush1.bf16.msra.mxu1 %v2320_v38 }
 0x925   :  { %v2293_v33 = vpop.permute.xlu1 %2292 }
 0x926   :  { %v2295_v52 = vsel %vm2294_vm15, %v2291_v53, %v2293_v33  ;;  %v2332_v40 = vsel %vm804_vm1, %v2288_v7, %v2293_v33 }
 0x927   :  { %2368 = vmatprep.subr.bf16.mxu1 %v2332_v40  ;;  %v2328_v59 = vsel %vm804_vm1, %v2289_v2, %v2295_v52 }
 0x928   :  { %v2297_v32 = vpop.permute.xlu0 %2296  ;;  %2369 = vmatpush1.bf16.msra.mxu1 %v2328_v59 }
 0x929   :  { %v2299_v42 = vpop.permute.xlu1 %2298 }
 0x92a   :  { %v2301_v31 = vsel %vm2300_vm11, %v2297_v32, %v2299_v42  ;;  %11525 = vmatprep.subr.msk.bf16.mxu1 %vm804_vm1, %v2299_v42 }
 0x92b   :  { %v2357_v20 = vsel %vm804_vm1, %v2301_v31, 0 }
 0x92c   :  { %2371 = vmatpush1.bf16.msra.mxu1 %v2357_v20 }
 0x92f   :  { %11526 = vmatmul.mubr.msk.bf16.vlgmr.msra.gmra.mrb[12].mxu1 %vm908_vm9, %v13547_v22 }
 0x930   :  { %11530 = vmatprep.mubr.msk.bf16.mxu1 %vm2532_vm8, %v13548_v24  ;;  %v13553_v24 = vld [vmem:[%s17904_s16 + $0x10] sm:$0xff]  }
 0x939   :  { %v2341_v37 = vpop.permute.xlu0 %2340 }
 0x93a   :  { %v2346_v26 = vpop.permute.xlu1 %2345 }
 0xa02   :  { %v2396_v29 = vpop.f32.mrb[12].mxu1 }
 0xa03   :  { %v2397_v45 = vadd.f32 %v2396_v29, %v2341_v37  ;;  %v2398_v41 = vpop.f32.mrb[13].mxu1  ;;  %v13550_v29 = vld [vmem:[#allocation7] ss:$8 sps:$4 sm:$0xff]  }
 0xa04   :  { %v2399_v58 = vadd.f32 %v2398_v41, %v2341_v37  ;;  %v2400_v43 = vpop.f32.mrb[14].mxu1 }
 0xa05   :  { %v2401_v34 = vadd.f32 %v2400_v43, %v2346_v26  ;;  %v2402_v62 = vpop.f32.mrb[15].mxu1  ;;  %v2405_v3 = vmax.f32 %v2397_v45, 0.0 }
 0xa06   :  { %v2403_v0 = vadd.f32 %v2402_v62, %v2346_v26  ;;  %v2406_v4 = vmax.f32 %v2399_v58, 0.0 }
 0xa07   :  { %v2407_v7 = vmax.f32 %v2401_v34, 0.0 }
 0xa08   :  { %v2408_v17 = vmax.f32 %v2403_v0, 0.0 }
 0xa09   :  { %v2409_v18 = vpack.c.bf16 %v2407_v7, %v2405_v3 }
 0xa0a   :  { %v2410_v9 = vpack.c.bf16 %v2408_v17, %v2406_v4  ;;  %v13551_v4 = vld [vmem:[%s17904_s16] sm:$0xff]  }
 0xa0b   :  { %v2449_v8 = vmul.bf16 %v16178_v5, %v2409_v18 }
 0xa0c   :  { %v2450_v16 = vmul.bf16 %v16181_v11, %v2410_v9 }
 0xa0d   :  { %2453 = vrot.lane.b32.xlu0 %v2449_v8, %s15027_s14 }
 0xa0e   :  { %2455 = vrot.lane.b32.xlu1 %v2450_v16, %s15027_s14  ;;  %2536 = vmatprep.subr.bf16.mxu1 %v2450_v16 }
 0xa0f   :  { %2537 = vmatpush1.bf16.msra.mxu1 %v2449_v8 }
 0xa11   :  { %2460 = vrot.lane.b32.xlu0 %v2449_v8, %s15028_s8 }
 0xa12   :  { %2462 = vrot.lane.b32.xlu1 %v2450_v16, %s15028_s8 }
 0xa15   :  { %2467 = vrot.lane.b32.xlu0 %v2449_v8, %s15039_s4 }
 0xa16   :  { %2469 = vrot.lane.b32.xlu1 %v2450_v16, %s15039_s4 }
 0xa19   :  { %2474 = vrot.lane.b32.xlu0 %v2449_v8, %s15038_s0 }
 0xa1a   :  { %2476 = vrot.lane.b32.xlu1 %v2450_v16, %s15038_s0 }
 0xa1d   :  { %2481 = vrot.lane.b32.xlu0 %v2449_v8, %s15040_s28 }
 0xa1e   :  { %2483 = vrot.lane.b32.xlu1 %v2450_v16, %s15040_s28 }
 0xa21   :  { %2488 = vrot.lane.b32.xlu0 %v2449_v8, %s15031_s24 }
 0xa22   :  { %2490 = vrot.lane.b32.xlu1 %v2450_v16, %s15031_s24 }
 0xa25   :  { %2495 = vrot.lane.b32.xlu0 %v2449_v8, %s15041_s26 }
 0xa26   :  { %2497 = vrot.lane.b32.xlu1 %v2450_v16, %s15041_s26 }
 0xa29   :  { %2502 = vrot.lane.b32.xlu0 %v2449_v8, %s15042_s20  ;;  %v13552_v8 = vld [vmem:[%s17904_s16 + $0x8] sm:$0xff]  }
 0xa2a   :  { %2504 = vrot.lane.b32.xlu1 %v2450_v16, %s15042_s20 }
 0xa2d   :  { %2515 = vperm.xlu0 %13314, %v2511_v13   ;;  %v13554_v13 = vld [vmem:[%s17904_s16 + $0x18] sm:$0xff]  }
 0xa2e   :  { %2520 = vperm.xlu1 %13340, %v2512_v56   ;;  %v13555_v56 = vld [vmem:[%s17904_s16 + $0x20] sm:$0xff]  }
 0xa7f   :  { %v2454_v60 = vpop.permute.xlu0 %2453 }
 0xa80   :  { %v2456_v61 = vpop.permute.xlu1 %2455 }
 0xa81   :  { %2538 = vmatprep.subr.bf16.mxu1 %v2456_v61  ;;  %v2457_v36 = vsel %vm672_vm0, %v2454_v60, %v2456_v61  ;;  %v13556_v60 = vld [vmem:[%s17904_s16 + $0x28] sm:$0xff]   ;;  %v13557_v61 = vld [vmem:[%s17904_s16 + $0x30] sm:$0xff]  }
 0xa82   :  { %2539 = vmatpush1.bf16.msra.mxu1 %v2457_v36  ;;  %v13558_v36 = vld [vmem:[%s17904_s16 + $0x38] sm:$0xff]  }
 0xa83   :  { %v2461_v27 = vpop.permute.xlu0 %2460 }
 0xa84   :  { %v2463_v55 = vpop.permute.xlu1 %2462 }
 0xa85   :  { %2540 = vmatprep.subr.bf16.mxu1 %v2463_v55  ;;  %v2464_v63 = vsel %vm690_vm2, %v2461_v27, %v2463_v55  ;;  %v13559_v27 = vld [vmem:[%s17904_s16 + $0x40] sm:$0xff]   ;;  %v13560_v55 = vld [vmem:[%s17904_s16 + $0x48] sm:$0xff]  }
 0xa86   :  { %2541 = vmatpush1.bf16.msra.mxu1 %v2464_v63  ;;  %v13561_v63 = vld [vmem:[%s17904_s16 + $0x50] sm:$0xff]  }
 0xa87   :  { %v2468_v35 = vpop.permute.xlu0 %2467 }
 0xa88   :  { %v2470_v38 = vpop.permute.xlu1 %2469 }
 0xa89   :  { %2542 = vmatprep.subr.bf16.mxu1 %v2470_v38  ;;  %v2471_v53 = vsel %vm2271_vm13, %v2468_v35, %v2470_v38  ;;  %v13562_v35 = vld [vmem:[%s17904_s16 + $0x58] sm:$0x7f]   ;;  %v2731_v38 = vsel %vm2729_vm7, 4294967295, %v15037_v39  ;;  %s17911_s16 = sld [smem:[#allocation104_spill]] }
 0xa8a   :  { %2543 = vmatpush1.bf16.msra.mxu1 %v2471_v53  ;;  %v2732_v53 = vsel %vm2730_vm6, %v2731_v38, 0  ;;  %vm2725_vm6 = vcmask 498688  }
 0xa8b   :  { %v2475_v33 = vpop.permute.xlu0 %2474 }
 0xa8c   :  { %v2477_v2 = vpop.permute.xlu1 %2476 }
 0xa8d   :  { %2544 = vmatprep.subr.bf16.mxu1 %v2477_v2  ;;  %v2478_v52 = vsel %vm2114_vm12, %v2475_v33, %v2477_v2  ;;  %v2734_v33 = vand.u32 %v13562_v35, %v2732_v53 }
 0xa8e   :  { %2545 = vmatpush1.bf16.msra.mxu1 %v2478_v52 }
 0xa8f   :  { %v2482_v40 = vpop.permute.xlu0 %2481 }
 0xa90   :  { %v2484_v59 = vpop.permute.xlu1 %2483 }
 0xa91   :  { %2546 = vmatprep.subr.bf16.mxu1 %v2484_v59  ;;  %v2485_v32 = vsel %vm2283_vm14, %v2482_v40, %v2484_v59 }
 0xa92   :  { %2547 = vmatpush1.bf16.msra.mxu1 %v2485_v32 }
 0xa93   :  { %v2489_v42 = vpop.permute.xlu0 %2488 }
 0xa94   :  { %v2491_v31 = vpop.permute.xlu1 %2490 }
 0xa95   :  { %2548 = vmatprep.subr.bf16.mxu1 %v2491_v31  ;;  %v2492_v20 = vsel %vm744_vm5, %v2489_v42, %v2491_v31 }
 0xa96   :  { %2549 = vmatpush1.bf16.msra.mxu1 %v2492_v20 }
 0xa97   :  { %v2496_v22 = vpop.permute.xlu0 %2495 }
 0xa98   :  { %v2498_v46 = vpop.permute.xlu1 %2497 }
 0xa99   :  { %2550 = vmatprep.subr.bf16.mxu1 %v2498_v46  ;;  %v2499_v30 = vsel %vm2294_vm15, %v2496_v22, %v2498_v46 }
 0xa9a   :  { %2551 = vmatpush1.bf16.msra.mxu1 %v2499_v30 }
 0xa9b   :  { %v2503_v47 = vpop.permute.xlu0 %2502 }
 0xa9c   :  { %v2505_v48 = vpop.permute.xlu1 %2504 }
 0xa9d   :  { %2552 = vmatprep.subr.bf16.mxu1 %v2505_v48  ;;  %v2506_v37 = vsel %vm2300_vm11, %v2503_v47, %v2505_v48 }
 0xa9e   :  { %2553 = vmatpush1.bf16.msra.mxu1 %v2506_v37 }
 0xa9f   :  { %2736 = vmatprep.subr.bf16.mxu1 %v17836_v6 }
 0xaa1   :  { %2569 = vmatmul.mubr.bf16.vlgmr.msra.gmra.mrb[16].mxu1 %v13550_v29 }
 0xaa2   :  { %2737 = vmatpush1.bf16.msra.mxu1 %v13551_v4 }
 0xaa3   :  { %2738 = vmatprep.subr.bf16.mxu1 %v17836_v6 }
 0xaa6   :  { %2739 = vmatpush1.bf16.msra.mxu1 %v13552_v8 }
 0xaa7   :  { %2740 = vmatprep.subr.bf16.mxu1 %v17836_v6 }
 0xaaa   :  { %2741 = vmatpush1.bf16.msra.mxu1 %v13553_v24 }
 0xaab   :  { %2742 = vmatprep.subr.bf16.mxu1 %v17836_v6 }
 0xaac   :  { %v2516_v26 = vpop.permute.xlu0 %2515 }
 0xaad   :  { %v2521_v58 = vpop.permute.xlu1 %2520 }
 0xaae   :  { %2743 = vmatpush1.bf16.msra.mxu1 %v13554_v13 }
 0xaaf   :  { %2744 = vmatprep.subr.bf16.mxu1 %v17836_v6 }
 0xab2   :  { %2745 = vmatpush1.bf16.msra.mxu1 %v13555_v56 }
 0xab3   :  { %2746 = vmatprep.subr.bf16.mxu1 %v17836_v6 }
 0xab6   :  { %2747 = vmatpush1.bf16.msra.mxu1 %v13556_v60 }
 0xab7   :  { %2748 = vmatprep.subr.bf16.mxu1 %v17836_v6 }
 0xaba   :  { %2749 = vmatpush1.bf16.msra.mxu1 %v13557_v61  ;;  %v2808_v61 = vld [vmem:[%s17905_s17 + $0x8] sm:$0xff] }
 0xabb   :  { %2750 = vmatprep.subr.bf16.mxu1 %v17836_v6 }
 0xabe   :  { %2751 = vmatpush1.bf16.msra.mxu1 %v13558_v36  ;;  %v2807_v36 = vld [vmem:[%s17905_s17] sm:$0xff] }
 0xabf   :  { %2752 = vmatprep.subr.bf16.mxu1 %v17836_v6 }
 0xac2   :  { %2753 = vmatpush1.bf16.msra.mxu1 %v13559_v27  ;;  %v13563_v27 = vld [vmem:[#allocation9 + $0x4] ss:$8 sps:$4 sm:$0xff]  }
 0xac3   :  { %2754 = vmatprep.subr.bf16.mxu1 %v17836_v6 }
 0xac6   :  { %2755 = vmatpush1.bf16.msra.mxu1 %v13560_v55  ;;  %v2810_v55 = vld [vmem:[%s17905_s17 + $0x18] sm:$0xff] }
 0xac7   :  { %2756 = vmatprep.subr.bf16.mxu1 %v17836_v6 }
 0xaca   :  { %2757 = vmatpush1.bf16.msra.mxu1 %v13561_v63  ;;  %v2809_v63 = vld [vmem:[%s17905_s17 + $0x10] sm:$0xff]  ;;  %s17912_s17 = sld [smem:[#allocation85_spill]] }
 0xacb   :  { %2758 = vmatprep.subr.bf16.mxu1 %v17836_v6 }
 0xace   :  { %2759 = vmatpush1.bf16.msra.mxu1 %v2734_v33 }
 0xacf   :  { %2855 = vmatprep.subr.bf16.mxu1 %v17836_v6 }
 0xb74   :  { %v2570_v45 = vpop.f32.mrb[16].mxu1 }
 0xb75   :  { %v2571_v41 = vadd.f32 %v2570_v45, %v2516_v26  ;;  %v2572_v12 = vpop.f32.mrb[17].mxu1 }
 0xb76   :  { %v2573_v43 = vadd.f32 %v2572_v12, %v2516_v26  ;;  %v2574_v25 = vpop.f32.mrb[18].mxu1 }
 0xb77   :  { %v16213_v34 = vmax.f32 %v2571_v41, 0.0  ;;  %v2575_v62 = vadd.f32 %v2574_v25, %v2521_v58  ;;  %v2576_v0 = vpop.f32.mrb[19].mxu1 }
 0xb78   :  { %v16215_v3 = vmax.f32 %v2573_v43, 0.0  ;;  %v2577_v7 = vadd.f32 %v2576_v0, %v2521_v58 }
 0xb79   :  { %v16218_v17 = vmax.f32 %v2575_v62, 0.0 }
 0xb7a   :  { %v13341_v18 = vpack.i.bf16 %v16215_v3, %v16213_v34  ;;  %v16222_v9 = vmax.f32 %v2577_v7, 0.0 }
 0xb7c   :  { %v13346_v16 = vpack.i.bf16 %v16222_v9, %v16218_v17  ;;  %13342 = vrot.lane.b32.xlu0 %v13341_v18, %s15027_s14 }
 0xb7e   :  { %13347 = vrot.lane.b32.xlu1 %v13346_v16, %s15027_s14 }
 0xbee   :  { %v13343_v2 = vpop.permute.xlu0 %13342 }
 0xbef   :  { %v13345_v52 = vunpack.i.h.bf16 %v13343_v2  ;;  %v13344_v40 = vunpack.i.l.bf16 %v13343_v2 }
 0xbf0   :  { %v13348_v59 = vpop.permute.xlu1 %13347 }
 0xbf1   :  { %v2602_v32 = vmax.f32 %v16215_v3, %v13345_v52  ;;  %v2595_v42 = vsel %vm672_vm0, %v13344_v40, %v13345_v52  ;;  %v13350_v31 = vunpack.i.h.bf16 %v13348_v59  ;;  %v13349_v20 = vunpack.i.l.bf16 %v13348_v59 }
 0xbf2   :  { %v2601_v22 = vmax.f32 %v16213_v34, %v2595_v42  ;;  %v13566_v42 = vld [vmem:[#allocation9 + $0x14] ss:$8 sps:$4 sm:$0xff]  }
 0xbf3   :  { %v2604_v46 = vmax.f32 %v16222_v9, %v13350_v31  ;;  %v2596_v30 = vsel %vm672_vm0, %v13349_v20, %v13350_v31  ;;  %v13568_v31 = vld [vmem:[#allocation9 + $0x10] ss:$8 sps:$4 sm:$0xff]   ;;  %v2910_v20 = vld [vmem:[#allocation33] sm:$0x1] }
 0xbf4   :  { %v2603_v47 = vmax.f32 %v16218_v17, %v2596_v30  ;;  %v13351_v48 = vpack.i.bf16 %v2602_v32, %v2601_v22 }
 0xbf6   :  { %13352 = vrot.lane.b32.xlu0 %v13351_v48, %s15039_s4  ;;  %v13356_v37 = vpack.i.bf16 %v2604_v46, %v2603_v47  ;;  %v2912_v48 = vpack.i.b16 %v2910_v20, %v2910_v20 }
 0xbf8   :  { %13357 = vrot.lane.b32.xlu1 %v13356_v37, %s15039_s4 }
 0xc68   :  { %v13353_v29 = vpop.permute.xlu0 %13352 }
 0xc69   :  { %v13355_v26 = vunpack.i.h.bf16 %v13353_v29  ;;  %v13354_v45 = vunpack.i.l.bf16 %v13353_v29 }
 0xc6a   :  { %v13358_v41 = vpop.permute.xlu1 %13357 }
 0xc6b   :  { %v2618_v12 = vsel %vm2271_vm13, %v13354_v45, %v13355_v26  ;;  %v13360_v58 = vunpack.i.h.bf16 %v13358_v41  ;;  %v13359_v43 = vunpack.i.l.bf16 %v13358_v41  ;;  %v2625_v25 = vmax.f32 %v2602_v32, %v13355_v26  ;;  %v13565_v32 = vld [vmem:[#allocation9] ss:$8 sps:$4 sm:$0xff]  }
 0xc6c   :  { %v2624_v7 = vmax.f32 %v2601_v22, %v2618_v12 }
 0xc6d   :  { %v2627_v62 = vmax.f32 %v2604_v46, %v13360_v58  ;;  %v2619_v0 = vsel %vm2271_vm13, %v13359_v43, %v13360_v58  ;;  %v16286_v58 = vrot.slane %v2912_v48, %v15817_v15 }
 0xc6e   :  { %v2626_v4 = vmax.f32 %v2603_v47, %v2619_v0 }
 0xc6f   :  { %v2629_v18 = vpack.c.bf16 %v2627_v62, %v2625_v25 }
 0xc70   :  { %v2628_v8 = vpack.c.bf16 %v2626_v4, %v2624_v7 }
 0xc71   :  { %11543 = vmatprep.mubr.msk.bf16.mxu1 %vm2725_vm6, %v2629_v18  ;;  %vm3032_vm6 = vcmask 261120  }
 0xc72   :  { %2769 = vmatmul.mubr.bf16.vlgmr.msra.gmra.mrb[20].mxu1 %v2628_v8 }
 0xc73   :  { %11548 = vmatprep.mubr.msk.bf16.mxu1 %vm2532_vm8, %v13563_v27  ;;  %v13572_v27 = vld [vmem:[#allocation10 + $0x8] ss:$12 sps:$4 sm:$0xff]  }
 0xc74   :  { %12767 = vmatprep.mubr.msk.bf16.mxu0 %vm3032_vm6, %v13572_v27 }
 0xd45   :  { %v2770_v16 = vpop.f32.mrb[20].mxu1 }
 0xd46   :  { %v2772_v24 = vpop.f32.mrb[21].mxu1 }
 0xd47   :  { %v2773_v13 = vpop.f32.mrb[22].mxu1 }
 0xd48   :  { %v2777_v56 = vpack.c.bf16 %v2773_v13, %v2770_v16  ;;  %v2775_v60 = vpop.f32.mrb[23].mxu1 }
 0xd4a   :  { %2782 = vrot.lane.b32.xlu1 %v2777_v56, %s15028_s8  ;;  %2779 = vrot.lane.b32.xlu0 %v2777_v56, %s15027_s14 }
 0xd4b   :  { %2856 = vmatpush1.bf16.msra.mxu1 %v2777_v56 }
 0xd4c   :  { %2857 = vmatprep.subr.bf16.mxu1 %v17836_v6 }
 0xd4e   :  { %2788 = vrot.lane.b32.xlu1 %v2777_v56, %s15043_s30  ;;  %2785 = vrot.lane.b32.xlu0 %v2777_v56, %s15044_s13 }
 0xd52   :  { %2794 = vrot.lane.b32.xlu1 %v2777_v56, %s15040_s28  ;;  %2791 = vrot.lane.b32.xlu0 %v2777_v56, %s15045_s1 }
 0xd56   :  { %2800 = vrot.lane.b32.xlu1 %v2777_v56, %s15046_s2  ;;  %2797 = vrot.lane.b32.xlu0 %v2777_v56, %s15047_s29 }
 0xd5a   :  { %2818 = vperm.xlu1 %13340, %v2808_v61   ;;  %2813 = vperm.xlu0 %13314, %v2807_v36   ;;  %v13571_v36 = vld [vmem:[#allocation10 + $0x4] ss:$12 sps:$4 sm:$0xff]  }
 0xd5e   :  { %2828 = vperm.xlu1 %13340, %v2810_v55   ;;  %2823 = vperm.xlu0 %13314, %v2809_v63   ;;  %v2978_v55 = vld [vmem:[%s17906_s7] sm:$0xff]  ;;  %v2980_v63 = vld [vmem:[%s17906_s7 + $0x10] sm:$0xff] }
 0xdbc   :  { %v2780_v35 = vpop.permute.xlu0 %2779  ;;  %v2783_v38 = vpop.permute.xlu1 %2782 }
 0xdbd   :  { %2858 = vmatpush1.bf16.msra.mxu1 %v2780_v35  ;;  %v2979_v35 = vld [vmem:[%s17906_s7 + $0x8] sm:$0xff] }
 0xdbe   :  { %2859 = vmatprep.subr.bf16.mxu1 %v17836_v6 }
 0xdc0   :  { %v2786_v53 = vpop.permute.xlu0 %2785  ;;  %v2789_v33 = vpop.permute.xlu1 %2788 }
 0xdc1   :  { %2860 = vmatpush1.bf16.msra.mxu1 %v2783_v38  ;;  %v2981_v38 = vld [vmem:[%s17906_s7 + $0x18] sm:$0xff]  ;;  %s17913_s7 = sld [smem:[#allocation86_spill]] }
 0xdc2   :  { %2861 = vmatprep.subr.bf16.mxu1 %v17836_v6 }
 0xdc4   :  { %v2792_v2 = vpop.permute.xlu0 %2791  ;;  %v2795_v52 = vpop.permute.xlu1 %2794 }
 0xdc5   :  { %2862 = vmatpush1.bf16.msra.mxu1 %v2786_v53 }
 0xdc6   :  { %2863 = vmatprep.subr.bf16.mxu1 %v17836_v6 }
 0xdc8   :  { %v2798_v40 = vpop.permute.xlu0 %2797  ;;  %v2801_v59 = vpop.permute.xlu1 %2800 }
 0xdc9   :  { %2864 = vmatpush1.bf16.msra.mxu1 %v2789_v33 }
 0xdca   :  { %2865 = vmatprep.subr.bf16.mxu1 %v17836_v6 }
 0xdcd   :  { %2866 = vmatpush1.bf16.msra.mxu1 %v2792_v2 }
 0xdce   :  { %2867 = vmatprep.subr.bf16.mxu1 %v17836_v6 }
 0xdd1   :  { %2868 = vmatpush1.bf16.msra.mxu1 %v2795_v52 }
 0xdd2   :  { %2869 = vmatprep.subr.bf16.mxu1 %v17836_v6 }
 0xdd5   :  { %2870 = vmatpush1.bf16.msra.mxu1 %v2798_v40 }
 0xdd6   :  { %2871 = vmatprep.subr.bf16.mxu1 %v17836_v6 }
 0xdd9   :  { %2872 = vmatpush1.bf16.msra.mxu1 %v2801_v59  ;;  %v2814_v22 = vpop.permute.xlu0 %2813  ;;  %v2819_v37 = vpop.permute.xlu1 %2818 }
 0xddc   :  { %2888 = vmatmul.mubr.bf16.vlgmr.msra.gmra.mrb[24].mxu1 %v13565_v32 }
 0xddd   :  { %11549 = vmatprep.mubr.msk.bf16.mxu1 %vm2532_vm8, %v13566_v42  ;;  %v2824_v25 = vpop.permute.xlu0 %2823  ;;  %v2829_v18 = vpop.permute.xlu1 %2828 }
 0xde4   :  { %2896 = vmatmul.mubr.bf16.gmra.mrb[28].mxu1 %v13568_v31 }
 0xde5   :  { %3071 = vmatprep.mubr.bf16.mxu1 %v13571_v36 }
 0xeaf   :  { %v2889_v46 = vpop.f32.mrb[24].mxu1 }
 0xeb0   :  { %v2890_v30 = vadd.f32 %v2889_v46, %v2814_v22  ;;  %v2891_v47 = vpop.f32.mrb[25].mxu1 }
 0xeb1   :  { %v2892_v29 = vpop.f32.mrb[26].mxu1 }
 0xeb2   :  { %v2893_v26 = vadd.f32 %v2892_v29, %v2819_v37  ;;  %v2894_v45 = vpop.f32.mrb[27].mxu1  ;;  %v2904_v41 = vmax.f32 %v2890_v30, 0.0  ;;  %v13569_v37 = vld [vmem:[#allocation10] ss:$12 sps:$4 sm:$0xff]   ;;  %v13574_v29 = vld [vmem:[#allocation10 + $0x1c] ss:$12 sps:$4 sm:$0xff]  }
 0xeb3   :  { %v13573_v45 = vld [vmem:[#allocation10 + $0x20] ss:$12 sps:$4 sm:$0xff]  }
 0xeb4   :  { %v2905_v12 = vmax.f32 %v2893_v26, 0.0 }
 0xeb6   :  { %v2908_v43 = vpack.c.bf16 %v2905_v12, %v2904_v41  ;;  %v13576_v41 = vld [vmem:[#allocation10 + $0x18] ss:$12 sps:$4 sm:$0xff]  }
 0xeb7   :  { %v2897_v62 = vpop.f32.mrb[28].mxu1 }
 0xeb8   :  { %v2918_v0 = vmul.bf16 %v16286_v58, %v2908_v43  ;;  %v2898_v7 = vadd.f32 %v2897_v62, %v2824_v25  ;;  %v2899_v4 = vpop.f32.mrb[29].mxu1 }
 0xeb9   :  { %v2900_v8 = vpop.f32.mrb[30].mxu1 }
 0xeba   :  { %v2901_v16 = vadd.f32 %v2900_v8, %v2829_v18  ;;  %v2902_v24 = vpop.f32.mrb[31].mxu1  ;;  %2940 = vrot.lane.b32.xlu0 %v2918_v0, %s15043_s30  ;;  %v2906_v13 = vmax.f32 %v2898_v7, 0.0 }
 0xebc   :  { %v2907_v56 = vmax.f32 %v2901_v16, 0.0 }
 0xebe   :  { %v2909_v60 = vpack.c.bf16 %v2907_v56, %v2906_v13  ;;  %2946 = vrot.lane.b32.xlu0 %v2918_v0, %s15045_s1 }
 0xec0   :  { %v2919_v61 = vmul.bf16 %v16286_v58, %v2909_v60 }
 0xec2   :  { %2942 = vrot.lane.b32.xlu1 %v2919_v61, %s15043_s30  ;;  %2948 = vrot.lane.b32.xlu0 %v2919_v61, %s15045_s1 }
 0xec6   :  { %2922 = vrot.lane.b32.xlu1 %v2918_v0, %s15027_s14  ;;  %2952 = vrot.lane.b32.xlu0 %v2918_v0, %s15040_s28 }
 0xeca   :  { %2924 = vrot.lane.b32.xlu1 %v2919_v61, %s15027_s14  ;;  %2954 = vrot.lane.b32.xlu0 %v2919_v61, %s15040_s28 }
 0xece   :  { %2928 = vrot.lane.b32.xlu1 %v2918_v0, %s15028_s8  ;;  %2958 = vrot.lane.b32.xlu0 %v2918_v0, %s15047_s29 }
 0xed2   :  { %2930 = vrot.lane.b32.xlu1 %v2919_v61, %s15028_s8  ;;  %2960 = vrot.lane.b32.xlu0 %v2919_v61, %s15047_s29 }
 0xed6   :  { %2934 = vrot.lane.b32.xlu1 %v2918_v0, %s15044_s13  ;;  %2964 = vrot.lane.b32.xlu0 %v2918_v0, %s15046_s2 }
 0xeda   :  { %2936 = vrot.lane.b32.xlu1 %v2919_v61, %s15044_s13  ;;  %2984 = vperm.xlu0 %13314, %v2978_v55  }
 0xede   :  { %2966 = vrot.lane.b32.xlu1 %v2919_v61, %s15046_s2  ;;  %2994 = vperm.xlu0 %13314, %v2980_v63  }
 0xee2   :  { %2989 = vperm.xlu1 %13340, %v2979_v35  }
 0xee6   :  { %2999 = vperm.xlu1 %13340, %v2981_v38  }
 0xf2c   :  { %v2941_v53 = vpop.permute.xlu0 %2940 }
 0xf2d   :  { %12055 = vmatprep.subr.bf16.mxu1 %v2941_v53 }
 0xf2e   :  { %12056 = vmatpush3.bf16.msra.mxu1 %v2918_v0 }
 0xf30   :  { %v2947_v33 = vpop.permute.xlu0 %2946 }
 0xf34   :  { %v2943_v2 = vpop.permute.xlu1 %2942  ;;  %v2949_v52 = vpop.permute.xlu0 %2948 }
 0xf35   :  { %12057 = vmatprep.subr.bf16.mxu1 %v2943_v2 }
 0xf36   :  { %12058 = vmatpush3.bf16.msra.mxu1 %v2919_v61 }
 0xf37   :  { %12059 = vmatprep.subr.bf16.mxu1 %v2947_v33 }
 0xf38   :  { %v2923_v40 = vpop.permute.xlu1 %2922  ;;  %v2953_v59 = vpop.permute.xlu0 %2952 }
 0xf3a   :  { %12060 = vmatpush3.bf16.msra.mxu1 %v2923_v40 }
 0xf3b   :  { %12061 = vmatprep.subr.bf16.mxu1 %v2949_v52 }
 0xf3c   :  { %v2925_v32 = vpop.permute.xlu1 %2924  ;;  %v2955_v42 = vpop.permute.xlu0 %2954 }
 0xf3e   :  { %12062 = vmatpush3.bf16.msra.mxu1 %v2925_v32 }
 0xf3f   :  { %12063 = vmatprep.subr.bf16.mxu1 %v2953_v59 }
 0xf40   :  { %v2929_v31 = vpop.permute.xlu1 %2928  ;;  %v2959_v20 = vpop.permute.xlu0 %2958 }
 0xf42   :  { %12064 = vmatpush3.bf16.msra.mxu1 %v2929_v31 }
 0xf43   :  { %12065 = vmatprep.subr.bf16.mxu1 %v2955_v42 }
 0xf44   :  { %v2931_v22 = vpop.permute.xlu1 %2930  ;;  %v2961_v46 = vpop.permute.xlu0 %2960 }
 0xf46   :  { %12066 = vmatpush3.bf16.msra.mxu1 %v2931_v22  ;;  %v13578_v22 = vld [vmem:[#allocation39 + $0x8] sm:$0xff]  }
 0xf47   :  { %12067 = vmatprep.subr.bf16.mxu1 %v2959_v20  ;;  %v13577_v20 = vld [vmem:[#allocation39] sm:$0xff]  }
 0xf48   :  { %v2935_v30 = vpop.permute.xlu1 %2934  ;;  %v2965_v47 = vpop.permute.xlu0 %2964 }
 0xf49   :  { %12763 = vmatprep.subr.bf16.mxu0 %v2965_v47 }
 0xf4a   :  { %12068 = vmatpush3.bf16.msra.mxu1 %v2935_v30  ;;  %12764 = vmatpush3.bf16.msra.mxu0 %v2965_v47 }
 0xf4b   :  { %12069 = vmatprep.subr.bf16.mxu1 %v2961_v46 }
 0xf4c   :  { %v2937_v48 = vpop.permute.xlu1 %2936 }
 0xf4e   :  { %12070 = vmatpush3.bf16.msra.mxu1 %v2937_v48 }
 0xf50   :  { %v2967_v26 = vpop.permute.xlu1 %2966 }
 0xf51   :  { %3072 = vmatmul.mubr.bf16.vlgmr.msra.gmra.mrb[32].mxu1 %v13569_v37  ;;  %12765 = vmatprep.subr.bf16.mxu0 %v2967_v26  ;;  %v13579_v37 = vld [vmem:[#allocation39 + $0x10] sm:$0xff]  }
 0xf52   :  { %12766 = vmatpush3.bf16.msra.mxu0 %v2967_v26  ;;  %3079 = vmatprep.mubr.bf16.mxu1 %v13574_v29  ;;  %v13580_v29 = vld [vmem:[#allocation39 + $0x18] sm:$0xff]  }
 0xf53   :  { %12771 = vmatprep.subr.bf16.mxu0 %v13577_v20 }
 0xf55   :  { %12768 = vmatmul.mubr.msk.bf16.vlgmr.msra.gmra.mrb[16].mxu0 %vm3032_vm6, %v13573_v45 }
 0xf56   :  { %12772 = vmatpush3.bf16.msra.mxu0 %v13577_v20 }
 0xf57   :  { %12773 = vmatprep.subr.bf16.mxu0 %v13578_v22 }
 0xf59   :  { %3080 = vmatmul.mubr.bf16.gmra.mrb[36].mxu1 %v13576_v41  ;;  %v2985_v0 = vpop.permute.xlu0 %2984 }
 0xf5a   :  { %12774 = vmatpush3.bf16.msra.mxu0 %v13578_v22 }
 0xf5b   :  { %12775 = vmatprep.subr.bf16.mxu0 %v13579_v37 }
 0xf5d   :  { %v2995_v33 = vpop.permute.xlu0 %2994 }
 0xf5e   :  { %12776 = vmatpush3.bf16.msra.mxu0 %v13579_v37  ;;  %v3350_v37 = vld [vmem:[%s17907_s15 + $0x8] sm:$0xff] }
 0xf5f   :  { %12777 = vmatprep.subr.bf16.mxu0 %v13580_v29 }
 0xf61   :  { %v2990_v16 = vpop.permute.xlu1 %2989 }
 0xf62   :  { %12778 = vmatpush3.bf16.msra.mxu0 %v13580_v29  ;;  %v3349_v29 = vld [vmem:[%s17907_s15] sm:$0xff] }
 0xf65   :  { %v3000_v32 = vpop.permute.xlu1 %2999 }
0x1024   :  { %v12071_v12 = vpop.f32.mrb[32].mxu1 }
0x1025   :  { %v12072_v43 = vpop.f32.mrb[33].mxu1 }
0x1026   :  { %v12073_v25 = vadd.f32 %v12072_v43, %v12071_v12  ;;  %v12074_v62 = vpop.f32.mrb[34].mxu1  ;;  %v13581_v12 = vld [vmem:[#allocation39 + $0x20] ss:$0 sps:$4 sm:$0x11]   ;;  %v3228_v43 = vsel %vm3226_vm4, 65535, %v17836_v6  ;;  %vm3219_vm4 = vcmask 531456  }
0x1027   :  { %v12075_v7 = vpop.f32.mrb[35].mxu1 }
0x1028   :  { %v12076_v4 = vadd.f32 %v12075_v7, %v12074_v62  ;;  %v12769_v18 = vpop.f32.mrb[16].mxu0  ;;  %v3074_v8 = vadd.f32 %v12073_v25, %v2985_v0  ;;  %v3230_v0 = vand.u32 %v13581_v12, %v3228_v43  ;;  %v3353_v12 = vld [vmem:[%s17907_s15 + $0x20] sm:$0xff]  ;;  %v3356_v43 = vld [vmem:[%s17907_s15 + $0x38] sm:$0xff] }
0x1029   :  { %v3122_v24 = vpop.f32.mrb[17].mxu0 }
0x102a   :  { %v3123_v13 = vadd.f32 %v3122_v24, %v3074_v8  ;;  %v12770_v56 = vpop.f32.mrb[18].mxu0  ;;  %v3077_v60 = vadd.f32 %v12076_v4, %v2990_v16  ;;  %12779 = vmatprep.subr.bf16.mxu0 %v3230_v0 }
0x102b   :  { %v3125_v61 = vpop.f32.mrb[19].mxu0  ;;  %12780 = vmatpush3.bf16.msra.mxu0 %v3230_v0 }
0x102c   :  { %v3126_v36 = vadd.f32 %v3125_v61, %v3077_v60  ;;  %v12077_v27 = vpop.f32.mrb[36].mxu1  ;;  %v16312_v63 = vmax.f32 %v3123_v13, 0.0 }
0x102d   :  { %v12078_v55 = vpop.f32.mrb[37].mxu1 }
0x102e   :  { %v16314_v35 = vmax.f32 %v3126_v36, 0.0  ;;  %v12079_v38 = vadd.f32 %v12078_v55, %v12077_v27  ;;  %v12080_v53 = vpop.f32.mrb[38].mxu1 }
0x102f   :  { %v12081_v2 = vpop.f32.mrb[39].mxu1 }
0x1030   :  { %v13361_v52 = vpack.i.bf16 %v16314_v35, %v16312_v63  ;;  %v3082_v40 = vadd.f32 %v12079_v38, %v2995_v33  ;;  %v12082_v59 = vadd.f32 %v12081_v2, %v12080_v53 }
0x1032   :  { %v3131_v42 = vadd.f32 %v12769_v18, %v3082_v40  ;;  %v3085_v31 = vadd.f32 %v12082_v59, %v3000_v32  ;;  %13362 = vrot.lane.b32.xlu0 %v13361_v52, %s15027_s14 }
0x1034   :  { %v3134_v46 = vadd.f32 %v12770_v56, %v3085_v31  ;;  %v16319_v30 = vmax.f32 %v3131_v42, 0.0 }
0x1036   :  { %v16321_v47 = vmax.f32 %v3134_v46, 0.0  ;;  %v13584_v46 = vld [vmem:[#allocation12 + $0x4] ss:$12 sps:$4 sm:$0xff]  }
0x1037   :  { %3501 = vmatprep.mubr.bf16.mxu1 %v13584_v46 }
0x1038   :  { %v13366_v48 = vpack.i.bf16 %v16321_v47, %v16319_v30 }
0x103a   :  { %13367 = vrot.lane.b32.xlu1 %v13366_v48, %s15027_s14  ;;  %v13585_v48 = vld [vmem:[#allocation12 + $0x8] ss:$12 sps:$4 sm:$0xff]  }
0x10a4   :  { %v13363_v26 = vpop.permute.xlu0 %13362 }
0x10a5   :  { %v13365_v45 = vunpack.i.h.bf16 %v13363_v26  ;;  %v13364_v41 = vunpack.i.l.bf16 %v13363_v26  ;;  %v3352_v26 = vld [vmem:[%s17907_s15 + $0x18] sm:$0xff] }
0x10a7   :  { %v3158_v25 = vmax.f32 %v16314_v35, %v13365_v45  ;;  %v3157_v62 = vmax.f32 %v16312_v63, %v13364_v41  ;;  %v3351_v45 = vld [vmem:[%s17907_s15 + $0x10] sm:$0xff]  ;;  %v3354_v41 = vld [vmem:[%s17907_s15 + $0x28] sm:$0xff] }
0x10a9   :  { %v13371_v7 = vpack.i.bf16 %v3158_v25, %v3157_v62 }
0x10ab   :  { %13372 = vrot.lane.b32.xlu0 %v13371_v7, %s15044_s13 }
0x10ac   :  { %v13368_v4 = vpop.permute.xlu1 %13367 }
0x10ad   :  { %v13370_v18 = vunpack.i.h.bf16 %v13368_v4  ;;  %v13369_v8 = vunpack.i.l.bf16 %v13368_v4 }
0x10af   :  { %v3160_v16 = vmax.f32 %v16321_v47, %v13370_v18  ;;  %v3159_v24 = vmax.f32 %v16319_v30, %v13369_v8 }
0x10b1   :  { %v13376_v13 = vpack.i.bf16 %v3160_v16, %v3159_v24 }
0x10b3   :  { %13377 = vrot.lane.b32.xlu1 %v13376_v13, %s15044_s13 }
0x111d   :  { %v13373_v56 = vpop.permute.xlu0 %13372 }
0x111e   :  { %v13375_v60 = vunpack.i.h.bf16 %v13373_v56  ;;  %v13374_v61 = vunpack.i.l.bf16 %v13373_v56 }
0x1120   :  { %v3178_v36 = vmax.f32 %v3158_v25, %v13375_v60  ;;  %v3177_v27 = vmax.f32 %v3157_v62, %v13374_v61  ;;  %v3355_v25 = vld [vmem:[%s17907_s15 + $0x30] sm:$0xff]  ;;  %s17915_s15 = sld [smem:[#allocation89_spill]] }
0x1122   :  { %v3181_v55 = vpack.c.bf16 %v3178_v36, %v3177_v27 }
0x1124   :  { %12781 = vmatprep.mubr.msk.bf16.mxu0 %vm3219_vm4, %v3181_v55 }
0x1125   :  { %v13378_v38 = vpop.permute.xlu1 %13377 }
0x1126   :  { %v13380_v53 = vunpack.i.h.bf16 %v13378_v38  ;;  %v13379_v33 = vunpack.i.l.bf16 %v13378_v38  ;;  %v13582_v38 = vld [vmem:[#allocation12] ss:$12 sps:$4 sm:$0xff]  }
0x1128   :  { %v3180_v2 = vmax.f32 %v3160_v16, %v13380_v53  ;;  %v3179_v52 = vmax.f32 %v3159_v24, %v13379_v33  ;;  %v13587_v33 = vld [vmem:[#allocation12 + $0x1c] ss:$12 sps:$4 sm:$0xff]  }
0x112a   :  { %v3182_v40 = vpack.c.bf16 %v3180_v2, %v3179_v52  ;;  %v13586_v2 = vld [vmem:[#allocation12 + $0x20] ss:$12 sps:$4 sm:$0xff]   ;;  %v13593_v52 = vld [vmem:[#allocation12 + $0x38] ss:$12 sps:$4 sm:$0xff]  }
0x112c   :  { %12782 = vmatmul.mubr.msk.bf16.vlgmr.msra.gmra.mrb[20].mxu0 %vm3219_vm4, %v3182_v40  ;;  %v13589_v40 = vld [vmem:[#allocation12 + $0x18] ss:$12 sps:$4 sm:$0xff]   ;;  %vm3895_vm4 = vcmask 523264  }
0x112d   :  { %12789 = vmatprep.mubr.msk.bf16.mxu0 %vm3032_vm6, %v13585_v48 }
0x11ff   :  { %v12783_v59 = vpop.f32.mrb[20].mxu0 }
0x1200   :  { %v3266_v32 = vpop.f32.mrb[21].mxu0 }
0x1201   :  { %v12784_v42 = vpop.f32.mrb[22].mxu0 }
0x1202   :  { %v3282_v31 = vpack.c.bf16 %v12784_v42, %v12783_v59  ;;  %v3269_v20 = vpop.f32.mrb[23].mxu0  ;;  %v13590_v59 = vld [vmem:[#allocation12 + $0x34] ss:$12 sps:$4 sm:$0xff]   ;;  %v13592_v42 = vld [vmem:[#allocation12 + $0x30] ss:$12 sps:$4 sm:$0xff]  }
0x1203   :  { %v3281_v22 = vpack.c.bf16 %v3269_v20, %v3266_v32  ;;  %v13594_v32 = vld [vmem:[#allocation12 + $0x50] ss:$12 sps:$4 sm:$0xff]   ;;  %v13597_v20 = vld [vmem:[#allocation12 + $0x48] ss:$12 sps:$4 sm:$0xff]  }
0x1204   :  { %3305 = vrot.lane.b32.xlu1 %v3282_v31, %s15048_s11 }
0x1205   :  { %3303 = vrot.lane.b32.xlu0 %v3281_v22, %s15048_s11 }
0x1208   :  { %3285 = vrot.lane.b32.xlu1 %v3281_v22, %s15027_s14 }
0x1209   :  { %3309 = vrot.lane.b32.xlu0 %v3281_v22, %s15044_s13 }
0x120c   :  { %3287 = vrot.lane.b32.xlu1 %v3282_v31, %s15027_s14 }
0x120d   :  { %3311 = vrot.lane.b32.xlu0 %v3282_v31, %s15044_s13 }
0x1210   :  { %3291 = vrot.lane.b32.xlu1 %v3281_v22, %s15028_s8 }
0x1211   :  { %3315 = vrot.lane.b32.xlu0 %v3281_v22, %s15045_s1 }
0x1214   :  { %3293 = vrot.lane.b32.xlu1 %v3282_v31, %s15028_s8 }
0x1215   :  { %3317 = vrot.lane.b32.xlu0 %v3282_v31, %s15045_s1 }
0x1218   :  { %3297 = vrot.lane.b32.xlu1 %v3281_v22, %s15049_s19 }
0x1219   :  { %3321 = vrot.lane.b32.xlu0 %v3281_v22, %s15050_s25 }
0x121c   :  { %3299 = vrot.lane.b32.xlu1 %v3282_v31, %s15049_s19 }
0x121d   :  { %3323 = vrot.lane.b32.xlu0 %v3282_v31, %s15050_s25 }
0x1220   :  { %3329 = vrot.lane.b32.xlu1 %v3282_v31, %s15039_s4 }
0x1221   :  { %3327 = vrot.lane.b32.xlu0 %v3281_v22, %s15039_s4 }
0x1224   :  { %3364 = vperm.xlu1 %13340, %v3350_v37  }
0x1225   :  { %3359 = vperm.xlu0 %13314, %v3349_v29  }
0x1228   :  { %3374 = vperm.xlu1 %13340, %v3352_v26  }
0x1229   :  { %3369 = vperm.xlu0 %13314, %v3351_v45   ;;  %v3611_v45 = vld [vmem:[#allocation34] sm:$0x1] }
0x122c   :  { %3384 = vperm.xlu1 %13340, %v3354_v41  }
0x122d   :  { %3379 = vperm.xlu0 %13314, %v3353_v12  }
0x1230   :  { %3394 = vperm.xlu1 %13340, %v3356_v43  }
0x1231   :  { %3389 = vperm.xlu0 %13314, %v3355_v25  }
0x1276   :  { %v3306_v62 = vpop.permute.xlu1 %3305 }
0x1277   :  { %v3304_v0 = vpop.permute.xlu0 %3303 }
0x1278   :  { %12094 = vmatprep.subr.bf16.mxu1 %v3304_v0 }
0x1279   :  { %12095 = vmatpush3.bf16.msra.mxu1 %v3281_v22 }
0x127a   :  { %v3286_v7 = vpop.permute.xlu1 %3285  ;;  %12096 = vmatprep.subr.bf16.mxu1 %v3306_v62 }
0x127b   :  { %v3310_v4 = vpop.permute.xlu0 %3309 }
0x127d   :  { %12097 = vmatpush3.bf16.msra.mxu1 %v3282_v31  ;;  %v13595_v31 = vld [vmem:[#allocation12 + $0x4c] ss:$12 sps:$4 sm:$0xff]  }
0x127e   :  { %v3288_v18 = vpop.permute.xlu1 %3287  ;;  %12098 = vmatprep.subr.bf16.mxu1 %v3310_v4 }
0x127f   :  { %v3312_v8 = vpop.permute.xlu0 %3311 }
0x1281   :  { %12099 = vmatpush3.bf16.msra.mxu1 %v3286_v7 }
0x1282   :  { %v3292_v16 = vpop.permute.xlu1 %3291  ;;  %12100 = vmatprep.subr.bf16.mxu1 %v3312_v8 }
0x1283   :  { %v3316_v24 = vpop.permute.xlu0 %3315 }
0x1285   :  { %12101 = vmatpush3.bf16.msra.mxu1 %v3288_v18  ;;  %v3613_v18 = vpack.i.b16 %v3611_v45, %v3611_v45 }
0x1286   :  { %v3294_v13 = vpop.permute.xlu1 %3293  ;;  %12102 = vmatprep.subr.bf16.mxu1 %v3316_v24 }
0x1287   :  { %v3318_v56 = vpop.permute.xlu0 %3317 }
0x1289   :  { %12103 = vmatpush3.bf16.msra.mxu1 %v3292_v16 }
0x128a   :  { %v3298_v60 = vpop.permute.xlu1 %3297  ;;  %12104 = vmatprep.subr.bf16.mxu1 %v3318_v56 }
0x128b   :  { %v3322_v61 = vpop.permute.xlu0 %3321 }
0x128d   :  { %12105 = vmatpush3.bf16.msra.mxu1 %v3294_v13 }
0x128e   :  { %12106 = vmatprep.subr.bf16.mxu1 %v3322_v61  ;;  %v3300_v36 = vpop.permute.xlu1 %3299  ;;  %v16362_v61 = vrot.slane %v3613_v18, %v15817_v15 }
0x128f   :  { %v3324_v27 = vpop.permute.xlu0 %3323 }
0x1291   :  { %12107 = vmatpush3.bf16.msra.mxu1 %v3298_v60 }
0x1292   :  { %12108 = vmatprep.subr.bf16.mxu1 %v3324_v27  ;;  %v3330_v53 = vpop.permute.xlu1 %3329 }
0x1293   :  { %v3328_v55 = vpop.permute.xlu0 %3327 }
0x1294   :  { %12785 = vmatprep.subr.bf16.mxu0 %v3328_v55 }
0x1295   :  { %12109 = vmatpush3.bf16.msra.mxu1 %v3300_v36  ;;  %12786 = vmatpush3.bf16.msra.mxu0 %v3328_v55 }
0x1296   :  { %12787 = vmatprep.subr.bf16.mxu0 %v3330_v53 }
0x1298   :  { %3502 = vmatmul.mubr.bf16.vlgmr.msra.gmra.mrb[40].mxu1 %v13582_v38 }
0x1299   :  { %12788 = vmatpush3.bf16.msra.mxu0 %v3330_v53  ;;  %3509 = vmatprep.mubr.bf16.mxu1 %v13587_v33 }
0x129c   :  { %12790 = vmatmul.mubr.msk.bf16.vlgmr.msra.gmra.mrb[24].mxu0 %vm3032_vm6, %v13586_v2 }
0x129d   :  { %12793 = vmatprep.mubr.msk.bf16.mxu0 %vm3032_vm6, %v13593_v52 }
0x12a0   :  { %3510 = vmatmul.mubr.bf16.gmra.mrb[44].mxu1 %v13589_v40 }
0x12a1   :  { %3517 = vmatprep.mubr.bf16.mxu1 %v13590_v59 }
0x12a3   :  { %v3365_v25 = vpop.permute.xlu1 %3364 }
0x12a4   :  { %12794 = vmatmul.mubr.msk.bf16.gmra.mrb[28].mxu0 %vm3032_vm6, %v13594_v32  ;;  %v3360_v29 = vpop.permute.xlu0 %3359 }
0x12a7   :  { %v3375_v40 = vpop.permute.xlu1 %3374 }
0x12a8   :  { %3518 = vmatmul.mubr.bf16.gmra.mrb[48].mxu1 %v13592_v42  ;;  %v3370_v55 = vpop.permute.xlu0 %3369 }
0x12a9   :  { %3525 = vmatprep.mubr.bf16.mxu1 %v13595_v31 }
0x12b0   :  { %3526 = vmatmul.mubr.bf16.gmra.mrb[52].mxu1 %v13597_v20 }
0x136b   :  { %v12110_v22 = vpop.f32.mrb[40].mxu1 }
0x136c   :  { %v12111_v46 = vpop.f32.mrb[41].mxu1 }
0x136d   :  { %v12112_v48 = vadd.f32 %v12111_v46, %v12110_v22  ;;  %v12113_v37 = vpop.f32.mrb[42].mxu1 }
0x136e   :  { %v12114_v26 = vpop.f32.mrb[43].mxu1 }
0x136f   :  { %v12115_v41 = vadd.f32 %v12114_v26, %v12113_v37  ;;  %v12791_v12 = vpop.f32.mrb[24].mxu0  ;;  %v3504_v43 = vadd.f32 %v12112_v48, %v3360_v29 }
0x1370   :  { %v3568_v62 = vpop.f32.mrb[25].mxu0 }
0x1371   :  { %v3569_v0 = vadd.f32 %v3568_v62, %v3504_v43  ;;  %v12792_v7 = vpop.f32.mrb[26].mxu0  ;;  %v3507_v4 = vadd.f32 %v12115_v41, %v3365_v25  ;;  %v3380_v43 = vpop.permute.xlu0 %3379 }
0x1372   :  { %v3571_v8 = vpop.f32.mrb[27].mxu0 }
0x1373   :  { %v3572_v16 = vadd.f32 %v3571_v8, %v3507_v4  ;;  %v12116_v24 = vpop.f32.mrb[44].mxu1  ;;  %v3599_v56 = vmax.f32 %v3569_v0, 0.0 }
0x1374   :  { %v12117_v13 = vpop.f32.mrb[45].mxu1 }
0x1375   :  { %v3600_v60 = vmax.f32 %v3572_v16, 0.0  ;;  %v12118_v36 = vadd.f32 %v12117_v13, %v12116_v24  ;;  %v12119_v27 = vpop.f32.mrb[46].mxu1 }
0x1376   :  { %v12120_v38 = vpop.f32.mrb[47].mxu1 }
0x1377   :  { %v3607_v53 = vpack.c.bf16 %v3600_v60, %v3599_v56  ;;  %v3512_v33 = vadd.f32 %v12118_v36, %v3370_v55  ;;  %v12121_v2 = vadd.f32 %v12120_v38, %v12119_v27  ;;  %v12795_v52 = vpop.f32.mrb[28].mxu0  ;;  %v3390_v55 = vpop.permute.xlu0 %3389 }
0x1378   :  { %v3584_v59 = vpop.f32.mrb[29].mxu0 }
0x1379   :  { %v16365_v32 = vmul.bf16 %v16362_v61, %v3607_v53  ;;  %v3577_v42 = vadd.f32 %v12791_v12, %v3512_v33  ;;  %v3515_v31 = vadd.f32 %v12121_v2, %v3375_v40  ;;  %v12796_v20 = vpop.f32.mrb[30].mxu0 }
0x137a   :  { %v3587_v22 = vpop.f32.mrb[31].mxu0 }
0x137b   :  { %v3580_v46 = vadd.f32 %v12792_v7, %v3515_v31  ;;  %v12122_v48 = vpop.f32.mrb[48].mxu1  ;;  %3663 = vrot.lane.b32.xlu1 %v16365_v32, %s15048_s11  ;;  %3639 = vrot.lane.b32.xlu0 %v16365_v32, %s15028_s8  ;;  %v3601_v29 = vmax.f32 %v3577_v42, 0.0  ;;  %v3385_v7 = vpop.permute.xlu1 %3384 }
0x137c   :  { %v12123_v37 = vpop.f32.mrb[49].mxu1 }
0x137d   :  { %v3602_v26 = vmax.f32 %v3580_v46, 0.0  ;;  %v12124_v45 = vadd.f32 %v12123_v37, %v12122_v48  ;;  %v12125_v41 = vpop.f32.mrb[50].mxu1 }
0x137e   :  { %v12126_v25 = vpop.f32.mrb[51].mxu1 }
0x137f   :  { %v3608_v62 = vpack.c.bf16 %v3602_v26, %v3601_v29  ;;  %v12127_v12 = vadd.f32 %v12126_v25, %v12125_v41  ;;  %3627 = vrot.lane.b32.xlu1 %v16365_v32, %s15027_s14  ;;  %3687 = vrot.lane.b32.xlu0 %v16365_v32, %s15045_s1  ;;  %v3520_v0 = vadd.f32 %v12124_v45, %v3380_v43  ;;  %v3395_v40 = vpop.permute.xlu1 %3394  ;;  %v3747_v26 = vld [vmem:[%s17908_s23] sm:$0xff]  ;;  %v3749_v45 = vld [vmem:[%s17908_s23 + $0x10] sm:$0xff] }
0x1380   :  { %v3748_v41 = vld [vmem:[%s17908_s23 + $0x8] sm:$0xff]  ;;  %v3751_v43 = vld [vmem:[%s17908_s23 + $0x20] sm:$0xff]  ;;  %v3750_v25 = vld [vmem:[%s17908_s23 + $0x18] sm:$0xff] }
0x1381   :  { %v16376_v4 = vmul.bf16 %v16362_v61, %v3608_v62  ;;  %v3585_v18 = vadd.f32 %v3584_v59, %v3520_v0  ;;  %v3523_v8 = vadd.f32 %v12127_v12, %v3385_v7  ;;  %v3753_v62 = vld [vmem:[%s17908_s23 + $0x30] sm:$0xff]  ;;  %v3752_v12 = vld [vmem:[%s17908_s23 + $0x28] sm:$0xff]  ;;  %v3754_v0 = vld [vmem:[%s17908_s23 + $0x38] sm:$0xff] }
0x1383   :  { %v3588_v16 = vadd.f32 %v3587_v22, %v3523_v8  ;;  %v12128_v24 = vpop.f32.mrb[52].mxu1  ;;  %3651 = vrot.lane.b32.xlu0 %v16365_v32, %s15049_s19  ;;  %3641 = vrot.lane.b32.xlu1 %v16376_v4, %s15028_s8  ;;  %v3603_v56 = vmax.f32 %v3585_v18, 0.0 }
0x1384   :  { %v12129_v13 = vpop.f32.mrb[53].mxu1 }
0x1385   :  { %v3604_v60 = vmax.f32 %v3588_v16, 0.0  ;;  %v12130_v36 = vadd.f32 %v12129_v13, %v12128_v24  ;;  %v12131_v27 = vpop.f32.mrb[54].mxu1 }
0x1386   :  { %v12132_v38 = vpop.f32.mrb[55].mxu1 }
0x1387   :  { %v3609_v53 = vpack.c.bf16 %v3604_v60, %v3603_v56  ;;  %v3528_v33 = vadd.f32 %v12130_v36, %v3390_v55  ;;  %v12133_v2 = vadd.f32 %v12132_v38, %v12131_v27  ;;  %3689 = vrot.lane.b32.xlu0 %v16376_v4, %s15045_s1  ;;  %3665 = vrot.lane.b32.xlu1 %v16376_v4, %s15048_s11 }
0x1389   :  { %v16387_v59 = vmul.bf16 %v16362_v61, %v3609_v53  ;;  %v3593_v42 = vadd.f32 %v12795_v52, %v3528_v33  ;;  %v3531_v31 = vadd.f32 %v12133_v2, %v3395_v40  ;;  %v13600_v52 = vld [vmem:[#allocation13 + $0x4] ss:$20 sps:$4 sm:$0xff]  }
0x138a   :  { %3940 = vmatprep.mubr.bf16.mxu0 %v13600_v52 }
0x138b   :  { %v3596_v22 = vadd.f32 %v12796_v20, %v3531_v31  ;;  %3629 = vrot.lane.b32.xlu1 %v16376_v4, %s15027_s14  ;;  %3643 = vrot.lane.b32.xlu0 %v16387_v59, %s15028_s8  ;;  %v3605_v46 = vmax.f32 %v3593_v42, 0.0  ;;  %v13606_v20 = vld [vmem:[#allocation13 + $0xc] ss:$20 sps:$4 sm:$0xff]  }
0x138c   :  { %4005 = vmatprep.mubr.bf16.mxu1 %v13606_v20  ;;  %v13603_v20 = vld [vmem:[#allocation13 + $0x28] ss:$20 sps:$4 sm:$0xff]  }
0x138d   :  { %v3606_v48 = vmax.f32 %v3596_v22, 0.0  ;;  %v13598_v22 = vld [vmem:[#allocation13] ss:$20 sps:$4 sm:$0xff]  }
0x138f   :  { %v3610_v37 = vpack.c.bf16 %v3606_v48, %v3605_v46  ;;  %3653 = vrot.lane.b32.xlu0 %v16376_v4, %s15049_s19  ;;  %v13601_v46 = vld [vmem:[#allocation13 + $0x2c] ss:$20 sps:$4 sm:$0xff]  }
0x1391   :  { %v16396_v29 = vmul.bf16 %v16362_v61, %v3610_v37 }
0x1393   :  { %3691 = vrot.lane.b32.xlu0 %v16387_v59, %s15045_s1  ;;  %3645 = vrot.lane.b32.xlu1 %v16396_v29, %s15028_s8 }
0x1397   :  { %3655 = vrot.lane.b32.xlu0 %v16387_v59, %s15049_s19  ;;  %3667 = vrot.lane.b32.xlu1 %v16387_v59, %s15048_s11 }
0x139b   :  { %3693 = vrot.lane.b32.xlu0 %v16396_v29, %s15045_s1  ;;  %3631 = vrot.lane.b32.xlu1 %v16387_v59, %s15027_s14 }
0x139f   :  { %3657 = vrot.lane.b32.xlu0 %v16396_v29, %s15049_s19  ;;  %3669 = vrot.lane.b32.xlu1 %v16396_v29, %s15048_s11 }
0x13a3   :  { %3699 = vrot.lane.b32.xlu0 %v16365_v32, %s15050_s25  ;;  %3633 = vrot.lane.b32.xlu1 %v16396_v29, %s15027_s14 }
0x13a7   :  { %3701 = vrot.lane.b32.xlu0 %v16376_v4, %s15050_s25  ;;  %3675 = vrot.lane.b32.xlu1 %v16365_v32, %s15044_s13 }
0x13ab   :  { %3703 = vrot.lane.b32.xlu0 %v16387_v59, %s15050_s25  ;;  %3677 = vrot.lane.b32.xlu1 %v16376_v4, %s15044_s13 }
0x13af   :  { %3705 = vrot.lane.b32.xlu0 %v16396_v29, %s15050_s25  ;;  %3679 = vrot.lane.b32.xlu1 %v16387_v59, %s15044_s13 }
0x13b3   :  { %3711 = vrot.lane.b32.xlu0 %v16365_v32, %s15039_s4  ;;  %3681 = vrot.lane.b32.xlu1 %v16396_v29, %s15044_s13 }
0x13b7   :  { %3715 = vrot.lane.b32.xlu0 %v16387_v59, %s15039_s4  ;;  %3713 = vrot.lane.b32.xlu1 %v16376_v4, %s15039_s4 }
0x13bb   :  { %3757 = vperm.xlu0 %13314, %v3747_v26   ;;  %3717 = vrot.lane.b32.xlu1 %v16396_v29, %s15039_s4  ;;  %v13607_v26 = vld [vmem:[#allocation13 + $0x54] ss:$20 sps:$4 sm:$0xff]  }
0x13bf   :  { %3767 = vperm.xlu0 %13314, %v3749_v45   ;;  %3762 = vperm.xlu1 %13340, %v3748_v41  }
0x13c3   :  { %3777 = vperm.xlu0 %13314, %v3751_v43   ;;  %3772 = vperm.xlu1 %13340, %v3750_v25  }
0x13c7   :  { %3787 = vperm.xlu0 %13314, %v3753_v62   ;;  %3782 = vperm.xlu1 %13340, %v3752_v12   ;;  %v13604_v62 = vld [vmem:[#allocation13 + $0x8] ss:$20 sps:$4 sm:$0xff]   ;;  %v13609_v12 = vld [vmem:[#allocation13 + $0x50] ss:$20 sps:$4 sm:$0xff]  }
0x13cb   :  { %3792 = vperm.xlu1 %13340, %v3754_v0   ;;  %v13610_v0 = vld [vmem:[#allocation13 + $0x34] ss:$20 sps:$4 sm:$0xff]  }
0x13ed   :  { %v3664_v7 = vpop.permute.xlu1 %3663  ;;  %v3640_v18 = vpop.permute.xlu0 %3639 }
0x13ee   :  { %12140 = vmatprep.subr.bf16.mxu0 %v3640_v18 }
0x13ef   :  { %12141 = vmatpush3.bf16.msra.mxu0 %v16365_v32 }
0x13f1   :  { %v3628_v8 = vpop.permute.xlu1 %3627  ;;  %v3688_v16 = vpop.permute.xlu0 %3687 }
0x13f2   :  { %12180 = vmatprep.subr.bf16.mxu1 %v3688_v16  ;;  %v13614_v16 = vld [vmem:[#allocation13 + $0x30] ss:$20 sps:$4 sm:$0xff]  }
0x13f3   :  { %12181 = vmatpush3.bf16.msra.mxu1 %v3664_v7  ;;  %v13612_v7 = vld [vmem:[#allocation13 + $0x7c] ss:$20 sps:$4 sm:$0xff]  }
0x13f5   :  { %v3642_v24 = vpop.permute.xlu1 %3641  ;;  %v3652_v13 = vpop.permute.xlu0 %3651 }
0x13f6   :  { %12142 = vmatprep.subr.bf16.mxu0 %v3642_v24  ;;  %v13615_v24 = vld [vmem:[#allocation13 + $0x78] ss:$20 sps:$4 sm:$0xff]  }
0x13f7   :  { %12143 = vmatpush3.bf16.msra.mxu0 %v16376_v4 }
0x13f9   :  { %v3666_v56 = vpop.permute.xlu1 %3665  ;;  %v3690_v60 = vpop.permute.xlu0 %3689 }
0x13fa   :  { %12182 = vmatprep.subr.bf16.mxu1 %v3690_v60  ;;  %v13619_v60 = vld [vmem:[#allocation13 + $0x10] ss:$20 sps:$4 sm:$0xff]  }
0x13fb   :  { %12183 = vmatpush3.bf16.msra.mxu1 %v3666_v56 }
0x13fd   :  { %v3644_v36 = vpop.permute.xlu0 %3643  ;;  %v3630_v27 = vpop.permute.xlu1 %3629 }
0x13fe   :  { %12144 = vmatprep.subr.bf16.mxu0 %v3644_v36  ;;  %v13618_v36 = vld [vmem:[#allocation13 + $0x58] ss:$20 sps:$4 sm:$0xff]  }
0x13ff   :  { %12145 = vmatpush3.bf16.msra.mxu0 %v16387_v59 }
0x1401   :  { %v3654_v55 = vpop.permute.xlu0 %3653 }
0x1405   :  { %v3646_v32 = vpop.permute.xlu1 %3645  ;;  %v3692_v38 = vpop.permute.xlu0 %3691 }
0x1406   :  { %12146 = vmatprep.subr.bf16.mxu0 %v3646_v32  ;;  %12184 = vmatprep.subr.bf16.mxu1 %v3692_v38  ;;  %v13624_v32 = vld [vmem:[#allocation13 + $0x60] ss:$20 sps:$4 sm:$0xff]  }
0x1407   :  { %12147 = vmatpush3.bf16.msra.mxu0 %v16396_v29  ;;  %v13623_v38 = vld [vmem:[#allocation13 + $0x80] ss:$20 sps:$4 sm:$0xff]  }
0x1408   :  { %12148 = vmatprep.subr.bf16.mxu0 %v3652_v13  ;;  %v13616_v13 = vld [vmem:[#allocation13 + $0x5c] ss:$20 sps:$4 sm:$0xff]  }
0x1409   :  { %v3668_v53 = vpop.permute.xlu1 %3667  ;;  %v3656_v33 = vpop.permute.xlu0 %3655 }
0x140a   :  { %12185 = vmatpush3.bf16.msra.mxu1 %v3668_v53  ;;  %v13625_v53 = vld [vmem:[#allocation13 + $0x88] ss:$20 sps:$4 sm:$0xff]  }
0x140b   :  { %12149 = vmatpush3.bf16.msra.mxu0 %v3628_v8 }
0x140c   :  { %12150 = vmatprep.subr.bf16.mxu0 %v3654_v55  ;;  %v13621_v55 = vld [vmem:[#allocation13 + $0x84] ss:$20 sps:$4 sm:$0xff]  }
0x140d   :  { %v3632_v4 = vpop.permute.xlu1 %3631  ;;  %v3694_v2 = vpop.permute.xlu0 %3693 }
0x140e   :  { %12186 = vmatprep.subr.bf16.mxu1 %v3694_v2 }
0x140f   :  { %12151 = vmatpush3.bf16.msra.mxu0 %v3630_v27  ;;  %v13620_v27 = vld [vmem:[#allocation13 + $0x38] ss:$20 sps:$4 sm:$0xff]  }
0x1410   :  { %12152 = vmatprep.subr.bf16.mxu0 %v3656_v33 }
0x1411   :  { %v3670_v40 = vpop.permute.xlu1 %3669  ;;  %v3658_v59 = vpop.permute.xlu0 %3657 }
0x1412   :  { %12187 = vmatpush3.bf16.msra.mxu1 %v3670_v40 }
0x1413   :  { %12153 = vmatpush3.bf16.msra.mxu0 %v3632_v4 }
0x1414   :  { %12154 = vmatprep.subr.bf16.mxu0 %v3658_v59 }
0x1415   :  { %v3634_v42 = vpop.permute.xlu1 %3633  ;;  %v3700_v31 = vpop.permute.xlu0 %3699 }
0x1416   :  { %12188 = vmatprep.subr.bf16.mxu1 %v3700_v31 }
0x1417   :  { %12155 = vmatpush3.bf16.msra.mxu0 %v3634_v42 }
0x1419   :  { %v3676_v48 = vpop.permute.xlu1 %3675  ;;  %v3702_v37 = vpop.permute.xlu0 %3701 }
0x141a   :  { %3941 = vmatmul.mubr.bf16.vlgmr.msra.gmra.mrb[32].mxu0 %v13598_v22  ;;  %12189 = vmatpush3.bf16.msra.mxu1 %v3676_v48 }
0x141b   :  { %12190 = vmatprep.subr.bf16.mxu1 %v3702_v37  ;;  %3948 = vmatprep.mubr.bf16.mxu0 %v13601_v46 }
0x141d   :  { %v3678_v29 = vpop.permute.xlu1 %3677  ;;  %v3704_v52 = vpop.permute.xlu0 %3703 }
0x141e   :  { %12191 = vmatpush3.bf16.msra.mxu1 %v3678_v29 }
0x141f   :  { %12192 = vmatprep.subr.bf16.mxu1 %v3704_v52 }
0x1421   :  { %v3680_v45 = vpop.permute.xlu1 %3679  ;;  %v3706_v41 = vpop.permute.xlu0 %3705 }
0x1422   :  { %3949 = vmatmul.mubr.bf16.gmra.mrb[36].mxu0 %v13603_v20  ;;  %12193 = vmatpush3.bf16.msra.mxu1 %v3680_v45 }
0x1423   :  { %12194 = vmatprep.subr.bf16.mxu1 %v3706_v41  ;;  %3956 = vmatprep.mubr.bf16.mxu0 %v13607_v26 }
0x1425   :  { %v3682_v43 = vpop.permute.xlu1 %3681  ;;  %v3712_v25 = vpop.permute.xlu0 %3711 }
0x1426   :  { %12195 = vmatpush3.bf16.msra.mxu1 %v3682_v43  ;;  %12797 = vmatprep.subr.bf16.mxu0 %v3712_v25 }
0x1427   :  { %12798 = vmatpush3.bf16.msra.mxu0 %v3712_v25 }
0x1429   :  { %v3714_v18 = vpop.permute.xlu1 %3713  ;;  %4006 = vmatmul.mubr.bf16.vlgmr.msra.gmra.mrb[56].mxu1 %v13604_v62  ;;  %v3716_v8 = vpop.permute.xlu0 %3715 }
0x142a   :  { %3957 = vmatmul.mubr.bf16.gmra.mrb[40].mxu0 %v13609_v12  ;;  %12799 = vmatprep.subr.bf16.mxu0 %v3714_v18 }
0x142b   :  { %12800 = vmatpush3.bf16.msra.mxu0 %v3714_v18  ;;  %4013 = vmatprep.mubr.bf16.mxu1 %v13610_v0 }
0x142c   :  { %12801 = vmatprep.subr.bf16.mxu0 %v3716_v8  ;;  %3964 = vmatprep.mubr.bf16.mxu0 %v13612_v7 }
0x142d   :  { %v3718_v56 = vpop.permute.xlu1 %3717 }
0x142f   :  { %12802 = vmatpush3.bf16.msra.mxu0 %v3716_v8 }
0x1430   :  { %12803 = vmatprep.subr.bf16.mxu0 %v3718_v56 }
0x1431   :  { %4014 = vmatmul.mubr.bf16.gmra.mrb[60].mxu1 %v13614_v16 }
0x1432   :  { %3965 = vmatmul.mubr.bf16.gmra.mrb[44].mxu0 %v13615_v24  ;;  %4021 = vmatprep.mubr.bf16.mxu1 %v13616_v13 }
0x1433   :  { %12804 = vmatpush3.bf16.msra.mxu0 %v3718_v56  ;;  %12805 = vmatprep.mubr.msk.bf16.mxu0 %vm3895_vm4, %v13619_v60 }
0x1439   :  { %4022 = vmatmul.mubr.bf16.gmra.mrb[64].mxu1 %v13618_v36 }
0x143a   :  { %12806 = vmatmul.mubr.msk.bf16.vlgmr.msra.gmra.mrb[48].mxu0 %vm3895_vm4, %v13620_v27  ;;  %4029 = vmatprep.mubr.bf16.mxu1 %v13621_v55  ;;  %v3758_v52 = vpop.permute.xlu0 %3757 }
0x143b   :  { %12809 = vmatprep.mubr.msk.bf16.mxu0 %vm3895_vm4, %v13624_v32 }
0x143e   :  { %v3763_v20 = vpop.permute.xlu1 %3762  ;;  %v3768_v36 = vpop.permute.xlu0 %3767 }
0x1441   :  { %4030 = vmatmul.mubr.bf16.gmra.mrb[68].mxu1 %v13623_v38 }
0x1442   :  { %12810 = vmatmul.mubr.msk.bf16.gmra.mrb[52].mxu0 %vm3895_vm4, %v13625_v53  ;;  %v3773_v27 = vpop.permute.xlu1 %3772 }
0x14ed   :  { %v12156_v33 = vpop.f32.mrb[32].mxu0 }
0x14ee   :  { %v12157_v4 = vpop.f32.mrb[33].mxu0 }
0x14ef   :  { %v12158_v2 = vadd.f32 %v12157_v4, %v12156_v33  ;;  %v12159_v40 = vpop.f32.mrb[34].mxu0 }
0x14f0   :  { %v12160_v59 = vpop.f32.mrb[35].mxu0 }
0x14f1   :  { %v12161_v42 = vadd.f32 %v12160_v59, %v12159_v40  ;;  %v3943_v43 = vadd.f32 %v12158_v2, %v3758_v52 }
0x14f3   :  { %v3946_v8 = vadd.f32 %v12161_v42, %v3763_v20 }
0x14f5   :  { %v12162_v31 = vpop.f32.mrb[36].mxu0 }
0x14f6   :  { %v12163_v22 = vpop.f32.mrb[37].mxu0 }
0x14f7   :  { %v12164_v46 = vadd.f32 %v12163_v22, %v12162_v31  ;;  %v12165_v48 = vpop.f32.mrb[38].mxu0 }
0x14f8   :  { %v12166_v37 = vpop.f32.mrb[39].mxu0 }
0x14f9   :  { %v12167_v29 = vadd.f32 %v12166_v37, %v12165_v48  ;;  %v3951_v53 = vadd.f32 %v12164_v46, %v3768_v36 }
0x14fb   :  { %v3954_v22 = vadd.f32 %v12167_v29, %v3773_v27 }
0x14fc   :  { %v12196_v26 = vpop.f32.mrb[56].mxu1 }
0x14fd   :  { %v12168_v45 = vpop.f32.mrb[40].mxu0  ;;  %v12197_v41 = vpop.f32.mrb[57].mxu1 }
0x14fe   :  { %v12198_v25 = vadd.f32 %v12197_v41, %v12196_v26  ;;  %v12169_v62 = vpop.f32.mrb[41].mxu0  ;;  %v12199_v12 = vpop.f32.mrb[58].mxu1 }
0x14ff   :  { %v12170_v0 = vadd.f32 %v12169_v62, %v12168_v45  ;;  %v12171_v7 = vpop.f32.mrb[42].mxu0  ;;  %v12200_v18 = vpop.f32.mrb[59].mxu1 }
0x1500   :  { %v12201_v16 = vadd.f32 %v12200_v18, %v12199_v12  ;;  %v12172_v24 = vpop.f32.mrb[43].mxu0  ;;  %v4008_v13 = vadd.f32 %v12198_v25, %v3943_v43  ;;  %v3778_v26 = vpop.permute.xlu0 %3777 }
0x1501   :  { %v12173_v56 = vadd.f32 %v12172_v24, %v12171_v7  ;;  %v3783_v45 = vpop.permute.xlu1 %3782  ;;  %v3959_v62 = vadd.f32 %v12170_v0, %v3778_v26 }
0x1502   :  { %v4011_v60 = vadd.f32 %v12201_v16, %v3946_v8 }
0x1503   :  { %v3962_v36 = vadd.f32 %v12173_v56, %v3783_v45 }
0x1504   :  { %v12202_v55 = vpop.f32.mrb[60].mxu1 }
0x1505   :  { %v12174_v32 = vpop.f32.mrb[44].mxu0  ;;  %v12203_v38 = vpop.f32.mrb[61].mxu1 }
0x1506   :  { %v12204_v33 = vadd.f32 %v12203_v38, %v12202_v55  ;;  %v12175_v4 = vpop.f32.mrb[45].mxu0  ;;  %v12205_v2 = vpop.f32.mrb[62].mxu1 }
0x1507   :  { %v12176_v40 = vadd.f32 %v12175_v4, %v12174_v32  ;;  %v12177_v59 = vpop.f32.mrb[46].mxu0  ;;  %v12206_v31 = vpop.f32.mrb[63].mxu1 }
0x1508   :  { %v12207_v48 = vadd.f32 %v12206_v31, %v12205_v2  ;;  %v12178_v42 = vpop.f32.mrb[47].mxu0  ;;  %v4016_v37 = vadd.f32 %v12204_v33, %v3951_v53  ;;  %v3788_v2 = vpop.permute.xlu0 %3787 }
0x1509   :  { %v12179_v52 = vadd.f32 %v12178_v42, %v12177_v59  ;;  %v3793_v31 = vpop.permute.xlu1 %3792  ;;  %v3967_v42 = vadd.f32 %v12176_v40, %v3788_v2 }
0x150a   :  { %v4019_v20 = vadd.f32 %v12207_v48, %v3954_v22 }
0x150c   :  { %v12208_v41 = vpop.f32.mrb[64].mxu1 }
0x150d   :  { %v12209_v43 = vpop.f32.mrb[65].mxu1  ;;  %v12807_v25 = vpop.f32.mrb[48].mxu0 }
0x150e   :  { %v12210_v12 = vadd.f32 %v12209_v43, %v12208_v41  ;;  %v4081_v46 = vadd.f32 %v12807_v25, %v4016_v37  ;;  %v12211_v7 = vpop.f32.mrb[66].mxu1  ;;  %v4072_v18 = vpop.f32.mrb[49].mxu0  ;;  %v3970_v25 = vadd.f32 %v12179_v52, %v3793_v31 }
0x150f   :  { %v4073_v8 = vadd.f32 %v4072_v18, %v4008_v13  ;;  %v12212_v16 = vpop.f32.mrb[67].mxu1  ;;  %v12808_v24 = vpop.f32.mrb[50].mxu0 }
0x1510   :  { %v12213_v29 = vadd.f32 %v12212_v16, %v12211_v7  ;;  %v4084_v27 = vadd.f32 %v12808_v24, %v4019_v20  ;;  %v4075_v55 = vpop.f32.mrb[51].mxu0  ;;  %v4024_v32 = vadd.f32 %v12210_v12, %v3959_v62  ;;  %v16456_v53 = vmax.f32 %v4081_v46, 0.0  ;;  %v13626_v24 = vld [vmem:[#allocation40] sm:$0xff]  }
0x1511   :  { %v4076_v38 = vadd.f32 %v4075_v55, %v4011_v60  ;;  %v16460_v0 = vmax.f32 %v4073_v8, 0.0  ;;  %12813 = vmatprep.subr.bf16.mxu1 %v13626_v24 }
0x1512   :  { %v16458_v33 = vmax.f32 %v4084_v27, 0.0  ;;  %v4027_v4 = vadd.f32 %v12213_v29, %v3962_v36  ;;  %12814 = vmatpush3.bf16.msra.mxu1 %v13626_v24 }
0x1513   :  { %v16462_v59 = vmax.f32 %v4076_v38, 0.0  ;;  %v4224_v38 = vsel %vm4223_vm3, 4294967295, %v15037_v39  ;;  %vm4210_vm3 = vcmask 220160  }
0x1514   :  { %v13386_v13 = vpack.i.bf16 %v16458_v33, %v16456_v53  ;;  %v12214_v56 = vpop.f32.mrb[68].mxu1 }
0x1515   :  { %v13381_v22 = vpack.i.bf16 %v16462_v59, %v16460_v0  ;;  %v12215_v48 = vpop.f32.mrb[69].mxu1  ;;  %v12811_v60 = vpop.f32.mrb[52].mxu0 }
0x1516   :  { %v12216_v37 = vadd.f32 %v12215_v48, %v12214_v56  ;;  %v12217_v20 = vpop.f32.mrb[70].mxu1  ;;  %v4088_v26 = vpop.f32.mrb[53].mxu0  ;;  %13387 = vrot.lane.b32.xlu1 %v13386_v13, %s15027_s14 }
0x1517   :  { %v4089_v45 = vadd.f32 %v4088_v26, %v4024_v32  ;;  %v12218_v41 = vpop.f32.mrb[71].mxu1  ;;  %v12812_v43 = vpop.f32.mrb[54].mxu0  ;;  %13382 = vrot.lane.b32.xlu0 %v13381_v22, %s15027_s14  ;;  %v13627_v32 = vld [vmem:[#allocation40 + $0x8] sm:$0x3f]  }
0x1518   :  { %v4032_v62 = vadd.f32 %v12216_v37, %v3967_v42  ;;  %v12219_v12 = vadd.f32 %v12218_v41, %v12217_v20  ;;  %v4091_v46 = vpop.f32.mrb[55].mxu0 }
0x1519   :  { %v4092_v7 = vadd.f32 %v4091_v46, %v4027_v4  ;;  %v16470_v16 = vmax.f32 %v4089_v45, 0.0  ;;  %v4225_v4 = vsel %vm2729_vm7, %v4224_v38, 0  ;;  %vm5291_vm7 = vcmask 146432  }
0x151a   :  { %v4097_v18 = vadd.f32 %v12811_v60, %v4032_v62  ;;  %v4035_v8 = vadd.f32 %v12219_v12, %v3970_v25  ;;  %v4227_v2 = vand.u32 %v13627_v32, %v4225_v4 }
0x151b   :  { %v16472_v40 = vmax.f32 %v4092_v7, 0.0 }
0x151c   :  { %v4100_v36 = vadd.f32 %v12812_v43, %v4035_v8  ;;  %v16476_v27 = vmax.f32 %v4097_v18, 0.0  ;;  %12815 = vmatprep.subr.bf16.mxu1 %v4227_v2 }
0x151d   :  { %v13391_v29 = vpack.i.bf16 %v16472_v40, %v16470_v16  ;;  %12816 = vmatpush3.bf16.msra.mxu1 %v4227_v2 }
0x151e   :  { %v16478_v55 = vmax.f32 %v4100_v36, 0.0 }
0x151f   :  { %13392 = vrot.lane.b32.xlu0 %v13391_v29, %s15027_s14 }
0x1520   :  { %v13396_v52 = vpack.i.bf16 %v16478_v55, %v16476_v27 }
0x1522   :  { %13397 = vrot.lane.b32.xlu1 %v13396_v52, %s15027_s14 }
0x1588   :  { %v13388_v31 = vpop.permute.xlu1 %13387 }
0x1589   :  { %v13390_v13 = vunpack.i.h.bf16 %v13388_v31  ;;  %v13389_v56 = vunpack.i.l.bf16 %v13388_v31  ;;  %v13383_v22 = vpop.permute.xlu0 %13382 }
0x158a   :  { %v13385_v48 = vunpack.i.h.bf16 %v13383_v22  ;;  %v13384_v60 = vunpack.i.l.bf16 %v13383_v22 }
0x158b   :  { %v4146_v42 = vmax.f32 %v16458_v33, %v13390_v13  ;;  %v4145_v37 = vmax.f32 %v16456_v53, %v13389_v56 }
0x158c   :  { %v4144_v20 = vmax.f32 %v16462_v59, %v13385_v48  ;;  %v4143_v26 = vmax.f32 %v16460_v0, %v13384_v60 }
0x158d   :  { %v13406_v39 = vpack.i.bf16 %v4146_v42, %v4145_v37 }
0x158e   :  { %v13401_v45 = vpack.i.bf16 %v4144_v20, %v4143_v26 }
0x158f   :  { %13407 = vrot.lane.b32.xlu1 %v13406_v39, %s15049_s19 }
0x1590   :  { %13402 = vrot.lane.b32.xlu0 %v13401_v45, %s15049_s19 }
0x1591   :  { %v13393_v41 = vpop.permute.xlu0 %13392 }
0x1592   :  { %v13395_v43 = vunpack.i.h.bf16 %v13393_v41  ;;  %v13394_v25 = vunpack.i.l.bf16 %v13393_v41 }
0x1594   :  { %v4148_v62 = vmax.f32 %v16472_v40, %v13395_v43  ;;  %v4147_v12 = vmax.f32 %v16470_v16, %v13394_v25  ;;  %v13398_v46 = vpop.permute.xlu1 %13397 }
0x1595   :  { %v13400_v7 = vunpack.i.h.bf16 %v13398_v46  ;;  %v13399_v18 = vunpack.i.l.bf16 %v13398_v46 }
0x1596   :  { %v13411_v8 = vpack.i.bf16 %v4148_v62, %v4147_v12 }
0x1597   :  { %v4150_v24 = vmax.f32 %v16478_v55, %v13400_v7  ;;  %v4149_v36 = vmax.f32 %v16476_v27, %v13399_v18 }
0x1598   :  { %13412 = vrot.lane.b32.xlu0 %v13411_v8, %s15049_s19 }
0x1599   :  { %v13416_v29 = vpack.i.bf16 %v4150_v24, %v4149_v36 }
0x159b   :  { %13417 = vrot.lane.b32.xlu1 %v13416_v29, %s15049_s19 }
0x1601   :  { %v13408_v52 = vpop.permute.xlu1 %13407 }
0x1602   :  { %v13410_v32 = vunpack.i.h.bf16 %v13408_v52  ;;  %v13409_v38 = vunpack.i.l.bf16 %v13408_v52  ;;  %v13403_v4 = vpop.permute.xlu0 %13402 }
0x1603   :  { %v13405_v2 = vunpack.i.h.bf16 %v13403_v4  ;;  %v13404_v31 = vunpack.i.l.bf16 %v13403_v4 }
0x1604   :  { %v4186_v13 = vmax.f32 %v4146_v42, %v13410_v32  ;;  %v4185_v56 = vmax.f32 %v4145_v37, %v13409_v38 }
0x1605   :  { %v4184_v22 = vmax.f32 %v4144_v20, %v13405_v2  ;;  %v4183_v48 = vmax.f32 %v4143_v26, %v13404_v31 }
0x1606   :  { %v4192_v39 = vpack.c.bf16 %v4186_v13, %v4185_v56  ;;  %v13630_v56 = vld [vmem:[#allocation15 + $0x4] ss:$20 sps:$4 sm:$0xff]  }
0x1607   :  { %v4191_v60 = vpack.c.bf16 %v4184_v22, %v4183_v48  ;;  %4614 = vmatprep.mubr.bf16.mxu0 %v13630_v56  ;;  %v13636_v22 = vld [vmem:[#allocation15 + $0xc] ss:$20 sps:$4 sm:$0xff]   ;;  %v4423_v48 = vld [vmem:[%s17909_s3 + $0x8] sm:$0xff] }
0x1609   :  { %12817 = vmatprep.mubr.msk.bf16.mxu1 %vm4210_vm3, %v4191_v60  ;;  %v4422_v60 = vld [vmem:[%s17909_s3] sm:$0xff] }
0x160a   :  { %v13413_v45 = vpop.permute.xlu0 %13412  ;;  %12818 = vmatmul.mubr.msk.bf16.vlgmr.msra.gmra.mrb[72].mxu1 %vm4210_vm3, %v4192_v39  ;;  %v4425_v39 = vld [vmem:[%s17909_s3 + $0x18] sm:$0xff] }
0x160b   :  { %v13415_v41 = vunpack.i.h.bf16 %v13413_v45  ;;  %v13414_v43 = vunpack.i.l.bf16 %v13413_v45  ;;  %v4424_v45 = vld [vmem:[%s17909_s3 + $0x10] sm:$0xff] }
0x160d   :  { %v4188_v25 = vmax.f32 %v4148_v62, %v13415_v41  ;;  %v4187_v46 = vmax.f32 %v4147_v12, %v13414_v43  ;;  %v13418_v7 = vpop.permute.xlu1 %13417  ;;  %v4427_v41 = vld [vmem:[%s17909_s3 + $0x28] sm:$0xff]  ;;  %v4426_v43 = vld [vmem:[%s17909_s3 + $0x20] sm:$0xff] }
0x160e   :  { %v13420_v18 = vunpack.i.h.bf16 %v13418_v7  ;;  %v13419_v8 = vunpack.i.l.bf16 %v13418_v7 }
0x160f   :  { %v4193_v29 = vpack.c.bf16 %v4188_v25, %v4187_v46  ;;  %v4429_v25 = vld [vmem:[%s17909_s3 + $0x38] sm:$0xff]  ;;  %v4428_v46 = vld [vmem:[%s17909_s3 + $0x30] sm:$0xff] }
0x1610   :  { %v4190_v42 = vmax.f32 %v4150_v24, %v13420_v18  ;;  %v4189_v37 = vmax.f32 %v4149_v36, %v13419_v8 }
0x1611   :  { %12821 = vmatprep.mubr.msk.bf16.mxu1 %vm4210_vm3, %v4193_v29 }
0x1612   :  { %v4194_v20 = vpack.c.bf16 %v4190_v42, %v4189_v37 }
0x1614   :  { %12822 = vmatmul.mubr.msk.bf16.gmra.mrb[76].mxu1 %vm4210_vm3, %v4194_v20 }
0x1615   :  { %4679 = vmatprep.mubr.bf16.mxu1 %v13636_v22 }
0x16dd   :  { %v12819_v26 = vpop.f32.mrb[72].mxu1 }
0x16de   :  { %v4263_v52 = vpop.f32.mrb[73].mxu1 }
0x16df   :  { %v12820_v32 = vpop.f32.mrb[74].mxu1 }
0x16e0   :  { %v16502_v38 = vpack.c.bf16 %v12820_v32, %v12819_v26  ;;  %v4266_v4 = vpop.f32.mrb[75].mxu1 }
0x16e1   :  { %v16504_v2 = vpack.c.bf16 %v4266_v4, %v4263_v52 }
0x16e2   :  { %4328 = vrot.lane.b32.xlu0 %v16502_v38, %s15051_s21  ;;  %4316 = vrot.lane.b32.xlu1 %v16502_v38, %s15028_s8 }
0x16e6   :  { %4364 = vrot.lane.b32.xlu1 %v16502_v38, %s15044_s13  ;;  %4314 = vrot.lane.b32.xlu0 %v16504_v2, %s15028_s8 }
0x16e7   :  { %v12823_v62 = vpop.f32.mrb[76].mxu1 }
0x16e8   :  { %v4279_v12 = vpop.f32.mrb[77].mxu1 }
0x16e9   :  { %v12824_v24 = vpop.f32.mrb[78].mxu1 }
0x16ea   :  { %v16514_v36 = vpack.c.bf16 %v12824_v24, %v12823_v62  ;;  %4362 = vrot.lane.b32.xlu1 %v16504_v2, %s15044_s13  ;;  %4326 = vrot.lane.b32.xlu0 %v16504_v2, %s15051_s21  ;;  %v4282_v31 = vpop.f32.mrb[79].mxu1 }
0x16eb   :  { %v16520_v13 = vpack.c.bf16 %v4282_v31, %v4279_v12 }
0x16ee   :  { %4338 = vrot.lane.b32.xlu1 %v16504_v2, %s15049_s19  ;;  %4302 = vrot.lane.b32.xlu0 %v16504_v2, %s15027_s14 }
0x16f2   :  { %4320 = vrot.lane.b32.xlu1 %v16514_v36, %s15028_s8  ;;  %4318 = vrot.lane.b32.xlu0 %v16520_v13, %s15028_s8 }
0x16f6   :  { %4340 = vrot.lane.b32.xlu1 %v16502_v38, %s15049_s19  ;;  %4304 = vrot.lane.b32.xlu0 %v16502_v38, %s15027_s14 }
0x16fa   :  { %4368 = vrot.lane.b32.xlu1 %v16514_v36, %s15044_s13  ;;  %4332 = vrot.lane.b32.xlu0 %v16514_v36, %s15051_s21 }
0x16fe   :  { %4366 = vrot.lane.b32.xlu1 %v16520_v13, %s15044_s13  ;;  %4330 = vrot.lane.b32.xlu0 %v16520_v13, %s15051_s21 }
0x1702   :  { %4342 = vrot.lane.b32.xlu1 %v16520_v13, %s15049_s19  ;;  %4306 = vrot.lane.b32.xlu0 %v16520_v13, %s15027_s14 }
0x1706   :  { %4344 = vrot.lane.b32.xlu1 %v16514_v36, %s15049_s19  ;;  %4308 = vrot.lane.b32.xlu0 %v16514_v36, %s15027_s14 }
0x170a   :  { %4350 = vrot.lane.b32.xlu1 %v16504_v2, %s15048_s11  ;;  %4374 = vrot.lane.b32.xlu0 %v16504_v2, %s15043_s30 }
0x170e   :  { %4352 = vrot.lane.b32.xlu1 %v16502_v38, %s15048_s11  ;;  %4376 = vrot.lane.b32.xlu0 %v16502_v38, %s15043_s30 }
0x1712   :  { %4354 = vrot.lane.b32.xlu1 %v16520_v13, %s15048_s11  ;;  %4378 = vrot.lane.b32.xlu0 %v16520_v13, %s15043_s30 }
0x1716   :  { %4356 = vrot.lane.b32.xlu1 %v16514_v36, %s15048_s11  ;;  %4380 = vrot.lane.b32.xlu0 %v16514_v36, %s15043_s30 }
0x171a   :  { %4388 = vrot.lane.b32.xlu1 %v16502_v38, %s15045_s1  ;;  %4386 = vrot.lane.b32.xlu0 %v16504_v2, %s15045_s1 }
0x171e   :  { %4392 = vrot.lane.b32.xlu1 %v16514_v36, %s15045_s1  ;;  %4390 = vrot.lane.b32.xlu0 %v16520_v13, %s15045_s1 }
0x1722   :  { %4437 = vperm.xlu1 %13340, %v4423_v48   ;;  %4432 = vperm.xlu0 %13314, %v4422_v60   ;;  %v13631_v48 = vld [vmem:[#allocation15 + $0x2c] ss:$20 sps:$4 sm:$0xff]  }
0x1726   :  { %4447 = vperm.xlu1 %13340, %v4425_v39   ;;  %4442 = vperm.xlu0 %13314, %v4424_v45  }
0x172a   :  { %4457 = vperm.xlu1 %13340, %v4427_v41   ;;  %4452 = vperm.xlu0 %13314, %v4426_v43   ;;  %v13633_v43 = vld [vmem:[#allocation15 + $0x28] ss:$20 sps:$4 sm:$0xff]  }
0x172e   :  { %4467 = vperm.xlu1 %13340, %v4429_v25   ;;  %4462 = vperm.xlu0 %13314, %v4428_v46   ;;  %v13637_v25 = vld [vmem:[#allocation15 + $0x54] ss:$20 sps:$4 sm:$0xff]  }
0x1754   :  { %v4329_v7 = vpop.permute.xlu0 %4328  ;;  %v4317_v18 = vpop.permute.xlu1 %4316 }
0x1758   :  { %v4365_v8 = vpop.permute.xlu1 %4364  ;;  %v4315_v29 = vpop.permute.xlu0 %4314 }
0x1759   :  { %12234 = vmatprep.subr.bf16.mxu0 %v4315_v29  ;;  %v13634_v29 = vld [vmem:[#allocation15 + $0x8] ss:$20 sps:$4 sm:$0xff]  }
0x175a   :  { %12235 = vmatpush3.bf16.msra.mxu0 %v16504_v2 }
0x175b   :  { %12236 = vmatprep.subr.bf16.mxu0 %v4317_v18 }
0x175c   :  { %v4363_v42 = vpop.permute.xlu1 %4362  ;;  %v4327_v37 = vpop.permute.xlu0 %4326 }
0x175d   :  { %12274 = vmatprep.subr.bf16.mxu1 %v4363_v42  ;;  %v13639_v42 = vld [vmem:[#allocation15 + $0x50] ss:$20 sps:$4 sm:$0xff]  }
0x175e   :  { %12237 = vmatpush3.bf16.msra.mxu0 %v16502_v38 }
0x1760   :  { %v4339_v20 = vpop.permute.xlu1 %4338  ;;  %v4303_v26 = vpop.permute.xlu0 %4302 }
0x1761   :  { %12275 = vmatpush3.bf16.msra.mxu1 %v4339_v20  ;;  %v13642_v20 = vld [vmem:[#allocation15 + $0x34] ss:$20 sps:$4 sm:$0xff]  }
0x1762   :  { %12276 = vmatprep.subr.bf16.mxu1 %v4365_v8 }
0x1764   :  { %v4321_v52 = vpop.permute.xlu1 %4320  ;;  %v4319_v32 = vpop.permute.xlu0 %4318 }
0x1765   :  { %12238 = vmatprep.subr.bf16.mxu0 %v4319_v32  ;;  %v13644_v32 = vld [vmem:[#allocation15 + $0x78] ss:$20 sps:$4 sm:$0xff]  }
0x1766   :  { %12239 = vmatpush3.bf16.msra.mxu0 %v16520_v13 }
0x1767   :  { %12240 = vmatprep.subr.bf16.mxu0 %v4321_v52 }
0x1768   :  { %v4341_v4 = vpop.permute.xlu1 %4340  ;;  %v4305_v62 = vpop.permute.xlu0 %4304 }
0x1769   :  { %12277 = vmatpush3.bf16.msra.mxu1 %v4341_v4  ;;  %v13645_v4 = vld [vmem:[#allocation15 + $0x30] ss:$20 sps:$4 sm:$0xff]  }
0x176a   :  { %12241 = vmatpush3.bf16.msra.mxu0 %v16514_v36  ;;  %v13628_v36 = vld [vmem:[#allocation15] ss:$20 sps:$4 sm:$0xff]  }
0x176b   :  { %12242 = vmatprep.subr.bf16.mxu0 %v4327_v37  ;;  %v13640_v37 = vld [vmem:[#allocation15 + $0x7c] ss:$20 sps:$4 sm:$0xff]  }
0x176c   :  { %v4369_v2 = vpop.permute.xlu1 %4368  ;;  %v4333_v12 = vpop.permute.xlu0 %4332 }
0x176e   :  { %12243 = vmatpush3.bf16.msra.mxu0 %v4303_v26 }
0x176f   :  { %12244 = vmatprep.subr.bf16.mxu0 %v4329_v7 }
0x1770   :  { %v4367_v38 = vpop.permute.xlu1 %4366  ;;  %v4331_v24 = vpop.permute.xlu0 %4330 }
0x1771   :  { %12278 = vmatprep.subr.bf16.mxu1 %v4367_v38 }
0x1772   :  { %12245 = vmatpush3.bf16.msra.mxu0 %v4305_v62  ;;  %v13646_v62 = vld [vmem:[#allocation15 + $0x5c] ss:$20 sps:$4 sm:$0xff]  }
0x1773   :  { %12246 = vmatprep.subr.bf16.mxu0 %v4331_v24  ;;  %v13649_v24 = vld [vmem:[#allocation15 + $0x58] ss:$20 sps:$4 sm:$0xff]  }
0x1774   :  { %v4343_v31 = vpop.permute.xlu1 %4342  ;;  %v4307_v56 = vpop.permute.xlu0 %4306 }
0x1775   :  { %12279 = vmatpush3.bf16.msra.mxu1 %v4343_v31  ;;  %v13650_v31 = vld [vmem:[#allocation15 + $0x38] ss:$20 sps:$4 sm:$0xff]  }
0x1776   :  { %12247 = vmatpush3.bf16.msra.mxu0 %v4307_v56  ;;  %12280 = vmatprep.subr.bf16.mxu1 %v4369_v2  ;;  %v13648_v2 = vld [vmem:[#allocation15 + $0x10] ss:$20 sps:$4 sm:$0xff]  }
0x1777   :  { %12248 = vmatprep.subr.bf16.mxu0 %v4333_v12  ;;  %v13651_v56 = vld [vmem:[#allocation15 + $0x84] ss:$20 sps:$4 sm:$0xff]  }
0x1778   :  { %v4345_v13 = vpop.permute.xlu1 %4344  ;;  %v4309_v22 = vpop.permute.xlu0 %4308 }
0x1779   :  { %12281 = vmatpush3.bf16.msra.mxu1 %v4345_v13  ;;  %v13653_v13 = vld [vmem:[#allocation15 + $0x60] ss:$20 sps:$4 sm:$0xff]  }
0x177a   :  { %12249 = vmatpush3.bf16.msra.mxu0 %v4309_v22  ;;  %v13654_v22 = vld [vmem:[#allocation15 + $0x80] ss:$20 sps:$4 sm:$0xff]  }
0x177c   :  { %v4351_v60 = vpop.permute.xlu1 %4350  ;;  %v4375_v39 = vpop.permute.xlu0 %4374 }
0x177d   :  { %4615 = vmatmul.mubr.bf16.vlgmr.msra.gmra.mrb[56].mxu0 %v13628_v36  ;;  %12282 = vmatprep.subr.bf16.mxu1 %v4375_v39  ;;  %v13655_v36 = vld [vmem:[#allocation15 + $0x88] ss:$20 sps:$4 sm:$0xff]  }
0x177e   :  { %12283 = vmatpush3.bf16.msra.mxu1 %v4351_v60  ;;  %4622 = vmatprep.mubr.bf16.mxu0 %v13631_v48 }
0x1780   :  { %v4353_v45 = vpop.permute.xlu1 %4352  ;;  %v4377_v41 = vpop.permute.xlu0 %4376 }
0x1781   :  { %12284 = vmatprep.subr.bf16.mxu1 %v4377_v41 }
0x1782   :  { %12285 = vmatpush3.bf16.msra.mxu1 %v4353_v45 }
0x1784   :  { %v4355_v46 = vpop.permute.xlu1 %4354  ;;  %v4379_v7 = vpop.permute.xlu0 %4378 }
0x1785   :  { %4623 = vmatmul.mubr.bf16.gmra.mrb[60].mxu0 %v13633_v43  ;;  %12286 = vmatprep.subr.bf16.mxu1 %v4379_v7 }
0x1786   :  { %12287 = vmatpush3.bf16.msra.mxu1 %v4355_v46  ;;  %4630 = vmatprep.mubr.bf16.mxu0 %v13637_v25 }
0x1788   :  { %v4357_v18 = vpop.permute.xlu1 %4356  ;;  %v4381_v8 = vpop.permute.xlu0 %4380 }
0x1789   :  { %12288 = vmatprep.subr.bf16.mxu1 %v4381_v8 }
0x178a   :  { %12289 = vmatpush3.bf16.msra.mxu1 %v4357_v18 }
0x178c   :  { %v4387_v26 = vpop.permute.xlu0 %4386  ;;  %v4389_v52 = vpop.permute.xlu1 %4388 }
0x178d   :  { %4631 = vmatmul.mubr.bf16.gmra.mrb[64].mxu0 %v13639_v42  ;;  %4680 = vmatmul.mubr.bf16.vlgmr.msra.gmra.mrb[80].mxu1 %v13634_v29 }
0x178e   :  { %12825 = vmatprep.subr.bf16.mxu0 %v4387_v26  ;;  %4638 = vmatprep.mubr.bf16.mxu0 %v13640_v37 }
0x178f   :  { %12826 = vmatpush3.bf16.msra.mxu0 %v4387_v26  ;;  %4687 = vmatprep.mubr.bf16.mxu1 %v13642_v20 }
0x1790   :  { %12827 = vmatprep.subr.bf16.mxu0 %v4389_v52  ;;  %v4391_v12 = vpop.permute.xlu0 %4390  ;;  %v4393_v38 = vpop.permute.xlu1 %4392 }
0x1793   :  { %12828 = vmatpush3.bf16.msra.mxu0 %v4389_v52 }
0x1794   :  { %12829 = vmatprep.subr.bf16.mxu0 %v4391_v12 }
0x1795   :  { %4639 = vmatmul.mubr.bf16.gmra.mrb[68].mxu0 %v13644_v32  ;;  %4688 = vmatmul.mubr.bf16.gmra.mrb[84].mxu1 %v13645_v4 }
0x1796   :  { %4695 = vmatprep.mubr.bf16.mxu1 %v13646_v62  ;;  %12833 = vmatprep.mubr.msk.bf16.mxu0 %vm3895_vm4, %v13648_v2 }
0x1797   :  { %12830 = vmatpush3.bf16.msra.mxu0 %v4391_v12 }
0x1798   :  { %12831 = vmatprep.subr.bf16.mxu0 %v4393_v38 }
0x179b   :  { %12832 = vmatpush3.bf16.msra.mxu0 %v4393_v38 }
0x179d   :  { %4696 = vmatmul.mubr.bf16.gmra.mrb[88].mxu1 %v13649_v24 }
0x179e   :  { %12834 = vmatmul.mubr.msk.bf16.vlgmr.msra.gmra.mrb[72].mxu0 %vm3895_vm4, %v13650_v31  ;;  %4703 = vmatprep.mubr.bf16.mxu1 %v13651_v56 }
0x179f   :  { %12837 = vmatprep.mubr.msk.bf16.mxu0 %vm3895_vm4, %v13653_v13 }
0x17a1   :  { %v4438_v42 = vpop.permute.xlu1 %4437  ;;  %v4433_v37 = vpop.permute.xlu0 %4432 }
0x17a5   :  { %4704 = vmatmul.mubr.bf16.gmra.mrb[92].mxu1 %v13654_v22 }
0x17a6   :  { %12838 = vmatmul.mubr.msk.bf16.gmra.mrb[76].mxu0 %vm3895_vm4, %v13655_v36 }
0x1850   :  { %v12250_v48 = vpop.f32.mrb[56].mxu0 }
0x1851   :  { %v12251_v60 = vpop.f32.mrb[57].mxu0 }
0x1852   :  { %v12252_v39 = vadd.f32 %v12251_v60, %v12250_v48  ;;  %v12253_v45 = vpop.f32.mrb[58].mxu0  ;;  %v4448_v60 = vpop.permute.xlu1 %4447 }
0x1853   :  { %v12254_v41 = vpop.f32.mrb[59].mxu0 }
0x1854   :  { %v12255_v43 = vadd.f32 %v12254_v41, %v12253_v45  ;;  %v4617_v4 = vadd.f32 %v12252_v39, %v4433_v37  ;;  %v4443_v45 = vpop.permute.xlu0 %4442 }
0x1856   :  { %v4620_v56 = vadd.f32 %v12255_v43, %v4438_v42 }
0x1858   :  { %v12256_v25 = vpop.f32.mrb[60].mxu0 }
0x1859   :  { %v12257_v46 = vpop.f32.mrb[61].mxu0 }
0x185a   :  { %v12258_v7 = vadd.f32 %v12257_v46, %v12256_v25  ;;  %v12259_v18 = vpop.f32.mrb[62].mxu0 }
0x185b   :  { %v12260_v8 = vpop.f32.mrb[63].mxu0 }
0x185c   :  { %v12261_v29 = vadd.f32 %v12260_v8, %v12259_v18  ;;  %v4625_v8 = vadd.f32 %v12258_v7, %v4443_v45 }
0x1860   :  { %v12262_v20 = vpop.f32.mrb[64].mxu0  ;;  %v12290_v26 = vpop.f32.mrb[80].mxu1 }
0x1861   :  { %v12263_v52 = vpop.f32.mrb[65].mxu0  ;;  %v12291_v32 = vpop.f32.mrb[81].mxu1 }
0x1862   :  { %v12264_v62 = vadd.f32 %v12263_v52, %v12262_v20  ;;  %v12292_v2 = vadd.f32 %v12291_v32, %v12290_v26  ;;  %v12265_v12 = vpop.f32.mrb[66].mxu0  ;;  %v12293_v38 = vpop.f32.mrb[82].mxu1  ;;  %v4628_v32 = vadd.f32 %v12261_v29, %v4448_v60 }
0x1863   :  { %v12266_v24 = vpop.f32.mrb[67].mxu0  ;;  %v12294_v31 = vpop.f32.mrb[83].mxu1 }
0x1864   :  { %v12267_v13 = vadd.f32 %v12266_v24, %v12265_v12  ;;  %v12295_v22 = vadd.f32 %v12294_v31, %v12293_v38  ;;  %v4682_v36 = vadd.f32 %v12292_v2, %v4617_v4  ;;  %v4458_v4 = vpop.permute.xlu1 %4457  ;;  %v4789_v2 = vld [vmem:[#allocation36] sm:$0x1]  ;;  %v4453_v38 = vpop.permute.xlu0 %4452 }
0x1866   :  { %v4685_v48 = vadd.f32 %v12295_v22, %v4620_v56  ;;  %v4633_v22 = vadd.f32 %v12264_v62, %v4453_v38  ;;  %v4636_v29 = vadd.f32 %v12267_v13, %v4458_v4 }
0x1868   :  { %v12268_v41 = vpop.f32.mrb[68].mxu0  ;;  %v12296_v25 = vpop.f32.mrb[84].mxu1 }
0x1869   :  { %v12269_v46 = vpop.f32.mrb[69].mxu0  ;;  %v12297_v18 = vpop.f32.mrb[85].mxu1 }
0x186a   :  { %v12270_v6 = vadd.f32 %v12269_v46, %v12268_v41  ;;  %v12298_v39 = vadd.f32 %v12297_v18, %v12296_v25  ;;  %v12271_v37 = vpop.f32.mrb[70].mxu0  ;;  %v12299_v20 = vpop.f32.mrb[86].mxu1  ;;  %v4791_v25 = vpack.i.b16 %v4789_v2, %v4789_v2 }
0x186b   :  { %v12272_v26 = vpop.f32.mrb[71].mxu0  ;;  %v12300_v52 = vpop.f32.mrb[87].mxu1 }
0x186c   :  { %v12273_v10 = vadd.f32 %v12272_v26, %v12271_v37  ;;  %v12301_v43 = vadd.f32 %v12300_v52, %v12299_v20  ;;  %v4690_v42 = vadd.f32 %v12298_v39, %v4625_v8  ;;  %v4468_v62 = vpop.permute.xlu1 %4467 }
0x186e   :  { %v4693_v12 = vadd.f32 %v12301_v43, %v4628_v32  ;;  %v4796_v32 = vrot.slane %v4791_v25, %v15817_v15  ;;  %v4644_v15 = vadd.f32 %v12273_v10, %v4468_v62 }
0x1870   :  { %v12302_v24 = vpop.f32.mrb[88].mxu1 }
0x1871   :  { %v12835_v31 = vpop.f32.mrb[72].mxu0  ;;  %v12303_v56 = vpop.f32.mrb[89].mxu1 }
0x1872   :  { %v4755_v14 = vadd.f32 %v12835_v31, %v4690_v42  ;;  %v12304_v7 = vadd.f32 %v12303_v56, %v12302_v24  ;;  %v4746_v45 = vpop.f32.mrb[73].mxu0  ;;  %v12305_v41 = vpop.f32.mrb[90].mxu1 }
0x1873   :  { %v4747_v46 = vadd.f32 %v4746_v45, %v4682_v36  ;;  %v12836_v18 = vpop.f32.mrb[74].mxu0  ;;  %v12306_v1 = vpop.f32.mrb[91].mxu1 }
0x1874   :  { %v4758_v60 = vadd.f32 %v12836_v18, %v4693_v12  ;;  %v12307_v37 = vadd.f32 %v12306_v1, %v12305_v41  ;;  %v4749_v8 = vpop.f32.mrb[75].mxu0  ;;  %v4698_v39 = vadd.f32 %v12304_v7, %v4633_v22  ;;  %v4779_v26 = vmax.f32 %v4755_v14, 0.0  ;;  %v4463_v24 = vpop.permute.xlu0 %4462 }
0x1875   :  { %v4750_v20 = vadd.f32 %v4749_v8, %v4685_v48  ;;  %v4777_v42 = vmax.f32 %v4747_v46, 0.0  ;;  %v4641_v13 = vadd.f32 %v12270_v6, %v4463_v24  ;;  %v4926_v24 = vld [vmem:[%s17910_s5 + $0x8] sm:$0xff] }
0x1876   :  { %v4780_v52 = vmax.f32 %v4758_v60, 0.0  ;;  %v4701_v43 = vadd.f32 %v12307_v37, %v4636_v29 }
0x1877   :  { %v4778_v38 = vmax.f32 %v4750_v20, 0.0 }
0x1878   :  { %v4786_v31 = vpack.c.bf16 %v4780_v52, %v4779_v26  ;;  %v12308_v2 = vpop.f32.mrb[92].mxu1 }
0x1879   :  { %v4785_v36 = vpack.c.bf16 %v4778_v38, %v4777_v42  ;;  %v12839_v56 = vpop.f32.mrb[76].mxu0  ;;  %v12309_v45 = vpop.f32.mrb[93].mxu1  ;;  %v13658_v42 = vld [vmem:[#allocation16 + $0x4] ss:$20 sps:$4 sm:$0xff]   ;;  %v4925_v38 = vld [vmem:[%s17910_s5] sm:$0xff] }
0x187a   :  { %v16591_v12 = vmul.bf16 %v4796_v32, %v4786_v31  ;;  %v12310_v1 = vadd.f32 %v12309_v45, %v12308_v2  ;;  %v4762_v4 = vpop.f32.mrb[77].mxu0  ;;  %v12311_v48 = vpop.f32.mrb[94].mxu1  ;;  %5117 = vmatprep.mubr.bf16.mxu1 %v13658_v42  ;;  %v4927_v31 = vld [vmem:[%s17910_s5 + $0x10] sm:$0xff]  ;;  %v4928_v2 = vld [vmem:[%s17910_s5 + $0x18] sm:$0xff] }
0x187b   :  { %v4763_v14 = vadd.f32 %v4762_v4, %v4698_v39  ;;  %v12840_v22 = vpop.f32.mrb[78].mxu0  ;;  %v12312_v7 = vpop.f32.mrb[95].mxu1  ;;  %v16597_v6 = vmul.bf16 %v4796_v32, %v4785_v36  ;;  %v4929_v36 = vld [vmem:[%s17910_s5 + $0x20] sm:$0xff]  ;;  %v4931_v45 = vld [vmem:[%s17910_s5 + $0x30] sm:$0xff] }
0x187c   :  { %v4706_v41 = vadd.f32 %v12310_v1, %v4641_v13  ;;  %v12313_v25 = vadd.f32 %v12312_v7, %v12311_v48  ;;  %v4765_v46 = vpop.f32.mrb[79].mxu0  ;;  %4831 = vrot.lane.b32.xlu0 %v16591_v12, %s15051_s21  ;;  %4819 = vrot.lane.b32.xlu1 %v16591_v12, %s15028_s8  ;;  %v4932_v13 = vld [vmem:[%s17910_s5 + $0x38] sm:$0xff] }
0x187d   :  { %v4766_v18 = vadd.f32 %v4765_v46, %v4701_v43  ;;  %v4781_v37 = vmax.f32 %v4763_v14, 0.0 }
0x187e   :  { %v4771_v29 = vadd.f32 %v12839_v56, %v4706_v41  ;;  %v4709_v60 = vadd.f32 %v12313_v25, %v4644_v15  ;;  %v4930_v56 = vld [vmem:[%s17910_s5 + $0x28] sm:$0xff] }
0x187f   :  { %v4782_v8 = vmax.f32 %v4766_v18, 0.0 }
0x1880   :  { %v4774_v39 = vadd.f32 %v12840_v22, %v4709_v60  ;;  %4817 = vrot.lane.b32.xlu0 %v16597_v6, %s15028_s8  ;;  %4867 = vrot.lane.b32.xlu1 %v16591_v12, %s15044_s13  ;;  %v4783_v20 = vmax.f32 %v4771_v29, 0.0 }
0x1881   :  { %v4787_v10 = vpack.c.bf16 %v4782_v8, %v4781_v37 }
0x1882   :  { %v4784_v26 = vmax.f32 %v4774_v39, 0.0 }
0x1883   :  { %v4799_v62 = vmul.bf16 %v4796_v32, %v4787_v10 }
0x1884   :  { %v4788_v52 = vpack.c.bf16 %v4784_v26, %v4783_v20  ;;  %4829 = vrot.lane.b32.xlu0 %v16597_v6, %s15051_s21  ;;  %4865 = vrot.lane.b32.xlu1 %v16597_v6, %s15044_s13  ;;  %v13656_v26 = vld [vmem:[#allocation16] ss:$20 sps:$4 sm:$0xff]  }
0x1886   :  { %v16611_v43 = vmul.bf16 %v4796_v32, %v4788_v52  ;;  %v13664_v32 = vld [vmem:[#allocation16 + $0xc] ss:$20 sps:$4 sm:$0xff]  }
0x1887   :  { %5182 = vmatprep.mubr.bf16.mxu0 %v13664_v32  ;;  %v13659_v52 = vld [vmem:[#allocation16 + $0x2c] ss:$20 sps:$4 sm:$0xff]  }
0x1888   :  { %4805 = vrot.lane.b32.xlu0 %v16597_v6, %s15027_s14  ;;  %4841 = vrot.lane.b32.xlu1 %v16597_v6, %s15049_s19 }
0x188c   :  { %4821 = vrot.lane.b32.xlu0 %v4799_v62, %s15028_s8  ;;  %4823 = vrot.lane.b32.xlu1 %v16611_v43, %s15028_s8 }
0x1890   :  { %4807 = vrot.lane.b32.xlu0 %v16591_v12, %s15027_s14  ;;  %4843 = vrot.lane.b32.xlu1 %v16591_v12, %s15049_s19 }
0x1894   :  { %4835 = vrot.lane.b32.xlu0 %v16611_v43, %s15051_s21  ;;  %4871 = vrot.lane.b32.xlu1 %v16611_v43, %s15044_s13 }
0x1898   :  { %4833 = vrot.lane.b32.xlu0 %v4799_v62, %s15051_s21  ;;  %4869 = vrot.lane.b32.xlu1 %v4799_v62, %s15044_s13 }
0x189c   :  { %4809 = vrot.lane.b32.xlu0 %v4799_v62, %s15027_s14  ;;  %4845 = vrot.lane.b32.xlu1 %v4799_v62, %s15049_s19 }
0x18a0   :  { %4811 = vrot.lane.b32.xlu0 %v16611_v43, %s15027_s14  ;;  %4847 = vrot.lane.b32.xlu1 %v16611_v43, %s15049_s19 }
0x18a4   :  { %4877 = vrot.lane.b32.xlu0 %v16597_v6, %s15043_s30  ;;  %4853 = vrot.lane.b32.xlu1 %v16597_v6, %s15048_s11 }
0x18a8   :  { %4879 = vrot.lane.b32.xlu0 %v16591_v12, %s15043_s30  ;;  %4855 = vrot.lane.b32.xlu1 %v16591_v12, %s15048_s11 }
0x18ac   :  { %4881 = vrot.lane.b32.xlu0 %v4799_v62, %s15043_s30  ;;  %4857 = vrot.lane.b32.xlu1 %v4799_v62, %s15048_s11 }
0x18b0   :  { %4883 = vrot.lane.b32.xlu0 %v16611_v43, %s15043_s30  ;;  %4859 = vrot.lane.b32.xlu1 %v16611_v43, %s15048_s11 }
0x18b4   :  { %4889 = vrot.lane.b32.xlu0 %v16597_v6, %s15045_s1  ;;  %4891 = vrot.lane.b32.xlu1 %v16591_v12, %s15045_s1 }
0x18b8   :  { %4893 = vrot.lane.b32.xlu0 %v4799_v62, %s15045_s1  ;;  %4895 = vrot.lane.b32.xlu1 %v16611_v43, %s15045_s1 }
0x18bc   :  { %4935 = vperm.xlu0 %13314, %v4925_v38   ;;  %4940 = vperm.xlu1 %13340, %v4926_v24   ;;  %v13661_v38 = vld [vmem:[#allocation16 + $0x28] ss:$20 sps:$4 sm:$0xff]  }
0x18bd   :  { %v13665_v24 = vld [vmem:[#allocation16 + $0x54] ss:$20 sps:$4 sm:$0xff]  }
0x18c0   :  { %4945 = vperm.xlu0 %13314, %v4927_v31   ;;  %4950 = vperm.xlu1 %13340, %v4928_v2  }
0x18c4   :  { %4955 = vperm.xlu0 %13314, %v4929_v36   ;;  %4960 = vperm.xlu1 %13340, %v4930_v56   ;;  %v13684_v36 = vld [vmem:[%s17911_s16] sm:$0xff]  }
0x18c8   :  { %4965 = vperm.xlu0 %13314, %v4931_v45   ;;  %4970 = vperm.xlu1 %13340, %v4932_v13   ;;  %v13662_v13 = vld [vmem:[#allocation16 + $0x8] ss:$20 sps:$4 sm:$0xff]  }
0x18ee   :  { %v4820_v1 = vpop.permute.xlu1 %4819  ;;  %v4832_v4 = vpop.permute.xlu0 %4831 }
0x18f2   :  { %v4868_v48 = vpop.permute.xlu1 %4867  ;;  %v4818_v14 = vpop.permute.xlu0 %4817 }
0x18f3   :  { %12322 = vmatprep.subr.bf16.mxu1 %v4818_v14 }
0x18f4   :  { %12323 = vmatpush3.bf16.msra.mxu1 %v16597_v6 }
0x18f5   :  { %12324 = vmatprep.subr.bf16.mxu1 %v4820_v1  ;;  %v13667_v1 = vld [vmem:[#allocation16 + $0x50] ss:$20 sps:$4 sm:$0xff]  }
0x18f6   :  { %v4866_v22 = vpop.permute.xlu1 %4865  ;;  %v4830_v7 = vpop.permute.xlu0 %4829 }
0x18f7   :  { %12362 = vmatprep.subr.bf16.mxu0 %v4866_v22  ;;  %v13685_v22 = vld [vmem:[%s17911_s16 + $0x8] sm:$0xff]  }
0x18f8   :  { %12325 = vmatpush3.bf16.msra.mxu1 %v16591_v12 }
0x18fa   :  { %v4842_v15 = vpop.permute.xlu1 %4841  ;;  %v4806_v41 = vpop.permute.xlu0 %4805 }
0x18fb   :  { %12363 = vmatpush3.bf16.msra.mxu0 %v4842_v15  ;;  %v13672_v15 = vld [vmem:[#allocation16 + $0x78] ss:$20 sps:$4 sm:$0xff]  }
0x18fc   :  { %12364 = vmatprep.subr.bf16.mxu0 %v4868_v48  ;;  %v13670_v48 = vld [vmem:[#allocation16 + $0x34] ss:$20 sps:$4 sm:$0xff]  }
0x18fe   :  { %v4824_v25 = vpop.permute.xlu1 %4823  ;;  %v4822_v46 = vpop.permute.xlu0 %4821 }
0x18ff   :  { %12326 = vmatprep.subr.bf16.mxu1 %v4822_v46  ;;  %v13676_v46 = vld [vmem:[#allocation16 + $0x10] ss:$20 sps:$4 sm:$0xff]  }
0x1900   :  { %12327 = vmatpush3.bf16.msra.mxu1 %v4799_v62 }
0x1901   :  { %12328 = vmatprep.subr.bf16.mxu1 %v4824_v25  ;;  %v13674_v25 = vld [vmem:[#allocation16 + $0x5c] ss:$20 sps:$4 sm:$0xff]  }
0x1902   :  { %v4844_v18 = vpop.permute.xlu1 %4843  ;;  %v4808_v29 = vpop.permute.xlu0 %4807 }
0x1903   :  { %12365 = vmatpush3.bf16.msra.mxu0 %v4844_v18 }
0x1904   :  { %12329 = vmatpush3.bf16.msra.mxu1 %v16611_v43 }
0x1905   :  { %12330 = vmatprep.subr.bf16.mxu1 %v4830_v7 }
0x1906   :  { %v4872_v6 = vpop.permute.xlu1 %4871  ;;  %v4836_v60 = vpop.permute.xlu0 %4835 }
0x1908   :  { %12331 = vmatpush3.bf16.msra.mxu1 %v4806_v41  ;;  %v13673_v41 = vld [vmem:[#allocation16 + $0x30] ss:$20 sps:$4 sm:$0xff]  }
0x1909   :  { %12332 = vmatprep.subr.bf16.mxu1 %v4832_v4  ;;  %v13668_v4 = vld [vmem:[#allocation16 + $0x7c] ss:$20 sps:$4 sm:$0xff]  }
0x190a   :  { %v4870_v12 = vpop.permute.xlu1 %4869  ;;  %v4834_v37 = vpop.permute.xlu0 %4833 }
0x190b   :  { %12366 = vmatprep.subr.bf16.mxu0 %v4870_v12  ;;  %v13679_v12 = vld [vmem:[#allocation16 + $0x84] ss:$20 sps:$4 sm:$0xff]  }
0x190c   :  { %12333 = vmatpush3.bf16.msra.mxu1 %v4808_v29 }
0x190d   :  { %12334 = vmatprep.subr.bf16.mxu1 %v4834_v37  ;;  %v13681_v37 = vld [vmem:[#allocation16 + $0x60] ss:$20 sps:$4 sm:$0xff]  }
0x190e   :  { %v4846_v8 = vpop.permute.xlu1 %4845  ;;  %v4810_v39 = vpop.permute.xlu0 %4809 }
0x190f   :  { %12367 = vmatpush3.bf16.msra.mxu0 %v4846_v8  ;;  %v13682_v8 = vld [vmem:[#allocation16 + $0x80] ss:$20 sps:$4 sm:$0xff]  }
0x1910   :  { %12335 = vmatpush3.bf16.msra.mxu1 %v4810_v39  ;;  %12368 = vmatprep.subr.bf16.mxu0 %v4872_v6  ;;  %v13677_v6 = vld [vmem:[#allocation16 + $0x58] ss:$20 sps:$4 sm:$0xff]   ;;  %v13683_v39 = vld [vmem:[#allocation16 + $0x88] ss:$20 sps:$4 sm:$0xff]  }
0x1911   :  { %12336 = vmatprep.subr.bf16.mxu1 %v4836_v60  ;;  %v13678_v60 = vld [vmem:[#allocation16 + $0x38] ss:$20 sps:$4 sm:$0xff]  }
0x1912   :  { %v4848_v10 = vpop.permute.xlu1 %4847  ;;  %v4812_v20 = vpop.permute.xlu0 %4811 }
0x1913   :  { %12369 = vmatpush3.bf16.msra.mxu0 %v4848_v10  ;;  %v5428_v10 = vpack.c.bf16 %v16462_v59, %v16460_v0  ;;  %v5288_v0 = vld [vmem:[#allocation42] sm:$0xff]  ;;  %v5289_v59 = vld [vmem:[#allocation42 + $0x8] sm:$0xff] }
0x1914   :  { %12337 = vmatpush3.bf16.msra.mxu1 %v4812_v20  ;;  %v5429_v20 = vpack.c.bf16 %v16458_v33, %v16456_v53 }
0x1916   :  { %v4854_v43 = vpop.permute.xlu1 %4853  ;;  %v4878_v62 = vpop.permute.xlu0 %4877 }
0x1917   :  { %5118 = vmatmul.mubr.bf16.vlgmr.msra.gmra.mrb[96].mxu1 %v13656_v26  ;;  %12370 = vmatprep.subr.bf16.mxu0 %v4878_v62  ;;  %v5430_v26 = vpack.c.bf16 %v16472_v40, %v16470_v16  ;;  %v5290_v62 = vld [vmem:[#allocation42 + $0x10] sm:$0x3] }
0x1918   :  { %12371 = vmatpush3.bf16.msra.mxu0 %v4854_v43  ;;  %5125 = vmatprep.mubr.bf16.mxu1 %v13659_v52  ;;  %v5431_v52 = vpack.c.bf16 %v16478_v55, %v16476_v27  ;;  %v12971_v43 = vpack.c.bf16 %v5289_v59, %v5288_v0 }
0x191a   :  { %v4856_v42 = vpop.permute.xlu1 %4855  ;;  %v4880_v32 = vpop.permute.xlu0 %4879 }
0x191b   :  { %12372 = vmatprep.subr.bf16.mxu0 %v4880_v32 }
0x191c   :  { %12373 = vmatpush3.bf16.msra.mxu0 %v4856_v42 }
0x191e   :  { %v4858_v31 = vpop.permute.xlu1 %4857  ;;  %v4882_v2 = vpop.permute.xlu0 %4881 }
0x191f   :  { %5126 = vmatmul.mubr.bf16.gmra.mrb[100].mxu1 %v13661_v38  ;;  %12374 = vmatprep.subr.bf16.mxu0 %v4882_v2 }
0x1920   :  { %12375 = vmatpush3.bf16.msra.mxu0 %v4858_v31  ;;  %5133 = vmatprep.mubr.bf16.mxu1 %v13665_v24 }
0x1922   :  { %v4860_v56 = vpop.permute.xlu1 %4859  ;;  %v4884_v45 = vpop.permute.xlu0 %4883 }
0x1923   :  { %12376 = vmatprep.subr.bf16.mxu0 %v4884_v45 }
0x1924   :  { %12377 = vmatpush3.bf16.msra.mxu0 %v4860_v56 }
0x1925   :  { %12875 = vmatprep.subr.bf16.mxu0 %v13684_v36 }
0x1926   :  { %v4890_v14 = vpop.permute.xlu0 %4889  ;;  %v4892_v7 = vpop.permute.xlu1 %4891 }
0x1927   :  { %5134 = vmatmul.mubr.bf16.gmra.mrb[104].mxu1 %v13667_v1  ;;  %5183 = vmatmul.mubr.bf16.vlgmr.msra.gmra.mrb[80].mxu0 %v13662_v13 }
0x1928   :  { %12841 = vmatprep.subr.bf16.mxu1 %v4890_v14  ;;  %5141 = vmatprep.mubr.bf16.mxu1 %v13668_v4 }
0x1929   :  { %12842 = vmatpush3.bf16.msra.mxu1 %v4890_v14  ;;  %5190 = vmatprep.mubr.bf16.mxu0 %v13670_v48 }
0x192a   :  { %12843 = vmatprep.subr.bf16.mxu1 %v4892_v7  ;;  %12876 = vmatpush3.bf16.msra.mxu0 %v13684_v36  ;;  %v4894_v18 = vpop.permute.xlu0 %4893  ;;  %v4896_v29 = vpop.permute.xlu1 %4895 }
0x192b   :  { %12877 = vmatprep.subr.bf16.mxu0 %v13685_v22 }
0x192d   :  { %12844 = vmatpush3.bf16.msra.mxu1 %v4892_v7 }
0x192e   :  { %12845 = vmatprep.subr.bf16.mxu1 %v4894_v18  ;;  %12878 = vmatpush3.bf16.msra.mxu0 %v13685_v22 }
0x192f   :  { %5142 = vmatmul.mubr.bf16.gmra.mrb[108].mxu1 %v13672_v15  ;;  %5191 = vmatmul.mubr.bf16.gmra.mrb[84].mxu0 %v13673_v41 }
0x1930   :  { %5198 = vmatprep.mubr.bf16.mxu0 %v13674_v25  ;;  %12849 = vmatprep.mubr.msk.bf16.mxu1 %vm3895_vm4, %v13676_v46 }
0x1931   :  { %12846 = vmatpush3.bf16.msra.mxu1 %v4894_v18 }
0x1932   :  { %12847 = vmatprep.subr.bf16.mxu1 %v4896_v29 }
0x1935   :  { %12848 = vmatpush3.bf16.msra.mxu1 %v4896_v29 }
0x1936   :  { %12972 = vmatprep.subr.bf16.mxu1 %v12971_v43 }
0x1937   :  { %5199 = vmatmul.mubr.bf16.gmra.mrb[88].mxu0 %v13677_v6 }
0x1938   :  { %12850 = vmatmul.mubr.msk.bf16.vlgmr.msra.gmra.mrb[112].mxu1 %vm3895_vm4, %v13678_v60  ;;  %5206 = vmatprep.mubr.bf16.mxu0 %v13679_v12 }
0x1939   :  { %12853 = vmatprep.mubr.msk.bf16.mxu1 %vm3895_vm4, %v13681_v37  ;;  %12974 = vmatpush3.bf16.msra.mxu1 %v12971_v43 }
0x193a   :  { %12861 = vmatprep.subr.msk.mxu1 %vm2118_vm10, %v5290_v62 }
0x193b   :  { %v4941_v36 = vpop.permute.xlu1 %4940  ;;  %v4936_v56 = vpop.permute.xlu0 %4935 }
0x193d   :  { %12862 = vmatpush3.msk.msra.mxu1 %vm2118_vm10, %v5290_v62 }
0x193f   :  { %5207 = vmatmul.mubr.bf16.gmra.mrb[92].mxu0 %v13682_v8  ;;  %v4951_v12 = vpop.permute.xlu1 %4950  ;;  %v4946_v37 = vpop.permute.xlu0 %4945 }
0x1940   :  { %12854 = vmatmul.mubr.msk.bf16.gmra.mrb[116].mxu1 %vm3895_vm4, %v13683_v39  ;;  %12879 = vmatprep.mubr.msk.bf16.mxu0 %vm3032_vm6, %v5428_v10 }
0x1947   :  { %12880 = vmatmul.mubr.msk.bf16.vlgmr.msra.gmra.mrb[96].mxu0 %vm3032_vm6, %v5429_v20 }
0x1948   :  { %12883 = vmatprep.mubr.msk.bf16.mxu0 %vm3032_vm6, %v5430_v26 }
0x194f   :  { %12884 = vmatmul.mubr.msk.bf16.gmra.mrb[100].mxu0 %vm3032_vm6, %v5431_v52 }
0x19ea   :  { %v12338_v53 = vpop.f32.mrb[96].mxu1 }
0x19eb   :  { %v12339_v33 = vpop.f32.mrb[97].mxu1 }
0x19ec   :  { %v12340_v16 = vadd.f32 %v12339_v33, %v12338_v53  ;;  %v12341_v40 = vpop.f32.mrb[98].mxu1 }
0x19ed   :  { %v12342_v42 = vpop.f32.mrb[99].mxu1 }
0x19ee   :  { %v12343_v32 = vadd.f32 %v12342_v42, %v12341_v40  ;;  %v5120_v48 = vadd.f32 %v12340_v16, %v4936_v56 }
0x19f0   :  { %v5123_v46 = vadd.f32 %v12343_v32, %v4941_v36 }
0x19f2   :  { %v12344_v38 = vpop.f32.mrb[100].mxu1 }
0x19f3   :  { %v12345_v27 = vpop.f32.mrb[101].mxu1 }
0x19f4   :  { %v12346_v55 = vadd.f32 %v12345_v27, %v12344_v38  ;;  %v12347_v24 = vpop.f32.mrb[102].mxu1  ;;  %v4961_v38 = vpop.permute.xlu1 %4960 }
0x19f5   :  { %v12348_v31 = vpop.f32.mrb[103].mxu1  ;;  %v4956_v27 = vpop.permute.xlu0 %4955 }
0x19f6   :  { %v12349_v2 = vadd.f32 %v12348_v31, %v12347_v24  ;;  %v5128_v26 = vadd.f32 %v12346_v55, %v4946_v37 }
0x19f8   :  { %v5131_v33 = vadd.f32 %v12349_v2, %v4951_v12  ;;  %v4971_v37 = vpop.permute.xlu1 %4970 }
0x19fa   :  { %v12350_v45 = vpop.f32.mrb[104].mxu1  ;;  %v12378_v13 = vpop.f32.mrb[80].mxu0 }
0x19fb   :  { %v12351_v1 = vpop.f32.mrb[105].mxu1  ;;  %v12379_v4 = vpop.f32.mrb[81].mxu0 }
0x19fc   :  { %v12352_v14 = vadd.f32 %v12351_v1, %v12350_v45  ;;  %v12380_v22 = vadd.f32 %v12379_v4, %v12378_v13  ;;  %v12353_v7 = vpop.f32.mrb[106].mxu1  ;;  %v12381_v15 = vpop.f32.mrb[82].mxu0 }
0x19fd   :  { %v12354_v41 = vpop.f32.mrb[107].mxu1  ;;  %v12382_v25 = vpop.f32.mrb[83].mxu0 }
0x19fe   :  { %v12355_v18 = vadd.f32 %v12354_v41, %v12353_v7  ;;  %v12383_v29 = vadd.f32 %v12382_v25, %v12381_v15  ;;  %v5185_v6 = vadd.f32 %v12380_v22, %v5120_v48  ;;  %v5136_v56 = vadd.f32 %v12352_v14, %v4956_v27  ;;  %v4966_v14 = vpop.permute.xlu0 %4965 }
0x1a00   :  { %v5188_v60 = vadd.f32 %v12383_v29, %v5123_v46  ;;  %v5139_v7 = vadd.f32 %v12355_v18, %v4961_v38 }
0x1a02   :  { %v12356_v8 = vpop.f32.mrb[108].mxu1  ;;  %v12384_v39 = vpop.f32.mrb[84].mxu0 }
0x1a03   :  { %v12357_v10 = vpop.f32.mrb[109].mxu1  ;;  %v12385_v20 = vpop.f32.mrb[85].mxu0 }
0x1a04   :  { %v12358_v52 = vadd.f32 %v12357_v10, %v12356_v8  ;;  %v12386_v0 = vadd.f32 %v12385_v20, %v12384_v39  ;;  %v12359_v59 = vpop.f32.mrb[110].mxu1  ;;  %v12387_v43 = vpop.f32.mrb[86].mxu0 }
0x1a05   :  { %v12360_v62 = vpop.f32.mrb[111].mxu1  ;;  %v12388_v53 = vpop.f32.mrb[87].mxu0 }
0x1a06   :  { %v12361_v16 = vadd.f32 %v12360_v62, %v12359_v59  ;;  %v12389_v40 = vadd.f32 %v12388_v53, %v12387_v43  ;;  %v5193_v42 = vadd.f32 %v12386_v0, %v5128_v26  ;;  %v5144_v26 = vadd.f32 %v12358_v52, %v4966_v14 }
0x1a08   :  { %v5196_v32 = vadd.f32 %v12389_v40, %v5131_v33  ;;  %v5147_v33 = vadd.f32 %v12361_v16, %v4971_v37 }
0x1a0a   :  { %v12390_v24 = vpop.f32.mrb[88].mxu0 }
0x1a0b   :  { %v12851_v31 = vpop.f32.mrb[112].mxu1  ;;  %v12391_v36 = vpop.f32.mrb[89].mxu0 }
0x1a0c   :  { %v5258_v45 = vadd.f32 %v12851_v31, %v5193_v42  ;;  %v12392_v13 = vadd.f32 %v12391_v36, %v12390_v24  ;;  %v5249_v55 = vpop.f32.mrb[113].mxu1  ;;  %v12393_v1 = vpop.f32.mrb[90].mxu0 }
0x1a0d   :  { %v5250_v4 = vadd.f32 %v5249_v55, %v5185_v6  ;;  %v12852_v48 = vpop.f32.mrb[114].mxu1  ;;  %v12394_v22 = vpop.f32.mrb[91].mxu0 }
0x1a0e   :  { %v5261_v2 = vadd.f32 %v12852_v48, %v5196_v32  ;;  %v12395_v15 = vadd.f32 %v12394_v22, %v12393_v1  ;;  %v5252_v41 = vpop.f32.mrb[115].mxu1  ;;  %v5201_v25 = vadd.f32 %v12392_v13, %v5136_v56  ;;  %v5282_v39 = vmax.f32 %v5258_v45, 0.0 }
0x1a0f   :  { %v5280_v46 = vmax.f32 %v5250_v4, 0.0  ;;  %v5253_v29 = vadd.f32 %v5252_v41, %v5188_v60 }
0x1a10   :  { %v5204_v12 = vadd.f32 %v12395_v15, %v5139_v7  ;;  %v5283_v43 = vmax.f32 %v5261_v2, 0.0 }
0x1a11   :  { %v5281_v8 = vmax.f32 %v5253_v29, 0.0  ;;  %12863 = vmatprep.mubr.msk.f32.mxu1 %vm5291_vm7, %v5280_v46 }
0x1a12   :  { %v12396_v10 = vpop.f32.mrb[92].mxu0 }
0x1a13   :  { %v12855_v20 = vpop.f32.mrb[116].mxu1  ;;  %12864 = vmatmul.mubr.msk.f32.vlgmr.msra.gmra.mrb[120].mxu1 %vm5291_vm7, %v5281_v8  ;;  %v12397_v6 = vpop.f32.mrb[93].mxu0 }
0x1a14   :  { %v12398_v18 = vadd.f32 %v12397_v6, %v12396_v10  ;;  %v5265_v0 = vpop.f32.mrb[117].mxu1  ;;  %12866 = vmatprep.mubr.msk.f32.mxu1 %vm5291_vm7, %v5282_v39  ;;  %v12399_v59 = vpop.f32.mrb[94].mxu0 }
0x1a15   :  { %v5266_v60 = vadd.f32 %v5265_v0, %v5201_v25  ;;  %v12856_v62 = vpop.f32.mrb[118].mxu1  ;;  %v12400_v53 = vpop.f32.mrb[95].mxu0 }
0x1a16   :  { %v5209_v40 = vadd.f32 %v12398_v18, %v5144_v26  ;;  %v12401_v42 = vadd.f32 %v12400_v53, %v12399_v59  ;;  %v5268_v32 = vpop.f32.mrb[119].mxu1 }
0x1a17   :  { %v5284_v38 = vmax.f32 %v5266_v60, 0.0  ;;  %v5269_v27 = vadd.f32 %v5268_v32, %v5204_v12  ;;  %12867 = vmatmul.mubr.msk.f32.gmra.mrb[122].mxu1 %vm5291_vm7, %v5283_v43 }
0x1a18   :  { %v5274_v24 = vadd.f32 %v12855_v20, %v5209_v40  ;;  %v5212_v31 = vadd.f32 %v12401_v42, %v5147_v33 }
0x1a19   :  { %v5285_v52 = vmax.f32 %v5269_v27, 0.0  ;;  %12869 = vmatprep.mubr.msk.f32.mxu1 %vm5291_vm7, %v5284_v38 }
0x1a1a   :  { %v5286_v36 = vmax.f32 %v5274_v24, 0.0  ;;  %v5277_v56 = vadd.f32 %v12856_v62, %v5212_v31  ;;  %v12881_v45 = vpop.f32.mrb[96].mxu0 }
0x1a1b   :  { %12870 = vmatmul.mubr.msk.f32.gmra.mrb[124].mxu1 %vm5291_vm7, %v5285_v52  ;;  %v5494_v13 = vpop.f32.mrb[97].mxu0 }
0x1a1c   :  { %v5287_v55 = vmax.f32 %v5277_v56, 0.0  ;;  %12872 = vmatprep.mubr.msk.f32.mxu1 %vm5291_vm7, %v5286_v36  ;;  %v12882_v16 = vpop.f32.mrb[98].mxu0 }
0x1a1d   :  { %v16691_v1 = vpack.c.bf16 %v12882_v16, %v12881_v45  ;;  %v5497_v4 = vpop.f32.mrb[99].mxu0  ;;  %v5770_v16 = vld [vmem:[%s17912_s17 + $0x8] sm:$0xff] }
0x1a1e   :  { %v16693_v48 = vpack.c.bf16 %v5497_v4, %v5494_v13  ;;  %v13688_v13 = vld [vmem:[#allocation18 + $0x4] ss:$36 sps:$4 sm:$0xff]  }
0x1a1f   :  { %12873 = vmatmul.mubr.msk.f32.gmra.mrb[126].mxu1 %vm5291_vm7, %v5287_v55  ;;  %5587 = vrot.lane.b32.xlu0 %v16691_v1, %s15049_s19  ;;  %v13700_v55 = vld [vmem:[#allocation18 + $0xc] ss:$36 sps:$4 sm:$0xff]   ;;  %vm17928_vm7 = vcmask 744448  }
0x1a20   :  { %5539 = vrot.lane.b32.xlu1 %v16691_v1, %s15027_s14  ;;  %6033 = vmatprep.mubr.bf16.mxu1 %v13688_v13  ;;  %v5772_v4 = vld [vmem:[%s17912_s17 + $0x18] sm:$0xff]  ;;  %v13694_v13 = vld [vmem:[#allocation18 + $0x90] ss:$36 sps:$4 sm:$0xff]  }
0x1a21   :  { %6098 = vmatprep.mubr.bf16.mxu0 %v13700_v55 }
0x1a22   :  { %v12885_v22 = vpop.f32.mrb[100].mxu0 }
0x1a23   :  { %5537 = vrot.lane.b32.xlu0 %v16693_v48, %s15027_s14  ;;  %v5510_v7 = vpop.f32.mrb[101].mxu0 }
0x1a24   :  { %5563 = vrot.lane.b32.xlu1 %v16691_v1, %s15028_s8  ;;  %v12886_v2 = vpop.f32.mrb[102].mxu0 }
0x1a25   :  { %v16704_v15 = vpack.c.bf16 %v12886_v2, %v12885_v22  ;;  %v5513_v41 = vpop.f32.mrb[103].mxu0  ;;  %v5776_v22 = vld [vmem:[%s17912_s17 + $0x38] sm:$0xff] }
0x1a26   :  { %v16706_v25 = vpack.c.bf16 %v5513_v41, %v5510_v7  ;;  %v5771_v7 = vld [vmem:[%s17912_s17 + $0x10] sm:$0xff]  ;;  %v5773_v41 = vld [vmem:[%s17912_s17 + $0x20] sm:$0xff] }
0x1a27   :  { %5561 = vrot.lane.b32.xlu0 %v16693_v48, %s15028_s8 }
0x1a28   :  { %5635 = vrot.lane.b32.xlu1 %v16691_v1, %s15044_s13 }
0x1a2b   :  { %5591 = vrot.lane.b32.xlu0 %v16704_v15, %s15049_s19 }
0x1a2c   :  { %5611 = vrot.lane.b32.xlu1 %v16691_v1, %s15048_s11 }
0x1a2f   :  { %5541 = vrot.lane.b32.xlu0 %v16706_v25, %s15027_s14 }
0x1a30   :  { %5585 = vrot.lane.b32.xlu1 %v16693_v48, %s15049_s19 }
0x1a33   :  { %5565 = vrot.lane.b32.xlu0 %v16706_v25, %s15028_s8 }
0x1a34   :  { %5633 = vrot.lane.b32.xlu1 %v16693_v48, %s15044_s13 }
0x1a38   :  { %5609 = vrot.lane.b32.xlu1 %v16693_v48, %s15048_s11 }
0x1a3c   :  { %5543 = vrot.lane.b32.xlu1 %v16704_v15, %s15027_s14 }
0x1a40   :  { %5567 = vrot.lane.b32.xlu1 %v16704_v15, %s15028_s8 }
0x1a44   :  { %5639 = vrot.lane.b32.xlu1 %v16704_v15, %s15044_s13 }
0x1a48   :  { %5615 = vrot.lane.b32.xlu1 %v16704_v15, %s15048_s11 }
0x1a4c   :  { %5589 = vrot.lane.b32.xlu1 %v16706_v25, %s15049_s19 }
0x1a50   :  { %5637 = vrot.lane.b32.xlu1 %v16706_v25, %s15044_s13 }
0x1a54   :  { %5613 = vrot.lane.b32.xlu1 %v16706_v25, %s15048_s11 }
0x1a91   :  { %v5588_v46 = vpop.permute.xlu0 %5587 }
0x1a92   :  { %v5540_v29 = vpop.permute.xlu1 %5539 }
0x1a95   :  { %v5538_v12 = vpop.permute.xlu0 %5537 }
0x1a96   :  { %v5564_v37 = vpop.permute.xlu1 %5563  ;;  %12427 = vmatprep.subr.bf16.mxu1 %v5538_v12 }
0x1a97   :  { %12428 = vmatpush3.bf16.msra.mxu1 %v16693_v48 }
0x1a98   :  { %12429 = vmatprep.subr.bf16.mxu1 %v5540_v29 }
0x1a99   :  { %v5562_v8 = vpop.permute.xlu0 %5561 }
0x1a9a   :  { %v16741_v14 = vpop.permute.xlu1 %5635 }
0x1a9b   :  { %12430 = vmatpush3.bf16.msra.mxu1 %v16691_v1 }
0x1a9d   :  { %v5592_v39 = vpop.permute.xlu0 %5591 }
0x1a9e   :  { %v16744_v10 = vpop.permute.xlu1 %5611 }
0x1aa1   :  { %v5542_v20 = vpop.permute.xlu0 %5541 }
0x1aa2   :  { %v5586_v6 = vpop.permute.xlu1 %5585  ;;  %12431 = vmatprep.subr.bf16.mxu1 %v5542_v20 }
0x1aa3   :  { %12467 = vmatprep.subr.bf16.mxu0 %v5586_v6  ;;  %12432 = vmatpush3.bf16.msra.mxu1 %v16706_v25 }
0x1aa4   :  { %12468 = vmatpush3.bf16.msra.mxu0 %v5562_v8 }
0x1aa5   :  { %12469 = vmatprep.subr.bf16.mxu0 %v5588_v46  ;;  %v5566_v53 = vpop.permute.xlu0 %5565 }
0x1aa6   :  { %v16747_v26 = vpop.permute.xlu1 %5633 }
0x1aa8   :  { %12470 = vmatpush3.bf16.msra.mxu0 %v5564_v37 }
0x1aaa   :  { %v16749_v18 = vpop.permute.xlu1 %5609 }
0x1aae   :  { %v5544_v0 = vpop.permute.xlu1 %5543 }
0x1aaf   :  { %12433 = vmatprep.subr.bf16.mxu1 %v5544_v0 }
0x1ab0   :  { %12434 = vmatpush3.bf16.msra.mxu1 %v16704_v15 }
0x1ab2   :  { %v5568_v59 = vpop.permute.xlu1 %5567 }
0x1ab6   :  { %v16752_v43 = vpop.permute.xlu1 %5639 }
0x1aba   :  { %v16754_v60 = vpop.permute.xlu1 %5615 }
0x1abe   :  { %v5590_v62 = vpop.permute.xlu1 %5589 }
0x1abf   :  { %12471 = vmatprep.subr.bf16.mxu0 %v5590_v62 }
0x1ac0   :  { %12472 = vmatpush3.bf16.msra.mxu0 %v5566_v53 }
0x1ac1   :  { %12473 = vmatprep.subr.bf16.mxu0 %v5592_v39 }
0x1ac2   :  { %v5638_v2 = vpop.permute.xlu1 %5637 }
0x1ac4   :  { %12474 = vmatpush3.bf16.msra.mxu0 %v5568_v59 }
0x1ac6   :  { %v5614_v46 = vpop.permute.xlu1 %5613 }
0x1ae6   :  { %v12865_v33 = vpop.f32.mrb[120].mxu1 }
0x1ae7   :  { %v5385_v40 = vpop.f32.mrb[121].mxu1 }
0x1ae8   :  { %v16756_v42 = vpack.c.bf16 %v12865_v33, %v5385_v40 }
0x1aea   :  { %5545 = vrot.lane.b32.xlu0 %v16756_v42, %s15027_s14  ;;  %v12868_v32 = vpop.f32.mrb[122].mxu1 }
0x1aeb   :  { %v5395_v38 = vpop.f32.mrb[123].mxu1 }
0x1aec   :  { %v16760_v27 = vpack.c.bf16 %v12868_v32, %v5395_v38  ;;  %v13686_v32 = vld [vmem:[#allocation18] ss:$36 sps:$4 sm:$0xff]   ;;  %v13689_v38 = vld [vmem:[#allocation18 + $0x4c] ss:$36 sps:$4 sm:$0xff]  }
0x1aee   :  { %5593 = vrot.lane.b32.xlu0 %v16756_v42, %s15049_s19  ;;  %5547 = vrot.lane.b32.xlu1 %v16760_v27, %s15027_s14  ;;  %v12871_v24 = vpop.f32.mrb[124].mxu1 }
0x1aef   :  { %v5405_v31 = vpop.f32.mrb[125].mxu1 }
0x1af0   :  { %v16766_v52 = vpack.c.bf16 %v12871_v24, %v5405_v31 }
0x1af2   :  { %5569 = vrot.lane.b32.xlu0 %v16756_v42, %s15028_s8  ;;  %5681 = vrot.lane.b32.xlu1 %v16693_v48, %s15050_s25  ;;  %v12874_v36 = vpop.f32.mrb[126].mxu1 }
0x1af3   :  { %v5415_v56 = vpop.f32.mrb[127].mxu1 }
0x1af4   :  { %v16772_v45 = vpack.c.bf16 %v12874_v36, %v5415_v56  ;;  %v13692_v36 = vld [vmem:[#allocation18 + $0x94] ss:$36 sps:$4 sm:$0xff]  }
0x1af6   :  { %5641 = vrot.lane.b32.xlu0 %v16756_v42, %s15044_s13  ;;  %5551 = vrot.lane.b32.xlu1 %v16772_v45, %s15027_s14 }
0x1afa   :  { %5617 = vrot.lane.b32.xlu0 %v16756_v42, %s15048_s11  ;;  %5657 = vrot.lane.b32.xlu1 %v16693_v48, %s15045_s1 }
0x1afe   :  { %5595 = vrot.lane.b32.xlu0 %v16760_v27, %s15049_s19  ;;  %5683 = vrot.lane.b32.xlu1 %v16691_v1, %s15050_s25 }
0x1b02   :  { %5571 = vrot.lane.b32.xlu0 %v16760_v27, %s15028_s8  ;;  %5659 = vrot.lane.b32.xlu1 %v16691_v1, %s15045_s1 }
0x1b06   :  { %5549 = vrot.lane.b32.xlu0 %v16766_v52, %s15027_s14  ;;  %5685 = vrot.lane.b32.xlu1 %v16706_v25, %s15050_s25 }
0x1b0a   :  { %5597 = vrot.lane.b32.xlu0 %v16766_v52, %s15049_s19  ;;  %5661 = vrot.lane.b32.xlu1 %v16706_v25, %s15045_s1 }
0x1b0e   :  { %5573 = vrot.lane.b32.xlu0 %v16766_v52, %s15028_s8  ;;  %5687 = vrot.lane.b32.xlu1 %v16704_v15, %s15050_s25 }
0x1b12   :  { %5643 = vrot.lane.b32.xlu0 %v16760_v27, %s15044_s13  ;;  %5663 = vrot.lane.b32.xlu1 %v16704_v15, %s15045_s1 }
0x1b16   :  { %5619 = vrot.lane.b32.xlu0 %v16760_v27, %s15048_s11  ;;  %5705 = vrot.lane.b32.xlu1 %v16693_v48, %s15039_s4  ;;  %v5774_v48 = vld [vmem:[%s17912_s17 + $0x28] sm:$0xff] }
0x1b1a   :  { %5645 = vrot.lane.b32.xlu0 %v16766_v52, %s15044_s13  ;;  %5691 = vrot.lane.b32.xlu1 %v16760_v27, %s15050_s25 }
0x1b1e   :  { %5621 = vrot.lane.b32.xlu0 %v16766_v52, %s15048_s11  ;;  %5667 = vrot.lane.b32.xlu1 %v16760_v27, %s15045_s1 }
0x1b22   :  { %5599 = vrot.lane.b32.xlu0 %v16772_v45, %s15049_s19  ;;  %5709 = vrot.lane.b32.xlu1 %v16706_v25, %s15039_s4  ;;  %v5775_v25 = vld [vmem:[%s17912_s17 + $0x30] sm:$0xff] }
0x1b26   :  { %5575 = vrot.lane.b32.xlu0 %v16772_v45, %s15028_s8  ;;  %5695 = vrot.lane.b32.xlu1 %v16772_v45, %s15050_s25 }
0x1b2a   :  { %5689 = vrot.lane.b32.xlu0 %v16756_v42, %s15050_s25  ;;  %5671 = vrot.lane.b32.xlu1 %v16772_v45, %s15045_s1 }
0x1b2e   :  { %5665 = vrot.lane.b32.xlu0 %v16756_v42, %s15045_s1  ;;  %5715 = vrot.lane.b32.xlu1 %v16760_v27, %s15039_s4 }
0x1b32   :  { %5647 = vrot.lane.b32.xlu0 %v16772_v45, %s15044_s13  ;;  %5719 = vrot.lane.b32.xlu1 %v16772_v45, %s15039_s4 }
0x1b36   :  { %5623 = vrot.lane.b32.xlu0 %v16772_v45, %s15048_s11  ;;  %5784 = vperm.xlu1 %13340, %v5770_v16  }
0x1b3a   :  { %5707 = vrot.lane.b32.xlu0 %v16691_v1, %s15039_s4  ;;  %5794 = vperm.xlu1 %13340, %v5772_v4   ;;  %v5769_v1 = vld [vmem:[%s17912_s17] sm:$0xff]  ;;  %v13697_v4 = vld [vmem:[#allocation18 + $0xd8] ss:$36 sps:$4 sm:$0xff]  }
0x1b3e   :  { %5693 = vrot.lane.b32.xlu0 %v16766_v52, %s15050_s25  ;;  %5804 = vperm.xlu1 %13340, %v5774_v48   ;;  %v13708_v48 = vld [vmem:[#allocation18 + $0x14] ss:$36 sps:$4 sm:$0xff]  }
0x1b42   :  { %5669 = vrot.lane.b32.xlu0 %v16766_v52, %s15045_s1  ;;  %5814 = vperm.xlu1 %13340, %v5776_v22   ;;  %v13698_v22 = vld [vmem:[#allocation18 + $0x8] ss:$36 sps:$4 sm:$0xff]  }
0x1b46   :  { %5711 = vrot.lane.b32.xlu0 %v16704_v15, %s15039_s4 }
0x1b4a   :  { %5713 = vrot.lane.b32.xlu0 %v16756_v42, %s15039_s4 }
0x1b4e   :  { %5717 = vrot.lane.b32.xlu0 %v16766_v52, %s15039_s4 }
0x1b52   :  { %5779 = vperm.xlu0 %13314, %v5769_v1   ;;  %v13701_v1 = vld [vmem:[#allocation18 + $0x54] ss:$36 sps:$4 sm:$0xff]  }
0x1b56   :  { %5789 = vperm.xlu0 %13314, %v5771_v7  }
0x1b5a   :  { %5799 = vperm.xlu0 %13314, %v5773_v41  }
0x1b5c   :  { %v5546_v29 = vpop.permute.xlu0 %5545 }
0x1b5d   :  { %12435 = vmatprep.subr.bf16.mxu1 %v5546_v29 }
0x1b5e   :  { %5809 = vperm.xlu0 %13314, %v5775_v25   ;;  %12436 = vmatpush3.bf16.msra.mxu1 %v16756_v42  ;;  %v13703_v25 = vld [vmem:[#allocation18 + $0x50] ss:$36 sps:$4 sm:$0xff]  }
0x1b60   :  { %v5548_v15 = vpop.permute.xlu1 %5547  ;;  %v5594_v12 = vpop.permute.xlu0 %5593 }
0x1b61   :  { %12437 = vmatprep.subr.bf16.mxu1 %v5548_v15  ;;  %12475 = vmatprep.subr.bf16.mxu0 %v5594_v12 }
0x1b62   :  { %12438 = vmatpush3.bf16.msra.mxu1 %v16760_v27 }
0x1b64   :  { %v16862_v37 = vpop.permute.xlu1 %5681  ;;  %v5570_v8 = vpop.permute.xlu0 %5569 }
0x1b65   :  { %12476 = vmatpush3.bf16.msra.mxu0 %v5570_v8  ;;  %v13709_v8 = vld [vmem:[#allocation18 + $0x98] ss:$36 sps:$4 sm:$0xff]  }
0x1b68   :  { %v5642_v39 = vpop.permute.xlu0 %5641  ;;  %v5552_v20 = vpop.permute.xlu1 %5551 }
0x1b6c   :  { %v5618_v6 = vpop.permute.xlu0 %5617  ;;  %v16864_v0 = vpop.permute.xlu1 %5657 }
0x1b70   :  { %v5596_v59 = vpop.permute.xlu0 %5595  ;;  %v5684_v53 = vpop.permute.xlu1 %5683 }
0x1b71   :  { %12477 = vmatprep.subr.bf16.mxu0 %v5596_v59 }
0x1b74   :  { %v5572_v62 = vpop.permute.xlu0 %5571  ;;  %v5660_v40 = vpop.permute.xlu1 %5659 }
0x1b75   :  { %12478 = vmatpush3.bf16.msra.mxu0 %v5572_v62  ;;  %v13714_v62 = vld [vmem:[#allocation18 + $0xe0] ss:$36 sps:$4 sm:$0xff]  }
0x1b78   :  { %v5550_v33 = vpop.permute.xlu0 %5549  ;;  %v5686_v24 = vpop.permute.xlu1 %5685 }
0x1b79   :  { %12439 = vmatprep.subr.bf16.mxu1 %v5550_v33 }
0x1b7a   :  { %12440 = vmatpush3.bf16.msra.mxu1 %v16766_v52  ;;  %v13691_v52 = vld [vmem:[#allocation18 + $0x48] ss:$36 sps:$4 sm:$0xff]  }
0x1b7b   :  { %12441 = vmatprep.subr.bf16.mxu1 %v5552_v20  ;;  %v13712_v20 = vld [vmem:[#allocation18 + $0x5c] ss:$36 sps:$4 sm:$0xff]  }
0x1b7c   :  { %v5598_v42 = vpop.permute.xlu0 %5597  ;;  %v5662_v56 = vpop.permute.xlu1 %5661 }
0x1b7d   :  { %12479 = vmatprep.subr.bf16.mxu0 %v5598_v42  ;;  %v13720_v42 = vld [vmem:[#allocation18 + $0x1c] ss:$36 sps:$4 sm:$0xff]  }
0x1b7e   :  { %12442 = vmatpush3.bf16.msra.mxu1 %v16772_v45 }
0x1b7f   :  { %12507 = vmatprep.subr.bf16.mxu1 %v16747_v26 }
0x1b80   :  { %v5574_v27 = vpop.permute.xlu0 %5573  ;;  %v5688_v55 = vpop.permute.xlu1 %5687 }
0x1b81   :  { %6034 = vmatmul.mubr.bf16.vlgmr.msra.gmra.mrb[128].mxu1 %v13686_v32  ;;  %12480 = vmatpush3.bf16.msra.mxu0 %v5574_v27 }
0x1b82   :  { %12508 = vmatpush3.bf16.msra.mxu1 %v16749_v18  ;;  %6041 = vmatprep.mubr.bf16.mxu1 %v13689_v38  ;;  %v13695_v18 = vld [vmem:[#allocation18 + $0xdc] ss:$36 sps:$4 sm:$0xff]  }
0x1b83   :  { %12509 = vmatprep.subr.bf16.mxu1 %v16741_v14 }
0x1b84   :  { %v5644_v31 = vpop.permute.xlu0 %5643 }
0x1b86   :  { %12510 = vmatpush3.bf16.msra.mxu1 %v16744_v10  ;;  %v5664_v10 = vpop.permute.xlu1 %5663 }
0x1b87   :  { %12511 = vmatprep.subr.bf16.mxu1 %v5638_v2 }
0x1b88   :  { %v5620_v45 = vpop.permute.xlu0 %5619 }
0x1b89   :  { %6042 = vmatmul.mubr.bf16.gmra.mrb[132].mxu1 %v13691_v52  ;;  %v13722_v52 = vld [vmem:[#allocation18 + $0xec] ss:$36 sps:$4 sm:$0xff]  }
0x1b8a   :  { %12512 = vmatpush3.bf16.msra.mxu1 %v5614_v46  ;;  %6049 = vmatprep.mubr.bf16.mxu1 %v13692_v36  ;;  %v13704_v46 = vld [vmem:[#allocation18 + $0x9c] ss:$36 sps:$4 sm:$0xff]   ;;  %v13724_v36 = vld [vmem:[#allocation18 + $0x64] ss:$36 sps:$4 sm:$0xff]  }
0x1b8b   :  { %12513 = vmatprep.subr.bf16.mxu1 %v16752_v43 }
0x1b8c   :  { %v5646_v26 = vpop.permute.xlu0 %5645 }
0x1b8e   :  { %12514 = vmatpush3.bf16.msra.mxu1 %v16754_v60  ;;  %v5706_v60 = vpop.permute.xlu1 %5705 }
0x1b8f   :  { %12515 = vmatprep.subr.bf16.mxu1 %v5642_v39  ;;  %v13710_v39 = vld [vmem:[#allocation18 + $0xe4] ss:$36 sps:$4 sm:$0xff]  }
0x1b90   :  { %v5622_v14 = vpop.permute.xlu0 %5621 }
0x1b91   :  { %6050 = vmatmul.mubr.bf16.gmra.mrb[136].mxu1 %v13694_v13  ;;  %v13727_v13 = vld [vmem:[#allocation18 + $0x60] ss:$36 sps:$4 sm:$0xff]  }
0x1b92   :  { %12516 = vmatpush3.bf16.msra.mxu1 %v5618_v6  ;;  %6057 = vmatprep.mubr.bf16.mxu1 %v13695_v18  ;;  %v5692_v2 = vpop.permute.xlu1 %5691  ;;  %v13731_v18 = vld [vmem:[#allocation18 + $0x20] ss:$36 sps:$4 sm:$0xff]  }
0x1b93   :  { %12517 = vmatprep.subr.bf16.mxu1 %v5644_v31  ;;  %v13721_v31 = vld [vmem:[#allocation18 + $0xa0] ss:$36 sps:$4 sm:$0xff]  }
0x1b94   :  { %v5600_v16 = vpop.permute.xlu0 %5599 }
0x1b95   :  { %12481 = vmatprep.subr.bf16.mxu0 %v5600_v16  ;;  %v13730_v16 = vld [vmem:[#allocation18 + $0xa8] ss:$36 sps:$4 sm:$0xff]  }
0x1b96   :  { %12518 = vmatpush3.bf16.msra.mxu1 %v5620_v45  ;;  %v5668_v15 = vpop.permute.xlu1 %5667 }
0x1b97   :  { %12519 = vmatprep.subr.bf16.mxu1 %v5646_v26  ;;  %v13726_v26 = vld [vmem:[#allocation18 + $0xe8] ss:$36 sps:$4 sm:$0xff]  }
0x1b98   :  { %v5576_v43 = vpop.permute.xlu0 %5575 }
0x1b99   :  { %6058 = vmatmul.mubr.bf16.gmra.mrb[140].mxu1 %v13697_v4  ;;  %12482 = vmatpush3.bf16.msra.mxu0 %v5576_v43  ;;  %v13732_v4 = vld [vmem:[#allocation18 + $0x68] ss:$36 sps:$4 sm:$0xff]   ;;  %v13736_v43 = vld [vmem:[#allocation18 + $0xb0] ss:$36 sps:$4 sm:$0xff]  }
0x1b9a   :  { %12520 = vmatpush3.bf16.msra.mxu1 %v5622_v14  ;;  %12547 = vmatprep.subr.bf16.mxu0 %v16862_v37  ;;  %v13706_v37 = vld [vmem:[#allocation18 + $0x10] ss:$36 sps:$4 sm:$0xff]   ;;  %v5710_v6 = vpop.permute.xlu1 %5709 }
0x1b9b   :  { %6163 = vmatprep.mubr.bf16.mxu1 %v13708_v48  ;;  %v13733_v48 = vld [vmem:[#allocation18 + $0xf4] ss:$36 sps:$4 sm:$0xff]  }
0x1b9c   :  { %6099 = vmatmul.mubr.bf16.vlgmr.msra.gmra.mrb[104].mxu0 %v13698_v22  ;;  %v5690_v7 = vpop.permute.xlu0 %5689  ;;  %v13735_v22 = vld [vmem:[#allocation18 + $0xf0] ss:$36 sps:$4 sm:$0xff]  }
0x1b9d   :  { %12548 = vmatpush3.bf16.msra.mxu0 %v16864_v0  ;;  %6106 = vmatprep.mubr.bf16.mxu0 %v13701_v1  ;;  %v13737_v1 = vld [vmem:[#allocation18 + $0xf8] ss:$36 sps:$4 sm:$0xff]  }
0x1b9e   :  { %12549 = vmatprep.subr.bf16.mxu0 %v5684_v53  ;;  %v13715_v53 = vld [vmem:[#allocation18 + $0x58] ss:$36 sps:$4 sm:$0xff]   ;;  %v5696_v33 = vpop.permute.xlu1 %5695 }
0x1ba0   :  { %v5666_v41 = vpop.permute.xlu0 %5665 }
0x1ba1   :  { %12550 = vmatpush3.bf16.msra.mxu0 %v5660_v40  ;;  %v13716_v40 = vld [vmem:[#allocation18 + $0xa4] ss:$36 sps:$4 sm:$0xff]  }
0x1ba2   :  { %12551 = vmatprep.subr.bf16.mxu0 %v5686_v24  ;;  %v5672_v38 = vpop.permute.xlu1 %5671  ;;  %v13718_v24 = vld [vmem:[#allocation18 + $0x18] ss:$36 sps:$4 sm:$0xff]  }
0x1ba4   :  { %6107 = vmatmul.mubr.bf16.gmra.mrb[108].mxu0 %v13703_v25  ;;  %v5648_v29 = vpop.permute.xlu0 %5647 }
0x1ba5   :  { %12521 = vmatprep.subr.bf16.mxu1 %v5648_v29  ;;  %12552 = vmatpush3.bf16.msra.mxu0 %v5662_v56 }
0x1ba6   :  { %12553 = vmatprep.subr.bf16.mxu0 %v5688_v55  ;;  %6114 = vmatprep.mubr.bf16.mxu0 %v13704_v46  ;;  %v5716_v45 = vpop.permute.xlu1 %5715  ;;  %v13728_v55 = vld [vmem:[#allocation18 + $0xac] ss:$36 sps:$4 sm:$0xff]  }
0x1ba8   :  { %v5624_v12 = vpop.permute.xlu0 %5623 }
0x1ba9   :  { %12522 = vmatpush3.bf16.msra.mxu1 %v5624_v12  ;;  %12554 = vmatpush3.bf16.msra.mxu0 %v5664_v10 }
0x1baa   :  { %12555 = vmatprep.subr.bf16.mxu0 %v5690_v7  ;;  %12887 = vmatprep.subr.bf16.mxu1 %v5706_v60  ;;  %v5720_v10 = vpop.permute.xlu1 %5719 }
0x1bac   :  { %6115 = vmatmul.mubr.bf16.gmra.mrb[112].mxu0 %v13709_v8  ;;  %6164 = vmatmul.mubr.bf16.vlgmr.msra.gmra.mrb[144].mxu1 %v13706_v37  ;;  %v5708_v0 = vpop.permute.xlu0 %5707 }
0x1bad   :  { %12556 = vmatpush3.bf16.msra.mxu0 %v5666_v41  ;;  %12888 = vmatpush3.bf16.msra.mxu1 %v5706_v60 }
0x1bae   :  { %12557 = vmatprep.subr.bf16.mxu0 %v5692_v2  ;;  %12889 = vmatprep.subr.bf16.mxu1 %v5708_v0 }
0x1baf   :  { %6122 = vmatprep.mubr.bf16.mxu0 %v13710_v39  ;;  %6171 = vmatprep.mubr.bf16.mxu1 %v13712_v20 }
0x1bb0   :  { %v5694_v59 = vpop.permute.xlu0 %5693 }
0x1bb1   :  { %12558 = vmatpush3.bf16.msra.mxu0 %v5668_v15  ;;  %12890 = vmatpush3.bf16.msra.mxu1 %v5708_v0 }
0x1bb2   :  { %12559 = vmatprep.subr.bf16.mxu0 %v5694_v59  ;;  %12891 = vmatprep.subr.bf16.mxu1 %v5710_v6 }
0x1bb4   :  { %6123 = vmatmul.mubr.bf16.gmra.mrb[116].mxu0 %v13714_v62  ;;  %6172 = vmatmul.mubr.bf16.gmra.mrb[148].mxu1 %v13715_v53  ;;  %v5670_v32 = vpop.permute.xlu0 %5669 }
0x1bb5   :  { %12560 = vmatpush3.bf16.msra.mxu0 %v5670_v32  ;;  %12892 = vmatpush3.bf16.msra.mxu1 %v5710_v6 }
0x1bb6   :  { %12561 = vmatprep.subr.bf16.mxu0 %v5696_v33  ;;  %6179 = vmatprep.mubr.bf16.mxu1 %v13716_v40 }
0x1bb7   :  { %6228 = vmatprep.mubr.bf16.mxu0 %v13720_v42 }
0x1bb8   :  { %v5712_v27 = vpop.permute.xlu0 %5711 }
0x1bb9   :  { %12562 = vmatpush3.bf16.msra.mxu0 %v5672_v38  ;;  %12893 = vmatprep.subr.bf16.mxu1 %v5712_v27 }
0x1bba   :  { %12894 = vmatpush3.bf16.msra.mxu1 %v5712_v27 }
0x1bbc   :  { %6180 = vmatmul.mubr.bf16.gmra.mrb[152].mxu1 %v13721_v31  ;;  %6229 = vmatmul.mubr.bf16.vlgmr.msra.gmra.mrb[120].mxu0 %v13718_v24  ;;  %v5714_v56 = vpop.permute.xlu0 %5713 }
0x1bbd   :  { %12895 = vmatprep.subr.bf16.mxu1 %v5714_v56  ;;  %6187 = vmatprep.mubr.bf16.mxu1 %v13722_v52 }
0x1bbe   :  { %12896 = vmatpush3.bf16.msra.mxu1 %v5714_v56  ;;  %6236 = vmatprep.mubr.bf16.mxu0 %v13724_v36  ;;  %v5785_v36 = vpop.permute.xlu1 %5784 }
0x1bbf   :  { %12897 = vmatprep.subr.bf16.mxu1 %v5716_v45 }
0x1bc0   :  { %v5718_v14 = vpop.permute.xlu0 %5717 }
0x1bc2   :  { %12898 = vmatpush3.bf16.msra.mxu1 %v5716_v45 }
0x1bc3   :  { %12899 = vmatprep.subr.bf16.mxu1 %v5718_v14 }
0x1bc4   :  { %6188 = vmatmul.mubr.bf16.gmra.mrb[156].mxu1 %v13726_v26  ;;  %6237 = vmatmul.mubr.bf16.gmra.mrb[124].mxu0 %v13727_v13 }
0x1bc5   :  { %6244 = vmatprep.mubr.bf16.mxu0 %v13728_v55  ;;  %12903 = vmatprep.mubr.bf16.mxu1 %v13731_v18 }
0x1bc6   :  { %12900 = vmatpush3.bf16.msra.mxu1 %v5718_v14 }
0x1bc7   :  { %12901 = vmatprep.subr.bf16.mxu1 %v5720_v10 }
0x1bca   :  { %12902 = vmatpush3.bf16.msra.mxu1 %v5720_v10 }
0x1bcc   :  { %6245 = vmatmul.mubr.bf16.gmra.mrb[128].mxu0 %v13730_v16  ;;  %v5795_v16 = vpop.permute.xlu1 %5794 }
0x1bcd   :  { %12904 = vmatmul.mubr.bf16.vlgmr.msra.gmra.mrb[160].mxu1 %v13732_v4  ;;  %6252 = vmatprep.mubr.bf16.mxu0 %v13733_v48 }
0x1bce   :  { %12907 = vmatprep.mubr.bf16.mxu1 %v13736_v43 }
0x1bd1   :  { %v5780_v24 = vpop.permute.xlu0 %5779 }
0x1bd4   :  { %6253 = vmatmul.mubr.bf16.gmra.mrb[132].mxu0 %v13735_v22 }
0x1bd5   :  { %12908 = vmatmul.mubr.bf16.gmra.mrb[164].mxu1 %v13737_v1  ;;  %v5790_v48 = vpop.permute.xlu0 %5789 }
0x1c54   :  { %v12443_v60 = vpop.f32.mrb[128].mxu1 }
0x1c55   :  { %v12444_v7 = vpop.f32.mrb[129].mxu1 }
0x1c56   :  { %v12445_v2 = vadd.f32 %v12444_v7, %v12443_v60  ;;  %v12446_v41 = vpop.f32.mrb[130].mxu1 }
0x1c57   :  { %v12447_v25 = vpop.f32.mrb[131].mxu1 }
0x1c58   :  { %v12448_v46 = vadd.f32 %v12447_v25, %v12446_v41  ;;  %v6036_v56 = vadd.f32 %v12445_v2, %v5780_v24  ;;  %v5805_v2 = vpop.permute.xlu1 %5804 }
0x1c5a   :  { %v6039_v55 = vadd.f32 %v12448_v46, %v5785_v36 }
0x1c5c   :  { %v12449_v29 = vpop.f32.mrb[132].mxu1 }
0x1c5d   :  { %v12450_v15 = vpop.f32.mrb[133].mxu1 }
0x1c5e   :  { %v12451_v12 = vadd.f32 %v12450_v15, %v12449_v29  ;;  %v12452_v37 = vpop.f32.mrb[134].mxu1 }
0x1c5f   :  { %v12453_v8 = vpop.f32.mrb[135].mxu1 }
0x1c60   :  { %v12454_v39 = vadd.f32 %v12453_v8, %v12452_v37  ;;  %v6044_v22 = vadd.f32 %v12451_v12, %v5790_v48  ;;  %v5800_v37 = vpop.permute.xlu0 %5799 }
0x1c62   :  { %v6047_v41 = vadd.f32 %v12454_v39, %v5795_v16 }
0x1c64   :  { %v12455_v20 = vpop.f32.mrb[136].mxu1 }
0x1c65   :  { %v12456_v6 = vpop.f32.mrb[137].mxu1 }
0x1c66   :  { %v12457_v0 = vadd.f32 %v12456_v6, %v12455_v20  ;;  %v12458_v59 = vpop.f32.mrb[138].mxu1 }
0x1c67   :  { %v12459_v62 = vpop.f32.mrb[139].mxu1 }
0x1c68   :  { %v12460_v53 = vadd.f32 %v12459_v62, %v12458_v59  ;;  %v6052_v59 = vadd.f32 %v12457_v0, %v5800_v37 }
0x1c6c   :  { %v12461_v33 = vpop.f32.mrb[140].mxu1 }
0x1c6d   :  { %v12462_v40 = vpop.f32.mrb[141].mxu1 }
0x1c6e   :  { %v12463_v42 = vadd.f32 %v12462_v40, %v12461_v33  ;;  %v12464_v32 = vpop.f32.mrb[142].mxu1 }
0x1c6f   :  { %v12465_v38 = vpop.f32.mrb[143].mxu1  ;;  %v12483_v27 = vpop.f32.mrb[104].mxu0 }
0x1c70   :  { %v12466_v31 = vadd.f32 %v12465_v38, %v12464_v32  ;;  %v12484_v52 = vpop.f32.mrb[105].mxu0  ;;  %v6055_v38 = vadd.f32 %v12460_v53, %v5805_v2 }
0x1c71   :  { %v12485_v45 = vadd.f32 %v12484_v52, %v12483_v27  ;;  %v12486_v26 = vpop.f32.mrb[106].mxu0 }
0x1c72   :  { %v12487_v13 = vpop.f32.mrb[107].mxu0 }
0x1c73   :  { %v6101_v18 = vadd.f32 %v12485_v45, %v6036_v56  ;;  %v12488_v14 = vadd.f32 %v12487_v13, %v12486_v26  ;;  %v5815_v26 = vpop.permute.xlu1 %5814  ;;  %v5810_v13 = vpop.permute.xlu0 %5809 }
0x1c74   :  { %v6060_v0 = vadd.f32 %v12463_v42, %v5810_v13  ;;  %v6063_v53 = vadd.f32 %v12466_v31, %v5815_v26 }
0x1c75   :  { %v6104_v10 = vadd.f32 %v12488_v14, %v6039_v55 }
0x1c77   :  { %v12489_v4 = vpop.f32.mrb[108].mxu0 }
0x1c78   :  { %v12490_v43 = vpop.f32.mrb[109].mxu0 }
0x1c79   :  { %v12491_v1 = vadd.f32 %v12490_v43, %v12489_v4  ;;  %v12492_v60 = vpop.f32.mrb[110].mxu0 }
0x1c7a   :  { %v12493_v7 = vpop.f32.mrb[111].mxu0 }
0x1c7b   :  { %v6109_v25 = vadd.f32 %v12491_v1, %v6044_v22  ;;  %v12494_v29 = vadd.f32 %v12493_v7, %v12492_v60 }
0x1c7d   :  { %v6112_v15 = vadd.f32 %v12494_v29, %v6047_v41 }
0x1c7f   :  { %v12495_v8 = vpop.f32.mrb[112].mxu0  ;;  %v12523_v20 = vpop.f32.mrb[144].mxu1 }
0x1c80   :  { %v12496_v46 = vpop.f32.mrb[113].mxu0  ;;  %v12524_v6 = vpop.f32.mrb[145].mxu1 }
0x1c81   :  { %v12497_v62 = vadd.f32 %v12496_v46, %v12495_v8  ;;  %v12525_v33 = vadd.f32 %v12524_v6, %v12523_v20  ;;  %v12498_v40 = vpop.f32.mrb[114].mxu0  ;;  %v12526_v32 = vpop.f32.mrb[146].mxu1 }
0x1c82   :  { %v12499_v12 = vpop.f32.mrb[115].mxu0  ;;  %v12527_v27 = vpop.f32.mrb[147].mxu1 }
0x1c83   :  { %v6117_v24 = vadd.f32 %v12497_v62, %v6052_v59  ;;  %v6166_v52 = vadd.f32 %v12525_v33, %v6101_v18  ;;  %v12500_v39 = vadd.f32 %v12499_v12, %v12498_v40  ;;  %v12528_v36 = vadd.f32 %v12527_v27, %v12526_v32 }
0x1c85   :  { %v6120_v56 = vadd.f32 %v12500_v39, %v6055_v38  ;;  %v6169_v45 = vadd.f32 %v12528_v36, %v6104_v10 }
0x1c87   :  { %v12501_v55 = vpop.f32.mrb[116].mxu0  ;;  %v12529_v14 = vpop.f32.mrb[148].mxu1 }
0x1c88   :  { %v12502_v16 = vpop.f32.mrb[117].mxu0  ;;  %v12530_v4 = vpop.f32.mrb[149].mxu1 }
0x1c89   :  { %v12503_v48 = vadd.f32 %v12502_v16, %v12501_v55  ;;  %v12531_v43 = vadd.f32 %v12530_v4, %v12529_v14  ;;  %v12504_v22 = vpop.f32.mrb[118].mxu0  ;;  %v12532_v1 = vpop.f32.mrb[150].mxu1 }
0x1c8a   :  { %v12505_v60 = vpop.f32.mrb[119].mxu0  ;;  %v12533_v7 = vpop.f32.mrb[151].mxu1 }
0x1c8b   :  { %v6125_v41 = vadd.f32 %v12503_v48, %v6060_v0  ;;  %v6174_v18 = vadd.f32 %v12531_v43, %v6109_v25  ;;  %v12506_v29 = vadd.f32 %v12505_v60, %v12504_v22  ;;  %v12534_v2 = vadd.f32 %v12533_v7, %v12532_v1 }
0x1c8d   :  { %v6128_v37 = vadd.f32 %v12506_v29, %v6063_v53  ;;  %v6177_v10 = vadd.f32 %v12534_v2, %v6112_v15 }
0x1c8f   :  { %v12535_v8 = vpop.f32.mrb[152].mxu1  ;;  %v12563_v20 = vpop.f32.mrb[120].mxu0 }
0x1c90   :  { %v12536_v46 = vpop.f32.mrb[153].mxu1  ;;  %v12564_v6 = vpop.f32.mrb[121].mxu0 }
0x1c91   :  { %v12537_v59 = vadd.f32 %v12536_v46, %v12535_v8  ;;  %v12565_v62 = vadd.f32 %v12564_v6, %v12563_v20  ;;  %v12538_v42 = vpop.f32.mrb[154].mxu1  ;;  %v12566_v33 = vpop.f32.mrb[122].mxu0 }
0x1c92   :  { %v12539_v40 = vpop.f32.mrb[155].mxu1  ;;  %v12567_v32 = vpop.f32.mrb[123].mxu0 }
0x1c93   :  { %v6182_v38 = vadd.f32 %v12537_v59, %v6117_v24  ;;  %v12540_v31 = vadd.f32 %v12539_v40, %v12538_v42  ;;  %v12568_v12 = vadd.f32 %v12567_v32, %v12566_v33  ;;  %v6231_v27 = vadd.f32 %v12565_v62, %v6166_v52 }
0x1c95   :  { %v6185_v39 = vadd.f32 %v12540_v31, %v6120_v56  ;;  %v6234_v25 = vadd.f32 %v12568_v12, %v6169_v45 }
0x1c97   :  { %v12541_v36 = vpop.f32.mrb[156].mxu1  ;;  %v12569_v26 = vpop.f32.mrb[124].mxu0 }
0x1c98   :  { %v12542_v13 = vpop.f32.mrb[157].mxu1  ;;  %v12570_v15 = vpop.f32.mrb[125].mxu0 }
0x1c99   :  { %v12543_v55 = vadd.f32 %v12542_v13, %v12541_v36  ;;  %v12571_v14 = vadd.f32 %v12570_v15, %v12569_v26  ;;  %v12544_v16 = vpop.f32.mrb[158].mxu1  ;;  %v12572_v4 = vpop.f32.mrb[126].mxu0 }
0x1c9a   :  { %v12545_v0 = vpop.f32.mrb[159].mxu1  ;;  %v12573_v48 = vpop.f32.mrb[127].mxu0 }
0x1c9b   :  { %v6190_v43 = vadd.f32 %v12543_v55, %v6125_v41  ;;  %v12546_v22 = vadd.f32 %v12545_v0, %v12544_v16  ;;  %v12574_v1 = vadd.f32 %v12573_v48, %v12572_v4  ;;  %v6239_v53 = vadd.f32 %v12571_v14, %v6174_v18 }
0x1c9d   :  { %v6193_v24 = vadd.f32 %v12546_v22, %v6128_v37  ;;  %v6242_v60 = vadd.f32 %v12574_v1, %v6177_v10 }
0x1c9f   :  { %v12575_v7 = vpop.f32.mrb[128].mxu0 }
0x1ca0   :  { %v12576_v52 = vpop.f32.mrb[129].mxu0  ;;  %v12905_v56 = vpop.f32.mrb[160].mxu1 }
0x1ca1   :  { %v12577_v45 = vadd.f32 %v12576_v52, %v12575_v7  ;;  %v6304_v29 = vadd.f32 %v12905_v56, %v6239_v53  ;;  %v12578_v2 = vpop.f32.mrb[130].mxu0  ;;  %v6295_v8 = vpop.f32.mrb[161].mxu1 }
0x1ca2   :  { %v6296_v20 = vadd.f32 %v6295_v8, %v6231_v27  ;;  %v12579_v46 = vpop.f32.mrb[131].mxu0  ;;  %v12906_v6 = vpop.f32.mrb[162].mxu1  ;;  %v13740_v8 = vld [vmem:[#allocation19 + $0x4] ss:$20 sps:$4 sm:$0xff]  }
0x1ca3   :  { %v12580_v59 = vadd.f32 %v12579_v46, %v12578_v2  ;;  %v6307_v62 = vadd.f32 %v12906_v6, %v6242_v60  ;;  %v6298_v42 = vpop.f32.mrb[163].mxu1  ;;  %v6247_v33 = vadd.f32 %v12577_v45, %v6182_v38  ;;  %v6328_v40 = vmax.f32 %v6304_v29, 0.0  ;;  %6566 = vmatprep.mubr.bf16.mxu0 %v13740_v8  ;;  %v6455_v46 = vld [vmem:[%s17913_s7 + $0x8] sm:$0xff]  ;;  %v6456_v6 = vld [vmem:[%s17913_s7 + $0x10] sm:$0xff]  ;;  %v13749_v8 = vld [vmem:[#allocation19 + $0x34] ss:$20 sps:$4 sm:$0xff]  }
0x1ca4   :  { %v6299_v41 = vadd.f32 %v6298_v42, %v6234_v25  ;;  %v6326_v37 = vmax.f32 %v6296_v20, 0.0  ;;  %v6454_v20 = vld [vmem:[%s17913_s7] sm:$0xff] }
0x1ca5   :  { %v6329_v32 = vmax.f32 %v6307_v62, 0.0  ;;  %v6250_v18 = vadd.f32 %v12580_v59, %v6185_v39  ;;  %v6457_v59 = vld [vmem:[%s17913_s7 + $0x18] sm:$0xff] }
0x1ca6   :  { %v6327_v10 = vmax.f32 %v6299_v41, 0.0 }
0x1ca7   :  { %v6335_v31 = vpack.c.bf16 %v6329_v32, %v6328_v40  ;;  %v12581_v12 = vpop.f32.mrb[132].mxu0 }
0x1ca8   :  { %v6334_v36 = vpack.c.bf16 %v6327_v10, %v6326_v37  ;;  %v12582_v26 = vpop.f32.mrb[133].mxu0  ;;  %v12909_v13 = vpop.f32.mrb[164].mxu1 }
0x1ca9   :  { %v16877_v15 = vmul.bf16 %v6335_v31, %v16362_v61  ;;  %v12583_v27 = vadd.f32 %v12582_v26, %v12581_v12  ;;  %v12584_v55 = vpop.f32.mrb[134].mxu0  ;;  %v6311_v14 = vpop.f32.mrb[165].mxu1 }
0x1caa   :  { %v6312_v16 = vadd.f32 %v6311_v14, %v6247_v33  ;;  %v12585_v4 = vpop.f32.mrb[135].mxu0  ;;  %v12910_v38 = vpop.f32.mrb[166].mxu1  ;;  %v6338_v52 = vmul.bf16 %v6334_v36, %v16362_v61 }
0x1cab   :  { %v6255_v25 = vadd.f32 %v12583_v27, %v6190_v43  ;;  %v12586_v0 = vadd.f32 %v12585_v4, %v12584_v55  ;;  %v6314_v48 = vpop.f32.mrb[167].mxu1  ;;  %6372 = vrot.lane.b32.xlu0 %v16877_v15, %s15049_s19  ;;  %6360 = vrot.lane.b32.xlu1 %v16877_v15, %s15028_s8 }
0x1cac   :  { %v6315_v39 = vadd.f32 %v6314_v48, %v6250_v18  ;;  %v6330_v53 = vmax.f32 %v6312_v16, 0.0 }
0x1cad   :  { %v6320_v22 = vadd.f32 %v12909_v13, %v6255_v25  ;;  %v6258_v1 = vadd.f32 %v12586_v0, %v6193_v24 }
0x1cae   :  { %v6331_v60 = vmax.f32 %v6315_v39, 0.0 }
0x1caf   :  { %v6323_v7 = vadd.f32 %v12910_v38, %v6258_v1  ;;  %6348 = vrot.lane.b32.xlu0 %v16877_v15, %s15027_s14  ;;  %6408 = vrot.lane.b32.xlu1 %v16877_v15, %s15045_s1  ;;  %v6332_v56 = vmax.f32 %v6320_v22, 0.0  ;;  %v13738_v1 = vld [vmem:[#allocation19] ss:$20 sps:$4 sm:$0xff]  }
0x1cb0   :  { %v6336_v43 = vpack.c.bf16 %v6331_v60, %v6330_v53  ;;  %v13741_v53 = vld [vmem:[#allocation19 + $0x2c] ss:$20 sps:$4 sm:$0xff]  }
0x1cb1   :  { %v6333_v45 = vmax.f32 %v6323_v7, 0.0 }
0x1cb2   :  { %v6340_v2 = vmul.bf16 %v6336_v43, %v16362_v61 }
0x1cb3   :  { %v6337_v29 = vpack.c.bf16 %v6333_v45, %v6332_v56  ;;  %6358 = vrot.lane.b32.xlu0 %v6338_v52, %s15028_s8  ;;  %6384 = vrot.lane.b32.xlu1 %v16877_v15, %s15048_s11  ;;  %v13743_v56 = vld [vmem:[#allocation19 + $0x28] ss:$20 sps:$4 sm:$0xff]   ;;  %v13747_v45 = vld [vmem:[#allocation19 + $0x10] ss:$20 sps:$4 sm:$0xff]  }
0x1cb5   :  { %v16894_v24 = vmul.bf16 %v6337_v29, %v16362_v61  ;;  %v13746_v61 = vld [vmem:[#allocation19 + $0xc] ss:$20 sps:$4 sm:$0xff]  }
0x1cb6   :  { %6615 = vmatprep.mubr.bf16.mxu1 %v13746_v61  ;;  %v13748_v61 = vld [vmem:[#allocation19 + $0x38] ss:$20 sps:$4 sm:$0xff]  }
0x1cb7   :  { %6406 = vrot.lane.b32.xlu0 %v6338_v52, %s15045_s1  ;;  %6382 = vrot.lane.b32.xlu1 %v6338_v52, %s15048_s11 }
0x1cbb   :  { %6370 = vrot.lane.b32.xlu0 %v6338_v52, %s15049_s19  ;;  %6364 = vrot.lane.b32.xlu1 %v16894_v24, %s15028_s8 }
0x1cbf   :  { %6346 = vrot.lane.b32.xlu0 %v6338_v52, %s15027_s14  ;;  %6412 = vrot.lane.b32.xlu1 %v16894_v24, %s15045_s1 }
0x1cc3   :  { %6362 = vrot.lane.b32.xlu0 %v6340_v2, %s15028_s8  ;;  %6388 = vrot.lane.b32.xlu1 %v16894_v24, %s15048_s11 }
0x1cc7   :  { %6376 = vrot.lane.b32.xlu0 %v16894_v24, %s15049_s19  ;;  %6418 = vrot.lane.b32.xlu1 %v6338_v52, %s15050_s25 }
0x1ccb   :  { %6352 = vrot.lane.b32.xlu0 %v16894_v24, %s15027_s14  ;;  %6410 = vrot.lane.b32.xlu1 %v6340_v2, %s15045_s1 }
0x1ccf   :  { %6420 = vrot.lane.b32.xlu0 %v16877_v15, %s15050_s25  ;;  %6386 = vrot.lane.b32.xlu1 %v6340_v2, %s15048_s11  ;;  %s17914_s11 = sld [smem:[#allocation88_spill]] }
0x1cd3   :  { %6374 = vrot.lane.b32.xlu0 %v6340_v2, %s15049_s19  ;;  %6394 = vrot.lane.b32.xlu1 %v6338_v52, %s15044_s13 }
0x1cd7   :  { %6350 = vrot.lane.b32.xlu0 %v6340_v2, %s15027_s14  ;;  %6430 = vrot.lane.b32.xlu1 %v6338_v52, %s15039_s4 }
0x1cdb   :  { %6396 = vrot.lane.b32.xlu0 %v16877_v15, %s15044_s13  ;;  %6422 = vrot.lane.b32.xlu1 %v6340_v2, %s15050_s25 }
0x1cdf   :  { %6432 = vrot.lane.b32.xlu0 %v16877_v15, %s15039_s4  ;;  %6398 = vrot.lane.b32.xlu1 %v6340_v2, %s15044_s13 }
0x1ce3   :  { %6424 = vrot.lane.b32.xlu0 %v16894_v24, %s15050_s25  ;;  %6434 = vrot.lane.b32.xlu1 %v6340_v2, %s15039_s4 }
0x1ce7   :  { %6400 = vrot.lane.b32.xlu0 %v16894_v24, %s15044_s13  ;;  %6436 = vrot.lane.b32.xlu1 %v16894_v24, %s15039_s4 }
0x1ceb   :  { %6460 = vperm.xlu0 %13314, %v6454_v20   ;;  %6465 = vperm.xlu1 %13340, %v6455_v46   ;;  %v13751_v20 = vld [vmem:[#allocation19 + $0x30] ss:$20 sps:$4 sm:$0xff]   ;;  %v6685_v46 = vld [vmem:[#allocation43] sm:$0xff] }
0x1cef   :  { %6470 = vperm.xlu0 %13314, %v6456_v6   ;;  %6475 = vperm.xlu1 %13340, %v6457_v59   ;;  %v6686_v6 = vld [vmem:[#allocation43 + $0x8] sm:$0xff] }
0x1cf0   :  { %v12975_v59 = vpack.c.bf16 %v6686_v6, %v6685_v46 }
0x1d1d   :  { %v6361_v62 = vpop.permute.xlu1 %6360  ;;  %v6373_v42 = vpop.permute.xlu0 %6372 }
0x1d21   :  { %v6409_v33 = vpop.permute.xlu1 %6408  ;;  %v6349_v41 = vpop.permute.xlu0 %6348 }
0x1d25   :  { %v6385_v40 = vpop.permute.xlu1 %6384  ;;  %v6359_v32 = vpop.permute.xlu0 %6358 }
0x1d26   :  { %12599 = vmatprep.subr.bf16.mxu0 %v6359_v32 }
0x1d27   :  { %12600 = vmatpush3.bf16.msra.mxu0 %v6338_v52 }
0x1d28   :  { %12601 = vmatprep.subr.bf16.mxu0 %v6361_v62  ;;  %v6687_v62 = vld [vmem:[#allocation43 + $0x10] sm:$0xff] }
0x1d29   :  { %v6383_v18 = vpop.permute.xlu1 %6382  ;;  %v6407_v37 = vpop.permute.xlu0 %6406 }
0x1d2a   :  { %12627 = vmatprep.subr.bf16.mxu1 %v6407_v37 }
0x1d2b   :  { %12602 = vmatpush3.bf16.msra.mxu0 %v16877_v15  ;;  %12628 = vmatpush3.bf16.msra.mxu1 %v6383_v18 }
0x1d2c   :  { %12629 = vmatprep.subr.bf16.mxu1 %v6409_v33 }
0x1d2d   :  { %v6365_v10 = vpop.permute.xlu1 %6364  ;;  %v6371_v31 = vpop.permute.xlu0 %6370 }
0x1d2f   :  { %12630 = vmatpush3.bf16.msra.mxu1 %v6385_v40 }
0x1d31   :  { %v6413_v12 = vpop.permute.xlu1 %6412  ;;  %v6347_v36 = vpop.permute.xlu0 %6346 }
0x1d35   :  { %v6389_v26 = vpop.permute.xlu1 %6388  ;;  %v6363_v13 = vpop.permute.xlu0 %6362 }
0x1d36   :  { %12603 = vmatprep.subr.bf16.mxu0 %v6363_v13 }
0x1d37   :  { %12604 = vmatpush3.bf16.msra.mxu0 %v6340_v2  ;;  %v13744_v2 = vld [vmem:[#allocation19 + $0x8] ss:$20 sps:$4 sm:$0xff]  }
0x1d38   :  { %12605 = vmatprep.subr.bf16.mxu0 %v6365_v10 }
0x1d39   :  { %v6419_v27 = vpop.permute.xlu1 %6418  ;;  %v6377_v55 = vpop.permute.xlu0 %6376 }
0x1d3b   :  { %12606 = vmatpush3.bf16.msra.mxu0 %v16894_v24 }
0x1d3c   :  { %12607 = vmatprep.subr.bf16.mxu0 %v6371_v31 }
0x1d3d   :  { %v6411_v14 = vpop.permute.xlu1 %6410  ;;  %v6353_v16 = vpop.permute.xlu0 %6352 }
0x1d3e   :  { %12631 = vmatprep.subr.bf16.mxu1 %v6411_v14 }
0x1d3f   :  { %12608 = vmatpush3.bf16.msra.mxu0 %v6347_v36 }
0x1d40   :  { %12609 = vmatprep.subr.bf16.mxu0 %v6373_v42  ;;  %v6688_v42 = vld [vmem:[#allocation43 + $0x18] sm:$0xff] }
0x1d41   :  { %v6387_v15 = vpop.permute.xlu1 %6386  ;;  %v6421_v4 = vpop.permute.xlu0 %6420  ;;  %v12979_v33 = vpack.c.bf16 %v6688_v42, %v6687_v62 }
0x1d42   :  { %12632 = vmatpush3.bf16.msra.mxu1 %v6387_v15 }
0x1d43   :  { %12610 = vmatpush3.bf16.msra.mxu0 %v6349_v41  ;;  %12633 = vmatprep.subr.bf16.mxu1 %v6413_v12  ;;  %v13752_v41 = vld [vmem:[#allocation46] sm:$0xff]  }
0x1d45   :  { %v6395_v38 = vpop.permute.xlu1 %6394  ;;  %v6375_v25 = vpop.permute.xlu0 %6374 }
0x1d46   :  { %12611 = vmatprep.subr.bf16.mxu0 %v6375_v25  ;;  %12634 = vmatpush3.bf16.msra.mxu1 %v6389_v26 }
0x1d47   :  { %12635 = vmatprep.subr.bf16.mxu1 %v6419_v27 }
0x1d49   :  { %v6431_v0 = vpop.permute.xlu1 %6430  ;;  %v6351_v48 = vpop.permute.xlu0 %6350 }
0x1d4a   :  { %12612 = vmatpush3.bf16.msra.mxu0 %v6351_v48  ;;  %12636 = vmatpush3.bf16.msra.mxu1 %v6395_v38 }
0x1d4b   :  { %12613 = vmatprep.subr.bf16.mxu0 %v6377_v55  ;;  %12637 = vmatprep.subr.bf16.mxu1 %v6421_v4 }
0x1d4d   :  { %v6423_v39 = vpop.permute.xlu1 %6422  ;;  %v6397_v22 = vpop.permute.xlu0 %6396 }
0x1d4e   :  { %12614 = vmatpush3.bf16.msra.mxu0 %v6353_v16  ;;  %12638 = vmatpush3.bf16.msra.mxu1 %v6397_v22 }
0x1d4f   :  { %12639 = vmatprep.subr.bf16.mxu1 %v6423_v39  ;;  %12911 = vmatprep.subr.bf16.mxu0 %v6431_v0 }
0x1d51   :  { %v6399_v60 = vpop.permute.xlu1 %6398  ;;  %6567 = vmatmul.mubr.bf16.vlgmr.msra.gmra.mrb[136].mxu0 %v13738_v1  ;;  %v6433_v7 = vpop.permute.xlu0 %6432 }
0x1d52   :  { %12640 = vmatpush3.bf16.msra.mxu1 %v6399_v60  ;;  %12912 = vmatpush3.bf16.msra.mxu0 %v6431_v0 }
0x1d53   :  { %12913 = vmatprep.subr.bf16.mxu0 %v6433_v7  ;;  %6574 = vmatprep.mubr.bf16.mxu0 %v13741_v53 }
0x1d55   :  { %v6435_v43 = vpop.permute.xlu1 %6434  ;;  %v6425_v52 = vpop.permute.xlu0 %6424 }
0x1d56   :  { %12641 = vmatprep.subr.bf16.mxu1 %v6425_v52  ;;  %12914 = vmatpush3.bf16.msra.mxu0 %v6433_v7 }
0x1d57   :  { %12915 = vmatprep.subr.bf16.mxu0 %v6435_v43 }
0x1d59   :  { %v6437_v29 = vpop.permute.xlu1 %6436  ;;  %6575 = vmatmul.mubr.bf16.gmra.mrb[140].mxu0 %v13743_v56  ;;  %v6401_v24 = vpop.permute.xlu0 %6400 }
0x1d5a   :  { %12642 = vmatpush3.bf16.msra.mxu1 %v6401_v24  ;;  %12916 = vmatpush3.bf16.msra.mxu0 %v6435_v43 }
0x1d5b   :  { %12917 = vmatprep.subr.bf16.mxu0 %v6437_v29  ;;  %12919 = vmatprep.mubr.msk.bf16.mxu0 %vm3895_vm4, %v13747_v45 }
0x1d5d   :  { %6616 = vmatmul.mubr.bf16.vlgmr.msra.gmra.mrb[168].mxu1 %v13744_v2 }
0x1d5e   :  { %12918 = vmatpush3.bf16.msra.mxu0 %v6437_v29  ;;  %6623 = vmatprep.mubr.bf16.mxu1 %v13749_v8 }
0x1d5f   :  { %12976 = vmatprep.subr.bf16.mxu0 %v12975_v59 }
0x1d61   :  { %12920 = vmatmul.mubr.msk.bf16.vlgmr.msra.gmra.mrb[144].mxu0 %vm3895_vm4, %v13748_v61 }
0x1d62   :  { %12978 = vmatpush3.bf16.msra.mxu0 %v12975_v59  ;;  %v13753_v59 = vld [vmem:[#allocation46 + $0x8] sm:$0xff]  }
0x1d63   :  { %12980 = vmatprep.subr.bf16.mxu0 %v12979_v33 }
0x1d65   :  { %6624 = vmatmul.mubr.bf16.gmra.mrb[172].mxu1 %v13751_v20 }
0x1d66   :  { %12982 = vmatpush3.bf16.msra.mxu0 %v12979_v33 }
0x1d67   :  { %12937 = vmatprep.subr.bf16.mxu0 %v13752_v41 }
0x1d6a   :  { %v6461_v16 = vpop.permute.xlu0 %6460  ;;  %v6466_v0 = vpop.permute.xlu1 %6465 }
0x1d6e   :  { %v6471_v2 = vpop.permute.xlu0 %6470  ;;  %v6476_v62 = vpop.permute.xlu1 %6475 }
0x1e24   :  { %v12615_v40 = vpop.f32.mrb[136].mxu0 }
0x1e25   :  { %v12616_v32 = vpop.f32.mrb[137].mxu0 }
0x1e26   :  { %v12617_v18 = vadd.f32 %v12616_v32, %v12615_v40  ;;  %v12618_v37 = vpop.f32.mrb[138].mxu0 }
0x1e27   :  { %v12619_v10 = vpop.f32.mrb[139].mxu0 }
0x1e28   :  { %v12620_v31 = vadd.f32 %v12619_v10, %v12618_v37  ;;  %v6569_v4 = vadd.f32 %v12617_v18, %v6461_v16  ;;  %v13754_v10 = vld [vmem:[#allocation46 + $0x10] sm:$0xff]  }
0x1e2a   :  { %v6572_v39 = vadd.f32 %v12620_v31, %v6466_v0 }
0x1e2c   :  { %v12621_v12 = vpop.f32.mrb[140].mxu0 }
0x1e2d   :  { %v12622_v36 = vpop.f32.mrb[141].mxu0 }
0x1e2e   :  { %v12623_v26 = vadd.f32 %v12622_v36, %v12621_v12  ;;  %v12624_v13 = vpop.f32.mrb[142].mxu0 }
0x1e2f   :  { %v12625_v27 = vpop.f32.mrb[143].mxu0 }
0x1e30   :  { %v12626_v55 = vadd.f32 %v12625_v27, %v12624_v13  ;;  %v12643_v14 = vpop.f32.mrb[168].mxu1  ;;  %v6577_v61 = vadd.f32 %v12623_v26, %v6471_v2  ;;  %v13755_v26 = vld [vmem:[#allocation46 + $0x18] sm:$0xff]   ;;  %v6788_v13 = vpack.c.bf16 %v16314_v35, %v16312_v63 }
0x1e31   :  { %v12644_v15 = vpop.f32.mrb[169].mxu1 }
0x1e32   :  { %v12645_v38 = vadd.f32 %v12644_v15, %v12643_v14  ;;  %v12646_v25 = vpop.f32.mrb[170].mxu1  ;;  %v6580_v33 = vadd.f32 %v12626_v55, %v6476_v62  ;;  %v6789_v55 = vpack.c.bf16 %v16321_v47, %v16319_v30 }
0x1e33   :  { %v12647_v48 = vpop.f32.mrb[171].mxu1 }
0x1e34   :  { %v12648_v22 = vadd.f32 %v12647_v48, %v12646_v25  ;;  %v12921_v1 = vpop.f32.mrb[144].mxu0  ;;  %v6618_v53 = vadd.f32 %v12645_v38, %v6569_v4 }
0x1e35   :  { %v6666_v60 = vpop.f32.mrb[145].mxu0 }
0x1e36   :  { %v6667_v7 = vadd.f32 %v6666_v60, %v6618_v53  ;;  %v12922_v43 = vpop.f32.mrb[146].mxu0  ;;  %v6621_v52 = vadd.f32 %v12648_v22, %v6572_v39  ;;  %v13759_v39 = vld [vmem:[#allocation21 + $0x4] ss:$20 sps:$4 sm:$0xff]   ;;  %v13764_v22 = vld [vmem:[#allocation21 + $0xc] ss:$20 sps:$4 sm:$0xff]  }
0x1e37   :  { %v6669_v56 = vpop.f32.mrb[147].mxu0  ;;  %7110 = vmatprep.mubr.bf16.mxu1 %v13759_v39  ;;  %v7001_v53 = vld [vmem:[%s17914_s11 + $0x18] sm:$0xff]  ;;  %v6998_v60 = vld [vmem:[%s17914_s11] sm:$0xff] }
0x1e38   :  { %v6681_v45 = vmax.f32 %v6667_v7, 0.0  ;;  %v6670_v29 = vadd.f32 %v6669_v56, %v6621_v52  ;;  %v12649_v24 = vpop.f32.mrb[172].mxu1  ;;  %v7000_v7 = vld [vmem:[%s17914_s11 + $0x10] sm:$0xff] }
0x1e39   :  { %v12650_v8 = vpop.f32.mrb[173].mxu1 }
0x1e3a   :  { %v6682_v20 = vmax.f32 %v6670_v29, 0.0  ;;  %v12651_v46 = vadd.f32 %v12650_v8, %v12649_v24  ;;  %v12652_v6 = vpop.f32.mrb[174].mxu1  ;;  %12931 = vmatprep.mubr.msk.f32.mxu0 %vm3032_vm6, %v6681_v45 }
0x1e3b   :  { %v12653_v42 = vpop.f32.mrb[175].mxu1 }
0x1e3c   :  { %v6626_v40 = vadd.f32 %v12651_v46, %v6577_v61  ;;  %v12654_v32 = vadd.f32 %v12653_v42, %v12652_v6  ;;  %12932 = vmatmul.mubr.msk.f32.vlgmr.msra.gmra.mrb[148].mxu0 %vm3032_vm6, %v6682_v20 }
0x1e3d   :  { %12938 = vmatpush3.bf16.msra.mxu0 %v13752_v41  ;;  %v13756_v41 = vld [vmem:[#allocation46 + $0x20] ss:$0 sps:$4 sm:$0xff]  }
0x1e3e   :  { %v6675_v18 = vadd.f32 %v12921_v1, %v6626_v40  ;;  %v6629_v37 = vadd.f32 %v12654_v32, %v6580_v33  ;;  %12939 = vmatprep.subr.bf16.mxu0 %v13753_v59  ;;  %v6833_v27 = vsel %vm804_vm1, %v13756_v41, 0  ;;  %v6999_v1 = vld [vmem:[%s17914_s11 + $0x8] sm:$0xff] }
0x1e40   :  { %v6683_v31 = vmax.f32 %v6675_v18, 0.0  ;;  %v6678_v12 = vadd.f32 %v12922_v43, %v6629_v37 }
0x1e41   :  { %12940 = vmatpush3.bf16.msra.mxu0 %v13753_v59 }
0x1e42   :  { %v6684_v36 = vmax.f32 %v6678_v12, 0.0  ;;  %12934 = vmatprep.mubr.msk.f32.mxu0 %vm3032_vm6, %v6683_v31  ;;  %12941 = vmatprep.subr.bf16.mxu0 %v13754_v10 }
0x1e44   :  { %12935 = vmatmul.mubr.msk.f32.gmra.mrb[150].mxu0 %vm3032_vm6, %v6684_v36 }
0x1e45   :  { %12942 = vmatpush3.bf16.msra.mxu0 %v13754_v10  ;;  %12947 = vmatprep.mubr.msk.bf16.mxu0 %vm908_vm9, %v6788_v13 }
0x1e46   :  { %12943 = vmatprep.subr.bf16.mxu0 %v13755_v26 }
0x1e49   :  { %12944 = vmatpush3.bf16.msra.mxu0 %v13755_v26 }
0x1e4a   :  { %13183 = vmatprep.subr.msk.bf16.mxu0 %vm804_vm1, %v13756_v41  ;;  %v13757_v41 = vld [vmem:[#allocation21] ss:$20 sps:$4 sm:$0xff]  }
0x1e4d   :  { %12946 = vmatpush3.bf16.msra.mxu0 %v6833_v27 }
0x1e50   :  { %12948 = vmatmul.mubr.msk.bf16.vlgmr.msra.gmra.mrb[152].mxu0 %vm908_vm9, %v6789_v55  ;;  %v13760_v55 = vld [vmem:[#allocation21 + $0x2c] ss:$20 sps:$4 sm:$0xff]  }
0x1e51   :  { %7159 = vmatprep.mubr.bf16.mxu0 %v13764_v22 }
0x1f0f   :  { %v12933_v14 = vpop.f32.mrb[148].mxu0 }
0x1f10   :  { %v6767_v63 = vpop.f32.mrb[149].mxu0 }
0x1f11   :  { %v16952_v35 = vpack.c.bf16 %v12933_v14, %v6767_v63 }
0x1f13   :  { %6954 = vrot.lane.b32.xlu1 %v16952_v35, %s15040_s28  ;;  %6906 = vrot.lane.b32.xlu0 %v16952_v35, %s15028_s8 }
0x1f17   :  { %6930 = vrot.lane.b32.xlu1 %v16952_v35, %s15043_s30  ;;  %v12936_v16 = vpop.f32.mrb[150].mxu0 }
0x1f18   :  { %v6777_v15 = vpop.f32.mrb[151].mxu0 }
0x1f19   :  { %v16960_v4 = vpack.c.bf16 %v12936_v16, %v6777_v15  ;;  %v13762_v16 = vld [vmem:[#allocation21 + $0x8] ss:$20 sps:$4 sm:$0xff]  }
0x1f1a   :  { %v13765_v15 = vld [vmem:[#allocation21 + $0x28] ss:$20 sps:$4 sm:$0xff]  }
0x1f1b   :  { %6908 = vrot.lane.b32.xlu1 %v16960_v4, %s15028_s8 }
0x1f1f   :  { %6956 = vrot.lane.b32.xlu1 %v16960_v4, %s15040_s28 }
0x1f23   :  { %v12949_v30 = vpop.f32.mrb[152].mxu0 }
0x1f24   :  { %v6869_v47 = vpop.f32.mrb[153].mxu0 }
0x1f25   :  { %v12950_v38 = vpop.f32.mrb[154].mxu0 }
0x1f26   :  { %v6885_v25 = vpack.c.bf16 %v12950_v38, %v12949_v30  ;;  %v6872_v0 = vpop.f32.mrb[155].mxu0  ;;  %v13769_v30 = vld [vmem:[#allocation21 + $0x10] ss:$20 sps:$4 sm:$0xff]  }
0x1f27   :  { %v6884_v48 = vpack.c.bf16 %v6872_v0, %v6869_v47  ;;  %v13770_v0 = vld [vmem:[#allocation21 + $0x38] ss:$20 sps:$4 sm:$0xff]  }
0x1f28   :  { %6952 = vrot.lane.b32.xlu0 %v6885_v25, %s15040_s28  ;;  %6904 = vrot.lane.b32.xlu1 %v6885_v25, %s15028_s8 }
0x1f2c   :  { %6916 = vrot.lane.b32.xlu0 %v6885_v25, %s15044_s13  ;;  %6928 = vrot.lane.b32.xlu1 %v6885_v25, %s15043_s30 }
0x1f30   :  { %6892 = vrot.lane.b32.xlu0 %v6885_v25, %s15027_s14  ;;  %6950 = vrot.lane.b32.xlu1 %v6884_v48, %s15040_s28 }
0x1f34   :  { %6932 = vrot.lane.b32.xlu1 %v16960_v4, %s15043_s30  ;;  %6902 = vrot.lane.b32.xlu0 %v6884_v48, %s15028_s8 }
0x1f38   :  { %6964 = vrot.lane.b32.xlu1 %v6885_v25, %s15047_s29  ;;  %6918 = vrot.lane.b32.xlu0 %v16952_v35, %s15044_s13 }
0x1f3c   :  { %6940 = vrot.lane.b32.xlu1 %v6885_v25, %s15045_s1  ;;  %6894 = vrot.lane.b32.xlu0 %v16952_v35, %s15027_s14 }
0x1f40   :  { %6962 = vrot.lane.b32.xlu1 %v6884_v48, %s15047_s29  ;;  %6926 = vrot.lane.b32.xlu0 %v6884_v48, %s15043_s30 }
0x1f44   :  { %6938 = vrot.lane.b32.xlu1 %v6884_v48, %s15045_s1  ;;  %6914 = vrot.lane.b32.xlu0 %v6884_v48, %s15044_s13 }
0x1f48   :  { %6974 = vrot.lane.b32.xlu1 %v6884_v48, %s15046_s2  ;;  %6890 = vrot.lane.b32.xlu0 %v6884_v48, %s15027_s14 }
0x1f4c   :  { %6968 = vrot.lane.b32.xlu1 %v16960_v4, %s15047_s29  ;;  %6920 = vrot.lane.b32.xlu0 %v16960_v4, %s15044_s13 }
0x1f50   :  { %6944 = vrot.lane.b32.xlu1 %v16960_v4, %s15045_s1  ;;  %6896 = vrot.lane.b32.xlu0 %v16960_v4, %s15027_s14 }
0x1f54   :  { %6980 = vrot.lane.b32.xlu1 %v16960_v4, %s15046_s2  ;;  %6966 = vrot.lane.b32.xlu0 %v16952_v35, %s15047_s29 }
0x1f58   :  { %7009 = vperm.xlu1 %13340, %v6999_v1   ;;  %6942 = vrot.lane.b32.xlu0 %v16952_v35, %s15045_s1 }
0x1f5c   :  { %7019 = vperm.xlu1 %13340, %v7001_v53   ;;  %6976 = vrot.lane.b32.xlu0 %v6885_v25, %s15046_s2 }
0x1f60   :  { %6978 = vrot.lane.b32.xlu0 %v16952_v35, %s15046_s2 }
0x1f64   :  { %7004 = vperm.xlu0 %13314, %v6998_v60  }
0x1f68   :  { %7014 = vperm.xlu0 %13314, %v7000_v7  }
0x1f85   :  { %v6955_v43 = vpop.permute.xlu1 %6954  ;;  %v6907_v45 = vpop.permute.xlu0 %6906 }
0x1f89   :  { %v6931_v52 = vpop.permute.xlu1 %6930 }
0x1f8d   :  { %v6909_v56 = vpop.permute.xlu1 %6908 }
0x1f91   :  { %v6957_v29 = vpop.permute.xlu1 %6956 }
0x1f9a   :  { %v6953_v24 = vpop.permute.xlu0 %6952  ;;  %v6905_v2 = vpop.permute.xlu1 %6904 }
0x1f9e   :  { %v6917_v8 = vpop.permute.xlu0 %6916  ;;  %v6929_v61 = vpop.permute.xlu1 %6928 }
0x1fa2   :  { %v6893_v20 = vpop.permute.xlu0 %6892  ;;  %v6951_v46 = vpop.permute.xlu1 %6950 }
0x1fa3   :  { %12704 = vmatprep.subr.bf16.mxu0 %v6951_v46 }
0x1fa6   :  { %v6933_v6 = vpop.permute.xlu1 %6932  ;;  %v6903_v59 = vpop.permute.xlu0 %6902 }
0x1fa7   :  { %12676 = vmatprep.subr.bf16.mxu1 %v6903_v59 }
0x1fa8   :  { %12677 = vmatpush3.bf16.msra.mxu1 %v6884_v48 }
0x1fa9   :  { %12678 = vmatprep.subr.bf16.mxu1 %v6905_v2 }
0x1faa   :  { %v6965_v62 = vpop.permute.xlu1 %6964  ;;  %v6919_v42 = vpop.permute.xlu0 %6918 }
0x1fac   :  { %12679 = vmatpush3.bf16.msra.mxu1 %v6885_v25  ;;  %v13768_v25 = vld [vmem:[#allocation21 + $0x30] ss:$20 sps:$4 sm:$0xff]  }
0x1fad   :  { %12680 = vmatprep.subr.bf16.mxu1 %v6907_v45 }
0x1fae   :  { %v6895_v33 = vpop.permute.xlu0 %6894  ;;  %v6941_v40 = vpop.permute.xlu1 %6940 }
0x1fb0   :  { %12681 = vmatpush3.bf16.msra.mxu1 %v16952_v35 }
0x1fb1   :  { %12682 = vmatprep.subr.bf16.mxu1 %v6909_v56 }
0x1fb2   :  { %v6927_v32 = vpop.permute.xlu0 %6926  ;;  %v6963_v18 = vpop.permute.xlu1 %6962 }
0x1fb3   :  { %12705 = vmatpush3.bf16.msra.mxu0 %v6927_v32 }
0x1fb4   :  { %12683 = vmatpush3.bf16.msra.mxu1 %v16960_v4  ;;  %12706 = vmatprep.subr.bf16.mxu0 %v6953_v24  ;;  %v13766_v4 = vld [vmem:[#allocation21 + $0x34] ss:$20 sps:$4 sm:$0xff]  }
0x1fb6   :  { %v6915_v37 = vpop.permute.xlu0 %6914  ;;  %v6939_v31 = vpop.permute.xlu1 %6938 }
0x1fb7   :  { %12684 = vmatprep.subr.bf16.mxu1 %v6915_v37  ;;  %12707 = vmatpush3.bf16.msra.mxu0 %v6929_v61 }
0x1fb8   :  { %12708 = vmatprep.subr.bf16.mxu0 %v6955_v43 }
0x1fba   :  { %v6891_v10 = vpop.permute.xlu0 %6890  ;;  %v6975_v36 = vpop.permute.xlu1 %6974 }
0x1fbb   :  { %12685 = vmatpush3.bf16.msra.mxu1 %v6891_v10  ;;  %12709 = vmatpush3.bf16.msra.mxu0 %v6931_v52 }
0x1fbc   :  { %12686 = vmatprep.subr.bf16.mxu1 %v6917_v8  ;;  %12710 = vmatprep.subr.bf16.mxu0 %v6957_v29 }
0x1fbe   :  { %v6921_v12 = vpop.permute.xlu0 %6920  ;;  %v6969_v27 = vpop.permute.xlu1 %6968 }
0x1fbf   :  { %12687 = vmatpush3.bf16.msra.mxu1 %v6893_v20  ;;  %12711 = vmatpush3.bf16.msra.mxu0 %v6933_v6 }
0x1fc0   :  { %12688 = vmatprep.subr.bf16.mxu1 %v6919_v42  ;;  %12712 = vmatprep.subr.bf16.mxu0 %v6963_v18 }
0x1fc2   :  { %v6897_v26 = vpop.permute.xlu0 %6896  ;;  %v6945_v63 = vpop.permute.xlu1 %6944 }
0x1fc3   :  { %12689 = vmatpush3.bf16.msra.mxu1 %v6895_v33  ;;  %12713 = vmatpush3.bf16.msra.mxu0 %v6939_v31 }
0x1fc4   :  { %12690 = vmatprep.subr.bf16.mxu1 %v6921_v12  ;;  %12714 = vmatprep.subr.bf16.mxu0 %v6965_v62 }
0x1fc6   :  { %v6967_v13 = vpop.permute.xlu0 %6966  ;;  %v6981_v38 = vpop.permute.xlu1 %6980 }
0x1fc7   :  { %12691 = vmatpush3.bf16.msra.mxu1 %v6897_v26  ;;  %12715 = vmatpush3.bf16.msra.mxu0 %v6941_v40 }
0x1fc8   :  { %12716 = vmatprep.subr.bf16.mxu0 %v6967_v13  ;;  %12951 = vmatprep.subr.bf16.mxu1 %v6975_v36 }
0x1fca   :  { %7111 = vmatmul.mubr.bf16.vlgmr.msra.gmra.mrb[176].mxu1 %v13757_v41  ;;  %v6943_v14 = vpop.permute.xlu0 %6942 }
0x1fcb   :  { %12717 = vmatpush3.bf16.msra.mxu0 %v6943_v14  ;;  %12952 = vmatpush3.bf16.msra.mxu1 %v6975_v36 }
0x1fcc   :  { %12718 = vmatprep.subr.bf16.mxu0 %v6969_v27  ;;  %7118 = vmatprep.mubr.bf16.mxu1 %v13760_v55 }
0x1fce   :  { %v6977_v35 = vpop.permute.xlu0 %6976 }
0x1fcf   :  { %12719 = vmatpush3.bf16.msra.mxu0 %v6945_v63  ;;  %12953 = vmatprep.subr.bf16.mxu1 %v6977_v35 }
0x1fd0   :  { %12954 = vmatpush3.bf16.msra.mxu1 %v6977_v35 }
0x1fd2   :  { %7119 = vmatmul.mubr.bf16.gmra.mrb[180].mxu1 %v13765_v15  ;;  %7160 = vmatmul.mubr.bf16.vlgmr.msra.gmra.mrb[156].mxu0 %v13762_v16  ;;  %v6979_v47 = vpop.permute.xlu0 %6978 }
0x1fd3   :  { %12955 = vmatprep.subr.bf16.mxu1 %v6979_v47  ;;  %7167 = vmatprep.mubr.bf16.mxu0 %v13766_v4 }
0x1fd4   :  { %12956 = vmatpush3.bf16.msra.mxu1 %v6979_v47  ;;  %12959 = vmatprep.mubr.msk.bf16.mxu1 %vm3895_vm4, %v13769_v30 }
0x1fd5   :  { %12957 = vmatprep.subr.bf16.mxu1 %v6981_v38 }
0x1fd7   :  { %v7010_v7 = vpop.permute.xlu1 %7009 }
0x1fd8   :  { %12958 = vmatpush3.bf16.msra.mxu1 %v6981_v38 }
0x1fda   :  { %7168 = vmatmul.mubr.bf16.gmra.mrb[160].mxu0 %v13768_v25 }
0x1fdb   :  { %12960 = vmatmul.mubr.msk.bf16.vlgmr.msra.gmra.mrb[184].mxu1 %vm3895_vm4, %v13770_v0  ;;  %v7020_v32 = vpop.permute.xlu1 %7019  ;;  %vm15053_vm4 = vmmov 0  }
0x1fe3   :  { %v7005_v43 = vpop.permute.xlu0 %7004 }
0x1fe7   :  { %v7015_v18 = vpop.permute.xlu0 %7014 }
0x209d   :  { %v12692_v48 = vpop.f32.mrb[176].mxu1 }
0x209e   :  { %v12693_v39 = vpop.f32.mrb[177].mxu1 }
0x209f   :  { %v12694_v22 = vadd.f32 %v12693_v39, %v12692_v48  ;;  %v12695_v1 = vpop.f32.mrb[178].mxu1 }
0x20a0   :  { %v12696_v53 = vpop.f32.mrb[179].mxu1 }
0x20a1   :  { %v12697_v60 = vadd.f32 %v12696_v53, %v12695_v1  ;;  %v7113_v24 = vadd.f32 %v12694_v22, %v7005_v43  ;;  %v7288_v43 = vld [vmem:[%s17915_s15 + $0x8] sm:$0xff] }
0x20a3   :  { %v7116_v59 = vadd.f32 %v12697_v60, %v7010_v7  ;;  %v15052_v60 = vmov 0.0   ;;  %v7287_v7 = vld [vmem:[%s17915_s15] sm:$0xff] }
0x20a4   :  { %12963 = vmatprep.subr.bf16.mxu0 %v15052_v60  ;;  %12967 = vmatprep.mubr.msk.bf16.mxu0 %vm15053_vm4, %v15052_v60  ;;  %vm17929_vm4 = vmmov %vm17928_vm7 }
0x20a5   :  { %v12698_v52 = vpop.f32.mrb[180].mxu1  ;;  %v12720_v56 = vpop.f32.mrb[156].mxu0 }
0x20a6   :  { %v12699_v45 = vpop.f32.mrb[181].mxu1  ;;  %v12721_v29 = vpop.f32.mrb[157].mxu0 }
0x20a7   :  { %v12700_v2 = vadd.f32 %v12699_v45, %v12698_v52  ;;  %v12722_v8 = vadd.f32 %v12721_v29, %v12720_v56  ;;  %v12701_v61 = vpop.f32.mrb[182].mxu1  ;;  %v12723_v20 = vpop.f32.mrb[158].mxu0 }
0x20a8   :  { %v12702_v46 = vpop.f32.mrb[183].mxu1  ;;  %v12724_v6 = vpop.f32.mrb[159].mxu0 }
0x20a9   :  { %v12703_v62 = vadd.f32 %v12702_v46, %v12701_v61  ;;  %v12725_v42 = vadd.f32 %v12724_v6, %v12723_v20  ;;  %v7162_v33 = vadd.f32 %v12722_v8, %v7113_v24  ;;  %v7121_v12 = vadd.f32 %v12700_v2, %v7015_v18  ;;  %v7404_v18 = vld [vmem:[#allocation45 + $0x18] sm:$0xff] }
0x20ab   :  { %v7165_v40 = vadd.f32 %v12725_v42, %v7116_v59  ;;  %v7124_v14 = vadd.f32 %v12703_v62, %v7020_v32  ;;  %v7402_v32 = vld [vmem:[#allocation45 + $0x8] sm:$0xff] }
0x20ad   :  { %v12726_v37 = vpop.f32.mrb[160].mxu0 }
0x20ae   :  { %v12727_v10 = vpop.f32.mrb[161].mxu0  ;;  %v12961_v31 = vpop.f32.mrb[184].mxu1 }
0x20af   :  { %v12728_v36 = vadd.f32 %v12727_v10, %v12726_v37  ;;  %v12729_v26 = vpop.f32.mrb[162].mxu0  ;;  %v7210_v13 = vpop.f32.mrb[185].mxu1  ;;  %v13771_v37 = vld [vmem:[#allocation22] ss:$12 sps:$4 sm:$0xff]  }
0x20b0   :  { %v7211_v41 = vadd.f32 %v7210_v13, %v7162_v33  ;;  %v12730_v27 = vpop.f32.mrb[163].mxu0  ;;  %v12962_v55 = vpop.f32.mrb[186].mxu1  ;;  %v12983_v13 = vpack.c.bf16 %v7404_v18, %v7402_v32  ;;  %v7414_v18 = vld [vmem:[#allocation45 + $0x68] sm:$0xff] }
0x20b1   :  { %v7170_v63 = vadd.f32 %v12728_v36, %v7121_v12  ;;  %v12731_v35 = vadd.f32 %v12730_v27, %v12729_v26  ;;  %v7213_v16 = vpop.f32.mrb[187].mxu1  ;;  %v7403_v12 = vld [vmem:[#allocation45 + $0x10] sm:$0xff]  ;;  %v7408_v27 = vld [vmem:[#allocation45 + $0x38] sm:$0xff] }
0x20b2   :  { %v7214_v15 = vadd.f32 %v7213_v16, %v7165_v40  ;;  %v7225_v47 = vmax.f32 %v7211_v41, 0.0  ;;  %v7406_v41 = vld [vmem:[#allocation45 + $0x28] sm:$0xff] }
0x20b3   :  { %v7219_v4 = vadd.f32 %v12961_v31, %v7170_v63  ;;  %v7173_v30 = vadd.f32 %v12731_v35, %v7124_v14  ;;  %v7401_v31 = vld [vmem:[#allocation45] sm:$0xff]  ;;  %v12987_v16 = vpack.c.bf16 %v7408_v27, %v7406_v41 }
0x20b4   :  { %v7226_v38 = vmax.f32 %v7214_v15, 0.0  ;;  %v13780_v14 = vld [vmem:[#allocation22 + $0x8] ss:$12 sps:$4 sm:$0xff]   ;;  %v12985_v63 = vpack.c.bf16 %v7403_v12, %v7401_v31 }
0x20b5   :  { %v7222_v25 = vadd.f32 %v12962_v55, %v7173_v30  ;;  %v7227_v48 = vmax.f32 %v7219_v4, 0.0  ;;  %v7505_v55 = vpack.c.bf16 %v16222_v9, %v16215_v3  ;;  %v7405_v15 = vld [vmem:[#allocation45 + $0x20] sm:$0xff]  ;;  %v7407_v4 = vld [vmem:[#allocation45 + $0x30] sm:$0xff] }
0x20b6   :  { %v7229_v0 = vpack.c.bf16 %v7226_v38, %v7225_v47  ;;  %v12989_v3 = vpack.c.bf16 %v7407_v4, %v7405_v15  ;;  %v7413_v31 = vld [vmem:[#allocation45 + $0x60] sm:$0xff]  ;;  %v7415_v12 = vld [vmem:[#allocation45 + $0x70] sm:$0xff] }
0x20b7   :  { %v7228_v39 = vmax.f32 %v7222_v25, 0.0 }
0x20b8   :  { %v7231_v22 = vmul.bf16 %v7229_v0, %v16286_v58 }
0x20b9   :  { %v7230_v1 = vpack.c.bf16 %v7228_v39, %v7227_v48 }
0x20ba   :  { %7253 = vrot.lane.b32.xlu0 %v7231_v22, %s15043_s30 }
0x20bb   :  { %v7232_v53 = vmul.bf16 %v7230_v1, %v16286_v58  ;;  %v13773_v58 = vld [vmem:[#allocation22 + $0x4] ss:$12 sps:$4 sm:$0xff]  }
0x20bc   :  { %7349 = vmatprep.mubr.bf16.mxu1 %v13773_v58 }
0x20bd   :  { %7255 = vrot.lane.b32.xlu1 %v7232_v53, %s15043_s30  ;;  %s17916_s30 = sld [smem:[#allocation106_spill]] }
0x20be   :  { %7259 = vrot.lane.b32.xlu0 %v7231_v22, %s15045_s1 }
0x20c1   :  { %7235 = vrot.lane.b32.xlu1 %v7231_v22, %s15027_s14 }
0x20c2   :  { %7261 = vrot.lane.b32.xlu0 %v7232_v53, %s15045_s1  ;;  %s17919_s1 = sld [smem:[#allocation92_spill]] }
0x20c3   :  { %v13776_v33 = vld [vmem:[%s17916_s30 + $0x4] ss:$8 sps:$4 sm:$0xff]   ;;  %v13774_v10 = vld [vmem:[%s17916_s30] ss:$8 sps:$4 sm:$0xff]   ;;  %v13779_v26 = vld [vmem:[%s17916_s30 + $0x14] ss:$8 sps:$4 sm:$0xff]  }
0x20c4   :  { %v13777_v35 = vld [vmem:[%s17916_s30 + $0x10] ss:$8 sps:$4 sm:$0xff]   ;;  %v13783_v30 = vld [vmem:[%s17916_s30 + $0x24] ss:$8 sps:$4 sm:$0xff]   ;;  %v13781_v9 = vld [vmem:[%s17916_s30 + $0x20] ss:$8 sps:$4 sm:$0xff]  }
0x20c5   :  { %7237 = vrot.lane.b32.xlu1 %v7232_v53, %s15027_s14  ;;  %v13786_v47 = vld [vmem:[%s17916_s30 + $0x34] ss:$8 sps:$4 sm:$0xff]   ;;  %v13784_v38 = vld [vmem:[%s17916_s30 + $0x30] ss:$8 sps:$4 sm:$0xff]   ;;  %v13789_v25 = vld [vmem:[%s17916_s30 + $0x44] ss:$8 sps:$4 sm:$0xff]  }
0x20c6   :  { %7265 = vrot.lane.b32.xlu0 %v7231_v22, %s15040_s28  ;;  %v13787_v0 = vld [vmem:[%s17916_s30 + $0x40] ss:$8 sps:$4 sm:$0xff]   ;;  %v13792_v48 = vld [vmem:[%s17916_s30 + $0x54] ss:$8 sps:$4 sm:$0xff]   ;;  %v13790_v39 = vld [vmem:[%s17916_s30 + $0x50] ss:$8 sps:$4 sm:$0xff]  }
0x20c7   :  { %v13793_v1 = vld [vmem:[%s17916_s30 + $0x60] ss:$8 sps:$4 sm:$0xff]   ;;  %v13796_v58 = vld [vmem:[%s17916_s30 + $0x70] ss:$8 sps:$4 sm:$0xff]  }
0x20c9   :  { %7241 = vrot.lane.b32.xlu1 %v7231_v22, %s15028_s8 }
0x20ca   :  { %7267 = vrot.lane.b32.xlu0 %v7232_v53, %s15040_s28 }
0x20cd   :  { %7243 = vrot.lane.b32.xlu1 %v7232_v53, %s15028_s8 }
0x20ce   :  { %7271 = vrot.lane.b32.xlu0 %v7231_v22, %s15047_s29 }
0x20d1   :  { %7247 = vrot.lane.b32.xlu1 %v7231_v22, %s15044_s13 }
0x20d2   :  { %7273 = vrot.lane.b32.xlu0 %v7232_v53, %s15047_s29 }
0x20d5   :  { %7249 = vrot.lane.b32.xlu1 %v7232_v53, %s15044_s13  ;;  %s17917_s13 = sld [smem:[#allocation91_spill]] }
0x20d6   :  { %7277 = vrot.lane.b32.xlu0 %v7231_v22, %s15046_s2 }
0x20d9   :  { %7279 = vrot.lane.b32.xlu1 %v7232_v53, %s15046_s2  ;;  %s17920_s2 = sld [smem:[#allocation103_spill]] }
0x20da   :  { %7291 = vperm.xlu0 %13314, %v7287_v7   ;;  %v13801_v7 = vld [vmem:[%s17916_s30 + $0x84] ss:$8 sps:$4 sm:$0xff]  }
0x20dd   :  { %7296 = vperm.xlu1 %13340, %v7288_v43   ;;  %v13799_v43 = vld [vmem:[%s17916_s30 + $0x80] ss:$8 sps:$4 sm:$0xff]  }
0x212c   :  { %v7254_v52 = vpop.permute.xlu0 %7253 }
0x212d   :  { %12738 = vmatprep.subr.bf16.mxu1 %v7254_v52  ;;  %v13804_v52 = vld [vmem:[%s17916_s30 + $0x94] ss:$8 sps:$4 sm:$0xff]  }
0x212e   :  { %12739 = vmatpush3.bf16.msra.mxu1 %v7231_v22  ;;  %v13795_v22 = vld [vmem:[%s17916_s30 + $0x64] ss:$8 sps:$4 sm:$0xff]  }
0x212f   :  { %v7256_v56 = vpop.permute.xlu1 %7255 }
0x2130   :  { %12740 = vmatprep.subr.bf16.mxu1 %v7256_v56  ;;  %v7260_v45 = vpop.permute.xlu0 %7259  ;;  %v13802_v56 = vld [vmem:[%s17916_s30 + $0x90] ss:$8 sps:$4 sm:$0xff]  }
0x2132   :  { %12741 = vmatpush3.bf16.msra.mxu1 %v7232_v53  ;;  %v13798_v53 = vld [vmem:[%s17916_s30 + $0x74] ss:$8 sps:$4 sm:$0xff]  }
0x2133   :  { %v7236_v29 = vpop.permute.xlu1 %7235  ;;  %12742 = vmatprep.subr.bf16.mxu1 %v7260_v45  ;;  %v13807_v45 = vld [vmem:[%s17916_s30 + $0xa4] ss:$8 sps:$4 sm:$0xff]  }
0x2134   :  { %v7262_v24 = vpop.permute.xlu0 %7261 }
0x2136   :  { %12743 = vmatpush3.bf16.msra.mxu1 %v7236_v29  ;;  %v13805_v29 = vld [vmem:[%s17916_s30 + $0xa0] ss:$8 sps:$4 sm:$0xff]  }
0x2137   :  { %v7238_v2 = vpop.permute.xlu1 %7237  ;;  %12744 = vmatprep.subr.bf16.mxu1 %v7262_v24  ;;  %v13810_v24 = vld [vmem:[%s17916_s30 + $0xb4] ss:$8 sps:$4 sm:$0xff]  }
0x2138   :  { %v7266_v8 = vpop.permute.xlu0 %7265 }
0x213a   :  { %12745 = vmatpush3.bf16.msra.mxu1 %v7238_v2  ;;  %v7530_v2 = vld [vmem:[%s17916_s30 + $0xc0] sm:$0xff] }
0x213b   :  { %v7242_v61 = vpop.permute.xlu1 %7241  ;;  %12746 = vmatprep.subr.bf16.mxu1 %v7266_v8  ;;  %v13808_v8 = vld [vmem:[%s17916_s30 + $0xb0] ss:$8 sps:$4 sm:$0xff]  }
0x213c   :  { %v7268_v20 = vpop.permute.xlu0 %7267 }
0x213e   :  { %12747 = vmatpush3.bf16.msra.mxu1 %v7242_v61  ;;  %v11776_v61 = vcombine.high %v7530_v2, %v7530_v2 }
0x213f   :  { %v7244_v46 = vpop.permute.xlu1 %7243  ;;  %12748 = vmatprep.subr.bf16.mxu1 %v7268_v20  ;;  %v11775_v20 = vcombine.low %v7530_v2, %v7530_v2 }
0x2140   :  { %v7272_v6 = vpop.permute.xlu0 %7271 }
0x2142   :  { %12749 = vmatpush3.bf16.msra.mxu1 %v7244_v46  ;;  %v7660_v46 = vsel %vm804_vm1, %v11775_v20, 0  ;;  %v7830_v20 = vld [vmem:[%s17917_s13] sm:$0xff] }
0x2143   :  { %v7248_v59 = vpop.permute.xlu1 %7247  ;;  %12750 = vmatprep.subr.bf16.mxu1 %v7272_v6  ;;  %v7504_v6 = vpack.c.bf16 %v16218_v17, %v16213_v34  ;;  %v7417_v34 = vld [vmem:[#allocation45 + $0x80] sm:$0xff] }
0x2144   :  { %v7274_v62 = vpop.permute.xlu0 %7273 }
0x2146   :  { %12751 = vmatpush3.bf16.msra.mxu1 %v7248_v59  ;;  %v7410_v59 = vld [vmem:[#allocation45 + $0x48] sm:$0xff] }
0x2147   :  { %v7250_v42 = vpop.permute.xlu1 %7249  ;;  %12752 = vmatprep.subr.bf16.mxu1 %v7274_v62  ;;  %v7412_v62 = vld [vmem:[#allocation45 + $0x58] sm:$0xff] }
0x2148   :  { %v7278_v40 = vpop.permute.xlu0 %7277 }
0x2149   :  { %12964 = vmatpush3.bf16.msra.mxu0 %v7278_v40  ;;  %v7411_v40 = vld [vmem:[#allocation45 + $0x50] sm:$0xff] }
0x214a   :  { %12753 = vmatpush3.bf16.msra.mxu1 %v7250_v42  ;;  %12965 = vmatprep.subr.bf16.mxu0 %v15052_v60  ;;  %v12991_v42 = vpack.c.bf16 %v7412_v62, %v7410_v59 }
0x214b   :  { %v7280_v36 = vpop.permute.xlu1 %7279  ;;  %7665 = vmatprep.subr.bf16.mxu1 %v13776_v33  ;;  %v7409_v33 = vld [vmem:[#allocation45 + $0x40] sm:$0xff] }
0x214c   :  { %v12993_v32 = vpack.c.bf16 %v7411_v40, %v7409_v33 }
0x214d   :  { %7350 = vmatmul.mubr.bf16.vlgmr.msra.gmra.mrb[188].mxu1 %v13771_v37  ;;  %12966 = vmatpush3.bf16.msra.mxu0 %v7280_v36  ;;  %v7416_v37 = vld [vmem:[#allocation45 + $0x78] sm:$0xff]  ;;  %v12997_v36 = vpack.c.bf16 %v7415_v12, %v7413_v31 }
0x214e   :  { %7666 = vmatpush1.bf16.msra.mxu1 %v13774_v10  ;;  %11778 = vmatprep.mubr.msk.bf16.mxu1 %vm908_vm9, %v7505_v55  ;;  %v12995_v10 = vpack.c.bf16 %v7416_v37, %v7414_v18 }
0x214f   :  { %7667 = vmatprep.subr.bf16.mxu1 %v13779_v26  ;;  %12984 = vmatprep.subr.bf16.mxu0 %v12983_v13  ;;  %v7418_v26 = vld [vmem:[#allocation45 + $0x88] sm:$0xff] }
0x2150   :  { %12968 = vmatmul.mubr.msk.bf16.vlgmr.msra.gmra.mrb[164].mxu0 %vm3032_vm6, %v13780_v14 }
0x2151   :  { %12986 = vmatpush1.bf16.msra.mxu0 %v12985_v63  ;;  %7489 = vmatprep.mubr.f32.mxu0 %v15052_v60 }
0x2152   :  { %7668 = vmatpush1.bf16.msra.mxu1 %v13777_v35  ;;  %12988 = vmatprep.subr.bf16.mxu0 %v12987_v16 }
0x2153   :  { %7669 = vmatprep.subr.bf16.mxu1 %v13783_v30 }
0x2155   :  { %12990 = vmatpush1.bf16.msra.mxu0 %v12989_v3 }
0x2156   :  { %7670 = vmatpush1.bf16.msra.mxu1 %v13781_v9  ;;  %12992 = vmatprep.subr.bf16.mxu0 %v12991_v42 }
0x2157   :  { %7671 = vmatprep.subr.bf16.mxu1 %v13786_v47 }
0x2159   :  { %12994 = vmatpush1.bf16.msra.mxu0 %v12993_v32  ;;  %v7292_v41 = vpop.permute.xlu0 %7291 }
0x215a   :  { %7672 = vmatpush1.bf16.msra.mxu1 %v13784_v38  ;;  %12996 = vmatprep.subr.bf16.mxu0 %v12995_v10 }
0x215b   :  { %7673 = vmatprep.subr.bf16.mxu1 %v13789_v25 }
0x215c   :  { %v7297_v4 = vpop.permute.xlu1 %7296 }
0x215d   :  { %12998 = vmatpush1.bf16.msra.mxu0 %v12997_v36 }
0x215e   :  { %7674 = vmatpush1.bf16.msra.mxu1 %v13787_v0  ;;  %7441 = vmatprep.subr.mxu0 %v7418_v26 }
0x215f   :  { %7675 = vmatprep.subr.bf16.mxu1 %v13792_v48 }
0x2161   :  { %7442 = vmatpush1.msra.mxu0 %v7417_v34 }
0x2162   :  { %7676 = vmatpush1.bf16.msra.mxu1 %v13790_v39 }
0x2163   :  { %7677 = vmatprep.subr.bf16.mxu1 %v13795_v22 }
0x2166   :  { %7678 = vmatpush1.bf16.msra.mxu1 %v13793_v1 }
0x2167   :  { %7679 = vmatprep.subr.bf16.mxu1 %v13798_v53 }
0x216a   :  { %7680 = vmatpush1.bf16.msra.mxu1 %v13796_v58 }
0x216b   :  { %7681 = vmatprep.subr.bf16.mxu1 %v13801_v7 }
0x216e   :  { %7682 = vmatpush1.bf16.msra.mxu1 %v13799_v43 }
0x216f   :  { %7683 = vmatprep.subr.bf16.mxu1 %v13804_v52 }
0x2172   :  { %7684 = vmatpush1.bf16.msra.mxu1 %v13802_v56 }
0x2173   :  { %7685 = vmatprep.subr.bf16.mxu1 %v13807_v45 }
0x2176   :  { %7686 = vmatpush1.bf16.msra.mxu1 %v13805_v29 }
0x2177   :  { %7687 = vmatprep.subr.bf16.mxu1 %v13810_v24 }
0x217a   :  { %7688 = vmatpush1.bf16.msra.mxu1 %v13808_v8 }
0x217b   :  { %11777 = vmatprep.subr.msk.bf16.mxu1 %vm804_vm1, %v11776_v61  ;;  %v13815_v61 = vld [vmem:[#allocation24 + $0x4] ss:$12 sps:$4 sm:$0xff]  }
0x217e   :  { %7690 = vmatpush1.bf16.msra.mxu1 %v7660_v46  ;;  %v7831_v46 = vld [vmem:[%s17917_s13 + $0x8] sm:$0xff] }
0x2181   :  { %7698 = vmatmul.mubr.bf16.vlgmr.msra.gmra.mrb[192].mxu1 %v7504_v6 }
0x2220   :  { %v12754_v17 = vpop.f32.mrb[188].mxu1 }
0x2221   :  { %v12755_v13 = vpop.f32.mrb[189].mxu1 }
0x2222   :  { %v12756_v27 = vadd.f32 %v12755_v13, %v12754_v17  ;;  %v12757_v55 = vpop.f32.mrb[190].mxu1 }
0x2223   :  { %v12758_v14 = vpop.f32.mrb[191].mxu1  ;;  %v7392_v63 = vpop.f32.mrb[164].mxu0 }
0x2224   :  { %v12759_v35 = vadd.f32 %v12758_v14, %v12757_v55  ;;  %v7352_v16 = vadd.f32 %v12756_v27, %v7292_v41  ;;  %v12969_v15 = vpop.f32.mrb[165].mxu0 }
0x2225   :  { %v7395_v30 = vpop.f32.mrb[166].mxu0 }
0x2226   :  { %v7393_v3 = vadd.f32 %v7392_v63, %v7352_v16  ;;  %v7355_v9 = vadd.f32 %v12759_v35, %v7297_v4  ;;  %v12970_v47 = vpop.f32.mrb[167].mxu0 }
0x2228   :  { %v7399_v38 = vmax.f32 %v7393_v3, 0.0  ;;  %v7396_v25 = vadd.f32 %v7395_v30, %v7355_v9 }
0x222a   :  { %11749 = vmatmul.mubr.msk.f32.vlgmr.msra.gmra.mrb[168].mxu0 %vm908_vm9, %v7399_v38  ;;  %v7400_v0 = vmax.f32 %v7396_v25, 0.0 }
0x222b   :  { %7495 = vmatprep.mubr.f32.mxu0 %v15052_v60 }
0x222e   :  { %11750 = vmatmul.mubr.msk.f32.gmra.mrb[170].mxu0 %vm908_vm9, %v7400_v0 }
0x222f   :  { %7892 = vmatprep.mubr.bf16.mxu0 %v13815_v61 }
0x2254   :  { %v7699_v48 = vpop.f32.mrb[192].mxu1 }
0x2255   :  { %v7701_v39 = vpop.f32.mrb[193].mxu1 }
0x2256   :  { %v7703_v22 = vpop.f32.mrb[194].mxu1 }
0x2257   :  { %v7708_v1 = vpack.c.bf16 %v7703_v22, %v7699_v48  ;;  %v7705_v53 = vpop.f32.mrb[195].mxu1 }
0x2258   :  { %v7709_v58 = vpack.c.bf16 %v7705_v53, %v7701_v39 }
0x2259   :  { %7714 = vrot.lane.b32.xlu0 %v7708_v1, %s15027_s14 }
0x225a   :  { %7716 = vrot.lane.b32.xlu1 %v7709_v58, %s15027_s14  ;;  %7860 = vmatprep.subr.bf16.mxu0 %v7709_v58 }
0x225b   :  { %7861 = vmatpush1.bf16.msra.mxu0 %v7708_v1 }
0x22cb   :  { %v7715_v24 = vpop.permute.xlu0 %7714 }
0x22cc   :  { %v7717_v2 = vpop.permute.xlu1 %7716 }
0x22cd   :  { %v7722_v8 = vsel %vm672_vm0, %v7715_v24, %v7717_v2 }
0x22fd   :  { %v7491_v7 = vpop.f32.mrb[168].mxu0 }
0x22fe   :  { %v7493_v43 = vpop.f32.mrb[169].mxu0 }
0x2301   :  { %v7497_v52 = vpop.f32.mrb[170].mxu0 }
0x2302   :  { %v7502_v56 = vpack.c.bf16 %v7497_v52, %v7491_v7  ;;  %v7499_v45 = vpop.f32.mrb[171].mxu0  ;;  %v13813_v7 = vld [vmem:[#allocation24] ss:$12 sps:$4 sm:$0xff]  }
0x2303   :  { %v7503_v29 = vpack.c.bf16 %v7499_v45, %v7493_v43  ;;  %v17918_v45 = vmov 0  }
0x2304   :  { %7718 = vrot.lane.b32.xlu0 %v7502_v56, %s15027_s14 }
0x2305   :  { %7720 = vrot.lane.b32.xlu1 %v7503_v29, %s15027_s14  ;;  %7862 = vmatprep.subr.bf16.mxu0 %v7503_v29 }
0x2306   :  { %7863 = vmatpush1.bf16.msra.mxu0 %v7502_v56 }
0x2307   :  { %7864 = vmatprep.subr.bf16.mxu0 %v7717_v2 }
0x2308   :  { %7728 = vrot.lane.b32.xlu0 %v7708_v1, %s15028_s8 }
0x2309   :  { %7730 = vrot.lane.b32.xlu1 %v7709_v58, %s15028_s8 }
0x230a   :  { %7865 = vmatpush1.bf16.msra.mxu0 %v7722_v8  ;;  %v13816_v8 = vld [vmem:[#allocation24 + $0x8] ss:$12 sps:$4 sm:$0xff]  }
0x230c   :  { %7732 = vrot.lane.b32.xlu0 %v7502_v56, %s15028_s8 }
0x230d   :  { %7734 = vrot.lane.b32.xlu1 %v7503_v29, %s15028_s8 }
0x2310   :  { %7742 = vrot.lane.b32.xlu0 %v7708_v1, %s15039_s4 }
0x2311   :  { %7744 = vrot.lane.b32.xlu1 %v7709_v58, %s15039_s4 }
0x2314   :  { %7746 = vrot.lane.b32.xlu0 %v7502_v56, %s15039_s4 }
0x2315   :  { %7748 = vrot.lane.b32.xlu1 %v7503_v29, %s15039_s4 }
0x2318   :  { %7756 = vrot.lane.b32.xlu0 %v7708_v1, %s15038_s0 }
0x2319   :  { %7758 = vrot.lane.b32.xlu1 %v7709_v58, %s15038_s0 }
0x231c   :  { %7760 = vrot.lane.b32.xlu0 %v7502_v56, %s15038_s0 }
0x231d   :  { %7762 = vrot.lane.b32.xlu1 %v7503_v29, %s15038_s0 }
0x2320   :  { %7770 = vrot.lane.b32.xlu0 %v7708_v1, %s15040_s28 }
0x2321   :  { %7772 = vrot.lane.b32.xlu1 %v7709_v58, %s15040_s28 }
0x2324   :  { %7774 = vrot.lane.b32.xlu0 %v7502_v56, %s15040_s28 }
0x2325   :  { %7776 = vrot.lane.b32.xlu1 %v7503_v29, %s15040_s28 }
0x2328   :  { %7784 = vrot.lane.b32.xlu0 %v7708_v1, %s15031_s24 }
0x2329   :  { %7786 = vrot.lane.b32.xlu1 %v7709_v58, %s15031_s24 }
0x232c   :  { %7788 = vrot.lane.b32.xlu0 %v7502_v56, %s15031_s24 }
0x232d   :  { %7790 = vrot.lane.b32.xlu1 %v7503_v29, %s15031_s24 }
0x2330   :  { %7798 = vrot.lane.b32.xlu0 %v7708_v1, %s15041_s26 }
0x2331   :  { %7800 = vrot.lane.b32.xlu1 %v7709_v58, %s15041_s26 }
0x2334   :  { %7802 = vrot.lane.b32.xlu0 %v7502_v56, %s15041_s26 }
0x2335   :  { %7804 = vrot.lane.b32.xlu1 %v7503_v29, %s15041_s26 }
0x2338   :  { %7812 = vrot.lane.b32.xlu0 %v7708_v1, %s15042_s20 }
0x2339   :  { %7814 = vrot.lane.b32.xlu1 %v7709_v58, %s15042_s20 }
0x233c   :  { %7816 = vrot.lane.b32.xlu0 %v7502_v56, %s15042_s20 }
0x233d   :  { %7818 = vrot.lane.b32.xlu1 %v7503_v29, %s15042_s20 }
0x2340   :  { %7834 = vperm.xlu0 %13314, %v7830_v20  }
0x2341   :  { %7839 = vperm.xlu1 %13340, %v7831_v46  }
0x2376   :  { %v7719_v6 = vpop.permute.xlu0 %7718 }
0x2377   :  { %v7721_v59 = vpop.permute.xlu1 %7720 }
0x2378   :  { %7866 = vmatprep.subr.bf16.mxu0 %v7721_v59  ;;  %v7723_v62 = vsel %vm672_vm0, %v7719_v6, %v7721_v59 }
0x2379   :  { %7867 = vmatpush1.bf16.msra.mxu0 %v7723_v62 }
0x237a   :  { %v7729_v42 = vpop.permute.xlu0 %7728 }
0x237b   :  { %v7731_v33 = vpop.permute.xlu1 %7730 }
0x237c   :  { %7868 = vmatprep.subr.bf16.mxu0 %v7731_v33  ;;  %v7736_v40 = vsel %vm690_vm2, %v7729_v42, %v7731_v33 }
0x237d   :  { %7869 = vmatpush1.bf16.msra.mxu0 %v7736_v40 }
0x237e   :  { %v7733_v32 = vpop.permute.xlu0 %7732 }
0x237f   :  { %v7735_v18 = vpop.permute.xlu1 %7734 }
0x2380   :  { %7870 = vmatprep.subr.bf16.mxu0 %v7735_v18  ;;  %v7737_v37 = vsel %vm690_vm2, %v7733_v32, %v7735_v18 }
0x2381   :  { %7871 = vmatpush1.bf16.msra.mxu0 %v7737_v37 }
0x2382   :  { %v7743_v10 = vpop.permute.xlu0 %7742 }
0x2383   :  { %v7745_v31 = vpop.permute.xlu1 %7744 }
0x2384   :  { %7872 = vmatprep.subr.bf16.mxu0 %v7745_v31  ;;  %v7750_v12 = vsel %vm2271_vm13, %v7743_v10, %v7745_v31 }
0x2385   :  { %7873 = vmatpush1.bf16.msra.mxu0 %v7750_v12 }
0x2386   :  { %v7747_v36 = vpop.permute.xlu0 %7746 }
0x2387   :  { %v7749_v26 = vpop.permute.xlu1 %7748 }
0x2388   :  { %7874 = vmatprep.subr.bf16.mxu0 %v7749_v26  ;;  %v7751_v34 = vsel %vm2271_vm13, %v7747_v36, %v7749_v26 }
0x2389   :  { %7875 = vmatpush1.bf16.msra.mxu0 %v7751_v34 }
0x238a   :  { %v7757_v17 = vpop.permute.xlu0 %7756 }
0x238b   :  { %v7759_v13 = vpop.permute.xlu1 %7758 }
0x238c   :  { %7876 = vmatprep.subr.bf16.mxu0 %v7759_v13  ;;  %v7764_v41 = vsel %vm2114_vm12, %v7757_v17, %v7759_v13  ;;  %v8013_v17 = vld [vmem:[%s17919_s1] sm:$0xff]  ;;  %v8072_v13 = vld [vmem:[%s17920_s2 + $0x8] sm:$0xff] }
0x238d   :  { %7877 = vmatpush1.bf16.msra.mxu0 %v7764_v41  ;;  %v8078_v41 = vld [vmem:[%s17920_s2 + $0x38] sm:$0xff] }
0x238e   :  { %v7761_v27 = vpop.permute.xlu0 %7760 }
0x238f   :  { %v7763_v55 = vpop.permute.xlu1 %7762 }
0x2390   :  { %7878 = vmatprep.subr.bf16.mxu0 %v7763_v55  ;;  %v7765_v14 = vsel %vm2114_vm12, %v7761_v27, %v7763_v55  ;;  %v12999_v27 = vpack.c.bf16 %v8078_v41, %v8072_v13  ;;  %v8071_v55 = vld [vmem:[%s17920_s2] sm:$0xff]  ;;  %v8173_v41 = vld [vmem:[%s17920_s2 + $0x330] sm:$0xff] }
0x2391   :  { %7879 = vmatpush1.bf16.msra.mxu0 %v7765_v14  ;;  %v8077_v14 = vld [vmem:[%s17920_s2 + $0x30] sm:$0xff]  ;;  %v8167_v13 = vld [vmem:[%s17920_s2 + $0x300] sm:$0xff] }
0x2392   :  { %v7771_v63 = vpop.permute.xlu0 %7770 }
0x2393   :  { %v7773_v35 = vpop.permute.xlu1 %7772 }
0x2394   :  { %7880 = vmatprep.subr.bf16.mxu0 %v7773_v35  ;;  %v7778_v16 = vsel %vm2283_vm14, %v7771_v63, %v7773_v35  ;;  %v13001_v63 = vpack.c.bf16 %v8077_v14, %v8071_v55  ;;  %v8084_v35 = vld [vmem:[%s17920_s2 + $0x68] sm:$0xff]  ;;  %v8186_v55 = vld [vmem:[%s17920_s2 + $0x398] sm:$0xff]  ;;  %v13033_v14 = vpack.c.bf16 %v8173_v41, %v8167_v13 }
0x2395   :  { %7881 = vmatpush1.bf16.msra.mxu0 %v7778_v16  ;;  %v8090_v16 = vld [vmem:[%s17920_s2 + $0x98] sm:$0xff]  ;;  %v8104_v41 = vld [vmem:[%s17920_s2 + $0x108] sm:$0xff] }
0x2396   :  { %v7775_v15 = vpop.permute.xlu0 %7774  ;;  %v8098_v13 = vld [vmem:[%s17920_s2 + $0xd8] sm:$0xff] }
0x2397   :  { %v7777_v4 = vpop.permute.xlu1 %7776 }
0x2398   :  { %7882 = vmatprep.subr.bf16.mxu0 %v7777_v4  ;;  %v7779_v30 = vsel %vm2283_vm14, %v7775_v15, %v7777_v4  ;;  %v13003_v15 = vpack.c.bf16 %v8090_v16, %v8084_v35  ;;  %v8083_v4 = vld [vmem:[%s17920_s2 + $0x60] sm:$0xff]  ;;  %v8185_v16 = vld [vmem:[%s17920_s2 + $0x390] sm:$0xff] }
0x2399   :  { %7883 = vmatpush1.bf16.msra.mxu0 %v7779_v30  ;;  %v8089_v30 = vld [vmem:[%s17920_s2 + $0x90] sm:$0xff]  ;;  %v8179_v35 = vld [vmem:[%s17920_s2 + $0x360] sm:$0xff] }
0x239a   :  { %v7785_v3 = vpop.permute.xlu0 %7784 }
0x239b   :  { %v7787_v9 = vpop.permute.xlu1 %7786 }
0x239c   :  { %7884 = vmatprep.subr.bf16.mxu0 %v7787_v9  ;;  %v7792_v47 = vsel %vm744_vm5, %v7785_v3, %v7787_v9  ;;  %v13005_v3 = vpack.c.bf16 %v8089_v30, %v8083_v4  ;;  %v8096_v9 = vld [vmem:[%s17920_s2 + $0xc8] sm:$0xff]  ;;  %v8198_v4 = vld [vmem:[%s17920_s2 + $0x3f8] sm:$0xff]  ;;  %v13037_v30 = vpack.c.bf16 %v8185_v16, %v8179_v35 }
0x239d   :  { %7885 = vmatpush1.bf16.msra.mxu0 %v7792_v47  ;;  %v8102_v47 = vld [vmem:[%s17920_s2 + $0xf8] sm:$0xff]  ;;  %v8116_v35 = vld [vmem:[%s17920_s2 + $0x168] sm:$0xff] }
0x239e   :  { %v7789_v38 = vpop.permute.xlu0 %7788 }
0x239f   :  { %v7791_v25 = vpop.permute.xlu1 %7790 }
0x23a0   :  { %7886 = vmatprep.subr.bf16.mxu0 %v7791_v25  ;;  %v7793_v0 = vsel %vm744_vm5, %v7789_v38, %v7791_v25  ;;  %v13007_v38 = vpack.c.bf16 %v8102_v47, %v8096_v9  ;;  %v8095_v25 = vld [vmem:[%s17920_s2 + $0xc0] sm:$0xff]  ;;  %v8197_v47 = vld [vmem:[%s17920_s2 + $0x3f0] sm:$0xff] }
0x23a1   :  { %7887 = vmatpush1.bf16.msra.mxu0 %v7793_v0  ;;  %v8101_v0 = vld [vmem:[%s17920_s2 + $0xf0] sm:$0xff]  ;;  %v8191_v9 = vld [vmem:[%s17920_s2 + $0x3c0] sm:$0xff] }
0x23a2   :  { %v7799_v48 = vpop.permute.xlu0 %7798 }
0x23a3   :  { %v7801_v39 = vpop.permute.xlu1 %7800 }
0x23a4   :  { %7888 = vmatprep.subr.bf16.mxu0 %v7801_v39  ;;  %v7806_v22 = vsel %vm2294_vm15, %v7799_v48, %v7801_v39  ;;  %v13009_v48 = vpack.c.bf16 %v8101_v0, %v8095_v25  ;;  %v8108_v39 = vld [vmem:[%s17920_s2 + $0x128] sm:$0xff] }
0x23a5   :  { %7889 = vmatpush1.bf16.msra.mxu0 %v7806_v22  ;;  %v8114_v22 = vld [vmem:[%s17920_s2 + $0x158] sm:$0xff] }
0x23a6   :  { %v7803_v1 = vpop.permute.xlu0 %7802 }
0x23a7   :  { %v7805_v53 = vpop.permute.xlu1 %7804 }
0x23a8   :  { %7890 = vmatprep.subr.bf16.mxu0 %v7805_v53  ;;  %v7807_v58 = vsel %vm2294_vm15, %v7803_v1, %v7805_v53  ;;  %v13011_v1 = vpack.c.bf16 %v8114_v22, %v8108_v39  ;;  %v8107_v53 = vld [vmem:[%s17920_s2 + $0x120] sm:$0xff] }
0x23a9   :  { %7891 = vmatpush1.bf16.msra.mxu0 %v7807_v58  ;;  %v8113_v58 = vld [vmem:[%s17920_s2 + $0x150] sm:$0xff] }
0x23aa   :  { %v7813_v43 = vpop.permute.xlu0 %7812 }
0x23ab   :  { %v7815_v52 = vpop.permute.xlu1 %7814 }
0x23ac   :  { %7893 = vmatmul.mubr.bf16.vlgmr.msra.gmra.mrb[172].mxu0 %v13813_v7  ;;  %7903 = vmatprep.subr.bf16.mxu0 %v7815_v52  ;;  %v7820_v56 = vsel %vm2300_vm11, %v7813_v43, %v7815_v52  ;;  %v8120_v7 = vld [vmem:[%s17920_s2 + $0x188] sm:$0xff]  ;;  %v8126_v43 = vld [vmem:[%s17920_s2 + $0x1b8] sm:$0xff]  ;;  %v13013_v52 = vpack.c.bf16 %v8113_v58, %v8107_v53 }
0x23ad   :  { %7904 = vmatpush1.bf16.msra.mxu0 %v7820_v56  ;;  %7935 = vmatprep.mubr.bf16.mxu0 %v17918_v45  ;;  %v13015_v56 = vpack.c.bf16 %v8126_v43, %v8120_v7 }
0x23ae   :  { %v7817_v29 = vpop.permute.xlu0 %7816 }
0x23af   :  { %v7819_v24 = vpop.permute.xlu1 %7818 }
0x23b0   :  { %7905 = vmatprep.subr.bf16.mxu0 %v7819_v24  ;;  %v7821_v2 = vsel %vm2300_vm11, %v7817_v29, %v7819_v24  ;;  %v8119_v29 = vld [vmem:[%s17920_s2 + $0x180] sm:$0xff]  ;;  %v8125_v24 = vld [vmem:[%s17920_s2 + $0x1b0] sm:$0xff] }
0x23b1   :  { %7906 = vmatpush1.bf16.msra.mxu0 %v7821_v2  ;;  %v8132_v2 = vld [vmem:[%s17920_s2 + $0x1e8] sm:$0xff] }
0x23b2   :  { %13000 = vmatprep.subr.bf16.mxu0 %v12999_v27  ;;  %v8180_v27 = vld [vmem:[%s17920_s2 + $0x368] sm:$0xff] }
0x23b8   :  { %11782 = vmatmul.mubr.msk.bf16.vlgmr.msra.gmra.mrb[172].mxu0 %vm3032_vm6, %v13816_v8  ;;  %v8138_v8 = vld [vmem:[%s17920_s2 + $0x218] sm:$0xff]  ;;  %vm17926_vm6 = vcmask 752640  }
0x23b9   :  { %13002 = vmatpush1.bf16.msra.mxu0 %v13001_v63  ;;  %v13035_v63 = vpack.c.bf16 %v8186_v55, %v8180_v27  ;;  %v13055_v55 = vpack.c.bf16 %v8104_v41, %v8098_v13  ;;  %v8193_v13 = vld [vmem:[%s17920_s2 + $0x3d0] sm:$0xff]  ;;  %v8199_v41 = vld [vmem:[%s17920_s2 + $0x400] sm:$0xff]  ;;  %vm17927_vm3 = vmmov %vm17926_vm6 }
0x23ba   :  { %13004 = vmatprep.subr.bf16.mxu0 %v13003_v15  ;;  %v8192_v15 = vld [vmem:[%s17920_s2 + $0x3c8] sm:$0xff] }
0x23bd   :  { %13006 = vmatpush1.bf16.msra.mxu0 %v13005_v3  ;;  %v13039_v3 = vpack.c.bf16 %v8198_v4, %v8192_v15  ;;  %v8109_v4 = vld [vmem:[%s17920_s2 + $0x130] sm:$0xff] }
0x23be   :  { %13008 = vmatprep.subr.bf16.mxu0 %v13007_v38  ;;  %v13041_v38 = vpack.c.bf16 %v8197_v47, %v8191_v9  ;;  %v8128_v9 = vld [vmem:[%s17920_s2 + $0x1c8] sm:$0xff] }
0x23bf   :  { %v7835_v61 = vpop.permute.xlu0 %7834 }
0x23c0   :  { %v7840_v59 = vpop.permute.xlu1 %7839 }
0x23c1   :  { %13010 = vmatpush1.bf16.msra.mxu0 %v13009_v48 }
0x23c2   :  { %13012 = vmatprep.subr.bf16.mxu0 %v13011_v1 }
0x23c5   :  { %13014 = vmatpush1.bf16.msra.mxu0 %v13013_v52 }
0x23c6   :  { %13016 = vmatprep.subr.bf16.mxu0 %v13015_v56 }
0x248b   :  { %v7937_v20 = vpop.f32.mrb[172].mxu0 }
0x248c   :  { %v13143_v46 = vadd.f32 %v7937_v20, %v7835_v61  ;;  %v7939_v6 = vpop.f32.mrb[173].mxu0  ;;  %v13019_v20 = vpack.c.bf16 %v8138_v8, %v8132_v2 }
0x248d   :  { %v13144_v62 = vadd.f32 %v7939_v6, %v7835_v61  ;;  %v7941_v42 = vpop.f32.mrb[174].mxu0  ;;  %v13017_v61 = vpack.c.bf16 %v8125_v24, %v8119_v29  ;;  %v8137_v6 = vld [vmem:[%s17920_s2 + $0x210] sm:$0xff] }
0x248e   :  { %v13145_v33 = vadd.f32 %v7941_v42, %v7840_v59  ;;  %v7943_v40 = vpop.f32.mrb[175].mxu0  ;;  %v7946_v18 = vmax.f32 %v13143_v46, 0.0  ;;  %v8131_v46 = vld [vmem:[%s17920_s2 + $0x1e0] sm:$0xff] }
0x248f   :  { %v13146_v32 = vadd.f32 %v7943_v40, %v7840_v59  ;;  %v7947_v10 = vmax.f32 %v13144_v62, 0.0  ;;  %v8144_v59 = vld [vmem:[%s17920_s2 + $0x248] sm:$0xff]  ;;  %v8150_v62 = vld [vmem:[%s17920_s2 + $0x278] sm:$0xff]  ;;  %13018 = vmatpush1.bf16.msra.mxu0 %v13017_v61  ;;  %v13021_v42 = vpack.c.bf16 %v8137_v6, %v8131_v46  ;;  %v8143_v40 = vld [vmem:[%s17920_s2 + $0x240] sm:$0xff] }
0x2490   :  { %v7948_v37 = vmax.f32 %v13145_v33, 0.0  ;;  %13020 = vmatprep.subr.bf16.mxu0 %v13019_v20  ;;  %v13023_v33 = vpack.c.bf16 %v8150_v62, %v8144_v59  ;;  %v8074_v59 = vld [vmem:[%s17920_s2 + $0x18] sm:$0xff]  ;;  %v8080_v62 = vld [vmem:[%s17920_s2 + $0x48] sm:$0xff] }
0x2491   :  { %v7949_v31 = vmax.f32 %v13146_v32, 0.0  ;;  %v8149_v32 = vld [vmem:[%s17920_s2 + $0x270] sm:$0xff] }
0x2492   :  { %v7950_v12 = vpack.c.bf16 %v7948_v37, %v7946_v18  ;;  %v8156_v18 = vld [vmem:[%s17920_s2 + $0x2a8] sm:$0xff]  ;;  %v8162_v37 = vld [vmem:[%s17920_s2 + $0x2d8] sm:$0xff] }
0x2493   :  { %v7951_v36 = vpack.c.bf16 %v7949_v31, %v7947_v10  ;;  %13022 = vmatpush1.bf16.msra.mxu0 %v13021_v42  ;;  %v13025_v10 = vpack.c.bf16 %v8149_v32, %v8143_v40  ;;  %v13027_v31 = vpack.c.bf16 %v8162_v37, %v8156_v18  ;;  %v13047_v40 = vpack.c.bf16 %v8080_v62, %v8074_v59  ;;  %v8073_v32 = vld [vmem:[%s17920_s2 + $0x10] sm:$0xff]  ;;  %v8079_v18 = vld [vmem:[%s17920_s2 + $0x40] sm:$0xff]  ;;  %v8170_v59 = vld [vmem:[%s17920_s2 + $0x318] sm:$0xff] }
0x2494   :  { %v7952_v26 = vmul.bf16 %v7950_v12, %v16178_v5  ;;  %v17135_v5 = vld [vmem:[#allocation25] sm:$0xff]  ;;  %13024 = vmatprep.subr.bf16.mxu0 %v13023_v33  ;;  %v8176_v62 = vld [vmem:[%s17920_s2 + $0x348] sm:$0xff] }
0x2495   :  { %v7953_v34 = vmul.bf16 %v7951_v36, %v16181_v11  ;;  %v11784_v11 = vcombine.high %v17135_v5, %v17135_v5  ;;  %v8155_v12 = vld [vmem:[%s17920_s2 + $0x2a0] sm:$0xff]  ;;  %v8161_v36 = vld [vmem:[%s17920_s2 + $0x2d0] sm:$0xff] }
0x2496   :  { %7956 = vrot.lane.b32.xlu0 %v7952_v26, %s15027_s14 }
0x2497   :  { %7958 = vrot.lane.b32.xlu1 %v7953_v34, %s15027_s14  ;;  %8028 = vmatprep.subr.bf16.mxu1 %v7953_v34 }
0x2498   :  { %8029 = vmatpush1.bf16.msra.mxu1 %v7952_v26  ;;  %11785 = vmatprep.mubr.msk.bf16.mxu1 %vm2532_vm8, %v11784_v11  ;;  %v13029_v11 = vpack.c.bf16 %v8161_v36, %v8155_v12  ;;  %v11783_v36 = vcombine.low %v17135_v5, %v17135_v5  ;;  %v8097_v5 = vld [vmem:[%s17920_s2 + $0xd0] sm:$0xff] }
0x2499   :  { %13026 = vmatpush1.bf16.msra.mxu0 %v13025_v10  ;;  %v8086_v10 = vld [vmem:[%s17920_s2 + $0x78] sm:$0xff] }
0x249a   :  { %7963 = vrot.lane.b32.xlu0 %v7952_v26, %s15028_s8  ;;  %13028 = vmatprep.subr.bf16.mxu0 %v13027_v31  ;;  %v8092_v31 = vld [vmem:[%s17920_s2 + $0xa8] sm:$0xff] }
0x249b   :  { %7965 = vrot.lane.b32.xlu1 %v7953_v34, %s15028_s8 }
0x249d   :  { %13030 = vmatpush1.bf16.msra.mxu0 %v13029_v11  ;;  %v8085_v11 = vld [vmem:[%s17920_s2 + $0x70] sm:$0xff] }
0x249e   :  { %7970 = vrot.lane.b32.xlu0 %v7952_v26, %s15039_s4 }
0x249f   :  { %7972 = vrot.lane.b32.xlu1 %v7953_v34, %s15039_s4 }
0x24a2   :  { %7977 = vrot.lane.b32.xlu0 %v7952_v26, %s15038_s0 }
0x24a3   :  { %7979 = vrot.lane.b32.xlu1 %v7953_v34, %s15038_s0  ;;  %s17921_s0 = sld [smem:[#allocation94_spill]] }
0x24a6   :  { %7984 = vrot.lane.b32.xlu0 %v7952_v26, %s15040_s28 }
0x24a7   :  { %7986 = vrot.lane.b32.xlu1 %v7953_v34, %s15040_s28 }
0x24aa   :  { %7991 = vrot.lane.b32.xlu0 %v7952_v26, %s15031_s24 }
0x24ab   :  { %7993 = vrot.lane.b32.xlu1 %v7953_v34, %s15031_s24 }
0x24ae   :  { %7998 = vrot.lane.b32.xlu0 %v7952_v26, %s15041_s26 }
0x24af   :  { %8000 = vrot.lane.b32.xlu1 %v7953_v34, %s15041_s26 }
0x24b2   :  { %8005 = vrot.lane.b32.xlu0 %v7952_v26, %s15042_s20  ;;  %v8168_v26 = vld [vmem:[%s17920_s2 + $0x308] sm:$0xff] }
0x24b3   :  { %8007 = vrot.lane.b32.xlu1 %v7953_v34, %s15042_s20  ;;  %v8174_v34 = vld [vmem:[%s17920_s2 + $0x338] sm:$0xff] }
0x24b6   :  { %8016 = vperm.xlu0 %13314, %v8013_v17   ;;  %v13031_v17 = vpack.c.bf16 %v8174_v34, %v8168_v26  ;;  %v13049_v26 = vpack.c.bf16 %v8079_v18, %v8073_v32  ;;  %v13051_v34 = vpack.c.bf16 %v8092_v31, %v8086_v10  ;;  %v8175_v32 = vld [vmem:[%s17920_s2 + $0x340] sm:$0xff]  ;;  %v8182_v18 = vld [vmem:[%s17920_s2 + $0x378] sm:$0xff] }
0x24b8   :  { %13032 = vmatprep.subr.bf16.mxu0 %v13031_v17  ;;  %v8091_v17 = vld [vmem:[%s17920_s2 + $0xa0] sm:$0xff] }
0x24b9   :  { %13034 = vmatpush1.bf16.msra.mxu0 %v13033_v14  ;;  %v13053_v27 = vpack.c.bf16 %v8091_v17, %v8085_v11  ;;  %v8103_v14 = vld [vmem:[%s17920_s2 + $0x100] sm:$0xff] }
0x24ba   :  { %13036 = vmatprep.subr.bf16.mxu0 %v13035_v63  ;;  %v8110_v63 = vld [vmem:[%s17920_s2 + $0x138] sm:$0xff]  ;;  %v13057_v16 = vpack.c.bf16 %v8103_v14, %v8097_v5 }
0x24bb   :  { %v13059_v15 = vpack.c.bf16 %v8116_v35, %v8110_v63  ;;  %v8210_v5 = vld [vmem:[%s17920_s2 + $0x458] sm:$0xff]  ;;  %v8212_v35 = vld [vmem:[%s17920_s2 + $0x468] sm:$0xff] }
0x24bc   :  { %v8206_v14 = vld [vmem:[%s17920_s2 + $0x438] sm:$0xff] }
0x24bd   :  { %13038 = vmatpush1.bf16.msra.mxu0 %v13037_v30  ;;  %v8115_v30 = vld [vmem:[%s17920_s2 + $0x160] sm:$0xff] }
0x24be   :  { %13040 = vmatprep.subr.bf16.mxu0 %v13039_v3  ;;  %v8122_v3 = vld [vmem:[%s17920_s2 + $0x198] sm:$0xff]  ;;  %v13061_v47 = vpack.c.bf16 %v8115_v30, %v8109_v4  ;;  %v13091_v4 = vpack.c.bf16 %v8212_v35, %v8206_v14  ;;  %v8117_v14 = vld [vmem:[%s17920_s2 + $0x170] sm:$0xff] }
0x24bf   :  { %v8130_v35 = vld [vmem:[%s17920_s2 + $0x1d8] sm:$0xff] }
0x24c1   :  { %13042 = vmatpush1.bf16.msra.mxu0 %v13041_v38  ;;  %v13063_v38 = vpack.c.bf16 %v8128_v9, %v8122_v3  ;;  %v8205_v3 = vld [vmem:[%s17920_s2 + $0x430] sm:$0xff]  ;;  %v8211_v9 = vld [vmem:[%s17920_s2 + $0x460] sm:$0xff] }
0x2508   :  { %v7957_v25 = vpop.permute.xlu0 %7956 }
0x2509   :  { %v7959_v0 = vpop.permute.xlu1 %7958 }
0x250a   :  { %8030 = vmatprep.subr.bf16.mxu1 %v7959_v0  ;;  %v7960_v48 = vsel %vm672_vm0, %v7957_v25, %v7959_v0  ;;  %v8121_v25 = vld [vmem:[%s17920_s2 + $0x190] sm:$0xff]  ;;  %v8127_v0 = vld [vmem:[%s17920_s2 + $0x1c0] sm:$0xff] }
0x250b   :  { %8031 = vmatpush1.bf16.msra.mxu1 %v7960_v48  ;;  %v8134_v48 = vld [vmem:[%s17920_s2 + $0x1f8] sm:$0xff] }
0x250c   :  { %v7964_v39 = vpop.permute.xlu0 %7963 }
0x250d   :  { %v7966_v22 = vpop.permute.xlu1 %7965 }
0x250e   :  { %8032 = vmatprep.subr.bf16.mxu1 %v7966_v22  ;;  %v7967_v1 = vsel %vm690_vm2, %v7964_v39, %v7966_v22  ;;  %v8140_v39 = vld [vmem:[%s17920_s2 + $0x228] sm:$0xff]  ;;  %v13065_v22 = vpack.c.bf16 %v8127_v0, %v8121_v25  ;;  %v8218_v25 = vld [vmem:[%s17920_s2 + $0x498] sm:$0xff] }
0x250f   :  { %8033 = vmatpush1.bf16.msra.mxu1 %v7967_v1  ;;  %v13067_v1 = vpack.c.bf16 %v8140_v39, %v8134_v48  ;;  %v8076_v0 = vld [vmem:[%s17920_s2 + $0x28] sm:$0xff]  ;;  %v8215_v48 = vld [vmem:[%s17920_s2 + $0x480] sm:$0xff]  ;;  %v8217_v39 = vld [vmem:[%s17920_s2 + $0x490] sm:$0xff] }
0x2510   :  { %v7971_v53 = vpop.permute.xlu0 %7970 }
0x2511   :  { %v7973_v58 = vpop.permute.xlu1 %7972 }
0x2512   :  { %8034 = vmatprep.subr.bf16.mxu1 %v7973_v58  ;;  %v7974_v7 = vsel %vm2271_vm13, %v7971_v53, %v7973_v58  ;;  %v8133_v53 = vld [vmem:[%s17920_s2 + $0x1f0] sm:$0xff]  ;;  %v8139_v58 = vld [vmem:[%s17920_s2 + $0x220] sm:$0xff]  ;;  %vm17922_vm13 = vcmask 900096  }
0x2513   :  { %8035 = vmatpush1.bf16.msra.mxu1 %v7974_v7  ;;  %v8146_v7 = vld [vmem:[%s17920_s2 + $0x258] sm:$0xff] }
0x2514   :  { %v7978_v43 = vpop.permute.xlu0 %7977 }
0x2515   :  { %v7980_v52 = vpop.permute.xlu1 %7979 }
0x2516   :  { %8036 = vmatprep.subr.bf16.mxu1 %v7980_v52  ;;  %v7981_v56 = vsel %vm2114_vm12, %v7978_v43, %v7980_v52  ;;  %v8152_v43 = vld [vmem:[%s17920_s2 + $0x288] sm:$0xff]  ;;  %v13069_v52 = vpack.c.bf16 %v8139_v58, %v8133_v53  ;;  %v13821_v53 = vld [vmem:[#allocation48 + $0x4] ss:$24 sps:$4 sm:$0xff]   ;;  %vm9907_vm12 = vcmask 64512  }
0x2517   :  { %8037 = vmatpush1.bf16.msra.mxu1 %v7981_v56  ;;  %v13071_v56 = vpack.c.bf16 %v8152_v43, %v8146_v7 }
0x2518   :  { %v7985_v29 = vpop.permute.xlu0 %7984 }
0x2519   :  { %v7987_v24 = vpop.permute.xlu1 %7986 }
0x251a   :  { %8038 = vmatprep.subr.bf16.mxu1 %v7987_v24  ;;  %v7988_v2 = vsel %vm2283_vm14, %v7985_v29, %v7987_v24  ;;  %v8145_v29 = vld [vmem:[%s17920_s2 + $0x250] sm:$0xff]  ;;  %v8151_v24 = vld [vmem:[%s17920_s2 + $0x280] sm:$0xff]  ;;  %vm17923_vm14 = vmmov %vm17922_vm13 }
0x251b   :  { %8039 = vmatpush1.bf16.msra.mxu1 %v7988_v2  ;;  %v8158_v2 = vld [vmem:[%s17920_s2 + $0x2b8] sm:$0xff] }
0x251c   :  { %v7992_v8 = vpop.permute.xlu0 %7991 }
0x251d   :  { %v7994_v61 = vpop.permute.xlu1 %7993 }
0x251e   :  { %8040 = vmatprep.subr.bf16.mxu1 %v7994_v61  ;;  %v7995_v20 = vsel %vm744_vm5, %v7992_v8, %v7994_v61  ;;  %v8164_v8 = vld [vmem:[%s17920_s2 + $0x2e8] sm:$0xff]  ;;  %v13073_v61 = vpack.c.bf16 %v8151_v24, %v8145_v29  ;;  %v8081_v29 = vld [vmem:[%s17920_s2 + $0x50] sm:$0xff] }
0x251f   :  { %8041 = vmatpush1.bf16.msra.mxu1 %v7995_v20  ;;  %v13075_v20 = vpack.c.bf16 %v8164_v8, %v8158_v2 }
0x2520   :  { %v7999_v46 = vpop.permute.xlu0 %7998 }
0x2521   :  { %v8001_v6 = vpop.permute.xlu1 %8000 }
0x2522   :  { %8042 = vmatprep.subr.bf16.mxu1 %v8001_v6  ;;  %v8002_v42 = vsel %vm2294_vm15, %v7999_v46, %v8001_v6  ;;  %v8157_v46 = vld [vmem:[%s17920_s2 + $0x2b0] sm:$0xff]  ;;  %v8163_v6 = vld [vmem:[%s17920_s2 + $0x2e0] sm:$0xff]  ;;  %vm17924_vm15 = vcmask 891904  }
0x2523   :  { %8043 = vmatpush1.bf16.msra.mxu1 %v8002_v42  ;;  %v13077_v42 = vpack.c.bf16 %v8163_v6, %v8157_v46  ;;  %v13819_v6 = vld [vmem:[#allocation48] ss:$24 sps:$4 sm:$0xff]  }
0x2524   :  { %v8006_v33 = vpop.permute.xlu0 %8005 }
0x2525   :  { %v8008_v37 = vpop.permute.xlu1 %8007 }
0x2526   :  { %8044 = vmatprep.subr.bf16.mxu1 %v8008_v37  ;;  %v8009_v12 = vsel %vm2300_vm11, %v8006_v33, %v8008_v37  ;;  %v13079_v33 = vpack.c.bf16 %v8176_v62, %v8170_v59  ;;  %v8188_v37 = vld [vmem:[%s17920_s2 + $0x3a8] sm:$0xff]  ;;  %vm17925_vm11 = vmmov %vm17924_vm15 }
0x2527   :  { %8045 = vmatpush1.bf16.msra.mxu1 %v8009_v12  ;;  %v13083_v31 = vpack.c.bf16 %v8188_v37, %v8182_v18  ;;  %v8181_v12 = vld [vmem:[%s17920_s2 + $0x370] sm:$0xff]  ;;  %v8100_v18 = vld [vmem:[%s17920_s2 + $0xe8] sm:$0xff]  ;;  %v8106_v37 = vld [vmem:[%s17920_s2 + $0x118] sm:$0xff] }
0x2528   :  { %13048 = vmatprep.subr.bf16.mxu1 %v13047_v40  ;;  %v8169_v40 = vld [vmem:[%s17920_s2 + $0x310] sm:$0xff] }
0x2529   :  { %v13081_v10 = vpack.c.bf16 %v8175_v32, %v8169_v40  ;;  %v13824_v32 = vld [vmem:[#allocation48 + $0x34] ss:$24 sps:$4 sm:$0xff]  }
0x252a   :  { %8061 = vmatmul.mubr.bf16.vlgmr.msra.gmra.mrb[196].mxu1 %v11783_v36  ;;  %v8187_v36 = vld [vmem:[%s17920_s2 + $0x3a0] sm:$0xff] }
0x252b   :  { %13050 = vmatpush1.bf16.msra.mxu1 %v13049_v26  ;;  %v8194_v26 = vld [vmem:[%s17920_s2 + $0x3d8] sm:$0xff]  ;;  %v13085_v11 = vpack.c.bf16 %v8187_v36, %v8181_v12  ;;  %v13103_v36 = vpack.c.bf16 %v8106_v37, %v8100_v18 }
0x252c   :  { %13052 = vmatprep.subr.bf16.mxu1 %v13051_v34  ;;  %v8200_v34 = vld [vmem:[%s17920_s2 + $0x408] sm:$0xff] }
0x252d   :  { %v13087_v17 = vpack.c.bf16 %v8200_v34, %v8194_v26  ;;  %v13827_v26 = vld [vmem:[#allocation48 + $0x64] ss:$24 sps:$4 sm:$0xff]  }
0x252e   :  { %v8099_v34 = vld [vmem:[%s17920_s2 + $0xe0] sm:$0xff] }
0x252f   :  { %13054 = vmatpush1.bf16.msra.mxu1 %v13053_v27  ;;  %v13089_v27 = vpack.c.bf16 %v8199_v41, %v8193_v13  ;;  %v13825_v13 = vld [vmem:[#allocation48 + $0x60] ss:$24 sps:$4 sm:$0xff]  }
0x2530   :  { %13056 = vmatprep.subr.bf16.mxu1 %v13055_v55  ;;  %v8204_v55 = vld [vmem:[%s17920_s2 + $0x428] sm:$0xff] }
0x2531   :  { %v13043_v63 = vpack.c.bf16 %v8210_v5, %v8204_v55  ;;  %v13830_v55 = vld [vmem:[#allocation48 + $0x94] ss:$24 sps:$4 sm:$0xff]  }
0x2532   :  { %v8111_v5 = vld [vmem:[%s17920_s2 + $0x140] sm:$0xff] }
0x2533   :  { %13058 = vmatpush1.bf16.msra.mxu1 %v13057_v16  ;;  %v8203_v16 = vld [vmem:[%s17920_s2 + $0x420] sm:$0xff]  ;;  %13044 = vmatprep.subr.bf16.mxu0 %v13043_v63  ;;  %v8124_v63 = vld [vmem:[%s17920_s2 + $0x1a8] sm:$0xff] }
0x2534   :  { %13060 = vmatprep.subr.bf16.mxu1 %v13059_v15  ;;  %v8209_v15 = vld [vmem:[%s17920_s2 + $0x450] sm:$0xff] }
0x2535   :  { %v13045_v30 = vpack.c.bf16 %v8209_v15, %v8203_v16  ;;  %v8017_v58 = vpop.permute.xlu0 %8016  ;;  %v13828_v16 = vld [vmem:[#allocation48 + $0x90] ss:$24 sps:$4 sm:$0xff]   ;;  %v13109_v15 = vpack.c.bf16 %v8117_v14, %v8111_v5  ;;  %v8202_v5 = vld [vmem:[%s17920_s2 + $0x418] sm:$0xff] }
0x2536   :  { %v13846_v14 = vld [vmem:[#allocation48 + $0x1b0] ss:$24 sps:$4 sm:$0xff]  }
0x2537   :  { %13062 = vmatpush1.bf16.msra.mxu1 %v13061_v47  ;;  %v13093_v47 = vpack.c.bf16 %v8211_v9, %v8205_v3  ;;  %13046 = vmatpush1.bf16.msra.mxu0 %v13045_v30  ;;  %v13833_v30 = vld [vmem:[#allocation48 + $0xc4] ss:$24 sps:$4 sm:$0xff]  }
0x2538   :  { %13064 = vmatprep.subr.bf16.mxu1 %v13063_v38  ;;  %v8216_v38 = vld [vmem:[%s17920_s2 + $0x488] sm:$0xff]  ;;  %v8123_v3 = vld [vmem:[%s17920_s2 + $0x1a0] sm:$0xff]  ;;  %v8129_v9 = vld [vmem:[%s17920_s2 + $0x1d0] sm:$0xff] }
0x2539   :  { %8272 = vmatprep.subr.mxu0 %v8216_v38  ;;  %v8142_v38 = vld [vmem:[%s17920_s2 + $0x238] sm:$0xff] }
0x253b   :  { %13066 = vmatpush1.bf16.msra.mxu1 %v13065_v22  ;;  %v8082_v22 = vld [vmem:[%s17920_s2 + $0x58] sm:$0xff]  ;;  %8273 = vmatpush1.msra.mxu0 %v8215_v48 }
0x253c   :  { %13068 = vmatprep.subr.bf16.mxu1 %v13067_v1  ;;  %v13095_v1 = vpack.c.bf16 %v8082_v22, %v8076_v0  ;;  %v13113_v0 = vpack.c.bf16 %v8129_v9, %v8123_v3  ;;  %v8135_v22 = vld [vmem:[%s17920_s2 + $0x200] sm:$0xff]  ;;  %v8214_v3 = vld [vmem:[%s17920_s2 + $0x478] sm:$0xff] }
0x253d   :  { %v13849_v9 = vld [vmem:[#allocation48 + $0x1e0] ss:$24 sps:$4 sm:$0xff]  }
0x253e   :  { %13096 = vmatprep.subr.bf16.mxu0 %v13095_v1  ;;  %v8141_v1 = vld [vmem:[%s17920_s2 + $0x230] sm:$0xff] }
0x253f   :  { %13070 = vmatpush1.bf16.msra.mxu1 %v13069_v52 }
0x2540   :  { %13072 = vmatprep.subr.bf16.mxu1 %v13071_v56  ;;  %v8075_v56 = vld [vmem:[%s17920_s2 + $0x20] sm:$0xff] }
0x2541   :  { %v13097_v59 = vpack.c.bf16 %v8081_v29, %v8075_v56  ;;  %v13839_v56 = vld [vmem:[#allocation48 + $0x124] ss:$24 sps:$4 sm:$0xff]  }
0x2542   :  { %v8147_v29 = vld [vmem:[%s17920_s2 + $0x260] sm:$0xff] }
0x2543   :  { %13074 = vmatpush1.bf16.msra.mxu1 %v13073_v61  ;;  %v8088_v61 = vld [vmem:[%s17920_s2 + $0x88] sm:$0xff] }
0x2544   :  { %13076 = vmatprep.subr.bf16.mxu1 %v13075_v20  ;;  %v8094_v20 = vld [vmem:[%s17920_s2 + $0xb8] sm:$0xff] }
0x2545   :  { %v13099_v40 = vpack.c.bf16 %v8094_v20, %v8088_v61  ;;  %v13837_v61 = vld [vmem:[#allocation48 + $0x120] ss:$24 sps:$4 sm:$0xff]  }
0x2547   :  { %13078 = vmatpush1.bf16.msra.mxu1 %v13077_v42  ;;  %v8087_v42 = vld [vmem:[%s17920_s2 + $0x80] sm:$0xff] }
0x2548   :  { %13080 = vmatprep.subr.bf16.mxu1 %v13079_v33  ;;  %v8093_v33 = vld [vmem:[%s17920_s2 + $0xb0] sm:$0xff] }
0x2549   :  { %v13101_v12 = vpack.c.bf16 %v8093_v33, %v8087_v42  ;;  %v8165_v42 = vld [vmem:[%s17920_s2 + $0x2f0] sm:$0xff]  ;;  %v8172_v33 = vld [vmem:[%s17920_s2 + $0x328] sm:$0xff] }
0x254b   :  { %13082 = vmatpush1.bf16.msra.mxu1 %v13081_v10  ;;  %v17276_v10 = vpack.c.bf16 %v16069_v50, %v16069_v50  ;;  %v8112_v50 = vld [vmem:[%s17920_s2 + $0x148] sm:$0xff] }
0x254c   :  { %13084 = vmatprep.subr.bf16.mxu1 %v13083_v31  ;;  %v13822_v31 = vld [vmem:[#allocation48 + $0x30] ss:$24 sps:$4 sm:$0xff]  }
0x254f   :  { %13086 = vmatpush1.bf16.msra.mxu1 %v13085_v11  ;;  %v8105_v11 = vld [vmem:[%s17920_s2 + $0x110] sm:$0xff] }
0x2550   :  { %13088 = vmatprep.subr.bf16.mxu1 %v13087_v17  ;;  %v8118_v17 = vld [vmem:[%s17920_s2 + $0x178] sm:$0xff]  ;;  %v13105_v41 = vpack.c.bf16 %v8105_v11, %v8099_v34 }
0x2551   :  { %v8190_v34 = vld [vmem:[%s17920_s2 + $0x3b8] sm:$0xff] }
0x2552   :  { %v13843_v11 = vld [vmem:[#allocation48 + $0x180] ss:$24 sps:$4 sm:$0xff]  }
0x2553   :  { %13090 = vmatpush1.bf16.msra.mxu1 %v13089_v27  ;;  %v13107_v27 = vpack.c.bf16 %v8118_v17, %v8112_v50 }
0x2554   :  { %13092 = vmatprep.subr.bf16.mxu1 %v13091_v4  ;;  %v13111_v4 = vpack.c.bf16 %v8130_v35, %v8124_v63 }
0x2557   :  { %13094 = vmatpush1.bf16.msra.mxu1 %v13093_v47  ;;  %v8136_v47 = vld [vmem:[%s17920_s2 + $0x208] sm:$0xff] }
0x2558   :  { %8343 = vmatprep.subr.mxu1 %v8218_v25  ;;  %v13831_v25 = vld [vmem:[#allocation48 + $0xc0] ss:$24 sps:$4 sm:$0xff]   ;;  %v13115_v48 = vpack.c.bf16 %v8142_v38, %v8136_v47 }
0x255b   :  { %8344 = vmatpush1.msra.mxu1 %v8217_v39  ;;  %v13836_v39 = vld [vmem:[#allocation48 + $0xf4] ss:$24 sps:$4 sm:$0xff]  }
0x255c   :  { %9929 = vmatprep.subr.bf16.mxu1 %v13821_v53  ;;  %v8148_v53 = vld [vmem:[%s17920_s2 + $0x268] sm:$0xff] }
0x25fd   :  { %v8062_v7 = vpop.f32.mrb[196].mxu1 }
0x25fe   :  { %v8063_v43 = vadd.f32 %v8062_v7, %v8017_v58  ;;  %v8064_v52 = vpop.f32.mrb[197].mxu1  ;;  %v13834_v7 = vld [vmem:[#allocation48 + $0xf0] ss:$24 sps:$4 sm:$0xff]  }
0x25ff   :  { %v8065_v24 = vadd.f32 %v8064_v52, %v8017_v58  ;;  %v8066_v2 = vpop.f32.mrb[198].mxu1  ;;  %v8154_v58 = vld [vmem:[%s17920_s2 + $0x298] sm:$0xff] }
0x2600   :  { %v8067_v8 = vpop.f32.mrb[199].mxu1  ;;  %v17264_v62 = vmax.f32 %v8063_v43, 0.0  ;;  %v13117_v43 = vpack.c.bf16 %v8141_v1, %v8135_v22  ;;  %v13119_v52 = vpack.c.bf16 %v8154_v58, %v8148_v53  ;;  %v8160_v2 = vld [vmem:[%s17920_s2 + $0x2c8] sm:$0xff]  ;;  %v13857_v1 = vld [vmem:[#allocation48 + $0x244] ss:$24 sps:$4 sm:$0xff]  }
0x2601   :  { %v8070_v46 = vmax.f32 %v8065_v24, 0.0  ;;  %v8153_v24 = vld [vmem:[%s17920_s2 + $0x290] sm:$0xff]  ;;  %v8166_v8 = vld [vmem:[%s17920_s2 + $0x2f8] sm:$0xff]  ;;  %v8220_v53 = vld [vmem:[%s17920_s2 + $0x4a8] sm:$0xff] }
0x2602   :  { %v13121_v20 = vpack.c.bf16 %v8153_v24, %v8147_v29  ;;  %v13855_v58 = vld [vmem:[#allocation48 + $0x240] ss:$24 sps:$4 sm:$0xff]   ;;  %v13866_v29 = vld [vmem:[#allocation48 + $0x3c] ss:$24 sps:$4 sm:$0xff]   ;;  %v13861_v24 = vld [vmem:[#allocation48 + $0x270] ss:$24 sps:$4 sm:$0xff]  }
0x2603   :  { %11786 = vmatprep.mubr.msk.f32.mxu0 %vm908_vm9, %v8070_v46  ;;  %11787 = vmatprep.mubr.msk.f32.mxu1 %vm908_vm9, %v8070_v46 }
0x2604   :  { %8289 = vmatmul.mubr.f32.vlgmr.msra.gmra.mrb[176].mxu0 %v17264_v62  ;;  %8360 = vmatmul.mubr.f32.vlgmr.msra.gmra.mrb[200].mxu1 %v17264_v62 }
0x2605   :  { %13098 = vmatpush1.bf16.msra.mxu0 %v13097_v59  ;;  %9930 = vmatpush1.bf16.msra.mxu1 %v13819_v6  ;;  %v13842_v6 = vld [vmem:[#allocation48 + $0x154] ss:$24 sps:$4 sm:$0xff]  }
0x2606   :  { %11788 = vmatprep.mubr.msk.f32.mxu0 %vm908_vm9, %v8070_v46  ;;  %9961 = vmatprep.mubr.bf16.mxu1 %v17276_v10  ;;  %v13123_v46 = vpack.c.bf16 %v8166_v8, %v8160_v2  ;;  %v8159_v59 = vld [vmem:[%s17920_s2 + $0x2c0] sm:$0xff]  ;;  %v13864_v8 = vld [vmem:[#allocation48 + $0x38] ss:$24 sps:$4 sm:$0xff]  }
0x2607   :  { %13100 = vmatprep.subr.bf16.mxu0 %v13099_v40  ;;  %9931 = vmatprep.subr.bf16.mxu1 %v13824_v32  ;;  %v8178_v40 = vld [vmem:[%s17920_s2 + $0x358] sm:$0xff]  ;;  %v13840_v32 = vld [vmem:[#allocation48 + $0x150] ss:$24 sps:$4 sm:$0xff]   ;;  %v13125_v18 = vpack.c.bf16 %v8165_v42, %v8159_v59 }
0x2608   :  { %v13127_v37 = vpack.c.bf16 %v8178_v40, %v8172_v33  ;;  %v13869_v2 = vld [vmem:[#allocation48 + $0x2a4] ss:$24 sps:$4 sm:$0xff]   ;;  %v13873_v42 = vld [vmem:[#allocation48 + $0x2d0] ss:$24 sps:$4 sm:$0xff]  }
0x2609   :  { %13102 = vmatpush1.bf16.msra.mxu0 %v13101_v12  ;;  %9932 = vmatpush1.bf16.msra.mxu1 %v13822_v31  ;;  %v13845_v31 = vld [vmem:[#allocation48 + $0x184] ss:$24 sps:$4 sm:$0xff]   ;;  %v13876_v33 = vld [vmem:[#allocation48 + $0x98] ss:$24 sps:$4 sm:$0xff]  }
0x260a   :  { %13104 = vmatprep.subr.bf16.mxu0 %v13103_v36  ;;  %9933 = vmatprep.subr.bf16.mxu1 %v13827_v26  ;;  %v8171_v12 = vld [vmem:[%s17920_s2 + $0x320] sm:$0xff]  ;;  %v8177_v36 = vld [vmem:[%s17920_s2 + $0x350] sm:$0xff]  ;;  %v8184_v26 = vld [vmem:[%s17920_s2 + $0x388] sm:$0xff] }
0x260b   :  { %v13129_v50 = vpack.c.bf16 %v8177_v36, %v8171_v12  ;;  %v13131_v17 = vpack.c.bf16 %v8190_v34, %v8184_v26  ;;  %v13878_v59 = vld [vmem:[#allocation48 + $0x9c] ss:$24 sps:$4 sm:$0xff]   ;;  %v13884_v40 = vld [vmem:[#allocation48 + $0xcc] ss:$24 sps:$4 sm:$0xff]   ;;  %v13882_v12 = vld [vmem:[#allocation48 + $0xc8] ss:$24 sps:$4 sm:$0xff]  }
0x260c   :  { %v13890_v36 = vld [vmem:[#allocation48 + $0xfc] ss:$24 sps:$4 sm:$0xff]   ;;  %v13885_v26 = vld [vmem:[#allocation48 + $0x330] ss:$24 sps:$4 sm:$0xff]  }
0x260d   :  { %13106 = vmatpush1.bf16.msra.mxu0 %v13105_v41  ;;  %9934 = vmatpush1.bf16.msra.mxu1 %v13825_v13  ;;  %v13848_v13 = vld [vmem:[#allocation48 + $0x1b4] ss:$24 sps:$4 sm:$0xff]   ;;  %v13893_v34 = vld [vmem:[#allocation48 + $0x364] ss:$24 sps:$4 sm:$0xff]  }
0x260e   :  { %13108 = vmatprep.subr.bf16.mxu0 %v13107_v27  ;;  %9935 = vmatprep.subr.bf16.mxu1 %v13830_v55  ;;  %v8183_v41 = vld [vmem:[%s17920_s2 + $0x380] sm:$0xff]  ;;  %v8189_v27 = vld [vmem:[%s17920_s2 + $0x3b0] sm:$0xff]  ;;  %v8196_v55 = vld [vmem:[%s17920_s2 + $0x3e8] sm:$0xff] }
0x260f   :  { %v13133_v63 = vpack.c.bf16 %v8189_v27, %v8183_v41  ;;  %v13135_v35 = vpack.c.bf16 %v8202_v5, %v8196_v55  ;;  %v13897_v41 = vld [vmem:[#allocation48 + $0x390] ss:$24 sps:$4 sm:$0xff]   ;;  %v13905_v27 = vld [vmem:[#allocation48 + $0x3c4] ss:$24 sps:$4 sm:$0xff]  }
0x2610   :  { %v13900_v55 = vld [vmem:[#allocation48 + $0x158] ss:$24 sps:$4 sm:$0xff]   ;;  %v13908_v5 = vld [vmem:[#allocation48 + $0x18c] ss:$24 sps:$4 sm:$0xff]  }
0x2611   :  { %13110 = vmatpush1.bf16.msra.mxu0 %v13109_v15  ;;  %9936 = vmatpush1.bf16.msra.mxu1 %v13828_v16  ;;  %v13851_v16 = vld [vmem:[#allocation48 + $0x1e4] ss:$24 sps:$4 sm:$0xff]  }
0x2612   :  { %13112 = vmatprep.subr.bf16.mxu0 %v13111_v4  ;;  %9937 = vmatprep.subr.bf16.mxu1 %v13833_v30  ;;  %v8195_v15 = vld [vmem:[%s17920_s2 + $0x3e0] sm:$0xff]  ;;  %v8201_v4 = vld [vmem:[%s17920_s2 + $0x410] sm:$0xff]  ;;  %v8208_v30 = vld [vmem:[%s17920_s2 + $0x448] sm:$0xff] }
0x2613   :  { %v13137_v47 = vpack.c.bf16 %v8201_v4, %v8195_v15  ;;  %v13139_v38 = vpack.c.bf16 %v8214_v3, %v8208_v30  ;;  %v13909_v15 = vld [vmem:[#allocation48 + $0x3f0] ss:$24 sps:$4 sm:$0xff]   ;;  %v13917_v4 = vld [vmem:[#allocation48 + $0x424] ss:$24 sps:$4 sm:$0xff]  }
0x2614   :  { %v13912_v30 = vld [vmem:[#allocation48 + $0x1b8] ss:$24 sps:$4 sm:$0xff]   ;;  %v13920_v3 = vld [vmem:[#allocation48 + $0x1ec] ss:$24 sps:$4 sm:$0xff]  }
0x2615   :  { %13114 = vmatpush1.bf16.msra.mxu0 %v13113_v0  ;;  %9938 = vmatpush1.bf16.msra.mxu1 %v13831_v25  ;;  %v13854_v25 = vld [vmem:[#allocation48 + $0x214] ss:$24 sps:$4 sm:$0xff]  }
0x2616   :  { %13116 = vmatprep.subr.bf16.mxu0 %v13115_v48  ;;  %9939 = vmatprep.subr.bf16.mxu1 %v13836_v39  ;;  %v8207_v0 = vld [vmem:[%s17920_s2 + $0x440] sm:$0xff]  ;;  %v8213_v48 = vld [vmem:[%s17920_s2 + $0x470] sm:$0xff] }
0x2617   :  { %v13852_v39 = vld [vmem:[#allocation48 + $0x210] ss:$24 sps:$4 sm:$0xff]   ;;  %v13141_v22 = vpack.c.bf16 %v8213_v48, %v8207_v0  ;;  %v13929_v48 = vld [vmem:[#allocation48 + $0x484] ss:$24 sps:$4 sm:$0xff]  }
0x2618   :  { %v13921_v0 = vld [vmem:[#allocation48 + $0x450] ss:$24 sps:$4 sm:$0xff]  }
0x2619   :  { %13118 = vmatpush1.bf16.msra.mxu0 %v13117_v43  ;;  %9940 = vmatpush1.bf16.msra.mxu1 %v13834_v7  ;;  %v8219_v7 = vld [vmem:[%s17920_s2 + $0x4a0] sm:$0xff] }
0x261a   :  { %13120 = vmatprep.subr.bf16.mxu0 %v13119_v52  ;;  %9941 = vmatprep.subr.bf16.mxu1 %v13839_v56  ;;  %v13860_v43 = vld [vmem:[#allocation48 + $0xc] ss:$24 sps:$4 sm:$0xff]   ;;  %v13858_v52 = vld [vmem:[#allocation48 + $0x8] ss:$24 sps:$4 sm:$0xff]  }
0x261b   :  { %v13863_v56 = vld [vmem:[#allocation48 + $0x274] ss:$24 sps:$4 sm:$0xff]  }
0x261d   :  { %13122 = vmatpush1.bf16.msra.mxu0 %v13121_v20  ;;  %9942 = vmatpush1.bf16.msra.mxu1 %v13837_v61  ;;  %v13872_v61 = vld [vmem:[#allocation48 + $0x6c] ss:$24 sps:$4 sm:$0xff]   ;;  %v13867_v20 = vld [vmem:[#allocation48 + $0x2a0] ss:$24 sps:$4 sm:$0xff]  }
0x261e   :  { %13124 = vmatprep.subr.bf16.mxu0 %v13123_v46  ;;  %9943 = vmatprep.subr.bf16.mxu1 %v13842_v6  ;;  %v13875_v46 = vld [vmem:[#allocation48 + $0x2d4] ss:$24 sps:$4 sm:$0xff]   ;;  %v13870_v6 = vld [vmem:[#allocation48 + $0x68] ss:$24 sps:$4 sm:$0xff]  }
0x2621   :  { %13126 = vmatpush1.bf16.msra.mxu0 %v13125_v18  ;;  %9944 = vmatpush1.bf16.msra.mxu1 %v13840_v32  ;;  %v13879_v32 = vld [vmem:[#allocation48 + $0x300] ss:$24 sps:$4 sm:$0xff]   ;;  %v17324_v18 = vpack.c.bf16 %v16073_v19, %v16073_v19 }
0x2622   :  { %13128 = vmatprep.subr.bf16.mxu0 %v13127_v37  ;;  %9945 = vmatprep.subr.bf16.mxu1 %v13845_v31  ;;  %v13887_v37 = vld [vmem:[#allocation48 + $0x334] ss:$24 sps:$4 sm:$0xff]   ;;  %v17328_v31 = vpack.c.bf16 %v16075_v21, %v16075_v21  ;;  %v13888_v19 = vld [vmem:[#allocation48 + $0xf8] ss:$24 sps:$4 sm:$0xff]  }
0x2623   :  { %v13899_v21 = vld [vmem:[#allocation48 + $0x394] ss:$24 sps:$4 sm:$0xff]  }
0x2625   :  { %13130 = vmatpush1.bf16.msra.mxu0 %v13129_v50  ;;  %9946 = vmatpush1.bf16.msra.mxu1 %v13843_v11  ;;  %v13896_v11 = vld [vmem:[#allocation48 + $0x12c] ss:$24 sps:$4 sm:$0xff]   ;;  %v13891_v50 = vld [vmem:[#allocation48 + $0x360] ss:$24 sps:$4 sm:$0xff]  }
0x2626   :  { %13132 = vmatprep.subr.bf16.mxu0 %v13131_v17  ;;  %9947 = vmatprep.subr.bf16.mxu1 %v13848_v13  ;;  %v13894_v17 = vld [vmem:[#allocation48 + $0x128] ss:$24 sps:$4 sm:$0xff]   ;;  %v13902_v13 = vld [vmem:[#allocation48 + $0x15c] ss:$24 sps:$4 sm:$0xff]  }
0x2629   :  { %13134 = vmatpush1.bf16.msra.mxu0 %v13133_v63  ;;  %9948 = vmatpush1.bf16.msra.mxu1 %v13846_v14  ;;  %v13903_v14 = vld [vmem:[#allocation48 + $0x3c0] ss:$24 sps:$4 sm:$0xff]   ;;  %v13911_v63 = vld [vmem:[#allocation48 + $0x3f4] ss:$24 sps:$4 sm:$0xff]  }
0x262a   :  { %13136 = vmatprep.subr.bf16.mxu0 %v13135_v35  ;;  %9949 = vmatprep.subr.bf16.mxu1 %v13851_v16  ;;  %v13906_v35 = vld [vmem:[#allocation48 + $0x188] ss:$24 sps:$4 sm:$0xff]   ;;  %v13914_v16 = vld [vmem:[#allocation48 + $0x1bc] ss:$24 sps:$4 sm:$0xff]  }
0x262d   :  { %13138 = vmatpush1.bf16.msra.mxu0 %v13137_v47  ;;  %9950 = vmatpush1.bf16.msra.mxu1 %v13849_v9  ;;  %v13915_v9 = vld [vmem:[#allocation48 + $0x420] ss:$24 sps:$4 sm:$0xff]   ;;  %v13923_v47 = vld [vmem:[#allocation48 + $0x454] ss:$24 sps:$4 sm:$0xff]  }
0x262e   :  { %13140 = vmatprep.subr.bf16.mxu0 %v13139_v38  ;;  %9951 = vmatprep.subr.bf16.mxu1 %v13854_v25  ;;  %v13918_v38 = vld [vmem:[#allocation48 + $0x1e8] ss:$24 sps:$4 sm:$0xff]   ;;  %v13926_v25 = vld [vmem:[#allocation48 + $0x21c] ss:$24 sps:$4 sm:$0xff]  }
0x2631   :  { %13142 = vmatpush1.bf16.msra.mxu0 %v13141_v22  ;;  %9952 = vmatpush1.bf16.msra.mxu1 %v13852_v39  ;;  %v13924_v39 = vld [vmem:[#allocation48 + $0x218] ss:$24 sps:$4 sm:$0xff]   ;;  %v13932_v22 = vld [vmem:[#allocation48 + $0x24c] ss:$24 sps:$4 sm:$0xff]  }
0x2632   :  { %8414 = vmatprep.subr.mxu0 %v8220_v53  ;;  %9953 = vmatprep.subr.bf16.mxu1 %v13857_v1  ;;  %v13927_v1 = vld [vmem:[#allocation48 + $0x480] ss:$24 sps:$4 sm:$0xff]   ;;  %v13935_v53 = vld [vmem:[#allocation48 + $0x4b4] ss:$24 sps:$4 sm:$0xff]  }
0x2635   :  { %8415 = vmatpush1.msra.mxu0 %v8219_v7  ;;  %9954 = vmatpush1.bf16.msra.mxu1 %v13855_v58  ;;  %v13930_v58 = vld [vmem:[#allocation48 + $0x248] ss:$24 sps:$4 sm:$0xff]   ;;  %v13938_v7 = vld [vmem:[#allocation48 + $0x27c] ss:$24 sps:$4 sm:$0xff]  }
0x2636   :  { %8431 = vmatmul.mubr.f32.vlgmr.msra.gmra.mrb[178].mxu0 %v17264_v62  ;;  %10052 = vmatprep.subr.bf16.mxu0 %v13860_v43  ;;  %v13881_v62 = vld [vmem:[#allocation48 + $0x304] ss:$24 sps:$4 sm:$0xff]   ;;  %v13933_v43 = vld [vmem:[#allocation48 + $0x4b0] ss:$24 sps:$4 sm:$0xff]  }
0x2637   :  { %10053 = vmatpush1.bf16.msra.mxu0 %v13858_v52  ;;  %10084 = vmatprep.mubr.bf16.mxu0 %v17276_v10  ;;  %v13941_v52 = vld [vmem:[#allocation48 + $0x4e4] ss:$24 sps:$4 sm:$0xff]  }
0x2638   :  { %9955 = vmatprep.subr.bf16.mxu1 %v13863_v56  ;;  %10054 = vmatprep.subr.bf16.mxu0 %v13866_v29  ;;  %v13936_v56 = vld [vmem:[#allocation48 + $0x278] ss:$24 sps:$4 sm:$0xff]   ;;  %v13944_v29 = vld [vmem:[#allocation48 + $0x2ac] ss:$24 sps:$4 sm:$0xff]  }
0x2639   :  { %9956 = vmatpush1.bf16.msra.mxu1 %v13861_v24  ;;  %v13939_v24 = vld [vmem:[#allocation48 + $0x4e0] ss:$24 sps:$4 sm:$0xff]  }
0x263a   :  { %9957 = vmatprep.subr.bf16.mxu1 %v13869_v2  ;;  %v13947_v2 = vld [vmem:[#allocation48 + $0x514] ss:$24 sps:$4 sm:$0xff]  }
0x263b   :  { %10055 = vmatpush1.bf16.msra.mxu0 %v13864_v8  ;;  %v13942_v8 = vld [vmem:[#allocation48 + $0x2a8] ss:$24 sps:$4 sm:$0xff]  }
0x263c   :  { %10056 = vmatprep.subr.bf16.mxu0 %v13872_v61  ;;  %v13950_v61 = vld [vmem:[#allocation48 + $0x2dc] ss:$24 sps:$4 sm:$0xff]  }
0x263d   :  { %9958 = vmatpush1.bf16.msra.mxu1 %v13867_v20  ;;  %v13945_v20 = vld [vmem:[#allocation48 + $0x510] ss:$24 sps:$4 sm:$0xff]  }
0x263e   :  { %9959 = vmatprep.subr.bf16.mxu1 %v13875_v46  ;;  %v13953_v46 = vld [vmem:[#allocation48 + $0x544] ss:$24 sps:$4 sm:$0xff]  }
0x263f   :  { %10057 = vmatpush1.bf16.msra.mxu0 %v13870_v6  ;;  %v13948_v6 = vld [vmem:[#allocation48 + $0x2d8] ss:$24 sps:$4 sm:$0xff]  }
0x2640   :  { %10058 = vmatprep.subr.bf16.mxu0 %v13878_v59  ;;  %v13956_v59 = vld [vmem:[#allocation48 + $0x30c] ss:$24 sps:$4 sm:$0xff]  }
0x2641   :  { %9960 = vmatpush1.bf16.msra.mxu1 %v13873_v42  ;;  %v13951_v42 = vld [vmem:[#allocation48 + $0x540] ss:$24 sps:$4 sm:$0xff]  }
0x2642   :  { %9970 = vmatprep.subr.bf16.mxu1 %v13881_v62  ;;  %v13959_v62 = vld [vmem:[#allocation48 + $0x574] ss:$24 sps:$4 sm:$0xff]  }
0x2643   :  { %10059 = vmatpush1.bf16.msra.mxu0 %v13876_v33  ;;  %v13954_v33 = vld [vmem:[#allocation48 + $0x308] ss:$24 sps:$4 sm:$0xff]  }
0x2644   :  { %9962 = vmatmul.mubr.bf16.vlgmr.msra.gmra.mrb[204].mxu1 %v17324_v18  ;;  %10060 = vmatprep.subr.bf16.mxu0 %v13884_v40  ;;  %v13962_v40 = vld [vmem:[#allocation48 + $0x33c] ss:$24 sps:$4 sm:$0xff]  }
0x2645   :  { %9971 = vmatpush1.bf16.msra.mxu1 %v13879_v32  ;;  %10002 = vmatprep.mubr.bf16.mxu1 %v17328_v31  ;;  %v13957_v32 = vld [vmem:[#allocation48 + $0x570] ss:$24 sps:$4 sm:$0xff]  }
0x2646   :  { %9972 = vmatprep.subr.bf16.mxu1 %v13887_v37  ;;  %v13965_v37 = vld [vmem:[#allocation48 + $0x5a4] ss:$24 sps:$4 sm:$0xff]  }
0x2647   :  { %10061 = vmatpush1.bf16.msra.mxu0 %v13882_v12  ;;  %v13960_v12 = vld [vmem:[#allocation48 + $0x338] ss:$24 sps:$4 sm:$0xff]  }
0x2648   :  { %10062 = vmatprep.subr.bf16.mxu0 %v13890_v36  ;;  %v13968_v36 = vld [vmem:[#allocation48 + $0x36c] ss:$24 sps:$4 sm:$0xff]  }
0x2649   :  { %9973 = vmatpush1.bf16.msra.mxu1 %v13885_v26  ;;  %v13963_v26 = vld [vmem:[#allocation48 + $0x5a0] ss:$24 sps:$4 sm:$0xff]  }
0x264a   :  { %9974 = vmatprep.subr.bf16.mxu1 %v13893_v34  ;;  %v13971_v34 = vld [vmem:[#allocation48 + $0x5d4] ss:$24 sps:$4 sm:$0xff]  }
0x264b   :  { %10063 = vmatpush1.bf16.msra.mxu0 %v13888_v19  ;;  %v13966_v19 = vld [vmem:[#allocation48 + $0x368] ss:$24 sps:$4 sm:$0xff]  }
0x264c   :  { %10064 = vmatprep.subr.bf16.mxu0 %v13896_v11  ;;  %v13974_v11 = vld [vmem:[#allocation48 + $0x39c] ss:$24 sps:$4 sm:$0xff]  }
0x264d   :  { %9975 = vmatpush1.bf16.msra.mxu1 %v13891_v50  ;;  %v13969_v50 = vld [vmem:[#allocation48 + $0x5d0] ss:$24 sps:$4 sm:$0xff]  }
0x264e   :  { %9976 = vmatprep.subr.bf16.mxu1 %v13899_v21  ;;  %v13977_v21 = vld [vmem:[#allocation48 + $0x604] ss:$24 sps:$4 sm:$0xff]  }
0x264f   :  { %10065 = vmatpush1.bf16.msra.mxu0 %v13894_v17  ;;  %v13972_v17 = vld [vmem:[#allocation48 + $0x398] ss:$24 sps:$4 sm:$0xff]  }
0x2650   :  { %10066 = vmatprep.subr.bf16.mxu0 %v13902_v13  ;;  %v13980_v13 = vld [vmem:[#allocation48 + $0x3cc] ss:$24 sps:$4 sm:$0xff]  }
0x2651   :  { %9977 = vmatpush1.bf16.msra.mxu1 %v13897_v41  ;;  %v13975_v41 = vld [vmem:[#allocation48 + $0x600] ss:$24 sps:$4 sm:$0xff]  }
0x2652   :  { %9978 = vmatprep.subr.bf16.mxu1 %v13905_v27  ;;  %v17336_v27 = vpack.c.bf16 %v16071_v51, %v16071_v51  ;;  %v13989_v51 = vld [vmem:[#allocation48 + $0x664] ss:$24 sps:$4 sm:$0xff]  }
0x2653   :  { %10067 = vmatpush1.bf16.msra.mxu0 %v13900_v55  ;;  %v13983_v55 = vld [vmem:[#allocation48 + $0x634] ss:$24 sps:$4 sm:$0xff]  }
0x2654   :  { %10068 = vmatprep.subr.bf16.mxu0 %v13908_v5  ;;  %v17340_v5 = vpack.c.bf16 %v16095_v57, %v16095_v57  ;;  %v13987_v57 = vld [vmem:[#allocation48 + $0x660] ss:$24 sps:$4 sm:$0xff]  }
0x2655   :  { %9979 = vmatpush1.bf16.msra.mxu1 %v13903_v14  ;;  %v13978_v14 = vld [vmem:[#allocation48 + $0x3c8] ss:$24 sps:$4 sm:$0xff]  }
0x2656   :  { %9980 = vmatprep.subr.bf16.mxu1 %v13911_v63  ;;  %v13986_v63 = vld [vmem:[#allocation48 + $0x3fc] ss:$24 sps:$4 sm:$0xff]  }
0x2657   :  { %10069 = vmatpush1.bf16.msra.mxu0 %v13906_v35  ;;  %v13981_v35 = vld [vmem:[#allocation48 + $0x630] ss:$24 sps:$4 sm:$0xff]  }
0x2658   :  { %10070 = vmatprep.subr.bf16.mxu0 %v13914_v16  ;;  %v13984_v16 = vld [vmem:[#allocation48 + $0x3f8] ss:$24 sps:$4 sm:$0xff]  }
0x2659   :  { %9981 = vmatpush1.bf16.msra.mxu1 %v13909_v15  ;;  %v13992_v15 = vld [vmem:[#allocation48 + $0x42c] ss:$24 sps:$4 sm:$0xff]  }
0x265a   :  { %9982 = vmatprep.subr.bf16.mxu1 %v13917_v4  ;;  %v13995_v4 = vld [vmem:[#allocation48 + $0x694] ss:$24 sps:$4 sm:$0xff]  }
0x265b   :  { %10071 = vmatpush1.bf16.msra.mxu0 %v13912_v30  ;;  %v13990_v30 = vld [vmem:[#allocation48 + $0x428] ss:$24 sps:$4 sm:$0xff]  }
0x265c   :  { %10072 = vmatprep.subr.bf16.mxu0 %v13920_v3  ;;  %v13998_v3 = vld [vmem:[#allocation48 + $0x45c] ss:$24 sps:$4 sm:$0xff]  }
0x265d   :  { %9983 = vmatpush1.bf16.msra.mxu1 %v13915_v9  ;;  %v13993_v9 = vld [vmem:[#allocation48 + $0x690] ss:$24 sps:$4 sm:$0xff]  }
0x265e   :  { %9984 = vmatprep.subr.bf16.mxu1 %v13923_v47  ;;  %v14001_v47 = vld [vmem:[#allocation48 + $0x6c4] ss:$24 sps:$4 sm:$0xff]  }
0x265f   :  { %10073 = vmatpush1.bf16.msra.mxu0 %v13918_v38  ;;  %v13996_v38 = vld [vmem:[#allocation48 + $0x458] ss:$24 sps:$4 sm:$0xff]  }
0x2660   :  { %10074 = vmatprep.subr.bf16.mxu0 %v13926_v25  ;;  %v14004_v25 = vld [vmem:[#allocation48 + $0x48c] ss:$24 sps:$4 sm:$0xff]  }
0x2661   :  { %9985 = vmatpush1.bf16.msra.mxu1 %v13921_v0  ;;  %v13999_v0 = vld [vmem:[#allocation48 + $0x6c0] ss:$24 sps:$4 sm:$0xff]  }
0x2662   :  { %9986 = vmatprep.subr.bf16.mxu1 %v13929_v48  ;;  %v14007_v48 = vld [vmem:[#allocation48 + $0x6f4] ss:$24 sps:$4 sm:$0xff]  }
0x2663   :  { %10075 = vmatpush1.bf16.msra.mxu0 %v13924_v39  ;;  %v14002_v39 = vld [vmem:[#allocation48 + $0x488] ss:$24 sps:$4 sm:$0xff]  }
0x2664   :  { %10076 = vmatprep.subr.bf16.mxu0 %v13932_v22  ;;  %v14010_v22 = vld [vmem:[#allocation48 + $0x4bc] ss:$24 sps:$4 sm:$0xff]  }
0x2665   :  { %9987 = vmatpush1.bf16.msra.mxu1 %v13927_v1  ;;  %v14005_v1 = vld [vmem:[#allocation48 + $0x6f0] ss:$24 sps:$4 sm:$0xff]  }
0x2666   :  { %9988 = vmatprep.subr.bf16.mxu1 %v13935_v53  ;;  %v14013_v53 = vld [vmem:[#allocation48 + $0x724] ss:$24 sps:$4 sm:$0xff]  }
0x2667   :  { %10077 = vmatpush1.bf16.msra.mxu0 %v13930_v58  ;;  %v14008_v58 = vld [vmem:[#allocation48 + $0x4b8] ss:$24 sps:$4 sm:$0xff]  }
0x2668   :  { %10078 = vmatprep.subr.bf16.mxu0 %v13938_v7  ;;  %v14016_v7 = vld [vmem:[#allocation48 + $0x4ec] ss:$24 sps:$4 sm:$0xff]  }
0x2669   :  { %9989 = vmatpush1.bf16.msra.mxu1 %v13933_v43  ;;  %v14011_v43 = vld [vmem:[#allocation48 + $0x720] ss:$24 sps:$4 sm:$0xff]  }
0x266a   :  { %9990 = vmatprep.subr.bf16.mxu1 %v13941_v52  ;;  %v14019_v52 = vld [vmem:[#allocation48 + $0x754] ss:$24 sps:$4 sm:$0xff]  }
0x266b   :  { %10079 = vmatpush1.bf16.msra.mxu0 %v13936_v56  ;;  %v14014_v56 = vld [vmem:[#allocation48 + $0x4e8] ss:$24 sps:$4 sm:$0xff]  }
0x266c   :  { %10080 = vmatprep.subr.bf16.mxu0 %v13944_v29  ;;  %v8689_v29 = vld [vmem:[#allocation48 + $0x780] sm:$0xff] }
0x266d   :  { %9991 = vmatpush1.bf16.msra.mxu1 %v13939_v24  ;;  %v14022_v24 = vld [vmem:[#allocation48 + $0x51c] ss:$24 sps:$4 sm:$0xff]  }
0x266e   :  { %9992 = vmatprep.subr.bf16.mxu1 %v13947_v2  ;;  %v14017_v2 = vld [vmem:[#allocation48 + $0x750] ss:$24 sps:$4 sm:$0xff]  }
0x266f   :  { %10081 = vmatpush1.bf16.msra.mxu0 %v13942_v8  ;;  %v12030_v8 = vcombine.high %v8689_v29, %v8689_v29 }
0x2670   :  { %10082 = vmatprep.subr.bf16.mxu0 %v13950_v61  ;;  %v12029_v61 = vcombine.low %v8689_v29, %v8689_v29  ;;  %v14096_v29 = vld [vmem:[#allocation48 + $0x224] ss:$24 sps:$4 sm:$0xff]  }
0x2671   :  { %9993 = vmatpush1.bf16.msra.mxu1 %v13945_v20  ;;  %v14020_v20 = vld [vmem:[#allocation48 + $0x518] ss:$24 sps:$4 sm:$0xff]  }
0x2672   :  { %9994 = vmatprep.subr.bf16.mxu1 %v13953_v46  ;;  %v14027_v46 = vld [vmem:[#allocation48 + $0x54c] ss:$24 sps:$4 sm:$0xff]  }
0x2673   :  { %10083 = vmatpush1.bf16.msra.mxu0 %v13948_v6  ;;  %v9912_v6 = vsel %vm804_vm1, %v12029_v61, 0  ;;  %v14094_v61 = vld [vmem:[#allocation48 + $0x220] ss:$24 sps:$4 sm:$0xff]  }
0x2674   :  { %10093 = vmatprep.subr.bf16.mxu0 %v13956_v59  ;;  %v14030_v59 = vld [vmem:[#allocation48 + $0x14] ss:$24 sps:$4 sm:$0xff]  }
0x2675   :  { %9995 = vmatpush1.bf16.msra.mxu1 %v13951_v42  ;;  %v14025_v42 = vld [vmem:[#allocation48 + $0x548] ss:$24 sps:$4 sm:$0xff]  }
0x2676   :  { %10085 = vmatmul.mubr.bf16.vlgmr.msra.gmra.mrb[180].mxu0 %v17324_v18  ;;  %9996 = vmatprep.subr.bf16.mxu1 %v13959_v62  ;;  %v14033_v62 = vld [vmem:[#allocation48 + $0x57c] ss:$24 sps:$4 sm:$0xff]  }
0x2677   :  { %10094 = vmatpush1.bf16.msra.mxu0 %v13954_v33  ;;  %10125 = vmatprep.mubr.bf16.mxu0 %v17328_v31  ;;  %v14028_v33 = vld [vmem:[#allocation48 + $0x10] ss:$24 sps:$4 sm:$0xff]  }
0x2678   :  { %10095 = vmatprep.subr.bf16.mxu0 %v13962_v40  ;;  %v17349_v40 = vpack.c.bf16 %v16093_v54, %v16093_v54  ;;  %v14040_v54 = vld [vmem:[#allocation48 + $0x70] ss:$24 sps:$4 sm:$0xff]  }
0x2679   :  { %9997 = vmatpush1.bf16.msra.mxu1 %v13957_v32  ;;  %v14036_v32 = vld [vmem:[#allocation48 + $0x44] ss:$24 sps:$4 sm:$0xff]  }
0x267a   :  { %9998 = vmatprep.subr.bf16.mxu1 %v13965_v37  ;;  %v14031_v37 = vld [vmem:[#allocation48 + $0x578] ss:$24 sps:$4 sm:$0xff]  }
0x267b   :  { %10096 = vmatpush1.bf16.msra.mxu0 %v13960_v12  ;;  %v14039_v12 = vld [vmem:[#allocation48 + $0x5ac] ss:$24 sps:$4 sm:$0xff]  }
0x267c   :  { %10097 = vmatprep.subr.bf16.mxu0 %v13968_v36  ;;  %v14034_v36 = vld [vmem:[#allocation48 + $0x40] ss:$24 sps:$4 sm:$0xff]  }
0x267d   :  { %9999 = vmatpush1.bf16.msra.mxu1 %v13963_v26  ;;  %v14042_v26 = vld [vmem:[#allocation48 + $0x74] ss:$24 sps:$4 sm:$0xff]  }
0x267e   :  { %10000 = vmatprep.subr.bf16.mxu1 %v13971_v34  ;;  %v14037_v34 = vld [vmem:[#allocation48 + $0x5a8] ss:$24 sps:$4 sm:$0xff]  }
0x267f   :  { %10098 = vmatpush1.bf16.msra.mxu0 %v13966_v19  ;;  %v14045_v19 = vld [vmem:[#allocation48 + $0x5dc] ss:$24 sps:$4 sm:$0xff]  }
0x2680   :  { %10099 = vmatprep.subr.bf16.mxu0 %v13974_v11  ;;  %v14048_v11 = vld [vmem:[#allocation48 + $0xa4] ss:$24 sps:$4 sm:$0xff]  }
0x2681   :  { %10001 = vmatpush1.bf16.msra.mxu1 %v13969_v50  ;;  %v14043_v50 = vld [vmem:[#allocation48 + $0x5d8] ss:$24 sps:$4 sm:$0xff]  }
0x2682   :  { %10011 = vmatprep.subr.bf16.mxu1 %v13977_v21  ;;  %v14051_v21 = vld [vmem:[#allocation48 + $0x60c] ss:$24 sps:$4 sm:$0xff]  }
0x2683   :  { %10100 = vmatpush1.bf16.msra.mxu0 %v13972_v17  ;;  %v14046_v17 = vld [vmem:[#allocation48 + $0xa0] ss:$24 sps:$4 sm:$0xff]  }
0x2684   :  { %10003 = vmatmul.mubr.bf16.vlgmr.msra.gmra.mrb[204].mxu1 %v17336_v27  ;;  %10101 = vmatprep.subr.bf16.mxu0 %v13980_v13  ;;  %v14054_v13 = vld [vmem:[#allocation48 + $0xd4] ss:$24 sps:$4 sm:$0xff]  }
0x2685   :  { %10012 = vmatpush1.bf16.msra.mxu1 %v13975_v41  ;;  %12036 = vmatprep.mubr.msk.bf16.mxu1 %vm9907_vm12, %v17340_v5  ;;  %v14057_v41 = vld [vmem:[#allocation48 + $0x63c] ss:$24 sps:$4 sm:$0xff]  }
0x2686   :  { %10013 = vmatprep.subr.bf16.mxu1 %v13983_v55  ;;  %v14052_v55 = vld [vmem:[#allocation48 + $0xd0] ss:$24 sps:$4 sm:$0xff]  }
0x2687   :  { %10102 = vmatpush1.bf16.msra.mxu0 %v13978_v14  ;;  %v14060_v14 = vld [vmem:[#allocation48 + $0x104] ss:$24 sps:$4 sm:$0xff]  }
0x2688   :  { %10103 = vmatprep.subr.bf16.mxu0 %v13986_v63  ;;  %v14055_v63 = vld [vmem:[#allocation48 + $0x638] ss:$24 sps:$4 sm:$0xff]  }
0x2689   :  { %10014 = vmatpush1.bf16.msra.mxu1 %v13981_v35  ;;  %v14063_v35 = vld [vmem:[#allocation48 + $0x66c] ss:$24 sps:$4 sm:$0xff]  }
0x268a   :  { %10015 = vmatprep.subr.bf16.mxu1 %v13989_v51  ;;  %v14058_v51 = vld [vmem:[#allocation48 + $0x100] ss:$24 sps:$4 sm:$0xff]  }
0x268b   :  { %10104 = vmatpush1.bf16.msra.mxu0 %v13984_v16  ;;  %v14066_v16 = vld [vmem:[#allocation48 + $0x134] ss:$24 sps:$4 sm:$0xff]  }
0x268c   :  { %10105 = vmatprep.subr.bf16.mxu0 %v13992_v15  ;;  %v14061_v15 = vld [vmem:[#allocation48 + $0x668] ss:$24 sps:$4 sm:$0xff]  }
0x268d   :  { %10016 = vmatpush1.bf16.msra.mxu1 %v13987_v57  ;;  %v14069_v57 = vld [vmem:[#allocation48 + $0x69c] ss:$24 sps:$4 sm:$0xff]  }
0x268e   :  { %10017 = vmatprep.subr.bf16.mxu1 %v13995_v4  ;;  %v14064_v4 = vld [vmem:[#allocation48 + $0x130] ss:$24 sps:$4 sm:$0xff]  }
0x268f   :  { %10106 = vmatpush1.bf16.msra.mxu0 %v13990_v30  ;;  %v14072_v30 = vld [vmem:[#allocation48 + $0x164] ss:$24 sps:$4 sm:$0xff]  }
0x2690   :  { %10107 = vmatprep.subr.bf16.mxu0 %v13998_v3  ;;  %v14067_v3 = vld [vmem:[#allocation48 + $0x698] ss:$24 sps:$4 sm:$0xff]  }
0x2691   :  { %10018 = vmatpush1.bf16.msra.mxu1 %v13993_v9  ;;  %v14075_v9 = vld [vmem:[#allocation48 + $0x6cc] ss:$24 sps:$4 sm:$0xff]  }
0x2692   :  { %10019 = vmatprep.subr.bf16.mxu1 %v14001_v47  ;;  %v14070_v47 = vld [vmem:[#allocation48 + $0x160] ss:$24 sps:$4 sm:$0xff]  }
0x2693   :  { %10108 = vmatpush1.bf16.msra.mxu0 %v13996_v38  ;;  %v14078_v38 = vld [vmem:[#allocation48 + $0x194] ss:$24 sps:$4 sm:$0xff]  }
0x2694   :  { %10109 = vmatprep.subr.bf16.mxu0 %v14004_v25  ;;  %v14073_v25 = vld [vmem:[#allocation48 + $0x6c8] ss:$24 sps:$4 sm:$0xff]  }
0x2695   :  { %10020 = vmatpush1.bf16.msra.mxu1 %v13999_v0  ;;  %v14081_v0 = vld [vmem:[#allocation48 + $0x6fc] ss:$24 sps:$4 sm:$0xff]  }
0x2696   :  { %10021 = vmatprep.subr.bf16.mxu1 %v14007_v48  ;;  %v14076_v48 = vld [vmem:[#allocation48 + $0x190] ss:$24 sps:$4 sm:$0xff]  }
0x2697   :  { %10110 = vmatpush1.bf16.msra.mxu0 %v14002_v39  ;;  %v14084_v39 = vld [vmem:[#allocation48 + $0x1c4] ss:$24 sps:$4 sm:$0xff]  }
0x2698   :  { %10111 = vmatprep.subr.bf16.mxu0 %v14010_v22  ;;  %v14079_v22 = vld [vmem:[#allocation48 + $0x6f8] ss:$24 sps:$4 sm:$0xff]  }
0x2699   :  { %10022 = vmatpush1.bf16.msra.mxu1 %v14005_v1  ;;  %v14087_v1 = vld [vmem:[#allocation48 + $0x72c] ss:$24 sps:$4 sm:$0xff]  }
0x269a   :  { %10023 = vmatprep.subr.bf16.mxu1 %v14013_v53  ;;  %v14082_v53 = vld [vmem:[#allocation48 + $0x1c0] ss:$24 sps:$4 sm:$0xff]  }
0x269b   :  { %10112 = vmatpush1.bf16.msra.mxu0 %v14008_v58  ;;  %v14090_v58 = vld [vmem:[#allocation48 + $0x1f4] ss:$24 sps:$4 sm:$0xff]  }
0x269c   :  { %10113 = vmatprep.subr.bf16.mxu0 %v14016_v7  ;;  %v14085_v7 = vld [vmem:[#allocation48 + $0x728] ss:$24 sps:$4 sm:$0xff]  }
0x269d   :  { %10024 = vmatpush1.bf16.msra.mxu1 %v14011_v43  ;;  %v14093_v43 = vld [vmem:[#allocation48 + $0x75c] ss:$24 sps:$4 sm:$0xff]  }
0x269e   :  { %10025 = vmatprep.subr.bf16.mxu1 %v14019_v52  ;;  %v14088_v52 = vld [vmem:[#allocation48 + $0x1f0] ss:$24 sps:$4 sm:$0xff]  }
0x269f   :  { %10114 = vmatpush1.bf16.msra.mxu0 %v14014_v56  ;;  %v8690_v56 = vld [vmem:[#allocation48 + $0x788] sm:$0xff] }
0x26a0   :  { %10115 = vmatprep.subr.bf16.mxu0 %v14022_v24  ;;  %v14091_v24 = vld [vmem:[#allocation48 + $0x758] ss:$24 sps:$4 sm:$0xff]  }
0x26a1   :  { %10026 = vmatpush1.bf16.msra.mxu1 %v14017_v2  ;;  %v12032_v2 = vcombine.high %v8690_v56, %v8690_v56 }
0x26a2   :  { %12035 = vmatprep.subr.msk.bf16.mxu1 %vm804_vm1, %v12030_v8  ;;  %v12031_v8 = vcombine.low %v8690_v56, %v8690_v56  ;;  %v14164_v56 = vld [vmem:[#allocation48 + $0x644] ss:$24 sps:$4 sm:$0xff]  }
0x26a3   :  { %10116 = vmatpush1.bf16.msra.mxu0 %v14020_v20  ;;  %v14101_v20 = vld [vmem:[#allocation48 + $0x254] ss:$24 sps:$4 sm:$0xff]  }
0x26a4   :  { %10117 = vmatprep.subr.bf16.mxu0 %v14027_v46  ;;  %v9918_v46 = vsel %vm804_vm1, %v12031_v8, 0  ;;  %v14170_v8 = vld [vmem:[#allocation48 + $0x6a4] ss:$24 sps:$4 sm:$0xff]  }
0x26a5   :  { %10028 = vmatpush1.bf16.msra.mxu1 %v9912_v6  ;;  %v14099_v6 = vld [vmem:[#allocation48 + $0x250] ss:$24 sps:$4 sm:$0xff]  }
0x26a6   :  { %10175 = vmatprep.subr.bf16.mxu1 %v14030_v59  ;;  %v14104_v59 = vld [vmem:[#allocation48 + $0x284] ss:$24 sps:$4 sm:$0xff]  }
0x26a7   :  { %10118 = vmatpush1.bf16.msra.mxu0 %v14025_v42 }
0x26a8   :  { %10044 = vmatmul.mubr.bf16.vlgmr.msra.gmra.mrb[204].mxu1 %v17349_v40  ;;  %10119 = vmatprep.subr.bf16.mxu0 %v14033_v62 }
0x26a9   :  { %10176 = vmatpush1.bf16.msra.mxu1 %v14028_v33  ;;  %10207 = vmatprep.mubr.bf16.mxu1 %v17276_v10  ;;  %v14049_v10 = vld [vmem:[#allocation48 + $0x608] ss:$24 sps:$4 sm:$0xff]  }
0x26aa   :  { %10177 = vmatprep.subr.bf16.mxu1 %v14036_v32 }
0x26ab   :  { %10120 = vmatpush1.bf16.msra.mxu0 %v14031_v37  ;;  %v14102_v37 = vld [vmem:[#allocation48 + $0x280] ss:$24 sps:$4 sm:$0xff]  }
0x26ac   :  { %10121 = vmatprep.subr.bf16.mxu0 %v14039_v12  ;;  %v14107_v12 = vld [vmem:[#allocation48 + $0x2b4] ss:$24 sps:$4 sm:$0xff]  }
0x26ad   :  { %10178 = vmatpush1.bf16.msra.mxu1 %v14034_v36  ;;  %v14105_v36 = vld [vmem:[#allocation48 + $0x2b0] ss:$24 sps:$4 sm:$0xff]  }
0x26ae   :  { %10179 = vmatprep.subr.bf16.mxu1 %v14042_v26  ;;  %v14110_v26 = vld [vmem:[#allocation48 + $0x2e4] ss:$24 sps:$4 sm:$0xff]  }
0x26af   :  { %10122 = vmatpush1.bf16.msra.mxu0 %v14037_v34  ;;  %v14108_v34 = vld [vmem:[#allocation48 + $0x2e0] ss:$24 sps:$4 sm:$0xff]  }
0x26b0   :  { %10123 = vmatprep.subr.bf16.mxu0 %v14045_v19  ;;  %v14113_v19 = vld [vmem:[#allocation48 + $0x314] ss:$24 sps:$4 sm:$0xff]  }
0x26b1   :  { %10180 = vmatpush1.bf16.msra.mxu1 %v14040_v54  ;;  %v14111_v54 = vld [vmem:[#allocation48 + $0x310] ss:$24 sps:$4 sm:$0xff]  }
0x26b2   :  { %10181 = vmatprep.subr.bf16.mxu1 %v14048_v11  ;;  %v14116_v11 = vld [vmem:[#allocation48 + $0x344] ss:$24 sps:$4 sm:$0xff]  }
0x26b3   :  { %10124 = vmatpush1.bf16.msra.mxu0 %v14043_v50  ;;  %v14114_v50 = vld [vmem:[#allocation48 + $0x340] ss:$24 sps:$4 sm:$0xff]  }
0x26b4   :  { %10134 = vmatprep.subr.bf16.mxu0 %v14051_v21  ;;  %v14119_v21 = vld [vmem:[#allocation48 + $0x374] ss:$24 sps:$4 sm:$0xff]  }
0x26b5   :  { %10182 = vmatpush1.bf16.msra.mxu1 %v14046_v17  ;;  %v14117_v17 = vld [vmem:[#allocation48 + $0x370] ss:$24 sps:$4 sm:$0xff]  }
0x26b6   :  { %10126 = vmatmul.mubr.bf16.vlgmr.msra.gmra.mrb[180].mxu0 %v17336_v27  ;;  %10183 = vmatprep.subr.bf16.mxu1 %v14054_v13  ;;  %v14122_v13 = vld [vmem:[#allocation48 + $0x3a4] ss:$24 sps:$4 sm:$0xff]  }
0x26b7   :  { %10135 = vmatpush1.bf16.msra.mxu0 %v14049_v10  ;;  %12038 = vmatprep.mubr.msk.bf16.mxu0 %vm9907_vm12, %v17340_v5  ;;  %v14120_v10 = vld [vmem:[#allocation48 + $0x3a0] ss:$24 sps:$4 sm:$0xff]  }
0x26b8   :  { %10136 = vmatprep.subr.bf16.mxu0 %v14057_v41  ;;  %v14125_v41 = vld [vmem:[#allocation48 + $0x3d4] ss:$24 sps:$4 sm:$0xff]  }
0x26b9   :  { %10184 = vmatpush1.bf16.msra.mxu1 %v14052_v55  ;;  %v14123_v55 = vld [vmem:[#allocation48 + $0x3d0] ss:$24 sps:$4 sm:$0xff]  }
0x26ba   :  { %10185 = vmatprep.subr.bf16.mxu1 %v14060_v14  ;;  %v14128_v14 = vld [vmem:[#allocation48 + $0x404] ss:$24 sps:$4 sm:$0xff]  }
0x26bb   :  { %10137 = vmatpush1.bf16.msra.mxu0 %v14055_v63  ;;  %v14131_v63 = vld [vmem:[#allocation48 + $0x434] ss:$24 sps:$4 sm:$0xff]  }
0x26bc   :  { %10138 = vmatprep.subr.bf16.mxu0 %v14063_v35  ;;  %v14134_v35 = vld [vmem:[#allocation48 + $0x464] ss:$24 sps:$4 sm:$0xff]  }
0x26bd   :  { %10186 = vmatpush1.bf16.msra.mxu1 %v14058_v51  ;;  %v14132_v51 = vld [vmem:[#allocation48 + $0x460] ss:$24 sps:$4 sm:$0xff]  }
0x26be   :  { %10187 = vmatprep.subr.bf16.mxu1 %v14066_v16  ;;  %v14137_v16 = vld [vmem:[#allocation48 + $0x494] ss:$24 sps:$4 sm:$0xff]  }
0x26bf   :  { %10139 = vmatpush1.bf16.msra.mxu0 %v14061_v15  ;;  %v14135_v15 = vld [vmem:[#allocation48 + $0x490] ss:$24 sps:$4 sm:$0xff]  }
0x26c0   :  { %10140 = vmatprep.subr.bf16.mxu0 %v14069_v57  ;;  %v14140_v57 = vld [vmem:[#allocation48 + $0x4c4] ss:$24 sps:$4 sm:$0xff]  }
0x26c1   :  { %10188 = vmatpush1.bf16.msra.mxu1 %v14064_v4 }
0x26c2   :  { %10189 = vmatprep.subr.bf16.mxu1 %v14072_v30  ;;  %v14138_v30 = vld [vmem:[#allocation48 + $0x4c0] ss:$24 sps:$4 sm:$0xff]  }
0x26c3   :  { %10141 = vmatpush1.bf16.msra.mxu0 %v14067_v3 }
0x26c4   :  { %10142 = vmatprep.subr.bf16.mxu0 %v14075_v9  ;;  %v14143_v9 = vld [vmem:[#allocation48 + $0x4f4] ss:$24 sps:$4 sm:$0xff]  }
0x26c5   :  { %10190 = vmatpush1.bf16.msra.mxu1 %v14070_v47  ;;  %v14141_v47 = vld [vmem:[#allocation48 + $0x4f0] ss:$24 sps:$4 sm:$0xff]  }
0x26c6   :  { %10191 = vmatprep.subr.bf16.mxu1 %v14078_v38  ;;  %v14146_v38 = vld [vmem:[#allocation48 + $0x524] ss:$24 sps:$4 sm:$0xff]  }
0x26c7   :  { %10143 = vmatpush1.bf16.msra.mxu0 %v14073_v25  ;;  %v14144_v25 = vld [vmem:[#allocation48 + $0x520] ss:$24 sps:$4 sm:$0xff]  }
0x26c8   :  { %10144 = vmatprep.subr.bf16.mxu0 %v14081_v0  ;;  %v14149_v0 = vld [vmem:[#allocation48 + $0x554] ss:$24 sps:$4 sm:$0xff]  }
0x26c9   :  { %10192 = vmatpush1.bf16.msra.mxu1 %v14076_v48  ;;  %v14147_v48 = vld [vmem:[#allocation48 + $0x550] ss:$24 sps:$4 sm:$0xff]  }
0x26ca   :  { %10193 = vmatprep.subr.bf16.mxu1 %v14084_v39  ;;  %v14152_v39 = vld [vmem:[#allocation48 + $0x584] ss:$24 sps:$4 sm:$0xff]  }
0x26cb   :  { %10145 = vmatpush1.bf16.msra.mxu0 %v14079_v22  ;;  %v14150_v22 = vld [vmem:[#allocation48 + $0x580] ss:$24 sps:$4 sm:$0xff]  }
0x26cc   :  { %10146 = vmatprep.subr.bf16.mxu0 %v14087_v1  ;;  %v14155_v1 = vld [vmem:[#allocation48 + $0x5b4] ss:$24 sps:$4 sm:$0xff]  }
0x26cd   :  { %10194 = vmatpush1.bf16.msra.mxu1 %v14082_v53  ;;  %v14153_v53 = vld [vmem:[#allocation48 + $0x5b0] ss:$24 sps:$4 sm:$0xff]  }
0x26ce   :  { %10195 = vmatprep.subr.bf16.mxu1 %v14090_v58  ;;  %v14158_v58 = vld [vmem:[#allocation48 + $0x5e4] ss:$24 sps:$4 sm:$0xff]  }
0x26cf   :  { %10147 = vmatpush1.bf16.msra.mxu0 %v14085_v7  ;;  %v14156_v7 = vld [vmem:[#allocation48 + $0x5e0] ss:$24 sps:$4 sm:$0xff]  }
0x26d0   :  { %10148 = vmatprep.subr.bf16.mxu0 %v14093_v43  ;;  %v14161_v43 = vld [vmem:[#allocation48 + $0x614] ss:$24 sps:$4 sm:$0xff]  }
0x26d1   :  { %10196 = vmatpush1.bf16.msra.mxu1 %v14088_v52  ;;  %v14159_v52 = vld [vmem:[#allocation48 + $0x610] ss:$24 sps:$4 sm:$0xff]  }
0x26d2   :  { %10197 = vmatprep.subr.bf16.mxu1 %v14096_v29  ;;  %v14162_v29 = vld [vmem:[#allocation48 + $0x640] ss:$24 sps:$4 sm:$0xff]  }
0x26d3   :  { %10149 = vmatpush1.bf16.msra.mxu0 %v14091_v24  ;;  %v14167_v24 = vld [vmem:[#allocation48 + $0x674] ss:$24 sps:$4 sm:$0xff]  }
0x26d4   :  { %12037 = vmatprep.subr.msk.bf16.mxu0 %vm804_vm1, %v12032_v2  ;;  %v14165_v2 = vld [vmem:[#allocation48 + $0x670] ss:$24 sps:$4 sm:$0xff]  }
0x26d5   :  { %10198 = vmatpush1.bf16.msra.mxu1 %v14094_v61  ;;  %v14168_v61 = vld [vmem:[#allocation48 + $0x6a0] ss:$24 sps:$4 sm:$0xff]  }
0x26d6   :  { %10199 = vmatprep.subr.bf16.mxu1 %v14101_v20  ;;  %v14173_v20 = vld [vmem:[#allocation48 + $0x6d4] ss:$24 sps:$4 sm:$0xff]  }
0x26d7   :  { %10151 = vmatpush1.bf16.msra.mxu0 %v9918_v46  ;;  %v17358_v42 = vpop.f32.mrb[176].mxu0  ;;  %v17360_v62 = vpop.f32.mrb[200].mxu1  ;;  %v14171_v46 = vld [vmem:[#allocation48 + $0x6d0] ss:$24 sps:$4 sm:$0xff]  }
0x26d8   :  { %v17362_v33 = vpop.f32.mrb[177].mxu0  ;;  %v17364_v32 = vpop.f32.mrb[201].mxu1 }
0x26d9   :  { %10200 = vmatpush1.bf16.msra.mxu1 %v14099_v6  ;;  %v14176_v6 = vld [vmem:[#allocation48 + $0x704] ss:$24 sps:$4 sm:$0xff]  }
0x26da   :  { %10167 = vmatmul.mubr.bf16.vlgmr.msra.gmra.mrb[180].mxu0 %v17349_v40  ;;  %10201 = vmatprep.subr.bf16.mxu1 %v14104_v59  ;;  %v14179_v59 = vld [vmem:[#allocation48 + $0x734] ss:$24 sps:$4 sm:$0xff]  }
0x26dd   :  { %10202 = vmatpush1.bf16.msra.mxu1 %v14102_v37  ;;  %v14182_v37 = vld [vmem:[#allocation48 + $0x764] ss:$24 sps:$4 sm:$0xff]  }
0x26de   :  { %10203 = vmatprep.subr.bf16.mxu1 %v14107_v12  ;;  %v8691_v12 = vld [vmem:[#allocation48 + $0x790] sm:$0xff] }
0x26e1   :  { %10204 = vmatpush1.bf16.msra.mxu1 %v14105_v36  ;;  %v14180_v36 = vld [vmem:[#allocation48 + $0x760] ss:$24 sps:$4 sm:$0xff]  }
0x26e2   :  { %10205 = vmatprep.subr.bf16.mxu1 %v14110_v26  ;;  %v12034_v26 = vcombine.high %v8691_v12, %v8691_v12 }
0x26e5   :  { %10206 = vmatpush1.bf16.msra.mxu1 %v14108_v34  ;;  %v12033_v34 = vcombine.low %v8691_v12, %v8691_v12 }
0x26e6   :  { %10216 = vmatprep.subr.bf16.mxu1 %v14113_v19 }
0x26e7   :  { %v9924_v19 = vsel %vm804_vm1, %v12033_v34, 0 }
0x26e8   :  { %10208 = vmatmul.mubr.bf16.vlgmr.msra.gmra.mrb[208].mxu1 %v17324_v18  ;;  %v14126_v18 = vld [vmem:[#allocation48 + $0x400] ss:$24 sps:$4 sm:$0xff]  }
0x26e9   :  { %10217 = vmatpush1.bf16.msra.mxu1 %v14111_v54  ;;  %10248 = vmatprep.mubr.bf16.mxu1 %v17328_v31  ;;  %v14129_v31 = vld [vmem:[#allocation48 + $0x430] ss:$24 sps:$4 sm:$0xff]   ;;  %v8437_v54 = vpack.c.bf16 %v17358_v42, %v17358_v42  ;;  %v8439_v42 = vpack.c.bf16 %v17360_v62, %v17360_v62 }
0x26ea   :  { %10218 = vmatprep.subr.bf16.mxu1 %v14116_v11  ;;  %v8438_v11 = vpack.c.bf16 %v17362_v33, %v17362_v33  ;;  %v8440_v33 = vpack.c.bf16 %v17364_v32, %v17364_v32  ;;  %v17420_v62 = vld [vmem:[#allocation27] sm:$0xff] }
0x26eb   :  { %v17426_v32 = vcombine.high %v17420_v62, %v17420_v62 }
0x26ed   :  { %10219 = vmatpush1.bf16.msra.mxu1 %v14114_v50  ;;  %12043 = vmatprep.mubr.msk.bf16.mxu0 %vm2532_vm8, %v17426_v32 }
0x26ee   :  { %10220 = vmatprep.subr.bf16.mxu1 %v14119_v21  ;;  %v10310_v21 = vrot.slane %v8437_v54, 4 }
0x26f1   :  { %10221 = vmatpush1.bf16.msra.mxu1 %v14117_v17 }
0x26f2   :  { %10222 = vmatprep.subr.bf16.mxu1 %v14122_v13 }
0x26f5   :  { %10223 = vmatpush1.bf16.msra.mxu1 %v14120_v10  ;;  %v10311_v10 = vrot.slane %v8438_v11, 4 }
0x26f6   :  { %10224 = vmatprep.subr.bf16.mxu1 %v14125_v41 }
0x26f9   :  { %10225 = vmatpush1.bf16.msra.mxu1 %v14123_v55 }
0x26fa   :  { %10226 = vmatprep.subr.bf16.mxu1 %v14128_v14 }
0x26fd   :  { %10227 = vmatpush1.bf16.msra.mxu1 %v14126_v18 }
0x26fe   :  { %10228 = vmatprep.subr.bf16.mxu1 %v14131_v63 }
0x2701   :  { %10229 = vmatpush1.bf16.msra.mxu1 %v14129_v31  ;;  %v10312_v31 = vrot.slane %v8439_v42, 4 }
0x2702   :  { %10230 = vmatprep.subr.bf16.mxu1 %v14134_v35 }
0x2705   :  { %10231 = vmatpush1.bf16.msra.mxu1 %v14132_v51 }
0x2706   :  { %10232 = vmatprep.subr.bf16.mxu1 %v14137_v16  ;;  %v10313_v16 = vrot.slane %v8440_v33, 4 }
0x2709   :  { %v17369_v4 = vpop.f32.mrb[178].mxu0  ;;  %10233 = vmatpush1.bf16.msra.mxu1 %v14135_v15 }
0x270a   :  { %v17371_v3 = vpop.f32.mrb[179].mxu0  ;;  %10234 = vmatprep.subr.bf16.mxu1 %v14140_v57 }
0x270d   :  { %10235 = vmatpush1.bf16.msra.mxu1 %v14138_v30 }
0x270e   :  { %10236 = vmatprep.subr.bf16.mxu1 %v14143_v9 }
0x2711   :  { %10237 = vmatpush1.bf16.msra.mxu1 %v14141_v47 }
0x2712   :  { %10238 = vmatprep.subr.bf16.mxu1 %v14146_v38 }
0x2715   :  { %10239 = vmatpush1.bf16.msra.mxu1 %v14144_v25 }
0x2716   :  { %10240 = vmatprep.subr.bf16.mxu1 %v14149_v0 }
0x2719   :  { %10241 = vmatpush1.bf16.msra.mxu1 %v14147_v48 }
0x271a   :  { %10242 = vmatprep.subr.bf16.mxu1 %v14152_v39 }
0x271d   :  { %10243 = vmatpush1.bf16.msra.mxu1 %v14150_v22 }
0x271e   :  { %10244 = vmatprep.subr.bf16.mxu1 %v14155_v1  ;;  %v8441_v1 = vpack.c.bf16 %v17369_v4, %v17369_v4 }
0x2721   :  { %10245 = vmatpush1.bf16.msra.mxu1 %v14153_v53  ;;  %v8442_v53 = vpack.c.bf16 %v17371_v3, %v17371_v3 }
0x2722   :  { %10246 = vmatprep.subr.bf16.mxu1 %v14158_v58 }
0x2725   :  { %10247 = vmatpush1.bf16.msra.mxu1 %v14156_v7 }
0x2726   :  { %10257 = vmatprep.subr.bf16.mxu1 %v14161_v43 }
0x2728   :  { %10249 = vmatmul.mubr.bf16.vlgmr.msra.gmra.mrb[208].mxu1 %v17336_v27  ;;  %v14174_v27 = vld [vmem:[#allocation48 + $0x700] ss:$24 sps:$4 sm:$0xff]  }
0x2729   :  { %10258 = vmatpush1.bf16.msra.mxu1 %v14159_v52  ;;  %12040 = vmatprep.mubr.msk.bf16.mxu1 %vm9907_vm12, %v17340_v5  ;;  %v14177_v5 = vld [vmem:[#allocation48 + $0x730] ss:$24 sps:$4 sm:$0xff]   ;;  %v10314_v52 = vrot.slane %v8441_v1, 4 }
0x272a   :  { %10259 = vmatprep.subr.bf16.mxu1 %v14164_v56 }
0x272d   :  { %10260 = vmatpush1.bf16.msra.mxu1 %v14162_v29 }
0x272e   :  { %10261 = vmatprep.subr.bf16.mxu1 %v14167_v24  ;;  %v10315_v24 = vrot.slane %v8442_v53, 4 }
0x2731   :  { %10262 = vmatpush1.bf16.msra.mxu1 %v14165_v2 }
0x2732   :  { %10263 = vmatprep.subr.bf16.mxu1 %v14170_v8 }
0x2735   :  { %10264 = vmatpush1.bf16.msra.mxu1 %v14168_v61 }
0x2736   :  { %10265 = vmatprep.subr.bf16.mxu1 %v14173_v20 }
0x2739   :  { %10266 = vmatpush1.bf16.msra.mxu1 %v14171_v46 }
0x273a   :  { %10267 = vmatprep.subr.bf16.mxu1 %v14176_v6 }
0x273d   :  { %10268 = vmatpush1.bf16.msra.mxu1 %v14174_v27 }
0x273e   :  { %10269 = vmatprep.subr.bf16.mxu1 %v14179_v59 }
0x2741   :  { %10270 = vmatpush1.bf16.msra.mxu1 %v14177_v5 }
0x2742   :  { %10271 = vmatprep.subr.bf16.mxu1 %v14182_v37 }
0x2745   :  { %10272 = vmatpush1.bf16.msra.mxu1 %v14180_v36 }
0x2746   :  { %12039 = vmatprep.subr.msk.bf16.mxu1 %vm804_vm1, %v12034_v26 }
0x2749   :  { %10274 = vmatpush1.bf16.msra.mxu1 %v9924_v19 }
0x274c   :  { %10290 = vmatmul.mubr.bf16.vlgmr.msra.gmra.mrb[208].mxu1 %v17349_v40 }
0x274d   :  { %11032 = vmatprep.mubr.bf16.mxu1 %v17918_v45 }
0x277b   :  { %v10045_v50 = vpop.f32.mrb[204].mxu1 }
0x277c   :  { %v10298_v17 = vpack.c.bf16 %v10045_v50, %v10045_v50  ;;  %v10047_v13 = vpop.f32.mrb[205].mxu1 }
0x277d   :  { %v10299_v41 = vpack.c.bf16 %v10047_v13, %v10047_v13  ;;  %v10049_v55 = vpop.f32.mrb[206].mxu1 }
0x277e   :  { %v10318_v14 = vsel %vm804_vm1, %v10298_v17, %v10310_v21  ;;  %v10050_v18 = vpop.f32.mrb[207].mxu1  ;;  %v10531_v17 = vld [vmem:[%s17921_s0] sm:$0xff] }
0x277f   :  { %v10322_v40 = vsel %vm804_vm1, %v10299_v41, %v10311_v10  ;;  %10369 = vrot.lane.b32.xlu0 %v10318_v14, %s15028_s8  ;;  %10346 = vrot.lane.b32.xlu1 %v10318_v14, %s15027_s14 }
0x2780   :  { %10546 = vmatprep.subr.bf16.mxu0 %v10322_v40 }
0x2781   :  { %10547 = vmatpush1.bf16.msra.mxu0 %v10318_v14 }
0x2783   :  { %10392 = vrot.lane.b32.xlu1 %v10318_v14, %s15029_s12  ;;  %10371 = vrot.lane.b32.xlu0 %v10322_v40, %s15028_s8 }
0x2787   :  { %10417 = vrot.lane.b32.xlu0 %v10322_v40, %s15030_s10  ;;  %10348 = vrot.lane.b32.xlu1 %v10322_v40, %s15027_s14 }
0x278b   :  { %10394 = vrot.lane.b32.xlu1 %v10322_v40, %s15029_s12 }
0x278f   :  { %10440 = vrot.lane.b32.xlu1 %v10322_v40, %s15031_s24 }
0x27ad   :  { %v10168_v63 = vpop.f32.mrb[180].mxu0 }
0x27ae   :  { %v10300_v35 = vpack.c.bf16 %v10168_v63, %v10168_v63  ;;  %v10170_v51 = vpop.f32.mrb[181].mxu0 }
0x27af   :  { %v10301_v15 = vpack.c.bf16 %v10170_v51, %v10170_v51  ;;  %v10172_v57 = vpop.f32.mrb[182].mxu0 }
0x27b0   :  { %v17399_v30 = vsel %vm804_vm1, %v10300_v35, %v10312_v31  ;;  %v10173_v9 = vpop.f32.mrb[183].mxu0 }
0x27b1   :  { %v17402_v47 = vsel %vm804_vm1, %v10301_v15, %v10313_v16  ;;  %10373 = vrot.lane.b32.xlu1 %v17399_v30, %s15028_s8  ;;  %10350 = vrot.lane.b32.xlu0 %v17399_v30, %s15027_s14  ;;  %v17528_v9 = vcombine.low %v17420_v62, %v17420_v62 }
0x27b5   :  { %10438 = vrot.lane.b32.xlu1 %v10318_v14, %s15031_s24  ;;  %10415 = vrot.lane.b32.xlu0 %v10318_v14, %s15030_s10 }
0x27b9   :  { %10419 = vrot.lane.b32.xlu1 %v17399_v30, %s15030_s10  ;;  %10396 = vrot.lane.b32.xlu0 %v17399_v30, %s15029_s12 }
0x27bd   :  { %10486 = vrot.lane.b32.xlu1 %v10322_v40, %s15033_s27  ;;  %10463 = vrot.lane.b32.xlu0 %v10322_v40, %s15032_s18 }
0x27c1   :  { %10465 = vrot.lane.b32.xlu1 %v17399_v30, %s15032_s18  ;;  %10442 = vrot.lane.b32.xlu0 %v17399_v30, %s15031_s24 }
0x27c5   :  { %10484 = vrot.lane.b32.xlu1 %v10318_v14, %s15033_s27  ;;  %10461 = vrot.lane.b32.xlu0 %v10318_v14, %s15032_s18 }
0x27c9   :  { %10511 = vrot.lane.b32.xlu1 %v17399_v30, %s15034_s22  ;;  %10488 = vrot.lane.b32.xlu0 %v17399_v30, %s15033_s27 }
0x27cd   :  { %10509 = vrot.lane.b32.xlu0 %v10322_v40, %s15034_s22  ;;  %10352 = vrot.lane.b32.xlu1 %v17402_v47, %s15027_s14 }
0x27d1   :  { %10507 = vrot.lane.b32.xlu0 %v10318_v14, %s15034_s22  ;;  %10375 = vrot.lane.b32.xlu1 %v17402_v47, %s15028_s8 }
0x27d5   :  { %10398 = vrot.lane.b32.xlu1 %v17402_v47, %s15029_s12 }
0x27d9   :  { %10421 = vrot.lane.b32.xlu1 %v17402_v47, %s15030_s10 }
0x27dd   :  { %10444 = vrot.lane.b32.xlu1 %v17402_v47, %s15031_s24 }
0x27e1   :  { %10467 = vrot.lane.b32.xlu1 %v17402_v47, %s15032_s18 }
0x27e5   :  { %10490 = vrot.lane.b32.xlu1 %v17402_v47, %s15033_s27 }
0x27e9   :  { %10513 = vrot.lane.b32.xlu1 %v17402_v47, %s15034_s22 }
0x27f1   :  { %v10347_v38 = vpop.permute.xlu1 %10346  ;;  %v10370_v0 = vpop.permute.xlu0 %10369 }
0x27f5   :  { %v10393_v25 = vpop.permute.xlu1 %10392  ;;  %v10372_v39 = vpop.permute.xlu0 %10371 }
0x27f6   :  { %v10381_v12 = vsel %vm690_vm2, %v10370_v0, %v10372_v39 }
0x27f9   :  { %v10349_v48 = vpop.permute.xlu1 %10348  ;;  %v10418_v58 = vpop.permute.xlu0 %10417 }
0x27fa   :  { %v10358_v27 = vsel %vm672_vm0, %v10347_v38, %v10349_v48 }
0x27fd   :  { %v10395_v22 = vpop.permute.xlu1 %10394 }
0x27fe   :  { %v10404_v19 = vsel %vm17923_vm14, %v10393_v25, %v10395_v22 }
0x2801   :  { %v10441_v7 = vpop.permute.xlu1 %10440 }
0x281f   :  { %v10291_v43 = vpop.f32.mrb[208].mxu1 }
0x2820   :  { %v10302_v56 = vpack.c.bf16 %v10291_v43, %v10291_v43  ;;  %v10293_v29 = vpop.f32.mrb[209].mxu1 }
0x2821   :  { %v10303_v2 = vpack.c.bf16 %v10293_v29, %v10293_v29  ;;  %v10295_v8 = vpop.f32.mrb[210].mxu1 }
0x2822   :  { %v17457_v61 = vsel %vm804_vm1, %v10302_v56, %v10314_v52  ;;  %v10296_v20 = vpop.f32.mrb[211].mxu1 }
0x2823   :  { %v17460_v46 = vsel %vm804_vm1, %v10303_v2, %v10315_v24  ;;  %v17462_v4 = vpop.permute.xlu1 %10373  ;;  %10354 = vrot.lane.b32.xlu0 %v17457_v61, %s15027_s14  ;;  %v17466_v3 = vpop.permute.xlu0 %10350 }
0x2824   :  { %10356 = vrot.lane.b32.xlu1 %v17460_v46, %s15027_s14  ;;  %v10359_v6 = vsel %vm672_vm0, %v10349_v48, %v17466_v3  ;;  %v10382_v59 = vsel %vm690_vm2, %v10372_v39, %v17462_v4 }
0x2825   :  { %10548 = vmatprep.subr.bf16.mxu0 %v10359_v6 }
0x2826   :  { %10549 = vmatpush1.bf16.msra.mxu0 %v10358_v27 }
0x2827   :  { %v10439_v5 = vpop.permute.xlu1 %10438  ;;  %10377 = vrot.lane.b32.xlu0 %v17457_v61, %s15028_s8  ;;  %10550 = vmatprep.subr.bf16.mxu0 %v10382_v59  ;;  %v10416_v37 = vpop.permute.xlu0 %10415 }
0x2828   :  { %10402 = vrot.lane.b32.xlu1 %v17460_v46, %s15029_s12  ;;  %v10427_v21 = vsel %vm17925_vm11, %v10416_v37, %v10418_v58  ;;  %v10450_v55 = vsel %vm744_vm5, %v10439_v5, %v10441_v7 }
0x282a   :  { %10551 = vmatpush1.bf16.msra.mxu0 %v10381_v12 }
0x282b   :  { %v17480_v36 = vpop.permute.xlu1 %10419  ;;  %10400 = vrot.lane.b32.xlu0 %v17457_v61, %s15029_s12  ;;  %v17484_v26 = vpop.permute.xlu0 %10396 }
0x282c   :  { %10448 = vrot.lane.b32.xlu1 %v17460_v46, %s15031_s24  ;;  %v10405_v34 = vsel %vm17922_vm13, %v10395_v22, %v17484_v26  ;;  %v10428_v54 = vsel %vm17924_vm15, %v10418_v58, %v17480_v36  ;;  %vm17930_vm13 = vcmask 736256   ;;  %vm17932_vm15 = vcmask 900096  }
0x282d   :  { %10552 = vmatprep.subr.bf16.mxu0 %v10405_v34  ;;  %vm17931_vm14 = vmmov %vm17930_vm13 }
0x282e   :  { %10553 = vmatpush1.bf16.msra.mxu0 %v10404_v19  ;;  %vm17933_vm11 = vmmov %vm17932_vm15 }
0x282f   :  { %v10487_v11 = vpop.permute.xlu1 %10486  ;;  %10423 = vrot.lane.b32.xlu0 %v17457_v61, %s15030_s10  ;;  %10554 = vmatprep.subr.bf16.mxu0 %v10428_v54  ;;  %v10464_v50 = vpop.permute.xlu0 %10463 }
0x2830   :  { %10494 = vrot.lane.b32.xlu1 %v17460_v46, %s15033_s27 }
0x2832   :  { %10555 = vmatpush1.bf16.msra.mxu0 %v10427_v21 }
0x2833   :  { %v17499_v13 = vpop.permute.xlu1 %10465  ;;  %10446 = vrot.lane.b32.xlu0 %v17457_v61, %s15031_s24  ;;  %v17503_v10 = vpop.permute.xlu0 %10442 }
0x2834   :  { %10534 = vperm.xlu1 %13340, %v10531_v17   ;;  %v10451_v41 = vsel %vm744_vm5, %v10441_v7, %v17503_v10  ;;  %v10474_v14 = vsel %vm17926_vm6, %v10464_v50, %v17499_v13  ;;  %vm17934_vm6 = vcmask 891904  }
0x2835   :  { %10556 = vmatprep.subr.bf16.mxu0 %v10451_v41 }
0x2836   :  { %10557 = vmatpush1.bf16.msra.mxu0 %v10450_v55 }
0x2837   :  { %10469 = vrot.lane.b32.xlu0 %v17457_v61, %s15032_s18  ;;  %10558 = vmatprep.subr.bf16.mxu0 %v10474_v14  ;;  %v10462_v18 = vpop.permute.xlu0 %10461  ;;  %v10485_v42 = vpop.permute.xlu1 %10484 }
0x2838   :  { %v10473_v40 = vsel %vm17927_vm3, %v10462_v18, %v10464_v50  ;;  %v10496_v31 = vsel %vm17929_vm4, %v10485_v42, %v10487_v11  ;;  %vm17935_vm3 = vmmov %vm17934_vm6 }
0x283a   :  { %10559 = vmatpush1.bf16.msra.mxu0 %v10473_v40 }
0x283b   :  { %10492 = vrot.lane.b32.xlu0 %v17457_v61, %s15033_s27  ;;  %v10489_v33 = vpop.permute.xlu0 %10488  ;;  %v17517_v35 = vpop.permute.xlu1 %10511 }
0x283c   :  { %v10497_v63 = vsel %vm17928_vm7, %v10487_v11, %v10489_v33  ;;  %vm17936_vm7 = vcmask 752640  }
0x283d   :  { %10560 = vmatprep.subr.bf16.mxu0 %v10497_v63  ;;  %vm17937_vm4 = vmmov %vm17936_vm7 }
0x283e   :  { %10561 = vmatpush1.bf16.msra.mxu0 %v10496_v31 }
0x283f   :  { %10515 = vrot.lane.b32.xlu0 %v17457_v61, %s15034_s22  ;;  %v10510_v51 = vpop.permute.xlu0 %10509  ;;  %v10353_v62 = vpop.permute.xlu1 %10352 }
0x2840   :  { %v10520_v16 = vsel %vm17930_vm13, %v10510_v51, %v17517_v35  ;;  %v10360_v48 = vsel %vm672_vm0, %v17466_v3, %v10353_v62  ;;  %vm17938_vm13 = vcmask 744448  }
0x2841   :  { %10562 = vmatprep.subr.bf16.mxu0 %v10520_v16 }
0x2843   :  { %v10508_v15 = vpop.permute.xlu0 %10507  ;;  %10379 = vrot.lane.b32.xlu0 %v17460_v46, %s15028_s8  ;;  %v10376_v38 = vpop.permute.xlu1 %10375 }
0x2844   :  { %v10519_v57 = vsel %vm17931_vm14, %v10508_v15, %v10510_v51  ;;  %v10383_v1 = vsel %vm690_vm2, %v17462_v4, %v10376_v38  ;;  %vm17939_vm14 = vmmov %vm17938_vm13 }
0x2845   :  { %10563 = vmatpush1.bf16.msra.mxu0 %v10519_v57 }
0x2846   :  { %10587 = vmatprep.subr.bf16.mxu0 %v17402_v47 }
0x2847   :  { %10425 = vrot.lane.b32.xlu0 %v17460_v46, %s15030_s10  ;;  %v10399_v25 = vpop.permute.xlu1 %10398 }
0x2848   :  { %10579 = vmatmul.mubr.bf16.vlgmr.msra.gmra.mrb[184].mxu0 %v17528_v9  ;;  %v10406_v43 = vsel %vm17933_vm11, %v17484_v26, %v10399_v25 }
0x2849   :  { %10588 = vmatpush1.bf16.msra.mxu0 %v17399_v30  ;;  %12044 = vmatprep.mubr.msk.bf16.mxu0 %vm2532_vm8, %v17426_v32 }
0x284b   :  { %10471 = vrot.lane.b32.xlu0 %v17460_v46, %s15032_s18  ;;  %v10422_v30 = vpop.permute.xlu1 %10421 }
0x284c   :  { %v10429_v29 = vsel %vm17935_vm3, %v17480_v36, %v10422_v30 }
0x284f   :  { %10517 = vrot.lane.b32.xlu0 %v17460_v46, %s15034_s22  ;;  %v10445_v58 = vpop.permute.xlu1 %10444 }
0x2850   :  { %v10452_v20 = vsel %vm744_vm5, %v17503_v10, %v10445_v58 }
0x2853   :  { %v10468_v24 = vpop.permute.xlu1 %10467 }
0x2854   :  { %v10475_v27 = vsel %vm17937_vm4, %v17499_v13, %v10468_v24 }
0x2857   :  { %v10491_v3 = vpop.permute.xlu1 %10490 }
0x2858   :  { %v10498_v37 = vsel %vm17939_vm14, %v10489_v33, %v10491_v3 }
0x285b   :  { %v10514_v12 = vpop.permute.xlu1 %10513 }
0x2895   :  { %v10355_v47 = vpop.permute.xlu0 %10354 }
0x2896   :  { %v10361_v0 = vsel %vm672_vm0, %v10353_v62, %v10355_v47  ;;  %v10357_v19 = vpop.permute.xlu1 %10356 }
0x2897   :  { %10589 = vmatprep.subr.bf16.mxu0 %v10361_v0  ;;  %v10362_v54 = vsel %vm672_vm0, %v10355_v47, %v10357_v19 }
0x2898   :  { %10590 = vmatpush1.bf16.msra.mxu0 %v10360_v48 }
0x2899   :  { %v10378_v39 = vpop.permute.xlu0 %10377 }
0x289a   :  { %v10384_v22 = vsel %vm690_vm2, %v10376_v38, %v10378_v39  ;;  %v10403_v21 = vpop.permute.xlu1 %10402 }
0x289b   :  { %10591 = vmatprep.subr.bf16.mxu0 %v10384_v22 }
0x289c   :  { %10592 = vmatpush1.bf16.msra.mxu0 %v10383_v1 }
0x289d   :  { %v10401_v53 = vpop.permute.xlu0 %10400 }
0x289e   :  { %v10407_v7 = vsel %vm17932_vm15, %v10399_v25, %v10401_v53  ;;  %vm17940_vm15 = vcmask 736256   ;;  %v10449_v13 = vpop.permute.xlu1 %10448 }
0x289f   :  { %10593 = vmatprep.subr.bf16.mxu0 %v10407_v7  ;;  %vm17941_vm11 = vmmov %vm17940_vm15 }
0x28a0   :  { %10594 = vmatpush1.bf16.msra.mxu0 %v10406_v43  ;;  %v10521_v34 = vsel %vm17941_vm11, %v17517_v35, %v10514_v12 }
0x28a1   :  { %v10424_v52 = vpop.permute.xlu0 %10423 }
0x28a2   :  { %v10430_v56 = vsel %vm17934_vm6, %v10422_v30, %v10424_v52  ;;  %vm17942_vm6 = vcmask 900096   ;;  %v10495_v55 = vpop.permute.xlu1 %10494 }
0x28a3   :  { %10595 = vmatprep.subr.bf16.mxu0 %v10430_v56  ;;  %vm17950_vm14 = vmmov %vm17942_vm6 }
0x28a4   :  { %10596 = vmatpush1.bf16.msra.mxu0 %v10429_v29 }
0x28a5   :  { %v10447_v2 = vpop.permute.xlu0 %10446 }
0x28a6   :  { %v10453_v8 = vsel %vm744_vm5, %v10445_v58, %v10447_v2 }
0x28a7   :  { %10597 = vmatprep.subr.bf16.mxu0 %v10453_v8 }
0x28a8   :  { %10598 = vmatpush1.bf16.msra.mxu0 %v10452_v20 }
0x28a9   :  { %v10470_v4 = vpop.permute.xlu0 %10469 }
0x28aa   :  { %v10476_v6 = vsel %vm17936_vm7, %v10468_v24, %v10470_v4  ;;  %vm17944_vm7 = vmmov %vm17938_vm13 }
0x28ab   :  { %10599 = vmatprep.subr.bf16.mxu0 %v10476_v6 }
0x28ac   :  { %10600 = vmatpush1.bf16.msra.mxu0 %v10475_v27 }
0x28ad   :  { %v10493_v59 = vpop.permute.xlu0 %10492 }
0x28ae   :  { %v10499_v5 = vsel %vm17938_vm13, %v10491_v3, %v10493_v59  ;;  %v10500_v14 = vsel %vm17944_vm7, %v10493_v59, %v10495_v55  ;;  %v17946_v59 = vld [vmem:[#allocation108_spill] sm:$0xff]  ;;  %vm17949_vm13 = vmmov %vm17942_vm6 }
0x28af   :  { %10601 = vmatprep.subr.bf16.mxu0 %v10499_v5 }
0x28b0   :  { %10602 = vmatpush1.bf16.msra.mxu0 %v10498_v37  ;;  %v17947_v37 = vld [vmem:[#allocation109_spill] sm:$0xff] }
0x28b1   :  { %v10516_v36 = vpop.permute.xlu0 %10515 }
0x28b2   :  { %v10522_v26 = vsel %vm17940_vm15, %v10514_v12, %v10516_v36  ;;  %vm17951_vm15 = vmmov %vm17935_vm3 }
0x28b3   :  { %10603 = vmatprep.subr.bf16.mxu0 %v10522_v26  ;;  %v10535_v42 = vpop.permute.xlu1 %10534 }
0x28b4   :  { %10604 = vmatpush1.bf16.msra.mxu0 %v10521_v34 }
0x28b5   :  { %10628 = vmatprep.subr.bf16.mxu0 %v17460_v46  ;;  %v10380_v11 = vpop.permute.xlu0 %10379  ;;  %v10408_v46 = vsel %vm17942_vm6, %v10401_v53, %v10403_v21  ;;  %vm17953_vm6 = vmmov %vm17935_vm3 }
0x28b6   :  { %v10385_v50 = vsel %vm690_vm2, %v10378_v39, %v10380_v11 }
0x28b7   :  { %10620 = vmatmul.mubr.bf16.vlgmr.msra.gmra.mrb[188].mxu0 %v17528_v9 }
0x28b8   :  { %10629 = vmatpush1.bf16.msra.mxu0 %v17457_v61  ;;  %12045 = vmatprep.mubr.msk.bf16.mxu0 %vm2532_vm8, %v17426_v32  ;;  %v10454_v32 = vsel %vm744_vm5, %v10447_v2, %v10449_v13  ;;  %vm17943_vm8 = vmmov %vm17937_vm4 }
0x28b9   :  { %10630 = vmatprep.subr.bf16.mxu0 %v10357_v19  ;;  %v10426_v17 = vpop.permute.xlu0 %10425  ;;  %vm17945_vm4 = vmmov %vm17941_vm11 }
0x28ba   :  { %v10431_v61 = vsel %vm17935_vm3, %v10424_v52, %v10426_v17  ;;  %vm17952_vm11 = vmmov %vm17944_vm7 }
0x28bb   :  { %vm17954_vm3 = vmmov %vm17943_vm8 }
0x28bc   :  { %10631 = vmatpush1.bf16.msra.mxu0 %v10362_v54  ;;  %v11089_v54 = vld [vmem:[%s15338_s9] sm:$0x3] }
0x28bd   :  { %10632 = vmatprep.subr.bf16.mxu0 %v10380_v11  ;;  %v10472_v10 = vpop.permute.xlu0 %10471 }
0x28be   :  { %v10477_v41 = vsel %vm17943_vm8, %v10470_v4, %v10472_v10  ;;  %vm17955_vm8 = vmmov %vm17944_vm7 }
0x28bf   :  { %vm17956_vm7 = vmmov %vm17954_vm3 }
0x28c0   :  { %10633 = vmatpush1.bf16.msra.mxu0 %v10385_v50 }
0x28c1   :  { %10634 = vmatprep.subr.bf16.mxu0 %v10403_v21  ;;  %v10518_v18 = vpop.permute.xlu0 %10517 }
0x28c2   :  { %v10523_v40 = vsel %vm17945_vm4, %v10516_v36, %v10518_v18 }
0x28c4   :  { %10635 = vmatpush1.bf16.msra.mxu0 %v10408_v46 }
0x28c5   :  { %10636 = vmatprep.subr.bf16.mxu0 %v10426_v17 }
0x28c8   :  { %10637 = vmatpush1.bf16.msra.mxu0 %v10431_v61 }
0x28c9   :  { %10638 = vmatprep.subr.bf16.mxu0 %v10449_v13 }
0x28cc   :  { %10639 = vmatpush1.bf16.msra.mxu0 %v10454_v32 }
0x28cd   :  { %10640 = vmatprep.subr.bf16.mxu0 %v10472_v10 }
0x28d0   :  { %10641 = vmatpush1.bf16.msra.mxu0 %v10477_v41 }
0x28d1   :  { %10642 = vmatprep.subr.bf16.mxu0 %v10495_v55 }
0x28d4   :  { %10643 = vmatpush1.bf16.msra.mxu0 %v10500_v14 }
0x28d5   :  { %10644 = vmatprep.subr.bf16.mxu0 %v10518_v18 }
0x28d8   :  { %10645 = vmatpush1.bf16.msra.mxu0 %v10523_v40 }
0x28db   :  { %10661 = vmatmul.mubr.bf16.vlgmr.msra.gmra.mrb[192].mxu0 %v17528_v9 }
0x28dc   :  { %10991 = vmatprep.mubr.bf16.mxu0 %v17918_v45 }
0x291b   :  { %v10580_v33 = vpop.f32.mrb[184].mxu0 }
0x291c   :  { %v10581_v63 = vadd.f32 %v10580_v33, %v10535_v42  ;;  %v10582_v31 = vpop.f32.mrb[185].mxu0 }
0x291d   :  { %v10583_v35 = vadd.f32 %v10582_v31, %v10535_v42  ;;  %v10584_v51 = vpop.f32.mrb[186].mxu0 }
0x291e   :  { %v10669_v16 = vmax.f32 %v10581_v63, 0.0  ;;  %v10585_v15 = vpop.f32.mrb[187].mxu0 }
0x291f   :  { %v10670_v57 = vmax.f32 %v10583_v35, 0.0 }
0x2920   :  { %v10675_v62 = vpack.c.bf16 %v10669_v16, %v10669_v16 }
0x2921   :  { %v10676_v38 = vpack.c.bf16 %v10670_v57, %v10670_v57 }
0x2922   :  { %v17580_v25 = vmul.bf16 %v10675_v62, %v15823_v23 }
0x2923   :  { %v17583_v47 = vmul.bf16 %v10676_v38, %v15829_v28 }
0x2924   :  { %10716 = vrot.lane.b32.xlu1 %v17580_v25, %s15028_s8  ;;  %v10693_v9 = vrot.slane %v17580_v25, 4 }
0x2925   :  { %10820 = vrot.lane.b32.xlu0 %v17583_v47, %s15034_s22  ;;  %v10694_v23 = vrot.slane %v17583_v47, 4 }
0x2928   :  { %10750 = vrot.lane.b32.xlu1 %v17580_v25, %s15030_s10 }
0x2929   :  { %10699 = vrot.lane.b32.xlu0 %v10693_v9, %s15027_s14 }
0x292c   :  { %10784 = vrot.lane.b32.xlu1 %v17580_v25, %s15032_s18 }
0x292d   :  { %10733 = vrot.lane.b32.xlu0 %v10693_v9, %s15029_s12 }
0x2930   :  { %10818 = vrot.lane.b32.xlu1 %v17580_v25, %s15034_s22 }
0x2931   :  { %10767 = vrot.lane.b32.xlu0 %v10693_v9, %s15031_s24 }
0x2934   :  { %10718 = vrot.lane.b32.xlu1 %v17583_v47, %s15028_s8 }
0x2935   :  { %10801 = vrot.lane.b32.xlu0 %v10693_v9, %s15033_s27 }
0x2938   :  { %10752 = vrot.lane.b32.xlu1 %v17583_v47, %s15030_s10 }
0x2939   :  { %10701 = vrot.lane.b32.xlu0 %v10694_v23, %s15027_s14 }
0x293c   :  { %10786 = vrot.lane.b32.xlu1 %v17583_v47, %s15032_s18 }
0x2940   :  { %10735 = vrot.lane.b32.xlu1 %v10694_v23, %s15029_s12 }
0x2944   :  { %10769 = vrot.lane.b32.xlu1 %v10694_v23, %s15031_s24 }
0x2948   :  { %10803 = vrot.lane.b32.xlu1 %v10694_v23, %s15033_s27 }
0x298a   :  { %v10621_v28 = vpop.f32.mrb[188].mxu0 }
0x298b   :  { %v10622_v0 = vadd.f32 %v10621_v28, %v10535_v42  ;;  %v10623_v48 = vpop.f32.mrb[189].mxu0 }
0x298c   :  { %v10624_v30 = vadd.f32 %v10623_v48, %v10535_v42  ;;  %v10625_v39 = vpop.f32.mrb[190].mxu0 }
0x298d   :  { %v10671_v22 = vmax.f32 %v10622_v0, 0.0  ;;  %v10626_v1 = vpop.f32.mrb[191].mxu0 }
0x298e   :  { %v10672_v53 = vmax.f32 %v10624_v30, 0.0 }
0x298f   :  { %v10677_v58 = vpack.c.bf16 %v10671_v22, %v10671_v22 }
0x2990   :  { %v10678_v43 = vpack.c.bf16 %v10672_v53, %v10672_v53 }
0x2991   :  { %v17612_v7 = vmul.bf16 %v10677_v58, %v15843_v44 }
0x2992   :  { %v17619_v52 = vmul.bf16 %v10678_v43, %v15846_v49 }
0x2993   :  { %10822 = vrot.lane.b32.xlu1 %v17612_v7, %s15034_s22  ;;  %10720 = vrot.lane.b32.xlu0 %v17612_v7, %s15028_s8  ;;  %v10695_v44 = vrot.slane %v17612_v7, 4 }
0x2994   :  { %v10696_v49 = vrot.slane %v17619_v52, 4 }
0x2996   :  { %v10717_v26 = vpop.permute.xlu1 %10716 }
0x2997   :  { %10722 = vrot.lane.b32.xlu1 %v17619_v52, %s15028_s8  ;;  %10754 = vrot.lane.b32.xlu0 %v17612_v7, %s15030_s10  ;;  %v10821_v46 = vpop.permute.xlu0 %10820 }
0x299a   :  { %v10751_v19 = vpop.permute.xlu1 %10750 }
0x299b   :  { %10756 = vrot.lane.b32.xlu1 %v17619_v52, %s15030_s10  ;;  %10788 = vrot.lane.b32.xlu0 %v17612_v7, %s15032_s18  ;;  %v10700_v61 = vpop.permute.xlu0 %10699 }
0x299e   :  { %v10785_v11 = vpop.permute.xlu1 %10784 }
0x299f   :  { %10703 = vrot.lane.b32.xlu1 %v10695_v44, %s15027_s14  ;;  %10737 = vrot.lane.b32.xlu0 %v10695_v44, %s15029_s12  ;;  %v10734_v32 = vpop.permute.xlu0 %10733 }
0x29a2   :  { %v10819_v50 = vpop.permute.xlu1 %10818 }
0x29a3   :  { %10739 = vrot.lane.b32.xlu1 %v10696_v49, %s15029_s12  ;;  %10771 = vrot.lane.b32.xlu0 %v10695_v44, %s15031_s24  ;;  %v10768_v41 = vpop.permute.xlu0 %10767 }
0x29a6   :  { %v10719_v17 = vpop.permute.xlu1 %10718 }
0x29a7   :  { %10773 = vrot.lane.b32.xlu1 %v10696_v49, %s15031_s24  ;;  %10805 = vrot.lane.b32.xlu0 %v10695_v44, %s15033_s27  ;;  %v10802_v14 = vpop.permute.xlu0 %10801  ;;  %v10728_v1 = vsel %vm690_vm2, %v10717_v26, %v10719_v17 }
0x29aa   :  { %v10753_v13 = vpop.permute.xlu1 %10752 }
0x29ab   :  { %10705 = vrot.lane.b32.xlu0 %v10696_v49, %s15027_s14  ;;  %v10702_v40 = vpop.permute.xlu0 %10701 }
0x29ac   :  { %v10711_v15 = vsel %vm672_vm0, %v10700_v61, %v10702_v40 }
0x29ad   :  { %v10837_v0 = vsel %vm804_vm1, %v17580_v25, %v10711_v15 }
0x29ae   :  { %v10662_v56 = vpop.f32.mrb[192].mxu0  ;;  %v10787_v10 = vpop.permute.xlu1 %10786 }
0x29af   :  { %v10663_v29 = vadd.f32 %v10662_v56, %v10535_v42  ;;  %v10664_v24 = vpop.f32.mrb[193].mxu0 }
0x29b0   :  { %v10665_v2 = vadd.f32 %v10664_v24, %v10535_v42  ;;  %v10666_v8 = vpop.f32.mrb[194].mxu0 }
0x29b1   :  { %v10673_v20 = vmax.f32 %v10663_v29, 0.0  ;;  %v10667_v4 = vpop.f32.mrb[195].mxu0  ;;  %v10796_v8 = vsel %vm17956_vm7, %v10785_v11, %v10787_v10  ;;  %vm17960_vm7 = vmmov %vm17955_vm8 }
0x29b2   :  { %v10674_v3 = vmax.f32 %v10665_v2, 0.0  ;;  %v10736_v55 = vpop.permute.xlu1 %10735 }
0x29b3   :  { %v10679_v6 = vpack.c.bf16 %v10673_v20, %v10673_v20  ;;  %v10745_v48 = vsel %vm17950_vm14, %v10734_v32, %v10736_v55 }
0x29b4   :  { %v10680_v27 = vpack.c.bf16 %v10674_v3, %v10674_v3  ;;  %v10861_v53 = vsel %vm804_vm1, %v10728_v1, %v10745_v48  ;;  %v10830_v3 = vsel %vm17945_vm4, %v10819_v50, %v10821_v46 }
0x29b5   :  { %v17639_v5 = vmul.bf16 %v10679_v6, %v17946_v59 }
0x29b6   :  { %v17642_v12 = vmul.bf16 %v10680_v27, %v17947_v37  ;;  %v10770_v18 = vpop.permute.xlu1 %10769  ;;  %v10942_v27 = vsel %vm804_vm1, %v10830_v3, 0  ;;  %v17721_v37 = vld [vmem:[#allocation28] sm:$0xf] }
0x29b7   :  { %10724 = vrot.lane.b32.xlu0 %v17639_v5, %s15028_s8  ;;  %v10697_v36 = vrot.slane %v17639_v5, 4  ;;  %v10779_v58 = vsel %vm744_vm5, %v10768_v41, %v10770_v18 }
0x29b8   :  { %10726 = vrot.lane.b32.xlu1 %v17642_v12, %s15028_s8  ;;  %s17948_s8 = sld [smem:[#allocation95_spill]]  ;;  %v10698_v34 = vrot.slane %v17642_v12, 4 }
0x29ba   :  { %v10804_v42 = vpop.permute.xlu1 %10803 }
0x29bb   :  { %10758 = vrot.lane.b32.xlu0 %v17639_v5, %s15030_s10  ;;  %v10813_v24 = vsel %vm17955_vm8, %v10802_v14, %v10804_v42 }
0x29bc   :  { %10760 = vrot.lane.b32.xlu1 %v17642_v12, %s15030_s10  ;;  %v10909_v4 = vsel %vm804_vm1, %v10796_v8, %v10813_v24 }
0x29be   :  { %v10932_v21 = vld [vmem:[%s17948_s8] sm:$0xff] }
0x29bf   :  { %10792 = vrot.lane.b32.xlu0 %v17639_v5, %s15032_s18 }
0x29c0   :  { %10707 = vrot.lane.b32.xlu1 %v10697_v36, %s15027_s14 }
0x29c3   :  { %10741 = vrot.lane.b32.xlu0 %v10697_v36, %s15029_s12 }
0x29c4   :  { %10790 = vrot.lane.b32.xlu1 %v17619_v52, %s15032_s18 }
0x29c7   :  { %10775 = vrot.lane.b32.xlu0 %v10697_v36, %s15031_s24 }
0x29c8   :  { %10807 = vrot.lane.b32.xlu1 %v10696_v49, %s15033_s27  ;;  %v10762_v49 = vsel %vm17953_vm6, %v10751_v19, %v10753_v13 }
0x29c9   :  { %v10885_v29 = vsel %vm804_vm1, %v10762_v49, %v10779_v58 }
0x29cb   :  { %10809 = vrot.lane.b32.xlu0 %v10697_v36, %s15033_s27 }
0x29cc   :  { %10794 = vrot.lane.b32.xlu1 %v17642_v12, %s15032_s18 }
0x29cf   :  { %10709 = vrot.lane.b32.xlu0 %v10698_v34, %s15027_s14 }
0x29d0   :  { %10824 = vrot.lane.b32.xlu1 %v17619_v52, %s15034_s22 }
0x29d3   :  { %10743 = vrot.lane.b32.xlu0 %v10698_v34, %s15029_s12 }
0x29d4   :  { %10828 = vrot.lane.b32.xlu1 %v17642_v12, %s15034_s22 }
0x29d7   :  { %10777 = vrot.lane.b32.xlu0 %v10698_v34, %s15031_s24 }
0x29d8   :  { %11092 = vperm.xlu1 %13340, %v11089_v54  }
0x29db   :  { %10811 = vrot.lane.b32.xlu0 %v10698_v34, %s15033_s27 }
0x29df   :  { %10826 = vrot.lane.b32.xlu0 %v17639_v5, %s15034_s22 }
0x29e3   :  { %10935 = vperm.xlu0 %13314, %v10932_v21  }
0x2a05   :  { %v17677_v33 = vpop.permute.xlu1 %10822  ;;  %v17679_v63 = vpop.permute.xlu0 %10720 }
0x2a06   :  { %v10729_v28 = vsel %vm690_vm2, %v10719_v17, %v17679_v63 }
0x2a09   :  { %v17681_v31 = vpop.permute.xlu1 %10722  ;;  %v17683_v35 = vpop.permute.xlu0 %10754 }
0x2a0d   :  { %v17685_v51 = vpop.permute.xlu1 %10756  ;;  %v17687_v16 = vpop.permute.xlu0 %10788 }
0x2a0e   :  { %v10797_v56 = vsel %vm17954_vm3, %v10787_v10, %v17687_v16 }
0x2a11   :  { %v10704_v57 = vpop.permute.xlu1 %10703  ;;  %v10738_v62 = vpop.permute.xlu0 %10737 }
0x2a12   :  { %v10712_v38 = vsel %vm672_vm0, %v10702_v40, %v10704_v57  ;;  %v10746_v9 = vsel %vm17949_vm13, %v10736_v55, %v10738_v62  ;;  %vm17957_vm13 = vmmov %vm17945_vm4 }
0x2a13   :  { %v10841_v23 = vsel %vm804_vm1, %v17583_v47, %v10712_v38  ;;  %v10865_v39 = vsel %vm804_vm1, %v10729_v28, %v10746_v9  ;;  %v10763_v47 = vsel %vm17951_vm15, %v10753_v13, %v17683_v35  ;;  %v10831_v6 = vsel %vm17957_vm13, %v10821_v46, %v17677_v33  ;;  %vm17958_vm15 = vmmov %vm17950_vm14 }
0x2a14   :  { %10959 = vmatprep.subr.bf16.mxu0 %v10841_v23  ;;  %vm17961_vm4 = vmmov %vm17954_vm3 }
0x2a15   :  { %v10772_v30 = vpop.permute.xlu0 %10771  ;;  %10960 = vmatpush1.bf16.msra.mxu0 %v10837_v0  ;;  %v10740_v20 = vpop.permute.xlu1 %10739  ;;  %vm17962_vm13 = vmmov %vm17950_vm14 }
0x2a16   :  { %v10780_v22 = vsel %vm744_vm5, %v10770_v18, %v10772_v30  ;;  %10961 = vmatprep.subr.bf16.mxu0 %v10865_v39  ;;  %v10747_v32 = vsel %vm17950_vm14, %v10738_v62, %v10740_v20  ;;  %v10764_v62 = vsel %vm17953_vm6, %v17683_v35, %v17685_v51  ;;  %vm17965_vm14 = vmmov %vm17960_vm7 }
0x2a17   :  { %v10889_v25 = vsel %vm804_vm1, %v10763_v47, %v10780_v22 }
0x2a19   :  { %v10806_v43 = vpop.permute.xlu0 %10805  ;;  %10962 = vmatpush1.bf16.msra.mxu0 %v10861_v53  ;;  %v10774_v36 = vpop.permute.xlu1 %10773 }
0x2a1a   :  { %v10814_v44 = vsel %vm17952_vm11, %v10804_v42, %v10806_v43  ;;  %10963 = vmatprep.subr.bf16.mxu0 %v10889_v25  ;;  %vm17959_vm11 = vmmov %vm17953_vm6 }
0x2a1b   :  { %v10913_v2 = vsel %vm804_vm1, %v10797_v56, %v10814_v44 }
0x2a1d   :  { %10964 = vmatpush1.bf16.msra.mxu0 %v10885_v29  ;;  %v10706_v59 = vpop.permute.xlu0 %10705 }
0x2a1e   :  { %10965 = vmatprep.subr.bf16.mxu0 %v10913_v2  ;;  %v10713_v50 = vsel %vm672_vm0, %v10704_v57, %v10706_v59 }
0x2a1f   :  { %v10845_v13 = vsel %vm804_vm1, %v17612_v7, %v10713_v50  ;;  %v10781_v7 = vsel %vm744_vm5, %v10772_v30, %v10774_v36 }
0x2a21   :  { %10966 = vmatpush1.bf16.msra.mxu0 %v10909_v4 }
0x2a22   :  { %12046 = vmatprep.subr.msk.bf16.mxu0 %vm804_vm1, %v10831_v6 }
0x2a25   :  { %10968 = vmatpush1.bf16.msra.mxu0 %v10942_v27 }
0x2a28   :  { %12047 = vmatmul.mubr.msk.bf16.vlgmr.msra.gmra.mrb[196].mxu0 %vm908_vm9, %v17721_v37 }
0x2a29   :  { %v10725_v26 = vpop.permute.xlu0 %10724  ;;  %11073 = vmatprep.mubr.bf16.mxu0 %v17918_v45 }
0x2a2a   :  { %v10727_v34 = vpop.permute.xlu1 %10726  ;;  %v10731_v45 = vsel %vm690_vm2, %v17681_v31, %v10725_v26 }
0x2a2b   :  { %v10732_v47 = vsel %vm690_vm2, %v10725_v26, %v10727_v34 }
0x2a2d   :  { %v10759_v19 = vpop.permute.xlu0 %10758 }
0x2a2e   :  { %v10761_v54 = vpop.permute.xlu1 %10760  ;;  %v10765_v40 = vsel %vm17959_vm11, %v17685_v51, %v10759_v19 }
0x2a31   :  { %v10793_v11 = vpop.permute.xlu0 %10792 }
0x2a32   :  { %v10708_v21 = vpop.permute.xlu1 %10707 }
0x2a33   :  { %v10714_v46 = vsel %vm672_vm0, %v10706_v59, %v10708_v21 }
0x2a34   :  { %v10849_v17 = vsel %vm804_vm1, %v17619_v52, %v10714_v46  ;;  %v10730_v52 = vsel %vm690_vm2, %v17679_v63, %v17681_v31  ;;  %v10893_v31 = vsel %vm804_vm1, %v10764_v62, %v10781_v7  ;;  %vm17964_vm2 = vmmov %vm17954_vm3 }
0x2a35   :  { %v10742_v61 = vpop.permute.xlu0 %10741  ;;  %11000 = vmatprep.subr.bf16.mxu1 %v10849_v17  ;;  %v10869_v18 = vsel %vm804_vm1, %v10730_v52, %v10747_v32  ;;  %v11088_v17 = vld [vmem:[#allocation49] sm:$0x3] }
0x2a36   :  { %v10748_v10 = vsel %vm17958_vm15, %v10740_v20, %v10742_v61  ;;  %11001 = vmatpush1.bf16.msra.mxu1 %v10845_v13  ;;  %v10791_v41 = vpop.permute.xlu1 %10790  ;;  %vm17966_vm15 = vcmask 736256  }
0x2a37   :  { %v10873_v55 = vsel %vm804_vm1, %v10731_v45, %v10748_v10  ;;  %v10799_v38 = vsel %vm17954_vm3, %v10791_v41, %v10793_v11  ;;  %v10798_v0 = vsel %vm17961_vm4, %v17687_v16, %v10791_v41 }
0x2a38   :  { %11002 = vmatprep.subr.bf16.mxu1 %v10873_v55 }
0x2a39   :  { %v10776_v14 = vpop.permute.xlu0 %10775 }
0x2a3a   :  { %v10782_v42 = vsel %vm744_vm5, %v10774_v36, %v10776_v14  ;;  %11003 = vmatpush1.bf16.msra.mxu1 %v10869_v18  ;;  %v10808_v15 = vpop.permute.xlu1 %10807 }
0x2a3b   :  { %v10897_v57 = vsel %vm804_vm1, %v10765_v40, %v10782_v42  ;;  %v10815_v9 = vsel %vm17955_vm8, %v10806_v43, %v10808_v15 }
0x2a3c   :  { %11004 = vmatprep.subr.bf16.mxu1 %v10897_v57  ;;  %v10917_v35 = vsel %vm804_vm1, %v10798_v0, %v10815_v9 }
0x2a3d   :  { %v10810_v63 = vpop.permute.xlu0 %10809 }
0x2a3e   :  { %v10816_v23 = vsel %vm17960_vm7, %v10808_v15, %v10810_v63  ;;  %11005 = vmatpush1.bf16.msra.mxu1 %v10893_v31  ;;  %v10795_v22 = vpop.permute.xlu1 %10794 }
0x2a3f   :  { %v10921_v28 = vsel %vm804_vm1, %v10799_v38, %v10816_v23  ;;  %v10800_v29 = vsel %vm17964_vm2, %v10793_v11, %v10795_v22  ;;  %v15054_v23 = vmov 1983009808  }
0x2a40   :  { %11006 = vmatprep.subr.bf16.mxu1 %v10921_v28  ;;  %v11320_v28 = vunpack.c.l.s4 %v15054_v23 }
0x2a41   :  { %v10710_v48 = vpop.permute.xlu0 %10709 }
0x2a42   :  { %v10715_v51 = vsel %vm672_vm0, %v10708_v21, %v10710_v48  ;;  %11007 = vmatpush1.bf16.msra.mxu1 %v10917_v35  ;;  %v10857_v30 = vsel %vm804_vm1, %v17642_v12, %v10710_v48  ;;  %vm17963_vm0 = vmmov %vm17953_vm6  ;;  %v10825_v25 = vpop.permute.xlu1 %10824  ;;  %v11321_v0 = vunpack.c.0.s8 %v11320_v28 }
0x2a43   :  { %11041 = vmatprep.subr.bf16.mxu0 %v10857_v30  ;;  %v10853_v39 = vsel %vm804_vm1, %v17639_v5, %v10715_v51  ;;  %v10766_v12 = vsel %vm17963_vm0, %v10759_v19, %v10761_v54  ;;  %v10832_v20 = vsel %vm17966_vm15, %v17677_v33, %v10825_v25 }
0x2a44   :  { %11042 = vmatpush1.bf16.msra.mxu0 %v10853_v39  ;;  %v10948_v59 = vsel %vm804_vm1, %v10832_v20, 0 }
0x2a45   :  { %v10744_v1 = vpop.permute.xlu0 %10743 }
0x2a46   :  { %v10749_v16 = vsel %vm17962_vm13, %v10742_v61, %v10744_v1  ;;  %v10881_v53 = vsel %vm804_vm1, %v10727_v34, %v10744_v1  ;;  %v10829_v4 = vpop.permute.xlu1 %10828  ;;  %v17969_v1 = vld [vmem:[#allocation107_spill] sm:$0xff] }
0x2a47   :  { %11043 = vmatprep.subr.bf16.mxu0 %v10881_v53  ;;  %v10877_v58 = vsel %vm804_vm1, %v10732_v47, %v10749_v16  ;;  %v11324_v47 = vsub.s32 %v11321_v0, %v17969_v1 }
0x2a48   :  { %11044 = vmatpush1.bf16.msra.mxu0 %v10877_v58 }
0x2a49   :  { %v10778_v43 = vpop.permute.xlu0 %10777 }
0x2a4a   :  { %v10783_v44 = vsel %vm744_vm5, %v10776_v14, %v10778_v43  ;;  %v10905_v5 = vsel %vm804_vm1, %v10761_v54, %v10778_v43  ;;  %vm17967_vm5 = vmmov %vm17966_vm15 }
0x2a4b   :  { %11045 = vmatprep.subr.bf16.mxu0 %v10905_v5  ;;  %v10901_v49 = vsel %vm804_vm1, %v10766_v12, %v10783_v44  ;;  %vm17968_vm11 = vmmov %vm17967_vm5 }
0x2a4c   :  { %11046 = vmatpush1.bf16.msra.mxu0 %v10901_v49 }
0x2a4d   :  { %v10812_v56 = vpop.permute.xlu0 %10811 }
0x2a4e   :  { %v10817_v24 = vsel %vm17965_vm14, %v10810_v63, %v10812_v56  ;;  %v10929_v2 = vsel %vm804_vm1, %v10795_v22, %v10812_v56 }
0x2a4f   :  { %11047 = vmatprep.subr.bf16.mxu0 %v10929_v2  ;;  %v10925_v8 = vsel %vm804_vm1, %v10800_v29, %v10817_v24 }
0x2a50   :  { %11048 = vmatpush1.bf16.msra.mxu0 %v10925_v8 }
0x2a51   :  { %v10827_v3 = vpop.permute.xlu0 %10826  ;;  %12050 = vmatprep.subr.msk.bf16.mxu0 %vm804_vm1, %v10829_v4 }
0x2a52   :  { %v10833_v6 = vsel %vm17967_vm5, %v10825_v25, %v10827_v3  ;;  %v10834_v27 = vsel %vm17968_vm11, %v10827_v3, %v10829_v4 }
0x2a53   :  { %v10954_v36 = vsel %vm804_vm1, %v10834_v27, 0  ;;  %12048 = vmatprep.subr.msk.bf16.mxu1 %vm804_vm1, %v10833_v6  ;;  %vm11345_vm1 = vcmask 60418  }
0x2a54   :  { %11009 = vmatpush1.bf16.msra.mxu1 %v10948_v59  ;;  %11050 = vmatpush1.bf16.msra.mxu0 %v10954_v36 }
0x2a57   :  { %12049 = vmatmul.mubr.msk.bf16.vlgmr.msra.gmra.mrb[212].mxu1 %vm908_vm9, %v17721_v37  ;;  %12051 = vmatmul.mubr.msk.bf16.vlgmr.msra.gmra.mrb[200].mxu0 %vm908_vm9, %v17721_v37  ;;  %vm11346_vm9 = vmor %vm11345_vm1, %vm2118_vm10 }
0x2a58   :  { %11162 = vmatprep.mubr.f32.mxu1 %v15052_v60  ;;  %11233 = vmatprep.mubr.f32.mxu0 %v15052_v60 }
0x2a62   :  { %v10936_v33 = vpop.permute.xlu0 %10935 }
0x2afb   :  { %v10993_v26 = vpop.f32.mrb[196].mxu0 }
0x2afc   :  { %v10994_v34 = vadd.f32 %v10993_v26, %v10936_v33  ;;  %v10995_v19 = vpop.f32.mrb[197].mxu0 }
0x2afd   :  { %v10996_v54 = vadd.f32 %v10995_v19, %v10936_v33  ;;  %v10997_v11 = vpop.f32.mrb[198].mxu0 }
0x2afe   :  { %v10998_v50 = vpop.f32.mrb[199].mxu0  ;;  %v11082_v46 = vmax.f32 %v10994_v34, 0.0 }
0x2aff   :  { %v11083_v21 = vmax.f32 %v10996_v54, 0.0 }
0x2b01   :  { %11098 = vmatprep.subr.mxu1 %v11083_v21 }
0x2b02   :  { %11099 = vmatpush1.msra.mxu1 %v11082_v46 }
0x2b03   :  { %12052 = vmatmul.mubr.msk.f32.vlgmr.msra.gmra.mrb[202].mxu1 %vm9907_vm12, %v11088_v17 }
0x2b04   :  { %11304 = vmatprep.mubr.f32.mxu1 %v15052_v60  ;;  %v11093_v60 = vpop.permute.xlu1 %11092 }
0x2b2a   :  { %v11034_v37 = vpop.f32.mrb[212].mxu1  ;;  %v11075_v61 = vpop.f32.mrb[200].mxu0 }
0x2b2b   :  { %v11035_v13 = vadd.f32 %v11034_v37, %v10936_v33  ;;  %v11076_v32 = vadd.f32 %v11075_v61, %v10936_v33  ;;  %v11036_v45 = vpop.f32.mrb[213].mxu1  ;;  %v11077_v10 = vpop.f32.mrb[201].mxu0 }
0x2b2c   :  { %v11037_v41 = vadd.f32 %v11036_v45, %v10936_v33  ;;  %v11078_v55 = vadd.f32 %v11077_v10, %v10936_v33  ;;  %v11038_v52 = vpop.f32.mrb[214].mxu1  ;;  %v11079_v14 = vpop.f32.mrb[202].mxu0 }
0x2b2d   :  { %v11039_v18 = vpop.f32.mrb[215].mxu1  ;;  %v11080_v7 = vpop.f32.mrb[203].mxu0  ;;  %v11084_v15 = vmax.f32 %v11035_v13, 0.0  ;;  %v11086_v57 = vmax.f32 %v11076_v32, 0.0 }
0x2b2e   :  { %v11085_v40 = vmax.f32 %v11037_v41, 0.0  ;;  %v11087_v42 = vmax.f32 %v11078_v55, 0.0 }
0x2b30   :  { %11169 = vmatprep.subr.mxu0 %v11085_v40  ;;  %11240 = vmatprep.subr.mxu1 %v11087_v42 }
0x2b31   :  { %11170 = vmatpush1.msra.mxu0 %v11084_v15  ;;  %11241 = vmatpush1.msra.mxu1 %v11086_v57 }
0x2b32   :  { %12053 = vmatmul.mubr.msk.f32.vlgmr.msra.gmra.mrb[204].mxu0 %vm9907_vm12, %v11088_v17  ;;  %12054 = vmatmul.mubr.msk.f32.vlgmr.msra.gmra.mrb[216].mxu1 %vm9907_vm12, %v11088_v17 }
0x2bd6   :  { %v11164_v62 = vpop.f32.mrb[202].mxu1 }
0x2bd7   :  { %v11165_v63 = vadd.f32 %v11164_v62, %v11093_v60  ;;  %v11166_v31 = vpop.f32.mrb[203].mxu1 }
0x2bd8   :  { %v11167_v38 = vadd.f32 %v11166_v31, %v11093_v60 }
0x2bda   :  { %v11317_v9 = vcombine.low %v11165_v63, %v11167_v38 }
0x2bdc   :  { %v11325_v12 = vrot.slane %v11317_v9, %v11324_v47 }
0x2c05   :  { %v11235_v48 = vpop.f32.mrb[204].mxu0  ;;  %v11306_v35 = vpop.f32.mrb[216].mxu1 }
0x2c06   :  { %v11236_v51 = vadd.f32 %v11235_v48, %v11093_v60  ;;  %v11307_v30 = vadd.f32 %v11306_v35, %v11093_v60  ;;  %v11237_v39 = vpop.f32.mrb[205].mxu0  ;;  %v11308_v22 = vpop.f32.mrb[217].mxu1 }
0x2c07   :  { %v11238_v16 = vadd.f32 %v11237_v39, %v11093_v60  ;;  %v11309_v53 = vadd.f32 %v11308_v22, %v11093_v60 }
0x2c09   :  { %v11318_v58 = vcombine.low %v11236_v51, %v11238_v16  ;;  %v11334_v43 = vcombine.low %v11307_v30, %v11309_v53 }
0x2c0b   :  { %v11332_v25 = vrot.slane %v11318_v58, %v11324_v47  ;;  %v11341_v44 = vrot.slane %v11334_v43, %v11324_v47 }
0x2c0d   :  { %v11333_v5 = vcombine.low %v11325_v12, %v11332_v25  ;;  %11347 = vst.msk [vmem:[%s15343_s6 + $0x8] sm:$0xf] %vm11346_vm9, %v11341_v44 }
0x2c0f   :  { %11344 = vst [vmem:[%s15343_s6] sm:$0xff] %v11333_v5 }
0x2c10   :  { %11352 = vsyncpa [#allocation3], 1 }
0x2c11   :  { %11353 = vsyncpa [#allocation5], 1 }
0x2c12   :  { %11354 = vsyncpa [#allocation8], 1 }
0x2c13   :  { %11355 = vsyncpa [#allocation11], 1 }
0x2c14   :  { %11356 = vsyncpa [#allocation14], 1 }
0x2c15   :  { %11357 = vsyncpa [#allocation17], 1 }
0x2c16   :  { %11358 = vsyncpa [#allocation20], 1 }
0x2c17   :  { %11359 = vsyncpa [#allocation23], 1 }
0x2c18   :  { %11360 = vsyncpa [#allocation26], 1 }
0x2c19   :  { %11361 = vsyncpa [#allocation29], 1 }
0x2c1a   :  { %11362 = vsyncpa [#allocation32], 1 }
0x2c1b   :  { %11363 = vsyncpa [#allocation35], 1 }
0x2c1c   :  { %11364 = vsyncpa [#allocation38], 1 }
0x2c1d   :  { %11365 = vsyncpa [#allocation41], 1 }
0x2c1e   :  { %11366 = vsyncpa [#allocation44], 1 }
0x2c1f   :  { %11367 = vsyncpa [#allocation47], 1 }
0x2c20   :  { %11368 = vsyncpa [#allocation50], 1 }

</bundles_post_ra>
